<compile_context>
chip_gen: v7x
topology: tpu7x:2x2x1
jax: 0.10.0
libtpu: 0.0.40
codegen_flags: <defaults>
</compile_context>

<pallas_src>
import functools
import math

import jax
import jax.numpy as jnp
from jax.experimental import pallas as pl
from jax.experimental.pallas import tpu as pltpu

CLASSES = 8      # `classes` arg of DRNSeg
OUT_DIM = 32     # model.out_dim of the DRN backbone (small synthetic value)
UP_K = 16        # ConvTranspose2d kernel size
UP_STRIDE = 8
UP_PAD = 4


# ---------------------------------------------------------------------------
# Kernel 1: 1x1 conv (lane-dense)
# ---------------------------------------------------------------------------
def _seg_conv_kernel(x_ref, w_ref, b_ref, seg_ref):
    # x_ref:   (1, Cin, H*W)   lane-dense input feature map for one image
    # w_ref:   (C, Cin)        seg conv weight
    # b_ref:   (C, 1)          seg conv bias (f32)
    # seg_ref: (1, C, H*W)     lane-dense seg logits (f32)
    s = jnp.dot(w_ref[...], x_ref[0], preferred_element_type=jnp.float32)
    seg_ref[0] = (s + b_ref[...]).astype(seg_ref.dtype)


# ---------------------------------------------------------------------------
# Kernel 2: separable bilinear x8 upsample + banded LogSoftmax (in place)
# ---------------------------------------------------------------------------
def _up_logsoftmax_kernel(seg_ref, uxt_ref, ubig_ref, y_ref, *, n_classes, band):
    # seg_ref:  (1, C*H, W)     seg logits, row index = c*H + h
    # uxt_ref:  (W, OW)         width-upsample matrix (transposed)
    # ubig_ref: (C*OH, C*H)     kron(I_C, uy): block-diag height-upsample weight
    # y_ref:    (1, C*OH, OW)   log-softmax output, row index = c*OH + oh
    ch = seg_ref.shape[1]
    coh, ow = y_ref.shape[1], y_ref.shape[2]
    oh = coh // n_classes

    # Width upsample for all (class, row) pairs in one matmul:
    #   (C*H, W) @ (W, OW) -> (C*H, OW), lane-dense result.
    seg = seg_ref[0]
    if seg.dtype != uxt_ref.dtype:
        seg = seg.astype(uxt_ref.dtype)         # bf16 operands on v6e/v7x
    t = jnp.dot(seg, uxt_ref[...], preferred_element_type=jnp.float32)
    t = t.astype(ubig_ref.dtype)

    # Height upsample as the block-diagonal kron(I_C, uy) matmul with
    # K = C*H (full MXU depth), tiled over M into C panels of (OH, C*H)@(C*H, OW)
    # so every panel result (OH, OW) is stored immediately into the lane-dense
    # output slab (rows c*OH .. (c+1)*OH) without blowing vreg pressure.
    for c in range(n_classes):
        panel = ubig_ref[pl.ds(c * oh, oh), :]
        y_ref[0, pl.ds(c * oh, oh), :] = jnp.dot(
            panel, t, preferred_element_type=jnp.float32)

    # Banded log-softmax over the class dim, in place: for each OH band load
    # the C class slices once, do max / logsumexp / subtract in-register, and
    # write each slice back once (1 read + 1 write per output element).
    for b0 in range(0, oh, band):
        rows = [y_ref[0, pl.ds(c * oh + b0, band), :] for c in range(n_classes)]
        m = rows[0]
        for r in rows[1:]:
            m = jnp.maximum(m, r)
        ssum = jnp.exp(rows[0] - m)
        for r in rows[1:]:
            ssum = ssum + jnp.exp(r - m)
        lse = m + jnp.log(ssum)
        for c in range(n_classes):
            y_ref[0, pl.ds(c * oh + b0, band), :] = rows[c] - lse


# ---------------------------------------------------------------------------
# Wrapper
# ---------------------------------------------------------------------------
def drn_seg_forward(x, seg_w, seg_b, uy, uxt, *, compute_dtype=jnp.float32,
                    softmax_band=8):
    """x: [N, out_dim, H, W] base feature map (NCHW).

    Returns (log_softmax(up(seg(x))), seg(x)) like DRNSeg.forward.
    compute_dtype: matmul operand dtype (bf16 recommended on v6e/v7x);
    accumulation and log-softmax stay in f32.
    """
    N, Cin, H, W = x.shape
    C = seg_w.shape[0]
    OH, OW = uy.shape[0], uxt.shape[1]
    cdt = compute_dtype

    # --- Kernel 1: 1x1 conv, all blocks lane-dense (last dim H*W) -----------
    x2 = x.reshape(N, Cin, H * W).astype(cdt)        # free contiguous reshape
    w = seg_w.astype(cdt)
    b2 = seg_b.reshape(C, 1).astype(jnp.float32)

    seg_flat = pl.pallas_call(
        _seg_conv_kernel,
        out_shape=jax.ShapeDtypeStruct((N, C, H * W), jnp.float32),
        grid=(N,),
        in_specs=[
            pl.BlockSpec((1, Cin, H * W), lambda n: (n, 0, 0)),
            pl.BlockSpec((C, Cin), lambda n: (0, 0)),
            pl.BlockSpec((C, 1), lambda n: (0, 0)),
        ],
        out_specs=pl.BlockSpec((1, C, H * W), lambda n: (n, 0, 0)),
        compiler_params=pltpu.CompilerParams(
            dimension_semantics=("parallel",)),
    )(x2, w, b2)

    # Returned seg logits: free reshape back to NCHW.
    x_seg = seg_flat.reshape(N, C, H, W)

    # --- Kernel 2: upsample + log-softmax ------------------------------------
    # Free contiguous HBM reshape into the (c*H + h, w) row layout.
    seg_rows = seg_flat.reshape(N, C * H, W)

    # Block-diagonal height-upsample weight kron(I_C, uy): (C*OH, C*H).
    # K = C*H fills the MXU pipe instead of C separate K=H matmuls.
    ubig = jnp.kron(jnp.eye(C, dtype=uy.dtype), uy).astype(cdt)
    uxt_c = uxt.astype(cdt)

    kernel2 = functools.partial(_up_logsoftmax_kernel,
                                n_classes=C, band=softmax_band)
    y_rows = pl.pallas_call(
        kernel2,
        out_shape=jax.ShapeDtypeStruct((N, C * OH, OW), jnp.float32),
        grid=(N,),
        in_specs=[
            # (C*H, W) block is lane-sparse (W lanes) but it is the smallest
            # tensor in the chain and already lives in HBM in this layout.
            pl.BlockSpec((1, C * H, W), lambda n: (n, 0, 0)),
            pl.BlockSpec((W, OW), lambda n: (0, 0)),
            pl.BlockSpec((C * OH, C * H), lambda n: (0, 0)),
        ],
        # Lane-dense output slab; wrapper reshape to NCHW is free/contiguous.
        out_specs=pl.BlockSpec((1, C * OH, OW), lambda n: (n, 0, 0)),
        compiler_params=pltpu.CompilerParams(
            dimension_semantics=("parallel",)),
    )(seg_rows, uxt_c, ubig)

    y_log = y_rows.reshape(N, C, OH, OW)
    return y_log, x_seg


# ---------------------------------------------------------------------------
# Parameter construction (deterministic, matches DRNSeg.__init__)
# ---------------------------------------------------------------------------
def make_seg_params(key, classes=CLASSES, in_dim=OUT_DIM):
    # m.weight.data.normal_(0, sqrt(2 / (kH*kW*out_channels))); bias zero.
    std = math.sqrt(2.0 / (1 * 1 * classes))
    w = jax.random.normal(key, (classes, in_dim), dtype=jnp.float32) * std
    b = jnp.zeros((classes,), dtype=jnp.float32)
    return w, b


def bilinear_up_matrix(in_size, k=UP_K, stride=UP_STRIDE, pad=UP_PAD):
    # 1-D factor of fill_up_weights(): w[i, j] = f(i) * f(j),
    # f(i) = 1 - |i / fac - center|, fac = ceil(k/2), center = (2*fac-1-fac%2)/(2*fac)
    out_size = (in_size - 1) * stride - 2 * pad + k
    fac = math.ceil(k / 2.0)
    center = (2 * fac - 1 - fac % 2) / (2.0 * fac)
    o = jnp.arange(out_size)[:, None]
    i = jnp.arange(in_size)[None, :]
    kk = o + pad - stride * i                     # which kernel tap connects o<-i
    valid = (kk >= 0) & (kk < k)
    w = 1.0 - jnp.abs(kk.astype(jnp.float32) / float(fac) - center)
    return jnp.where(valid, w, 0.0).astype(jnp.float32)  # (out_size, in_size)


if __name__ == "__main__":
    key = jax.random.PRNGKey(0)
    k_x, k_w = jax.random.split(key)

    N, H, W = 2, 16, 16
    x = jax.random.normal(k_x, (N, OUT_DIM, H, W), dtype=jnp.float32)

    seg_w, seg_b = make_seg_params(k_w)
    uy = bilinear_up_matrix(H)                    # (8H, H)
    uxt = jnp.transpose(bilinear_up_matrix(W))    # (W, 8W)

    fwd = jax.jit(drn_seg_forward)
    y_log, x_seg = fwd(x, seg_w, seg_b, uy, uxt)
    jax.block_until_ready((y_log, x_seg))

    assert y_log.shape == (N, CLASSES, 8 * H, 8 * W)
    assert x_seg.shape == (N, CLASSES, H, W)

    # Pure-JAX reference: 1x1 conv + separable bilinear upsample + log-softmax.
    s_ref = jnp.einsum('nchw,kc->nkhw', x, seg_w) + seg_b[None, :, None, None]
    up_ref = jnp.einsum('oh,nkhw,pw->nkop', uy, s_ref, jnp.transpose(uxt))
    y_ref = jax.nn.log_softmax(up_ref, axis=1)
    assert bool(jnp.allclose(x_seg, s_ref, atol=1e-2, rtol=1e-2)), "seg mismatch"
    assert bool(jnp.allclose(y_log, y_ref, atol=1e-2, rtol=1e-2)), "up/logsoftmax mismatch"

    # log-softmax sanity: probabilities sum to 1 over the class dim.
    psum = jnp.sum(jnp.exp(y_log), axis=1)
    assert bool(jnp.allclose(psum, 1.0, atol=1e-4)), "log-softmax check failed"

    # bf16-operand path (v6e/v7x MXU peak); f32 accumulation keeps the
    # normalization exact, so only structural checks here.
    fwd_bf16 = jax.jit(functools.partial(drn_seg_forward,
                                         compute_dtype=jnp.bfloat16))
    y_bf, seg_bf = fwd_bf16(x, seg_w, seg_b, uy, uxt)
    jax.block_until_ready((y_bf, seg_bf))
    assert y_bf.shape == y_log.shape and seg_bf.shape == x_seg.shape
    assert bool(jnp.all(jnp.isfinite(y_bf))) and bool(jnp.all(jnp.isfinite(seg_bf)))
    psum_bf = jnp.sum(jnp.exp(y_bf), axis=1)
    assert bool(jnp.allclose(psum_bf, 1.0, atol=1e-3)), "bf16 log-softmax check failed"

    print("KERNEL_OK")
</pallas_src>

<mosaic_0001>
module attributes {stable_mosaic.version = 11 : i64} {
  func.func @_seg_conv_kernel(%arg0: i32, %arg1: memref<1x32x256xf32, #tpu.memory_space<vmem>>, %arg2: memref<8x32xf32, #tpu.memory_space<vmem>>, %arg3: memref<8x1xf32, #tpu.memory_space<vmem>>, %arg4: memref<1x8x256xf32, #tpu.memory_space<vmem>>) attributes {dimension_semantics = [#tpu.dimension_semantics<parallel>], iteration_bounds = array<i64: 2>, scalar_prefetch = 0 : i64, scratch_operands = 0 : i64, tpu.core_type = #tpu.core_type<tc>, window_params = [{transform_indices = @transform_0, window_bounds = array<i64: 1, 32, 256>}, {pipeline_mode = #tpu.pipeline_mode<synchronous>, transform_indices = @transform_1, window_bounds = array<i64: 8, 32>}, {pipeline_mode = #tpu.pipeline_mode<synchronous>, transform_indices = @transform_2, window_bounds = array<i64: 8, 1>}, {transform_indices = @transform_3, window_bounds = array<i64: 1, 8, 256>}]} {
    %c0 = arith.constant 0 : index
    %c0_0 = arith.constant 0 : index
    %0 = vector.load %arg2[%c0, %c0_0] : memref<8x32xf32, #tpu.memory_space<vmem>>, vector<8x32xf32>
    %c0_1 = arith.constant 0 : index
    %c0_2 = arith.constant 0 : index
    %c0_3 = arith.constant 0 : index
    %1 = vector.load %arg1[%c0_1, %c0_2, %c0_3] : memref<1x32x256xf32, #tpu.memory_space<vmem>>, vector<1x32x256xf32>
    %2 = vector.shape_cast %1 : vector<1x32x256xf32> to vector<32x256xf32>
    %cst = arith.constant dense<0.000000e+00> : vector<8x256xf32>
    %3 = tpu.matmul %0, %2, %cst {dimension_numbers = #tpu.dot_dimension_numbers<[1], [0], [0], [1], [0, 0, 1, 1], [], []>} : vector<8x32xf32>, vector<32x256xf32>, vector<8x256xf32> -> vector<8x256xf32>
    %c0_4 = arith.constant 0 : index
    %c0_5 = arith.constant 0 : index
    %4 = vector.load %arg3[%c0_4, %c0_5] : memref<8x1xf32, #tpu.memory_space<vmem>>, vector<8x1xf32>
    %5 = vector.broadcast %4 : vector<8x1xf32> to vector<8x256xf32>
    %6 = arith.addf %3, %5 : vector<8x256xf32>
    %c0_6 = arith.constant 0 : index
    %c0_7 = arith.constant 0 : index
    %c0_8 = arith.constant 0 : index
    %7 = vector.load %arg4[%c0_6, %c0_7, %c0_8] : memref<1x8x256xf32, #tpu.memory_space<vmem>>, vector<1x8x256xf32>
    %8 = vector.shape_cast %7 : vector<1x8x256xf32> to vector<8x256xf32>
    %9 = vector.shape_cast %6 : vector<8x256xf32> to vector<1x8x256xf32>
    tpu.vector_store %arg4[%c0_6, %c0_7, %c0_8], %9 {strides = array<i32>} : memref<1x8x256xf32, #tpu.memory_space<vmem>>, vector<1x8x256xf32>,
    return
  }
  func.func @transform_0(%arg0: i32) -> (i32, i32, i32) {
    %c0_i32 = arith.constant 0 : i32
    %c0_i32_0 = arith.constant 0 : i32
    %c0_i32_1 = arith.constant 0 : i32
    return %arg0, %c0_i32, %c0_i32_0 : i32, i32, i32
  }
  func.func @transform_1(%arg0: i32) -> (i32, i32) {
    %c0_i32 = arith.constant 0 : i32
    %c0_i32_0 = arith.constant 0 : i32
    %c0_i32_1 = arith.constant 0 : i32
    return %c0_i32, %c0_i32_0 : i32, i32
  }
  func.func @transform_2(%arg0: i32) -> (i32, i32) {
    %c0_i32 = arith.constant 0 : i32
    %c0_i32_0 = arith.constant 0 : i32
    %c0_i32_1 = arith.constant 0 : i32
    return %c0_i32, %c0_i32_0 : i32, i32
  }
  func.func @transform_3(%arg0: i32) -> (i32, i32, i32) {
    %c0_i32 = arith.constant 0 : i32
    %c0_i32_0 = arith.constant 0 : i32
    %c0_i32_1 = arith.constant 0 : i32
    return %arg0, %c0_i32, %c0_i32_0 : i32, i32, i32
  }
}

module attributes {stable_mosaic.version = 11 : i64} {
  func.func @_up_logsoftmax_kernel(%arg0: i32, %arg1: memref<1x128x16xf32, #tpu.memory_space<vmem>>, %arg2: memref<16x128xf32, #tpu.memory_space<vmem>>, %arg3: memref<1024x128xf32, #tpu.memory_space<vmem>>, %arg4: memref<1x1024x128xf32, #tpu.memory_space<vmem>>) attributes {dimension_semantics = [#tpu.dimension_semantics<parallel>], iteration_bounds = array<i64: 2>, scalar_prefetch = 0 : i64, scratch_operands = 0 : i64, tpu.core_type = #tpu.core_type<tc>, window_params = [{transform_indices = @transform_0, window_bounds = array<i64: 1, 128, 16>}, {pipeline_mode = #tpu.pipeline_mode<synchronous>, transform_indices = @transform_1, window_bounds = array<i64: 16, 128>}, {pipeline_mode = #tpu.pipeline_mode<synchronous>, transform_indices = @transform_2, window_bounds = array<i64: 1024, 128>}, {transform_indices = @transform_3, window_bounds = array<i64: 1, 1024, 128>}]} {
    %c0 = arith.constant 0 : index
    %c0_0 = arith.constant 0 : index
    %c0_1 = arith.constant 0 : index
    %0 = vector.load %arg1[%c0, %c0_0, %c0_1] : memref<1x128x16xf32, #tpu.memory_space<vmem>>, vector<1x128x16xf32>
    %1 = vector.shape_cast %0 : vector<1x128x16xf32> to vector<128x16xf32>
    %c0_2 = arith.constant 0 : index
    %c0_3 = arith.constant 0 : index
    %2 = vector.load %arg2[%c0_2, %c0_3] : memref<16x128xf32, #tpu.memory_space<vmem>>, vector<16x128xf32>
    %cst = arith.constant dense<0.000000e+00> : vector<128x128xf32>
    %3 = tpu.matmul %1, %2, %cst {dimension_numbers = #tpu.dot_dimension_numbers<[1], [0], [0], [1], [0, 0, 1, 1], [], []>} : vector<128x16xf32>, vector<16x128xf32>, vector<128x128xf32> -> vector<128x128xf32>
    %c0_4 = arith.constant 0 : index
    %c0_5 = arith.constant 0 : index
    %4 = vector.load %arg3[%c0_4, %c0_5] : memref<1024x128xf32, #tpu.memory_space<vmem>>, vector<128x128xf32>
    %cst_6 = arith.constant dense<0.000000e+00> : vector<128x128xf32>
    %5 = tpu.matmul %4, %3, %cst_6 {dimension_numbers = #tpu.dot_dimension_numbers<[1], [0], [0], [1], [0, 0, 1, 1], [], []>} : vector<128x128xf32>, vector<128x128xf32>, vector<128x128xf32> -> vector<128x128xf32>
    %c0_7 = arith.constant 0 : index
    %c0_8 = arith.constant 0 : index
    %c0_9 = arith.constant 0 : index
    %6 = vector.load %arg4[%c0_7, %c0_8, %c0_9] : memref<1x1024x128xf32, #tpu.memory_space<vmem>>, vector<1x128x128xf32>
    %7 = vector.shape_cast %6 : vector<1x128x128xf32> to vector<128x128xf32>
    %8 = vector.shape_cast %5 : vector<128x128xf32> to vector<1x128x128xf32>
    tpu.vector_store %arg4[%c0_7, %c0_8, %c0_9], %8 {strides = array<i32>} : memref<1x1024x128xf32, #tpu.memory_space<vmem>>, vector<1x128x128xf32>,
    %c128 = arith.constant 128 : index
    %c0_10 = arith.constant 0 : index
    %9 = vector.load %arg3[%c128, %c0_10] : memref<1024x128xf32, #tpu.memory_space<vmem>>, vector<128x128xf32>
    %cst_11 = arith.constant dense<0.000000e+00> : vector<128x128xf32>
    %10 = tpu.matmul %9, %3, %cst_11 {dimension_numbers = #tpu.dot_dimension_numbers<[1], [0], [0], [1], [0, 0, 1, 1], [], []>} : vector<128x128xf32>, vector<128x128xf32>, vector<128x128xf32> -> vector<128x128xf32>
    %c0_12 = arith.constant 0 : index
    %c128_13 = arith.constant 128 : index
    %c0_14 = arith.constant 0 : index
    %11 = vector.load %arg4[%c0_12, %c128_13, %c0_14] : memref<1x1024x128xf32, #tpu.memory_space<vmem>>, vector<1x128x128xf32>
    %12 = vector.shape_cast %11 : vector<1x128x128xf32> to vector<128x128xf32>
    %13 = vector.shape_cast %10 : vector<128x128xf32> to vector<1x128x128xf32>
    tpu.vector_store %arg4[%c0_12, %c128_13, %c0_14], %13 {strides = array<i32>} : memref<1x1024x128xf32, #tpu.memory_space<vmem>>, vector<1x128x128xf32>,
    %c256 = arith.constant 256 : index
    %c0_15 = arith.constant 0 : index
    %14 = vector.load %arg3[%c256, %c0_15] : memref<1024x128xf32, #tpu.memory_space<vmem>>, vector<128x128xf32>
    %cst_16 = arith.constant dense<0.000000e+00> : vector<128x128xf32>
    %15 = tpu.matmul %14, %3, %cst_16 {dimension_numbers = #tpu.dot_dimension_numbers<[1], [0], [0], [1], [0, 0, 1, 1], [], []>} : vector<128x128xf32>, vector<128x128xf32>, vector<128x128xf32> -> vector<128x128xf32>
    %c0_17 = arith.constant 0 : index
    %c256_18 = arith.constant 256 : index
    %c0_19 = arith.constant 0 : index
    %16 = vector.load %arg4[%c0_17, %c256_18, %c0_19] : memref<1x1024x128xf32, #tpu.memory_space<vmem>>, vector<1x128x128xf32>
    %17 = vector.shape_cast %16 : vector<1x128x128xf32> to vector<128x128xf32>
    %18 = vector.shape_cast %15 : vector<128x128xf32> to vector<1x128x128xf32>
    tpu.vector_store %arg4[%c0_17, %c256_18, %c0_19], %18 {strides = array<i32>} : memref<1x1024x128xf32, #tpu.memory_space<vmem>>, vector<1x128x128xf32>,
    %c384 = arith.constant 384 : index
    %c0_20 = arith.constant 0 : index
    %19 = vector.load %arg3[%c384, %c0_20] : memref<1024x128xf32, #tpu.memory_space<vmem>>, vector<128x128xf32>
    %cst_21 = arith.constant dense<0.000000e+00> : vector<128x128xf32>
    %20 = tpu.matmul %19, %3, %cst_21 {dimension_numbers = #tpu.dot_dimension_numbers<[1], [0], [0], [1], [0, 0, 1, 1], [], []>} : vector<128x128xf32>, vector<128x128xf32>, vector<128x128xf32> -> vector<128x128xf32>
    %c0_22 = arith.constant 0 : index
    %c384_23 = arith.constant 384 : index
    %c0_24 = arith.constant 0 : index
    %21 = vector.load %arg4[%c0_22, %c384_23, %c0_24] : memref<1x1024x128xf32, #tpu.memory_space<vmem>>, vector<1x128x128xf32>
    %22 = vector.shape_cast %21 : vector<1x128x128xf32> to vector<128x128xf32>
    %23 = vector.shape_cast %20 : vector<128x128xf32> to vector<1x128x128xf32>
    tpu.vector_store %arg4[%c0_22, %c384_23, %c0_24], %23 {strides = array<i32>} : memref<1x1024x128xf32, #tpu.memory_space<vmem>>, vector<1x128x128xf32>,
    %c512 = arith.constant 512 : index
    %c0_25 = arith.constant 0 : index
    %24 = vector.load %arg3[%c512, %c0_25] : memref<1024x128xf32, #tpu.memory_space<vmem>>, vector<128x128xf32>
    %cst_26 = arith.constant dense<0.000000e+00> : vector<128x128xf32>
    %25 = tpu.matmul %24, %3, %cst_26 {dimension_numbers = #tpu.dot_dimension_numbers<[1], [0], [0], [1], [0, 0, 1, 1], [], []>} : vector<128x128xf32>, vector<128x128xf32>, vector<128x128xf32> -> vector<128x128xf32>
    %c0_27 = arith.constant 0 : index
    %c512_28 = arith.constant 512 : index
    %c0_29 = arith.constant 0 : index
    %26 = vector.load %arg4[%c0_27, %c512_28, %c0_29] : memref<1x1024x128xf32, #tpu.memory_space<vmem>>, vector<1x128x128xf32>
    %27 = vector.shape_cast %26 : vector<1x128x128xf32> to vector<128x128xf32>
    %28 = vector.shape_cast %25 : vector<128x128xf32> to vector<1x128x128xf32>
    tpu.vector_store %arg4[%c0_27, %c512_28, %c0_29], %28 {strides = array<i32>} : memref<1x1024x128xf32, #tpu.memory_space<vmem>>, vector<1x128x128xf32>,
    %c640 = arith.constant 640 : index
    %c0_30 = arith.constant 0 : index
    %29 = vector.load %arg3[%c640, %c0_30] : memref<1024x128xf32, #tpu.memory_space<vmem>>, vector<128x128xf32>
    %cst_31 = arith.constant dense<0.000000e+00> : vector<128x128xf32>
    %30 = tpu.matmul %29, %3, %cst_31 {dimension_numbers = #tpu.dot_dimension_numbers<[1], [0], [0], [1], [0, 0, 1, 1], [], []>} : vector<128x128xf32>, vector<128x128xf32>, vector<128x128xf32> -> vector<128x128xf32>
    %c0_32 = arith.constant 0 : index
    %c640_33 = arith.constant 640 : index
    %c0_34 = arith.constant 0 : index
    %31 = vector.load %arg4[%c0_32, %c640_33, %c0_34] : memref<1x1024x128xf32, #tpu.memory_space<vmem>>, vector<1x128x128xf32>
    %32 = vector.shape_cast %31 : vector<1x128x128xf32> to vector<128x128xf32>
    %33 = vector.shape_cast %30 : vector<128x128xf32> to vector<1x128x128xf32>
    tpu.vector_store %arg4[%c0_32, %c640_33, %c0_34], %33 {strides = array<i32>} : memref<1x1024x128xf32, #tpu.memory_space<vmem>>, vector<1x128x128xf32>,
    %c768 = arith.constant 768 : index
    %c0_35 = arith.constant 0 : index
    %34 = vector.load %arg3[%c768, %c0_35] : memref<1024x128xf32, #tpu.memory_space<vmem>>, vector<128x128xf32>
    %cst_36 = arith.constant dense<0.000000e+00> : vector<128x128xf32>
    %35 = tpu.matmul %34, %3, %cst_36 {dimension_numbers = #tpu.dot_dimension_numbers<[1], [0], [0], [1], [0, 0, 1, 1], [], []>} : vector<128x128xf32>, vector<128x128xf32>, vector<128x128xf32> -> vector<128x128xf32>
    %c0_37 = arith.constant 0 : index
    %c768_38 = arith.constant 768 : index
    %c0_39 = arith.constant 0 : index
    %36 = vector.load %arg4[%c0_37, %c768_38, %c0_39] : memref<1x1024x128xf32, #tpu.memory_space<vmem>>, vector<1x128x128xf32>
    %37 = vector.shape_cast %36 : vector<1x128x128xf32> to vector<128x128xf32>
    %38 = vector.shape_cast %35 : vector<128x128xf32> to vector<1x128x128xf32>
    tpu.vector_store %arg4[%c0_37, %c768_38, %c0_39], %38 {strides = array<i32>} : memref<1x1024x128xf32, #tpu.memory_space<vmem>>, vector<1x128x128xf32>,
    %c896 = arith.constant 896 : index
    %c0_40 = arith.constant 0 : index
    %39 = vector.load %arg3[%c896, %c0_40] : memref<1024x128xf32, #tpu.memory_space<vmem>>, vector<128x128xf32>
    %cst_41 = arith.constant dense<0.000000e+00> : vector<128x128xf32>
    %40 = tpu.matmul %39, %3, %cst_41 {dimension_numbers = #tpu.dot_dimension_numbers<[1], [0], [0], [1], [0, 0, 1, 1], [], []>} : vector<128x128xf32>, vector<128x128xf32>, vector<128x128xf32> -> vector<128x128xf32>
    %c0_42 = arith.constant 0 : index
    %c896_43 = arith.constant 896 : index
    %c0_44 = arith.constant 0 : index
    %41 = vector.load %arg4[%c0_42, %c896_43, %c0_44] : memref<1x1024x128xf32, #tpu.memory_space<vmem>>, vector<1x128x128xf32>
    %42 = vector.shape_cast %41 : vector<1x128x128xf32> to vector<128x128xf32>
    %43 = vector.shape_cast %40 : vector<128x128xf32> to vector<1x128x128xf32>
    tpu.vector_store %arg4[%c0_42, %c896_43, %c0_44], %43 {strides = array<i32>} : memref<1x1024x128xf32, #tpu.memory_space<vmem>>, vector<1x128x128xf32>,
    %c0_45 = arith.constant 0 : index
    %c0_46 = arith.constant 0 : index
    %c0_47 = arith.constant 0 : index
    %44 = vector.load %arg4[%c0_45, %c0_46, %c0_47] : memref<1x1024x128xf32, #tpu.memory_space<vmem>>, vector<1x8x128xf32>
    %45 = vector.shape_cast %44 : vector<1x8x128xf32> to vector<8x128xf32>
    %c0_48 = arith.constant 0 : index
    %c128_49 = arith.constant 128 : index
    %c0_50 = arith.constant 0 : index
    %46 = vector.load %arg4[%c0_48, %c128_49, %c0_50] : memref<1x1024x128xf32, #tpu.memory_space<vmem>>, vector<1x8x128xf32>
    %47 = vector.shape_cast %46 : vector<1x8x128xf32> to vector<8x128xf32>
    %c0_51 = arith.constant 0 : index
    %c256_52 = arith.constant 256 : index
    %c0_53 = arith.constant 0 : index
    %48 = vector.load %arg4[%c0_51, %c256_52, %c0_53] : memref<1x1024x128xf32, #tpu.memory_space<vmem>>, vector<1x8x128xf32>
    %49 = vector.shape_cast %48 : vector<1x8x128xf32> to vector<8x128xf32>
    %c0_54 = arith.constant 0 : index
    %c384_55 = arith.constant 384 : index
    %c0_56 = arith.constant 0 : index
    %50 = vector.load %arg4[%c0_54, %c384_55, %c0_56] : memref<1x1024x128xf32, #tpu.memory_space<vmem>>, vector<1x8x128xf32>
    %51 = vector.shape_cast %50 : vector<1x8x128xf32> to vector<8x128xf32>
    %c0_57 = arith.constant 0 : index
    %c512_58 = arith.constant 512 : index
    %c0_59 = arith.constant 0 : index
    %52 = vector.load %arg4[%c0_57, %c512_58, %c0_59] : memref<1x1024x128xf32, #tpu.memory_space<vmem>>, vector<1x8x128xf32>
    %53 = vector.shape_cast %52 : vector<1x8x128xf32> to vector<8x128xf32>
    %c0_60 = arith.constant 0 : index
    %c640_61 = arith.constant 640 : index
    %c0_62 = arith.constant 0 : index
    %54 = vector.load %arg4[%c0_60, %c640_61, %c0_62] : memref<1x1024x128xf32, #tpu.memory_space<vmem>>, vector<1x8x128xf32>
    %55 = vector.shape_cast %54 : vector<1x8x128xf32> to vector<8x128xf32>
    %c0_63 = arith.constant 0 : index
    %c768_64 = arith.constant 768 : index
    %c0_65 = arith.constant 0 : index
    %56 = vector.load %arg4[%c0_63, %c768_64, %c0_65] : memref<1x1024x128xf32, #tpu.memory_space<vmem>>, vector<1x8x128xf32>
    %57 = vector.shape_cast %56 : vector<1x8x128xf32> to vector<8x128xf32>
    %c0_66 = arith.constant 0 : index
    %c896_67 = arith.constant 896 : index
    %c0_68 = arith.constant 0 : index
    %58 = vector.load %arg4[%c0_66, %c896_67, %c0_68] : memref<1x1024x128xf32, #tpu.memory_space<vmem>>, vector<1x8x128xf32>
    %59 = vector.shape_cast %58 : vector<1x8x128xf32> to vector<8x128xf32>
    %60 = arith.maximumf %45, %47 : vector<8x128xf32>
    %61 = arith.maximumf %60, %49 : vector<8x128xf32>
    %62 = arith.maximumf %61, %51 : vector<8x128xf32>
    %63 = arith.maximumf %62, %53 : vector<8x128xf32>
    %64 = arith.maximumf %63, %55 : vector<8x128xf32>
    %65 = arith.maximumf %64, %57 : vector<8x128xf32>
    %66 = arith.maximumf %65, %59 : vector<8x128xf32>
    %67 = arith.subf %45, %66 : vector<8x128xf32>
    %68 = math.exp %67 : vector<8x128xf32>
    %69 = arith.subf %47, %66 : vector<8x128xf32>
    %70 = math.exp %69 : vector<8x128xf32>
    %71 = arith.addf %68, %70 : vector<8x128xf32>
    %72 = arith.subf %49, %66 : vector<8x128xf32>
    %73 = math.exp %72 : vector<8x128xf32>
    %74 = arith.addf %71, %73 : vector<8x128xf32>
    %75 = arith.subf %51, %66 : vector<8x128xf32>
    %76 = math.exp %75 : vector<8x128xf32>
    %77 = arith.addf %74, %76 : vector<8x128xf32>
    %78 = arith.subf %53, %66 : vector<8x128xf32>
    %79 = math.exp %78 : vector<8x128xf32>
    %80 = arith.addf %77, %79 : vector<8x128xf32>
    %81 = arith.subf %55, %66 : vector<8x128xf32>
    %82 = math.exp %81 : vector<8x128xf32>
    %83 = arith.addf %80, %82 : vector<8x128xf32>
    %84 = arith.subf %57, %66 : vector<8x128xf32>
    %85 = math.exp %84 : vector<8x128xf32>
    %86 = arith.addf %83, %85 : vector<8x128xf32>
    %87 = arith.subf %59, %66 : vector<8x128xf32>
    %88 = math.exp %87 : vector<8x128xf32>
    %89 = arith.addf %86, %88 : vector<8x128xf32>
    %90 = math.log %89 : vector<8x128xf32>
    %91 = arith.addf %66, %90 : vector<8x128xf32>
    %92 = arith.subf %45, %91 : vector<8x128xf32>
    %c0_69 = arith.constant 0 : index
    %c0_70 = arith.constant 0 : index
    %c0_71 = arith.constant 0 : index
    %93 = vector.load %arg4[%c0_69, %c0_70, %c0_71] : memref<1x1024x128xf32, #tpu.memory_space<vmem>>, vector<1x8x128xf32>
    %94 = vector.shape_cast %93 : vector<1x8x128xf32> to vector<8x128xf32>
    %95 = vector.shape_cast %92 : vector<8x128xf32> to vector<1x8x128xf32>
    tpu.vector_store %arg4[%c0_69, %c0_70, %c0_71], %95 {strides = array<i32>} : memref<1x1024x128xf32, #tpu.memory_space<vmem>>, vector<1x8x128xf32>,
    %96 = arith.subf %47, %91 : vector<8x128xf32>
    %c0_72 = arith.constant 0 : index
    %c128_73 = arith.constant 128 : index
    %c0_74 = arith.constant 0 : index
    %97 = vector.load %arg4[%c0_72, %c128_73, %c0_74] : memref<1x1024x128xf32, #tpu.memory_space<vmem>>, vector<1x8x128xf32>
    %98 = vector.shape_cast %97 : vector<1x8x128xf32> to vector<8x128xf32>
    %99 = vector.shape_cast %96 : vector<8x128xf32> to vector<1x8x128xf32>
    tpu.vector_store %arg4[%c0_72, %c128_73, %c0_74], %99 {strides = array<i32>} : memref<1x1024x128xf32, #tpu.memory_space<vmem>>, vector<1x8x128xf32>,
    %100 = arith.subf %49, %91 : vector<8x128xf32>
    %c0_75 = arith.constant 0 : index
    %c256_76 = arith.constant 256 : index
    %c0_77 = arith.constant 0 : index
    %101 = vector.load %arg4[%c0_75, %c256_76, %c0_77] : memref<1x1024x128xf32, #tpu.memory_space<vmem>>, vector<1x8x128xf32>
    %102 = vector.shape_cast %101 : vector<1x8x128xf32> to vector<8x128xf32>
    %103 = vector.shape_cast %100 : vector<8x128xf32> to vector<1x8x128xf32>
    tpu.vector_store %arg4[%c0_75, %c256_76, %c0_77], %103 {strides = array<i32>} : memref<1x1024x128xf32, #tpu.memory_space<vmem>>, vector<1x8x128xf32>,
    %104 = arith.subf %51, %91 : vector<8x128xf32>
    %c0_78 = arith.constant 0 : index
    %c384_79 = arith.constant 384 : index
    %c0_80 = arith.constant 0 : index
    %105 = vector.load %arg4[%c0_78, %c384_79, %c0_80] : memref<1x1024x128xf32, #tpu.memory_space<vmem>>, vector<1x8x128xf32>
    %106 = vector.shape_cast %105 : vector<1x8x128xf32> to vector<8x128xf32>
    %107 = vector.shape_cast %104 : vector<8x128xf32> to vector<1x8x128xf32>
    tpu.vector_store %arg4[%c0_78, %c384_79, %c0_80], %107 {strides = array<i32>} : memref<1x1024x128xf32, #tpu.memory_space<vmem>>, vector<1x8x128xf32>,
    %108 = arith.subf %53, %91 : vector<8x128xf32>
    %c0_81 = arith.constant 0 : index
    %c512_82 = arith.constant 512 : index
    %c0_83 = arith.constant 0 : index
    %109 = vector.load %arg4[%c0_81, %c512_82, %c0_83] : memref<1x1024x128xf32, #tpu.memory_space<vmem>>, vector<1x8x128xf32>
    %110 = vector.shape_cast %109 : vector<1x8x128xf32> to vector<8x128xf32>
    %111 = vector.shape_cast %108 : vector<8x128xf32> to vector<1x8x128xf32>
    tpu.vector_store %arg4[%c0_81, %c512_82, %c0_83], %111 {strides = array<i32>} : memref<1x1024x128xf32, #tpu.memory_space<vmem>>, vector<1x8x128xf32>,
    %112 = arith.subf %55, %91 : vector<8x128xf32>
    %c0_84 = arith.constant 0 : index
    %c640_85 = arith.constant 640 : index
    %c0_86 = arith.constant 0 : index
    %113 = vector.load %arg4[%c0_84, %c640_85, %c0_86] : memref<1x1024x128xf32, #tpu.memory_space<vmem>>, vector<1x8x128xf32>
    %114 = vector.shape_cast %113 : vector<1x8x128xf32> to vector<8x128xf32>
    %115 = vector.shape_cast %112 : vector<8x128xf32> to vector<1x8x128xf32>
    tpu.vector_store %arg4[%c0_84, %c640_85, %c0_86], %115 {strides = array<i32>} : memref<1x1024x128xf32, #tpu.memory_space<vmem>>, vector<1x8x128xf32>,
    %116 = arith.subf %57, %91 : vector<8x128xf32>
    %c0_87 = arith.constant 0 : index
    %c768_88 = arith.constant 768 : index
    %c0_89 = arith.constant 0 : index
    %117 = vector.load %arg4[%c0_87, %c768_88, %c0_89] : memref<1x1024x128xf32, #tpu.memory_space<vmem>>, vector<1x8x128xf32>
    %118 = vector.shape_cast %117 : vector<1x8x128xf32> to vector<8x128xf32>
    %119 = vector.shape_cast %116 : vector<8x128xf32> to vector<1x8x128xf32>
    tpu.vector_store %arg4[%c0_87, %c768_88, %c0_89], %119 {strides = array<i32>} : memref<1x1024x128xf32, #tpu.memory_space<vmem>>, vector<1x8x128xf32>,
    %120 = arith.subf %59, %91 : vector<8x128xf32>
    %c0_90 = arith.constant 0 : index
    %c896_91 = arith.constant 896 : index
    %c0_92 = arith.constant 0 : index
    %121 = vector.load %arg4[%c0_90, %c896_91, %c0_92] : memref<1x1024x128xf32, #tpu.memory_space<vmem>>, vector<1x8x128xf32>
    %122 = vector.shape_cast %121 : vector<1x8x128xf32> to vector<8x128xf32>
    %123 = vector.shape_cast %120 : vector<8x128xf32> to vector<1x8x128xf32>
    tpu.vector_store %arg4[%c0_90, %c896_91, %c0_92], %123 {strides = array<i32>} : memref<1x1024x128xf32, #tpu.memory_space<vmem>>, vector<1x8x128xf32>,
    %c0_93 = arith.constant 0 : index
    %c8 = arith.constant 8 : index
    %c0_94 = arith.constant 0 : index
    %124 = vector.load %arg4[%c0_93, %c8, %c0_94] : memref<1x1024x128xf32, #tpu.memory_space<vmem>>, vector<1x8x128xf32>
    %125 = vector.shape_cast %124 : vector<1x8x128xf32> to vector<8x128xf32>
    %c0_95 = arith.constant 0 : index
    %c136 = arith.constant 136 : index
    %c0_96 = arith.constant 0 : index
    %126 = vector.load %arg4[%c0_95, %c136, %c0_96] : memref<1x1024x128xf32, #tpu.memory_space<vmem>>, vector<1x8x128xf32>
    %127 = vector.shape_cast %126 : vector<1x8x128xf32> to vector<8x128xf32>
    %c0_97 = arith.constant 0 : index
    %c264 = arith.constant 264 : index
    %c0_98 = arith.constant 0 : index
    %128 = vector.load %arg4[%c0_97, %c264, %c0_98] : memref<1x1024x128xf32, #tpu.memory_space<vmem>>, vector<1x8x128xf32>
    %129 = vector.shape_cast %128 : vector<1x8x128xf32> to vector<8x128xf32>
    %c0_99 = arith.constant 0 : index
    %c392 = arith.constant 392 : index
    %c0_100 = arith.constant 0 : index
    %130 = vector.load %arg4[%c0_99, %c392, %c0_100] : memref<1x1024x128xf32, #tpu.memory_space<vmem>>, vector<1x8x128xf32>
    %131 = vector.shape_cast %130 : vector<1x8x128xf32> to vector<8x128xf32>
    %c0_101 = arith.constant 0 : index
    %c520 = arith.constant 520 : index
    %c0_102 = arith.constant 0 : index
    %132 = vector.load %arg4[%c0_101, %c520, %c0_102] : memref<1x1024x128xf32, #tpu.memory_space<vmem>>, vector<1x8x128xf32>
    %133 = vector.shape_cast %132 : vector<1x8x128xf32> to vector<8x128xf32>
    %c0_103 = arith.constant 0 : index
    %c648 = arith.constant 648 : index
    %c0_104 = arith.constant 0 : index
    %134 = vector.load %arg4[%c0_103, %c648, %c0_104] : memref<1x1024x128xf32, #tpu.memory_space<vmem>>, vector<1x8x128xf32>
    %135 = vector.shape_cast %134 : vector<1x8x128xf32> to vector<8x128xf32>
    %c0_105 = arith.constant 0 : index
    %c776 = arith.constant 776 : index
    %c0_106 = arith.constant 0 : index
    %136 = vector.load %arg4[%c0_105, %c776, %c0_106] : memref<1x1024x128xf32, #tpu.memory_space<vmem>>, vector<1x8x128xf32>
    %137 = vector.shape_cast %136 : vector<1x8x128xf32> to vector<8x128xf32>
    %c0_107 = arith.constant 0 : index
    %c904 = arith.constant 904 : index
    %c0_108 = arith.constant 0 : index
    %138 = vector.load %arg4[%c0_107, %c904, %c0_108] : memref<1x1024x128xf32, #tpu.memory_space<vmem>>, vector<1x8x128xf32>
    %139 = vector.shape_cast %138 : vector<1x8x128xf32> to vector<8x128xf32>
    %140 = arith.maximumf %125, %127 : vector<8x128xf32>
    %141 = arith.maximumf %140, %129 : vector<8x128xf32>
    %142 = arith.maximumf %141, %131 : vector<8x128xf32>
    %143 = arith.maximumf %142, %133 : vector<8x128xf32>
    %144 = arith.maximumf %143, %135 : vector<8x128xf32>
    %145 = arith.maximumf %144, %137 : vector<8x128xf32>
    %146 = arith.maximumf %145, %139 : vector<8x128xf32>
    %147 = arith.subf %125, %146 : vector<8x128xf32>
    %148 = math.exp %147 : vector<8x128xf32>
    %149 = arith.subf %127, %146 : vector<8x128xf32>
    %150 = math.exp %149 : vector<8x128xf32>
    %151 = arith.addf %148, %150 : vector<8x128xf32>
    %152 = arith.subf %129, %146 : vector<8x128xf32>
    %153 = math.exp %152 : vector<8x128xf32>
    %154 = arith.addf %151, %153 : vector<8x128xf32>
    %155 = arith.subf %131, %146 : vector<8x128xf32>
    %156 = math.exp %155 : vector<8x128xf32>
    %157 = arith.addf %154, %156 : vector<8x128xf32>
    %158 = arith.subf %133, %146 : vector<8x128xf32>
    %159 = math.exp %158 : vector<8x128xf32>
    %160 = arith.addf %157, %159 : vector<8x128xf32>
    %161 = arith.subf %135, %146 : vector<8x128xf32>
    %162 = math.exp %161 : vector<8x128xf32>
    %163 = arith.addf %160, %162 : vector<8x128xf32>
    %164 = arith.subf %137, %146 : vector<8x128xf32>
    %165 = math.exp %164 : vector<8x128xf32>
    %166 = arith.addf %163, %165 : vector<8x128xf32>
    %167 = arith.subf %139, %146 : vector<8x128xf32>
    %168 = math.exp %167 : vector<8x128xf32>
    %169 = arith.addf %166, %168 : vector<8x128xf32>
    %170 = math.log %169 : vector<8x128xf32>
    %171 = arith.addf %146, %170 : vector<8x128xf32>
    %172 = arith.subf %125, %171 : vector<8x128xf32>
    %c0_109 = arith.constant 0 : index
    %c8_110 = arith.constant 8 : index
    %c0_111 = arith.constant 0 : index
    %173 = vector.load %arg4[%c0_109, %c8_110, %c0_111] : memref<1x1024x128xf32, #tpu.memory_space<vmem>>, vector<1x8x128xf32>
    %174 = vector.shape_cast %173 : vector<1x8x128xf32> to vector<8x128xf32>
    %175 = vector.shape_cast %172 : vector<8x128xf32> to vector<1x8x128xf32>
    tpu.vector_store %arg4[%c0_109, %c8_110, %c0_111], %175 {strides = array<i32>} : memref<1x1024x128xf32, #tpu.memory_space<vmem>>, vector<1x8x128xf32>,
    %176 = arith.subf %127, %171 : vector<8x128xf32>
    %c0_112 = arith.constant 0 : index
    %c136_113 = arith.constant 136 : index
    %c0_114 = arith.constant 0 : index
    %177 = vector.load %arg4[%c0_112, %c136_113, %c0_114] : memref<1x1024x128xf32, #tpu.memory_space<vmem>>, vector<1x8x128xf32>
    %178 = vector.shape_cast %177 : vector<1x8x128xf32> to vector<8x128xf32>
    %179 = vector.shape_cast %176 : vector<8x128xf32> to vector<1x8x128xf32>
    tpu.vector_store %arg4[%c0_112, %c136_113, %c0_114], %179 {strides = array<i32>} : memref<1x1024x128xf32, #tpu.memory_space<vmem>>, vector<1x8x128xf32>,
    %180 = arith.subf %129, %171 : vector<8x128xf32>
    %c0_115 = arith.constant 0 : index
    %c264_116 = arith.constant 264 : index
    %c0_117 = arith.constant 0 : index
    %181 = vector.load %arg4[%c0_115, %c264_116, %c0_117] : memref<1x1024x128xf32, #tpu.memory_space<vmem>>, vector<1x8x128xf32>
    %182 = vector.shape_cast %181 : vector<1x8x128xf32> to vector<8x128xf32>
    %183 = vector.shape_cast %180 : vector<8x128xf32> to vector<1x8x128xf32>
    tpu.vector_store %arg4[%c0_115, %c264_116, %c0_117], %183 {strides = array<i32>} : memref<1x1024x128xf32, #tpu.memory_space<vmem>>, vector<1x8x128xf32>,
    %184 = arith.subf %131, %171 : vector<8x128xf32>
    %c0_118 = arith.constant 0 : index
    %c392_119 = arith.constant 392 : index
    %c0_120 = arith.constant 0 : index
    %185 = vector.load %arg4[%c0_118, %c392_119, %c0_120] : memref<1x1024x128xf32, #tpu.memory_space<vmem>>, vector<1x8x128xf32>
    %186 = vector.shape_cast %185 : vector<1x8x128xf32> to vector<8x128xf32>
    %187 = vector.shape_cast %184 : vector<8x128xf32> to vector<1x8x128xf32>
    tpu.vector_store %arg4[%c0_118, %c392_119, %c0_120], %187 {strides = array<i32>} : memref<1x1024x128xf32, #tpu.memory_space<vmem>>, vector<1x8x128xf32>,
    %188 = arith.subf %133, %171 : vector<8x128xf32>
    %c0_121 = arith.constant 0 : index
    %c520_122 = arith.constant 520 : index
    %c0_123 = arith.constant 0 : index
    %189 = vector.load %arg4[%c0_121, %c520_122, %c0_123] : memref<1x1024x128xf32, #tpu.memory_space<vmem>>, vector<1x8x128xf32>
    %190 = vector.shape_cast %189 : vector<1x8x128xf32> to vector<8x128xf32>
    %191 = vector.shape_cast %188 : vector<8x128xf32> to vector<1x8x128xf32>
    tpu.vector_store %arg4[%c0_121, %c520_122, %c0_123], %191 {strides = array<i32>} : memref<1x1024x128xf32, #tpu.memory_space<vmem>>, vector<1x8x128xf32>,
    %192 = arith.subf %135, %171 : vector<8x128xf32>
    %c0_124 = arith.constant 0 : index
    %c648_125 = arith.constant 648 : index
    %c0_126 = arith.constant 0 : index
    %193 = vector.load %arg4[%c0_124, %c648_125, %c0_126] : memref<1x1024x128xf32, #tpu.memory_space<vmem>>, vector<1x8x128xf32>
    %194 = vector.shape_cast %193 : vector<1x8x128xf32> to vector<8x128xf32>
    %195 = vector.shape_cast %192 : vector<8x128xf32> to vector<1x8x128xf32>
    tpu.vector_store %arg4[%c0_124, %c648_125, %c0_126], %195 {strides = array<i32>} : memref<1x1024x128xf32, #tpu.memory_space<vmem>>, vector<1x8x128xf32>,
    %196 = arith.subf %137, %171 : vector<8x128xf32>
    %c0_127 = arith.constant 0 : index
    %c776_128 = arith.constant 776 : index
    %c0_129 = arith.constant 0 : index
    %197 = vector.load %arg4[%c0_127, %c776_128, %c0_129] : memref<1x1024x128xf32, #tpu.memory_space<vmem>>, vector<1x8x128xf32>
    %198 = vector.shape_cast %197 : vector<1x8x128xf32> to vector<8x128xf32>
    %199 = vector.shape_cast %196 : vector<8x128xf32> to vector<1x8x128xf32>
    tpu.vector_store %arg4[%c0_127, %c776_128, %c0_129], %199 {strides = array<i32>} : memref<1x1024x128xf32, #tpu.memory_space<vmem>>, vector<1x8x128xf32>,
    %200 = arith.subf %139, %171 : vector<8x128xf32>
    %c0_130 = arith.constant 0 : index
    %c904_131 = arith.constant 904 : index
    %c0_132 = arith.constant 0 : index
    %201 = vector.load %arg4[%c0_130, %c904_131, %c0_132] : memref<1x1024x128xf32, #tpu.memory_space<vmem>>, vector<1x8x128xf32>
    %202 = vector.shape_cast %201 : vector<1x8x128xf32> to vector<8x128xf32>
    %203 = vector.shape_cast %200 : vector<8x128xf32> to vector<1x8x128xf32>
    tpu.vector_store %arg4[%c0_130, %c904_131, %c0_132], %203 {strides = array<i32>} : memref<1x1024x128xf32, #tpu.memory_space<vmem>>, vector<1x8x128xf32>,
    %c0_133 = arith.constant 0 : index
    %c16 = arith.constant 16 : index
    %c0_134 = arith.constant 0 : index
    %204 = vector.load %arg4[%c0_133, %c16, %c0_134] : memref<1x1024x128xf32, #tpu.memory_space<vmem>>, vector<1x8x128xf32>
    %205 = vector.shape_cast %204 : vector<1x8x128xf32> to vector<8x128xf32>
    %c0_135 = arith.constant 0 : index
    %c144 = arith.constant 144 : index
    %c0_136 = arith.constant 0 : index
    %206 = vector.load %arg4[%c0_135, %c144, %c0_136] : memref<1x1024x128xf32, #tpu.memory_space<vmem>>, vector<1x8x128xf32>
    %207 = vector.shape_cast %206 : vector<1x8x128xf32> to vector<8x128xf32>
    %c0_137 = arith.constant 0 : index
    %c272 = arith.constant 272 : index
    %c0_138 = arith.constant 0 : index
    %208 = vector.load %arg4[%c0_137, %c272, %c0_138] : memref<1x1024x128xf32, #tpu.memory_space<vmem>>, vector<1x8x128xf32>
    %209 = vector.shape_cast %208 : vector<1x8x128xf32> to vector<8x128xf32>
    %c0_139 = arith.constant 0 : index
    %c400 = arith.constant 400 : index
    %c0_140 = arith.constant 0 : index
    %210 = vector.load %arg4[%c0_139, %c400, %c0_140] : memref<1x1024x128xf32, #tpu.memory_space<vmem>>, vector<1x8x128xf32>
    %211 = vector.shape_cast %210 : vector<1x8x128xf32> to vector<8x128xf32>
    %c0_141 = arith.constant 0 : index
    %c528 = arith.constant 528 : index
    %c0_142 = arith.constant 0 : index
    %212 = vector.load %arg4[%c0_141, %c528, %c0_142] : memref<1x1024x128xf32, #tpu.memory_space<vmem>>, vector<1x8x128xf32>
    %213 = vector.shape_cast %212 : vector<1x8x128xf32> to vector<8x128xf32>
    %c0_143 = arith.constant 0 : index
    %c656 = arith.constant 656 : index
    %c0_144 = arith.constant 0 : index
    %214 = vector.load %arg4[%c0_143, %c656, %c0_144] : memref<1x1024x128xf32, #tpu.memory_space<vmem>>, vector<1x8x128xf32>
    %215 = vector.shape_cast %214 : vector<1x8x128xf32> to vector<8x128xf32>
    %c0_145 = arith.constant 0 : index
    %c784 = arith.constant 784 : index
    %c0_146 = arith.constant 0 : index
    %216 = vector.load %arg4[%c0_145, %c784, %c0_146] : memref<1x1024x128xf32, #tpu.memory_space<vmem>>, vector<1x8x128xf32>
    %217 = vector.shape_cast %216 : vector<1x8x128xf32> to vector<8x128xf32>
    %c0_147 = arith.constant 0 : index
    %c912 = arith.constant 912 : index
    %c0_148 = arith.constant 0 : index
    %218 = vector.load %arg4[%c0_147, %c912, %c0_148] : memref<1x1024x128xf32, #tpu.memory_space<vmem>>, vector<1x8x128xf32>
    %219 = vector.shape_cast %218 : vector<1x8x128xf32> to vector<8x128xf32>
    %220 = arith.maximumf %205, %207 : vector<8x128xf32>
    %221 = arith.maximumf %220, %209 : vector<8x128xf32>
    %222 = arith.maximumf %221, %211 : vector<8x128xf32>
    %223 = arith.maximumf %222, %213 : vector<8x128xf32>
    %224 = arith.maximumf %223, %215 : vector<8x128xf32>
    %225 = arith.maximumf %224, %217 : vector<8x128xf32>
    %226 = arith.maximumf %225, %219 : vector<8x128xf32>
    %227 = arith.subf %205, %226 : vector<8x128xf32>
    %228 = math.exp %227 : vector<8x128xf32>
    %229 = arith.subf %207, %226 : vector<8x128xf32>
    %230 = math.exp %229 : vector<8x128xf32>
    %231 = arith.addf %228, %230 : vector<8x128xf32>
    %232 = arith.subf %209, %226 : vector<8x128xf32>
    %233 = math.exp %232 : vector<8x128xf32>
    %234 = arith.addf %231, %233 : vector<8x128xf32>
    %235 = arith.subf %211, %226 : vector<8x128xf32>
    %236 = math.exp %235 : vector<8x128xf32>
    %237 = arith.addf %234, %236 : vector<8x128xf32>
    %238 = arith.subf %213, %226 : vector<8x128xf32>
    %239 = math.exp %238 : vector<8x128xf32>
    %240 = arith.addf %237, %239 : vector<8x128xf32>
    %241 = arith.subf %215, %226 : vector<8x128xf32>
    %242 = math.exp %241 : vector<8x128xf32>
    %243 = arith.addf %240, %242 : vector<8x128xf32>
    %244 = arith.subf %217, %226 : vector<8x128xf32>
    %245 = math.exp %244 : vector<8x128xf32>
    %246 = arith.addf %243, %245 : vector<8x128xf32>
    %247 = arith.subf %219, %226 : vector<8x128xf32>
    %248 = math.exp %247 : vector<8x128xf32>
    %249 = arith.addf %246, %248 : vector<8x128xf32>
    %250 = math.log %249 : vector<8x128xf32>
    %251 = arith.addf %226, %250 : vector<8x128xf32>
    %252 = arith.subf %205, %251 : vector<8x128xf32>
    %c0_149 = arith.constant 0 : index
    %c16_150 = arith.constant 16 : index
    %c0_151 = arith.constant 0 : index
    %253 = vector.load %arg4[%c0_149, %c16_150, %c0_151] : memref<1x1024x128xf32, #tpu.memory_space<vmem>>, vector<1x8x128xf32>
    %254 = vector.shape_cast %253 : vector<1x8x128xf32> to vector<8x128xf32>
    %255 = vector.shape_cast %252 : vector<8x128xf32> to vector<1x8x128xf32>
    tpu.vector_store %arg4[%c0_149, %c16_150, %c0_151], %255 {strides = array<i32>} : memref<1x1024x128xf32, #tpu.memory_space<vmem>>, vector<1x8x128xf32>,
    %256 = arith.subf %207, %251 : vector<8x128xf32>
    %c0_152 = arith.constant 0 : index
    %c144_153 = arith.constant 144 : index
    %c0_154 = arith.constant 0 : index
    %257 = vector.load %arg4[%c0_152, %c144_153, %c0_154] : memref<1x1024x128xf32, #tpu.memory_space<vmem>>, vector<1x8x128xf32>
    %258 = vector.shape_cast %257 : vector<1x8x128xf32> to vector<8x128xf32>
    %259 = vector.shape_cast %256 : vector<8x128xf32> to vector<1x8x128xf32>
    tpu.vector_store %arg4[%c0_152, %c144_153, %c0_154], %259 {strides = array<i32>} : memref<1x1024x128xf32, #tpu.memory_space<vmem>>, vector<1x8x128xf32>,
    %260 = arith.subf %209, %251 : vector<8x128xf32>
    %c0_155 = arith.constant 0 : index
    %c272_156 = arith.constant 272 : index
    %c0_157 = arith.constant 0 : index
    %261 = vector.load %arg4[%c0_155, %c272_156, %c0_157] : memref<1x1024x128xf32, #tpu.memory_space<vmem>>, vector<1x8x128xf32>
    %262 = vector.shape_cast %261 : vector<1x8x128xf32> to vector<8x128xf32>
    %263 = vector.shape_cast %260 : vector<8x128xf32> to vector<1x8x128xf32>
    tpu.vector_store %arg4[%c0_155, %c272_156, %c0_157], %263 {strides = array<i32>} : memref<1x1024x128xf32, #tpu.memory_space<vmem>>, vector<1x8x128xf32>,
    %264 = arith.subf %211, %251 : vector<8x128xf32>
    %c0_158 = arith.constant 0 : index
    %c400_159 = arith.constant 400 : index
    %c0_160 = arith.constant 0 : index
    %265 = vector.load %arg4[%c0_158, %c400_159, %c0_160] : memref<1x1024x128xf32, #tpu.memory_space<vmem>>, vector<1x8x128xf32>
    %266 = vector.shape_cast %265 : vector<1x8x128xf32> to vector<8x128xf32>
    %267 = vector.shape_cast %264 : vector<8x128xf32> to vector<1x8x128xf32>
    tpu.vector_store %arg4[%c0_158, %c400_159, %c0_160], %267 {strides = array<i32>} : memref<1x1024x128xf32, #tpu.memory_space<vmem>>, vector<1x8x128xf32>,
    %268 = arith.subf %213, %251 : vector<8x128xf32>
    %c0_161 = arith.constant 0 : index
    %c528_162 = arith.constant 528 : index
    %c0_163 = arith.constant 0 : index
    %269 = vector.load %arg4[%c0_161, %c528_162, %c0_163] : memref<1x1024x128xf32, #tpu.memory_space<vmem>>, vector<1x8x128xf32>
    %270 = vector.shape_cast %269 : vector<1x8x128xf32> to vector<8x128xf32>
    %271 = vector.shape_cast %268 : vector<8x128xf32> to vector<1x8x128xf32>
    tpu.vector_store %arg4[%c0_161, %c528_162, %c0_163], %271 {strides = array<i32>} : memref<1x1024x128xf32, #tpu.memory_space<vmem>>, vector<1x8x128xf32>,
    %272 = arith.subf %215, %251 : vector<8x128xf32>
    %c0_164 = arith.constant 0 : index
    %c656_165 = arith.constant 656 : index
    %c0_166 = arith.constant 0 : index
    %273 = vector.load %arg4[%c0_164, %c656_165, %c0_166] : memref<1x1024x128xf32, #tpu.memory_space<vmem>>, vector<1x8x128xf32>
    %274 = vector.shape_cast %273 : vector<1x8x128xf32> to vector<8x128xf32>
    %275 = vector.shape_cast %272 : vector<8x128xf32> to vector<1x8x128xf32>
    tpu.vector_store %arg4[%c0_164, %c656_165, %c0_166], %275 {strides = array<i32>} : memref<1x1024x128xf32, #tpu.memory_space<vmem>>, vector<1x8x128xf32>,
    %276 = arith.subf %217, %251 : vector<8x128xf32>
    %c0_167 = arith.constant 0 : index
    %c784_168 = arith.constant 784 : index
    %c0_169 = arith.constant 0 : index
    %277 = vector.load %arg4[%c0_167, %c784_168, %c0_169] : memref<1x1024x128xf32, #tpu.memory_space<vmem>>, vector<1x8x128xf32>
    %278 = vector.shape_cast %277 : vector<1x8x128xf32> to vector<8x128xf32>
    %279 = vector.shape_cast %276 : vector<8x128xf32> to vector<1x8x128xf32>
    tpu.vector_store %arg4[%c0_167, %c784_168, %c0_169], %279 {strides = array<i32>} : memref<1x1024x128xf32, #tpu.memory_space<vmem>>, vector<1x8x128xf32>,
    %280 = arith.subf %219, %251 : vector<8x128xf32>
    %c0_170 = arith.constant 0 : index
    %c912_171 = arith.constant 912 : index
    %c0_172 = arith.constant 0 : index
    %281 = vector.load %arg4[%c0_170, %c912_171, %c0_172] : memref<1x1024x128xf32, #tpu.memory_space<vmem>>, vector<1x8x128xf32>
    %282 = vector.shape_cast %281 : vector<1x8x128xf32> to vector<8x128xf32>
    %283 = vector.shape_cast %280 : vector<8x128xf32> to vector<1x8x128xf32>
    tpu.vector_store %arg4[%c0_170, %c912_171, %c0_172], %283 {strides = array<i32>} : memref<1x1024x128xf32, #tpu.memory_space<vmem>>, vector<1x8x128xf32>,
    %c0_173 = arith.constant 0 : index
    %c24 = arith.constant 24 : index
    %c0_174 = arith.constant 0 : index
    %284 = vector.load %arg4[%c0_173, %c24, %c0_174] : memref<1x1024x128xf32, #tpu.memory_space<vmem>>, vector<1x8x128xf32>
    %285 = vector.shape_cast %284 : vector<1x8x128xf32> to vector<8x128xf32>
    %c0_175 = arith.constant 0 : index
    %c152 = arith.constant 152 : index
    %c0_176 = arith.constant 0 : index
    %286 = vector.load %arg4[%c0_175, %c152, %c0_176] : memref<1x1024x128xf32, #tpu.memory_space<vmem>>, vector<1x8x128xf32>
    %287 = vector.shape_cast %286 : vector<1x8x128xf32> to vector<8x128xf32>
    %c0_177 = arith.constant 0 : index
    %c280 = arith.constant 280 : index
    %c0_178 = arith.constant 0 : index
    %288 = vector.load %arg4[%c0_177, %c280, %c0_178] : memref<1x1024x128xf32, #tpu.memory_space<vmem>>, vector<1x8x128xf32>
    %289 = vector.shape_cast %288 : vector<1x8x128xf32> to vector<8x128xf32>
    %c0_179 = arith.constant 0 : index
    %c408 = arith.constant 408 : index
    %c0_180 = arith.constant 0 : index
    %290 = vector.load %arg4[%c0_179, %c408, %c0_180] : memref<1x1024x128xf32, #tpu.memory_space<vmem>>, vector<1x8x128xf32>
    %291 = vector.shape_cast %290 : vector<1x8x128xf32> to vector<8x128xf32>
    %c0_181 = arith.constant 0 : index
    %c536 = arith.constant 536 : index
    %c0_182 = arith.constant 0 : index
    %292 = vector.load %arg4[%c0_181, %c536, %c0_182] : memref<1x1024x128xf32, #tpu.memory_space<vmem>>, vector<1x8x128xf32>
    %293 = vector.shape_cast %292 : vector<1x8x128xf32> to vector<8x128xf32>
    %c0_183 = arith.constant 0 : index
    %c664 = arith.constant 664 : index
    %c0_184 = arith.constant 0 : index
    %294 = vector.load %arg4[%c0_183, %c664, %c0_184] : memref<1x1024x128xf32, #tpu.memory_space<vmem>>, vector<1x8x128xf32>
    %295 = vector.shape_cast %294 : vector<1x8x128xf32> to vector<8x128xf32>
    %c0_185 = arith.constant 0 : index
    %c792 = arith.constant 792 : index
    %c0_186 = arith.constant 0 : index
    %296 = vector.load %arg4[%c0_185, %c792, %c0_186] : memref<1x1024x128xf32, #tpu.memory_space<vmem>>, vector<1x8x128xf32>
    %297 = vector.shape_cast %296 : vector<1x8x128xf32> to vector<8x128xf32>
    %c0_187 = arith.constant 0 : index
    %c920 = arith.constant 920 : index
    %c0_188 = arith.constant 0 : index
    %298 = vector.load %arg4[%c0_187, %c920, %c0_188] : memref<1x1024x128xf32, #tpu.memory_space<vmem>>, vector<1x8x128xf32>
    %299 = vector.shape_cast %298 : vector<1x8x128xf32> to vector<8x128xf32>
    %300 = arith.maximumf %285, %287 : vector<8x128xf32>
    %301 = arith.maximumf %300, %289 : vector<8x128xf32>
    %302 = arith.maximumf %301, %291 : vector<8x128xf32>
    %303 = arith.maximumf %302, %293 : vector<8x128xf32>
    %304 = arith.maximumf %303, %295 : vector<8x128xf32>
    %305 = arith.maximumf %304, %297 : vector<8x128xf32>
    %306 = arith.maximumf %305, %299 : vector<8x128xf32>
    %307 = arith.subf %285, %306 : vector<8x128xf32>
    %308 = math.exp %307 : vector<8x128xf32>
    %309 = arith.subf %287, %306 : vector<8x128xf32>
    %310 = math.exp %309 : vector<8x128xf32>
    %311 = arith.addf %308, %310 : vector<8x128xf32>
    %312 = arith.subf %289, %306 : vector<8x128xf32>
    %313 = math.exp %312 : vector<8x128xf32>
    %314 = arith.addf %311, %313 : vector<8x128xf32>
    %315 = arith.subf %291, %306 : vector<8x128xf32>
    %316 = math.exp %315 : vector<8x128xf32>
    %317 = arith.addf %314, %316 : vector<8x128xf32>
    %318 = arith.subf %293, %306 : vector<8x128xf32>
    %319 = math.exp %318 : vector<8x128xf32>
    %320 = arith.addf %317, %319 : vector<8x128xf32>
    %321 = arith.subf %295, %306 : vector<8x128xf32>
    %322 = math.exp %321 : vector<8x128xf32>
    %323 = arith.addf %320, %322 : vector<8x128xf32>
    %324 = arith.subf %297, %306 : vector<8x128xf32>
    %325 = math.exp %324 : vector<8x128xf32>
    %326 = arith.addf %323, %325 : vector<8x128xf32>
    %327 = arith.subf %299, %306 : vector<8x128xf32>
    %328 = math.exp %327 : vector<8x128xf32>
    %329 = arith.addf %326, %328 : vector<8x128xf32>
    %330 = math.log %329 : vector<8x128xf32>
    %331 = arith.addf %306, %330 : vector<8x128xf32>
    %332 = arith.subf %285, %331 : vector<8x128xf32>
    %c0_189 = arith.constant 0 : index
    %c24_190 = arith.constant 24 : index
    %c0_191 = arith.constant 0 : index
    %333 = vector.load %arg4[%c0_189, %c24_190, %c0_191] : memref<1x1024x128xf32, #tpu.memory_space<vmem>>, vector<1x8x128xf32>
    %334 = vector.shape_cast %333 : vector<1x8x128xf32> to vector<8x128xf32>
    %335 = vector.shape_cast %332 : vector<8x128xf32> to vector<1x8x128xf32>
    tpu.vector_store %arg4[%c0_189, %c24_190, %c0_191], %335 {strides = array<i32>} : memref<1x1024x128xf32, #tpu.memory_space<vmem>>, vector<1x8x128xf32>,
    %336 = arith.subf %287, %331 : vector<8x128xf32>
    %c0_192 = arith.constant 0 : index
    %c152_193 = arith.constant 152 : index
    %c0_194 = arith.constant 0 : index
    %337 = vector.load %arg4[%c0_192, %c152_193, %c0_194] : memref<1x1024x128xf32, #tpu.memory_space<vmem>>, vector<1x8x128xf32>
    %338 = vector.shape_cast %337 : vector<1x8x128xf32> to vector<8x128xf32>
    %339 = vector.shape_cast %336 : vector<8x128xf32> to vector<1x8x128xf32>
    tpu.vector_store %arg4[%c0_192, %c152_193, %c0_194], %339 {strides = array<i32>} : memref<1x1024x128xf32, #tpu.memory_space<vmem>>, vector<1x8x128xf32>,
    %340 = arith.subf %289, %331 : vector<8x128xf32>
    %c0_195 = arith.constant 0 : index
    %c280_196 = arith.constant 280 : index
    %c0_197 = arith.constant 0 : index
    %341 = vector.load %arg4[%c0_195, %c280_196, %c0_197] : memref<1x1024x128xf32, #tpu.memory_space<vmem>>, vector<1x8x128xf32>
    %342 = vector.shape_cast %341 : vector<1x8x128xf32> to vector<8x128xf32>
    %343 = vector.shape_cast %340 : vector<8x128xf32> to vector<1x8x128xf32>
    tpu.vector_store %arg4[%c0_195, %c280_196, %c0_197], %343 {strides = array<i32>} : memref<1x1024x128xf32, #tpu.memory_space<vmem>>, vector<1x8x128xf32>,
    %344 = arith.subf %291, %331 : vector<8x128xf32>
    %c0_198 = arith.constant 0 : index
    %c408_199 = arith.constant 408 : index
    %c0_200 = arith.constant 0 : index
    %345 = vector.load %arg4[%c0_198, %c408_199, %c0_200] : memref<1x1024x128xf32, #tpu.memory_space<vmem>>, vector<1x8x128xf32>
    %346 = vector.shape_cast %345 : vector<1x8x128xf32> to vector<8x128xf32>
    %347 = vector.shape_cast %344 : vector<8x128xf32> to vector<1x8x128xf32>
    tpu.vector_store %arg4[%c0_198, %c408_199, %c0_200], %347 {strides = array<i32>} : memref<1x1024x128xf32, #tpu.memory_space<vmem>>, vector<1x8x128xf32>,
    %348 = arith.subf %293, %331 : vector<8x128xf32>
    %c0_201 = arith.constant 0 : index
    %c536_202 = arith.constant 536 : index
    %c0_203 = arith.constant 0 : index
    %349 = vector.load %arg4[%c0_201, %c536_202, %c0_203] : memref<1x1024x128xf32, #tpu.memory_space<vmem>>, vector<1x8x128xf32>
    %350 = vector.shape_cast %349 : vector<1x8x128xf32> to vector<8x128xf32>
    %351 = vector.shape_cast %348 : vector<8x128xf32> to vector<1x8x128xf32>
    tpu.vector_store %arg4[%c0_201, %c536_202, %c0_203], %351 {strides = array<i32>} : memref<1x1024x128xf32, #tpu.memory_space<vmem>>, vector<1x8x128xf32>,
    %352 = arith.subf %295, %331 : vector<8x128xf32>
    %c0_204 = arith.constant 0 : index
    %c664_205 = arith.constant 664 : index
    %c0_206 = arith.constant 0 : index
    %353 = vector.load %arg4[%c0_204, %c664_205, %c0_206] : memref<1x1024x128xf32, #tpu.memory_space<vmem>>, vector<1x8x128xf32>
    %354 = vector.shape_cast %353 : vector<1x8x128xf32> to vector<8x128xf32>
    %355 = vector.shape_cast %352 : vector<8x128xf32> to vector<1x8x128xf32>
    tpu.vector_store %arg4[%c0_204, %c664_205, %c0_206], %355 {strides = array<i32>} : memref<1x1024x128xf32, #tpu.memory_space<vmem>>, vector<1x8x128xf32>,
    %356 = arith.subf %297, %331 : vector<8x128xf32>
    %c0_207 = arith.constant 0 : index
    %c792_208 = arith.constant 792 : index
    %c0_209 = arith.constant 0 : index
    %357 = vector.load %arg4[%c0_207, %c792_208, %c0_209] : memref<1x1024x128xf32, #tpu.memory_space<vmem>>, vector<1x8x128xf32>
    %358 = vector.shape_cast %357 : vector<1x8x128xf32> to vector<8x128xf32>
    %359 = vector.shape_cast %356 : vector<8x128xf32> to vector<1x8x128xf32>
    tpu.vector_store %arg4[%c0_207, %c792_208, %c0_209], %359 {strides = array<i32>} : memref<1x1024x128xf32, #tpu.memory_space<vmem>>, vector<1x8x128xf32>,
    %360 = arith.subf %299, %331 : vector<8x128xf32>
    %c0_210 = arith.constant 0 : index
    %c920_211 = arith.constant 920 : index
    %c0_212 = arith.constant 0 : index
    %361 = vector.load %arg4[%c0_210, %c920_211, %c0_212] : memref<1x1024x128xf32, #tpu.memory_space<vmem>>, vector<1x8x128xf32>
    %362 = vector.shape_cast %361 : vector<1x8x128xf32> to vector<8x128xf32>
    %363 = vector.shape_cast %360 : vector<8x128xf32> to vector<1x8x128xf32>
    tpu.vector_store %arg4[%c0_210, %c920_211, %c0_212], %363 {strides = array<i32>} : memref<1x1024x128xf32, #tpu.memory_space<vmem>>, vector<1x8x128xf32>,
    %c0_213 = arith.constant 0 : index
    %c32 = arith.constant 32 : index
    %c0_214 = arith.constant 0 : index
    %364 = vector.load %arg4[%c0_213, %c32, %c0_214] : memref<1x1024x128xf32, #tpu.memory_space<vmem>>, vector<1x8x128xf32>
    %365 = vector.shape_cast %364 : vector<1x8x128xf32> to vector<8x128xf32>
    %c0_215 = arith.constant 0 : index
    %c160 = arith.constant 160 : index
    %c0_216 = arith.constant 0 : index
    %366 = vector.load %arg4[%c0_215, %c160, %c0_216] : memref<1x1024x128xf32, #tpu.memory_space<vmem>>, vector<1x8x128xf32>
    %367 = vector.shape_cast %366 : vector<1x8x128xf32> to vector<8x128xf32>
    %c0_217 = arith.constant 0 : index
    %c288 = arith.constant 288 : index
    %c0_218 = arith.constant 0 : index
    %368 = vector.load %arg4[%c0_217, %c288, %c0_218] : memref<1x1024x128xf32, #tpu.memory_space<vmem>>, vector<1x8x128xf32>
    %369 = vector.shape_cast %368 : vector<1x8x128xf32> to vector<8x128xf32>
    %c0_219 = arith.constant 0 : index
    %c416 = arith.constant 416 : index
    %c0_220 = arith.constant 0 : index
    %370 = vector.load %arg4[%c0_219, %c416, %c0_220] : memref<1x1024x128xf32, #tpu.memory_space<vmem>>, vector<1x8x128xf32>
    %371 = vector.shape_cast %370 : vector<1x8x128xf32> to vector<8x128xf32>
    %c0_221 = arith.constant 0 : index
    %c544 = arith.constant 544 : index
    %c0_222 = arith.constant 0 : index
    %372 = vector.load %arg4[%c0_221, %c544, %c0_222] : memref<1x1024x128xf32, #tpu.memory_space<vmem>>, vector<1x8x128xf32>
    %373 = vector.shape_cast %372 : vector<1x8x128xf32> to vector<8x128xf32>
    %c0_223 = arith.constant 0 : index
    %c672 = arith.constant 672 : index
    %c0_224 = arith.constant 0 : index
    %374 = vector.load %arg4[%c0_223, %c672, %c0_224] : memref<1x1024x128xf32, #tpu.memory_space<vmem>>, vector<1x8x128xf32>
    %375 = vector.shape_cast %374 : vector<1x8x128xf32> to vector<8x128xf32>
    %c0_225 = arith.constant 0 : index
    %c800 = arith.constant 800 : index
    %c0_226 = arith.constant 0 : index
    %376 = vector.load %arg4[%c0_225, %c800, %c0_226] : memref<1x1024x128xf32, #tpu.memory_space<vmem>>, vector<1x8x128xf32>
    %377 = vector.shape_cast %376 : vector<1x8x128xf32> to vector<8x128xf32>
    %c0_227 = arith.constant 0 : index
    %c928 = arith.constant 928 : index
    %c0_228 = arith.constant 0 : index
    %378 = vector.load %arg4[%c0_227, %c928, %c0_228] : memref<1x1024x128xf32, #tpu.memory_space<vmem>>, vector<1x8x128xf32>
    %379 = vector.shape_cast %378 : vector<1x8x128xf32> to vector<8x128xf32>
    %380 = arith.maximumf %365, %367 : vector<8x128xf32>
    %381 = arith.maximumf %380, %369 : vector<8x128xf32>
    %382 = arith.maximumf %381, %371 : vector<8x128xf32>
    %383 = arith.maximumf %382, %373 : vector<8x128xf32>
    %384 = arith.maximumf %383, %375 : vector<8x128xf32>
    %385 = arith.maximumf %384, %377 : vector<8x128xf32>
    %386 = arith.maximumf %385, %379 : vector<8x128xf32>
    %387 = arith.subf %365, %386 : vector<8x128xf32>
    %388 = math.exp %387 : vector<8x128xf32>
    %389 = arith.subf %367, %386 : vector<8x128xf32>
    %390 = math.exp %389 : vector<8x128xf32>
    %391 = arith.addf %388, %390 : vector<8x128xf32>
    %392 = arith.subf %369, %386 : vector<8x128xf32>
    %393 = math.exp %392 : vector<8x128xf32>
    %394 = arith.addf %391, %393 : vector<8x128xf32>
    %395 = arith.subf %371, %386 : vector<8x128xf32>
    %396 = math.exp %395 : vector<8x128xf32>
    %397 = arith.addf %394, %396 : vector<8x128xf32>
    %398 = arith.subf %373, %386 : vector<8x128xf32>
    %399 = math.exp %398 : vector<8x128xf32>
    %400 = arith.addf %397, %399 : vector<8x128xf32>
    %401 = arith.subf %375, %386 : vector<8x128xf32>
    %402 = math.exp %401 : vector<8x128xf32>
    %403 = arith.addf %400, %402 : vector<8x128xf32>
    %404 = arith.subf %377, %386 : vector<8x128xf32>
    %405 = math.exp %404 : vector<8x128xf32>
    %406 = arith.addf %403, %405 : vector<8x128xf32>
    %407 = arith.subf %379, %386 : vector<8x128xf32>
    %408 = math.exp %407 : vector<8x128xf32>
    %409 = arith.addf %406, %408 : vector<8x128xf32>
    %410 = math.log %409 : vector<8x128xf32>
    %411 = arith.addf %386, %410 : vector<8x128xf32>
    %412 = arith.subf %365, %411 : vector<8x128xf32>
    %c0_229 = arith.constant 0 : index
    %c32_230 = arith.constant 32 : index
    %c0_231 = arith.constant 0 : index
    %413 = vector.load %arg4[%c0_229, %c32_230, %c0_231] : memref<1x1024x128xf32, #tpu.memory_space<vmem>>, vector<1x8x128xf32>
    %414 = vector.shape_cast %413 : vector<1x8x128xf32> to vector<8x128xf32>
    %415 = vector.shape_cast %412 : vector<8x128xf32> to vector<1x8x128xf32>
    tpu.vector_store %arg4[%c0_229, %c32_230, %c0_231], %415 {strides = array<i32>} : memref<1x1024x128xf32, #tpu.memory_space<vmem>>, vector<1x8x128xf32>,
    %416 = arith.subf %367, %411 : vector<8x128xf32>
    %c0_232 = arith.constant 0 : index
    %c160_233 = arith.constant 160 : index
    %c0_234 = arith.constant 0 : index
    %417 = vector.load %arg4[%c0_232, %c160_233, %c0_234] : memref<1x1024x128xf32, #tpu.memory_space<vmem>>, vector<1x8x128xf32>
    %418 = vector.shape_cast %417 : vector<1x8x128xf32> to vector<8x128xf32>
    %419 = vector.shape_cast %416 : vector<8x128xf32> to vector<1x8x128xf32>
    tpu.vector_store %arg4[%c0_232, %c160_233, %c0_234], %419 {strides = array<i32>} : memref<1x1024x128xf32, #tpu.memory_space<vmem>>, vector<1x8x128xf32>,
    %420 = arith.subf %369, %411 : vector<8x128xf32>
    %c0_235 = arith.constant 0 : index
    %c288_236 = arith.constant 288 : index
    %c0_237 = arith.constant 0 : index
    %421 = vector.load %arg4[%c0_235, %c288_236, %c0_237] : memref<1x1024x128xf32, #tpu.memory_space<vmem>>, vector<1x8x128xf32>
    %422 = vector.shape_cast %421 : vector<1x8x128xf32> to vector<8x128xf32>
    %423 = vector.shape_cast %420 : vector<8x128xf32> to vector<1x8x128xf32>
    tpu.vector_store %arg4[%c0_235, %c288_236, %c0_237], %423 {strides = array<i32>} : memref<1x1024x128xf32, #tpu.memory_space<vmem>>, vector<1x8x128xf32>,
    %424 = arith.subf %371, %411 : vector<8x128xf32>
    %c0_238 = arith.constant 0 : index
    %c416_239 = arith.constant 416 : index
    %c0_240 = arith.constant 0 : index
    %425 = vector.load %arg4[%c0_238, %c416_239, %c0_240] : memref<1x1024x128xf32, #tpu.memory_space<vmem>>, vector<1x8x128xf32>
    %426 = vector.shape_cast %425 : vector<1x8x128xf32> to vector<8x128xf32>
    %427 = vector.shape_cast %424 : vector<8x128xf32> to vector<1x8x128xf32>
    tpu.vector_store %arg4[%c0_238, %c416_239, %c0_240], %427 {strides = array<i32>} : memref<1x1024x128xf32, #tpu.memory_space<vmem>>, vector<1x8x128xf32>,
    %428 = arith.subf %373, %411 : vector<8x128xf32>
    %c0_241 = arith.constant 0 : index
    %c544_242 = arith.constant 544 : index
    %c0_243 = arith.constant 0 : index
    %429 = vector.load %arg4[%c0_241, %c544_242, %c0_243] : memref<1x1024x128xf32, #tpu.memory_space<vmem>>, vector<1x8x128xf32>
    %430 = vector.shape_cast %429 : vector<1x8x128xf32> to vector<8x128xf32>
    %431 = vector.shape_cast %428 : vector<8x128xf32> to vector<1x8x128xf32>
    tpu.vector_store %arg4[%c0_241, %c544_242, %c0_243], %431 {strides = array<i32>} : memref<1x1024x128xf32, #tpu.memory_space<vmem>>, vector<1x8x128xf32>,
    %432 = arith.subf %375, %411 : vector<8x128xf32>
    %c0_244 = arith.constant 0 : index
    %c672_245 = arith.constant 672 : index
    %c0_246 = arith.constant 0 : index
    %433 = vector.load %arg4[%c0_244, %c672_245, %c0_246] : memref<1x1024x128xf32, #tpu.memory_space<vmem>>, vector<1x8x128xf32>
    %434 = vector.shape_cast %433 : vector<1x8x128xf32> to vector<8x128xf32>
    %435 = vector.shape_cast %432 : vector<8x128xf32> to vector<1x8x128xf32>
    tpu.vector_store %arg4[%c0_244, %c672_245, %c0_246], %435 {strides = array<i32>} : memref<1x1024x128xf32, #tpu.memory_space<vmem>>, vector<1x8x128xf32>,
    %436 = arith.subf %377, %411 : vector<8x128xf32>
    %c0_247 = arith.constant 0 : index
    %c800_248 = arith.constant 800 : index
    %c0_249 = arith.constant 0 : index
    %437 = vector.load %arg4[%c0_247, %c800_248, %c0_249] : memref<1x1024x128xf32, #tpu.memory_space<vmem>>, vector<1x8x128xf32>
    %438 = vector.shape_cast %437 : vector<1x8x128xf32> to vector<8x128xf32>
    %439 = vector.shape_cast %436 : vector<8x128xf32> to vector<1x8x128xf32>
    tpu.vector_store %arg4[%c0_247, %c800_248, %c0_249], %439 {strides = array<i32>} : memref<1x1024x128xf32, #tpu.memory_space<vmem>>, vector<1x8x128xf32>,
    %440 = arith.subf %379, %411 : vector<8x128xf32>
    %c0_250 = arith.constant 0 : index
    %c928_251 = arith.constant 928 : index
    %c0_252 = arith.constant 0 : index
    %441 = vector.load %arg4[%c0_250, %c928_251, %c0_252] : memref<1x1024x128xf32, #tpu.memory_space<vmem>>, vector<1x8x128xf32>
    %442 = vector.shape_cast %441 : vector<1x8x128xf32> to vector<8x128xf32>
    %443 = vector.shape_cast %440 : vector<8x128xf32> to vector<1x8x128xf32>
    tpu.vector_store %arg4[%c0_250, %c928_251, %c0_252], %443 {strides = array<i32>} : memref<1x1024x128xf32, #tpu.memory_space<vmem>>, vector<1x8x128xf32>,
    %c0_253 = arith.constant 0 : index
    %c40 = arith.constant 40 : index
    %c0_254 = arith.constant 0 : index
    %444 = vector.load %arg4[%c0_253, %c40, %c0_254] : memref<1x1024x128xf32, #tpu.memory_space<vmem>>, vector<1x8x128xf32>
    %445 = vector.shape_cast %444 : vector<1x8x128xf32> to vector<8x128xf32>
    %c0_255 = arith.constant 0 : index
    %c168 = arith.constant 168 : index
    %c0_256 = arith.constant 0 : index
    %446 = vector.load %arg4[%c0_255, %c168, %c0_256] : memref<1x1024x128xf32, #tpu.memory_space<vmem>>, vector<1x8x128xf32>
    %447 = vector.shape_cast %446 : vector<1x8x128xf32> to vector<8x128xf32>
    %c0_257 = arith.constant 0 : index
    %c296 = arith.constant 296 : index
    %c0_258 = arith.constant 0 : index
    %448 = vector.load %arg4[%c0_257, %c296, %c0_258] : memref<1x1024x128xf32, #tpu.memory_space<vmem>>, vector<1x8x128xf32>
    %449 = vector.shape_cast %448 : vector<1x8x128xf32> to vector<8x128xf32>
    %c0_259 = arith.constant 0 : index
    %c424 = arith.constant 424 : index
    %c0_260 = arith.constant 0 : index
    %450 = vector.load %arg4[%c0_259, %c424, %c0_260] : memref<1x1024x128xf32, #tpu.memory_space<vmem>>, vector<1x8x128xf32>
    %451 = vector.shape_cast %450 : vector<1x8x128xf32> to vector<8x128xf32>
    %c0_261 = arith.constant 0 : index
    %c552 = arith.constant 552 : index
    %c0_262 = arith.constant 0 : index
    %452 = vector.load %arg4[%c0_261, %c552, %c0_262] : memref<1x1024x128xf32, #tpu.memory_space<vmem>>, vector<1x8x128xf32>
    %453 = vector.shape_cast %452 : vector<1x8x128xf32> to vector<8x128xf32>
    %c0_263 = arith.constant 0 : index
    %c680 = arith.constant 680 : index
    %c0_264 = arith.constant 0 : index
    %454 = vector.load %arg4[%c0_263, %c680, %c0_264] : memref<1x1024x128xf32, #tpu.memory_space<vmem>>, vector<1x8x128xf32>
    %455 = vector.shape_cast %454 : vector<1x8x128xf32> to vector<8x128xf32>
    %c0_265 = arith.constant 0 : index
    %c808 = arith.constant 808 : index
    %c0_266 = arith.constant 0 : index
    %456 = vector.load %arg4[%c0_265, %c808, %c0_266] : memref<1x1024x128xf32, #tpu.memory_space<vmem>>, vector<1x8x128xf32>
    %457 = vector.shape_cast %456 : vector<1x8x128xf32> to vector<8x128xf32>
    %c0_267 = arith.constant 0 : index
    %c936 = arith.constant 936 : index
    %c0_268 = arith.constant 0 : index
    %458 = vector.load %arg4[%c0_267, %c936, %c0_268] : memref<1x1024x128xf32, #tpu.memory_space<vmem>>, vector<1x8x128xf32>
    %459 = vector.shape_cast %458 : vector<1x8x128xf32> to vector<8x128xf32>
    %460 = arith.maximumf %445, %447 : vector<8x128xf32>
    %461 = arith.maximumf %460, %449 : vector<8x128xf32>
    %462 = arith.maximumf %461, %451 : vector<8x128xf32>
    %463 = arith.maximumf %462, %453 : vector<8x128xf32>
    %464 = arith.maximumf %463, %455 : vector<8x128xf32>
    %465 = arith.maximumf %464, %457 : vector<8x128xf32>
    %466 = arith.maximumf %465, %459 : vector<8x128xf32>
    %467 = arith.subf %445, %466 : vector<8x128xf32>
    %468 = math.exp %467 : vector<8x128xf32>
    %469 = arith.subf %447, %466 : vector<8x128xf32>
    %470 = math.exp %469 : vector<8x128xf32>
    %471 = arith.addf %468, %470 : vector<8x128xf32>
    %472 = arith.subf %449, %466 : vector<8x128xf32>
    %473 = math.exp %472 : vector<8x128xf32>
    %474 = arith.addf %471, %473 : vector<8x128xf32>
    %475 = arith.subf %451, %466 : vector<8x128xf32>
    %476 = math.exp %475 : vector<8x128xf32>
    %477 = arith.addf %474, %476 : vector<8x128xf32>
    %478 = arith.subf %453, %466 : vector<8x128xf32>
    %479 = math.exp %478 : vector<8x128xf32>
    %480 = arith.addf %477, %479 : vector<8x128xf32>
    %481 = arith.subf %455, %466 : vector<8x128xf32>
    %482 = math.exp %481 : vector<8x128xf32>
    %483 = arith.addf %480, %482 : vector<8x128xf32>
    %484 = arith.subf %457, %466 : vector<8x128xf32>
    %485 = math.exp %484 : vector<8x128xf32>
    %486 = arith.addf %483, %485 : vector<8x128xf32>
    %487 = arith.subf %459, %466 : vector<8x128xf32>
    %488 = math.exp %487 : vector<8x128xf32>
    %489 = arith.addf %486, %488 : vector<8x128xf32>
    %490 = math.log %489 : vector<8x128xf32>
    %491 = arith.addf %466, %490 : vector<8x128xf32>
    %492 = arith.subf %445, %491 : vector<8x128xf32>
    %c0_269 = arith.constant 0 : index
    %c40_270 = arith.constant 40 : index
    %c0_271 = arith.constant 0 : index
    %493 = vector.load %arg4[%c0_269, %c40_270, %c0_271] : memref<1x1024x128xf32, #tpu.memory_space<vmem>>, vector<1x8x128xf32>
    %494 = vector.shape_cast %493 : vector<1x8x128xf32> to vector<8x128xf32>
    %495 = vector.shape_cast %492 : vector<8x128xf32> to vector<1x8x128xf32>
    tpu.vector_store %arg4[%c0_269, %c40_270, %c0_271], %495 {strides = array<i32>} : memref<1x1024x128xf32, #tpu.memory_space<vmem>>, vector<1x8x128xf32>,
    %496 = arith.subf %447, %491 : vector<8x128xf32>
    %c0_272 = arith.constant 0 : index
    %c168_273 = arith.constant 168 : index
    %c0_274 = arith.constant 0 : index
    %497 = vector.load %arg4[%c0_272, %c168_273, %c0_274] : memref<1x1024x128xf32, #tpu.memory_space<vmem>>, vector<1x8x128xf32>
    %498 = vector.shape_cast %497 : vector<1x8x128xf32> to vector<8x128xf32>
    %499 = vector.shape_cast %496 : vector<8x128xf32> to vector<1x8x128xf32>
    tpu.vector_store %arg4[%c0_272, %c168_273, %c0_274], %499 {strides = array<i32>} : memref<1x1024x128xf32, #tpu.memory_space<vmem>>, vector<1x8x128xf32>,
    %500 = arith.subf %449, %491 : vector<8x128xf32>
    %c0_275 = arith.constant 0 : index
    %c296_276 = arith.constant 296 : index
    %c0_277 = arith.constant 0 : index
    %501 = vector.load %arg4[%c0_275, %c296_276, %c0_277] : memref<1x1024x128xf32, #tpu.memory_space<vmem>>, vector<1x8x128xf32>
    %502 = vector.shape_cast %501 : vector<1x8x128xf32> to vector<8x128xf32>
    %503 = vector.shape_cast %500 : vector<8x128xf32> to vector<1x8x128xf32>
    tpu.vector_store %arg4[%c0_275, %c296_276, %c0_277], %503 {strides = array<i32>} : memref<1x1024x128xf32, #tpu.memory_space<vmem>>, vector<1x8x128xf32>,
    %504 = arith.subf %451, %491 : vector<8x128xf32>
    %c0_278 = arith.constant 0 : index
    %c424_279 = arith.constant 424 : index
    %c0_280 = arith.constant 0 : index
    %505 = vector.load %arg4[%c0_278, %c424_279, %c0_280] : memref<1x1024x128xf32, #tpu.memory_space<vmem>>, vector<1x8x128xf32>
    %506 = vector.shape_cast %505 : vector<1x8x128xf32> to vector<8x128xf32>
    %507 = vector.shape_cast %504 : vector<8x128xf32> to vector<1x8x128xf32>
    tpu.vector_store %arg4[%c0_278, %c424_279, %c0_280], %507 {strides = array<i32>} : memref<1x1024x128xf32, #tpu.memory_space<vmem>>, vector<1x8x128xf32>,
    %508 = arith.subf %453, %491 : vector<8x128xf32>
    %c0_281 = arith.constant 0 : index
    %c552_282 = arith.constant 552 : index
    %c0_283 = arith.constant 0 : index
    %509 = vector.load %arg4[%c0_281, %c552_282, %c0_283] : memref<1x1024x128xf32, #tpu.memory_space<vmem>>, vector<1x8x128xf32>
    %510 = vector.shape_cast %509 : vector<1x8x128xf32> to vector<8x128xf32>
    %511 = vector.shape_cast %508 : vector<8x128xf32> to vector<1x8x128xf32>
    tpu.vector_store %arg4[%c0_281, %c552_282, %c0_283], %511 {strides = array<i32>} : memref<1x1024x128xf32, #tpu.memory_space<vmem>>, vector<1x8x128xf32>,
    %512 = arith.subf %455, %491 : vector<8x128xf32>
    %c0_284 = arith.constant 0 : index
    %c680_285 = arith.constant 680 : index
    %c0_286 = arith.constant 0 : index
    %513 = vector.load %arg4[%c0_284, %c680_285, %c0_286] : memref<1x1024x128xf32, #tpu.memory_space<vmem>>, vector<1x8x128xf32>
    %514 = vector.shape_cast %513 : vector<1x8x128xf32> to vector<8x128xf32>
    %515 = vector.shape_cast %512 : vector<8x128xf32> to vector<1x8x128xf32>
    tpu.vector_store %arg4[%c0_284, %c680_285, %c0_286], %515 {strides = array<i32>} : memref<1x1024x128xf32, #tpu.memory_space<vmem>>, vector<1x8x128xf32>,
    %516 = arith.subf %457, %491 : vector<8x128xf32>
    %c0_287 = arith.constant 0 : index
    %c808_288 = arith.constant 808 : index
    %c0_289 = arith.constant 0 : index
    %517 = vector.load %arg4[%c0_287, %c808_288, %c0_289] : memref<1x1024x128xf32, #tpu.memory_space<vmem>>, vector<1x8x128xf32>
    %518 = vector.shape_cast %517 : vector<1x8x128xf32> to vector<8x128xf32>
    %519 = vector.shape_cast %516 : vector<8x128xf32> to vector<1x8x128xf32>
    tpu.vector_store %arg4[%c0_287, %c808_288, %c0_289], %519 {strides = array<i32>} : memref<1x1024x128xf32, #tpu.memory_space<vmem>>, vector<1x8x128xf32>,
    %520 = arith.subf %459, %491 : vector<8x128xf32>
    %c0_290 = arith.constant 0 : index
    %c936_291 = arith.constant 936 : index
    %c0_292 = arith.constant 0 : index
    %521 = vector.load %arg4[%c0_290, %c936_291, %c0_292] : memref<1x1024x128xf32, #tpu.memory_space<vmem>>, vector<1x8x128xf32>
    %522 = vector.shape_cast %521 : vector<1x8x128xf32> to vector<8x128xf32>
    %523 = vector.shape_cast %520 : vector<8x128xf32> to vector<1x8x128xf32>
    tpu.vector_store %arg4[%c0_290, %c936_291, %c0_292], %523 {strides = array<i32>} : memref<1x1024x128xf32, #tpu.memory_space<vmem>>, vector<1x8x128xf32>,
    %c0_293 = arith.constant 0 : index
    %c48 = arith.constant 48 : index
    %c0_294 = arith.constant 0 : index
    %524 = vector.load %arg4[%c0_293, %c48, %c0_294] : memref<1x1024x128xf32, #tpu.memory_space<vmem>>, vector<1x8x128xf32>
    %525 = vector.shape_cast %524 : vector<1x8x128xf32> to vector<8x128xf32>
    %c0_295 = arith.constant 0 : index
    %c176 = arith.constant 176 : index
    %c0_296 = arith.constant 0 : index
    %526 = vector.load %arg4[%c0_295, %c176, %c0_296] : memref<1x1024x128xf32, #tpu.memory_space<vmem>>, vector<1x8x128xf32>
    %527 = vector.shape_cast %526 : vector<1x8x128xf32> to vector<8x128xf32>
    %c0_297 = arith.constant 0 : index
    %c304 = arith.constant 304 : index
    %c0_298 = arith.constant 0 : index
    %528 = vector.load %arg4[%c0_297, %c304, %c0_298] : memref<1x1024x128xf32, #tpu.memory_space<vmem>>, vector<1x8x128xf32>
    %529 = vector.shape_cast %528 : vector<1x8x128xf32> to vector<8x128xf32>
    %c0_299 = arith.constant 0 : index
    %c432 = arith.constant 432 : index
    %c0_300 = arith.constant 0 : index
    %530 = vector.load %arg4[%c0_299, %c432, %c0_300] : memref<1x1024x128xf32, #tpu.memory_space<vmem>>, vector<1x8x128xf32>
    %531 = vector.shape_cast %530 : vector<1x8x128xf32> to vector<8x128xf32>
    %c0_301 = arith.constant 0 : index
    %c560 = arith.constant 560 : index
    %c0_302 = arith.constant 0 : index
    %532 = vector.load %arg4[%c0_301, %c560, %c0_302] : memref<1x1024x128xf32, #tpu.memory_space<vmem>>, vector<1x8x128xf32>
    %533 = vector.shape_cast %532 : vector<1x8x128xf32> to vector<8x128xf32>
    %c0_303 = arith.constant 0 : index
    %c688 = arith.constant 688 : index
    %c0_304 = arith.constant 0 : index
    %534 = vector.load %arg4[%c0_303, %c688, %c0_304] : memref<1x1024x128xf32, #tpu.memory_space<vmem>>, vector<1x8x128xf32>
    %535 = vector.shape_cast %534 : vector<1x8x128xf32> to vector<8x128xf32>
    %c0_305 = arith.constant 0 : index
    %c816 = arith.constant 816 : index
    %c0_306 = arith.constant 0 : index
    %536 = vector.load %arg4[%c0_305, %c816, %c0_306] : memref<1x1024x128xf32, #tpu.memory_space<vmem>>, vector<1x8x128xf32>
    %537 = vector.shape_cast %536 : vector<1x8x128xf32> to vector<8x128xf32>
    %c0_307 = arith.constant 0 : index
    %c944 = arith.constant 944 : index
    %c0_308 = arith.constant 0 : index
    %538 = vector.load %arg4[%c0_307, %c944, %c0_308] : memref<1x1024x128xf32, #tpu.memory_space<vmem>>, vector<1x8x128xf32>
    %539 = vector.shape_cast %538 : vector<1x8x128xf32> to vector<8x128xf32>
    %540 = arith.maximumf %525, %527 : vector<8x128xf32>
    %541 = arith.maximumf %540, %529 : vector<8x128xf32>
    %542 = arith.maximumf %541, %531 : vector<8x128xf32>
    %543 = arith.maximumf %542, %533 : vector<8x128xf32>
    %544 = arith.maximumf %543, %535 : vector<8x128xf32>
    %545 = arith.maximumf %544, %537 : vector<8x128xf32>
    %546 = arith.maximumf %545, %539 : vector<8x128xf32>
    %547 = arith.subf %525, %546 : vector<8x128xf32>
    %548 = math.exp %547 : vector<8x128xf32>
    %549 = arith.subf %527, %546 : vector<8x128xf32>
    %550 = math.exp %549 : vector<8x128xf32>
    %551 = arith.addf %548, %550 : vector<8x128xf32>
    %552 = arith.subf %529, %546 : vector<8x128xf32>
    %553 = math.exp %552 : vector<8x128xf32>
    %554 = arith.addf %551, %553 : vector<8x128xf32>
    %555 = arith.subf %531, %546 : vector<8x128xf32>
    %556 = math.exp %555 : vector<8x128xf32>
    %557 = arith.addf %554, %556 : vector<8x128xf32>
    %558 = arith.subf %533, %546 : vector<8x128xf32>
    %559 = math.exp %558 : vector<8x128xf32>
    %560 = arith.addf %557, %559 : vector<8x128xf32>
    %561 = arith.subf %535, %546 : vector<8x128xf32>
    %562 = math.exp %561 : vector<8x128xf32>
    %563 = arith.addf %560, %562 : vector<8x128xf32>
    %564 = arith.subf %537, %546 : vector<8x128xf32>
    %565 = math.exp %564 : vector<8x128xf32>
    %566 = arith.addf %563, %565 : vector<8x128xf32>
    %567 = arith.subf %539, %546 : vector<8x128xf32>
    %568 = math.exp %567 : vector<8x128xf32>
    %569 = arith.addf %566, %568 : vector<8x128xf32>
    %570 = math.log %569 : vector<8x128xf32>
    %571 = arith.addf %546, %570 : vector<8x128xf32>
    %572 = arith.subf %525, %571 : vector<8x128xf32>
    %c0_309 = arith.constant 0 : index
    %c48_310 = arith.constant 48 : index
    %c0_311 = arith.constant 0 : index
    %573 = vector.load %arg4[%c0_309, %c48_310, %c0_311] : memref<1x1024x128xf32, #tpu.memory_space<vmem>>, vector<1x8x128xf32>
    %574 = vector.shape_cast %573 : vector<1x8x128xf32> to vector<8x128xf32>
    %575 = vector.shape_cast %572 : vector<8x128xf32> to vector<1x8x128xf32>
    tpu.vector_store %arg4[%c0_309, %c48_310, %c0_311], %575 {strides = array<i32>} : memref<1x1024x128xf32, #tpu.memory_space<vmem>>, vector<1x8x128xf32>,
    %576 = arith.subf %527, %571 : vector<8x128xf32>
    %c0_312 = arith.constant 0 : index
    %c176_313 = arith.constant 176 : index
    %c0_314 = arith.constant 0 : index
    %577 = vector.load %arg4[%c0_312, %c176_313, %c0_314] : memref<1x1024x128xf32, #tpu.memory_space<vmem>>, vector<1x8x128xf32>
    %578 = vector.shape_cast %577 : vector<1x8x128xf32> to vector<8x128xf32>
    %579 = vector.shape_cast %576 : vector<8x128xf32> to vector<1x8x128xf32>
    tpu.vector_store %arg4[%c0_312, %c176_313, %c0_314], %579 {strides = array<i32>} : memref<1x1024x128xf32, #tpu.memory_space<vmem>>, vector<1x8x128xf32>,
    %580 = arith.subf %529, %571 : vector<8x128xf32>
    %c0_315 = arith.constant 0 : index
    %c304_316 = arith.constant 304 : index
    %c0_317 = arith.constant 0 : index
    %581 = vector.load %arg4[%c0_315, %c304_316, %c0_317] : memref<1x1024x128xf32, #tpu.memory_space<vmem>>, vector<1x8x128xf32>
    %582 = vector.shape_cast %581 : vector<1x8x128xf32> to vector<8x128xf32>
    %583 = vector.shape_cast %580 : vector<8x128xf32> to vector<1x8x128xf32>
    tpu.vector_store %arg4[%c0_315, %c304_316, %c0_317], %583 {strides = array<i32>} : memref<1x1024x128xf32, #tpu.memory_space<vmem>>, vector<1x8x128xf32>,
    %584 = arith.subf %531, %571 : vector<8x128xf32>
    %c0_318 = arith.constant 0 : index
    %c432_319 = arith.constant 432 : index
    %c0_320 = arith.constant 0 : index
    %585 = vector.load %arg4[%c0_318, %c432_319, %c0_320] : memref<1x1024x128xf32, #tpu.memory_space<vmem>>, vector<1x8x128xf32>
    %586 = vector.shape_cast %585 : vector<1x8x128xf32> to vector<8x128xf32>
    %587 = vector.shape_cast %584 : vector<8x128xf32> to vector<1x8x128xf32>
    tpu.vector_store %arg4[%c0_318, %c432_319, %c0_320], %587 {strides = array<i32>} : memref<1x1024x128xf32, #tpu.memory_space<vmem>>, vector<1x8x128xf32>,
    %588 = arith.subf %533, %571 : vector<8x128xf32>
    %c0_321 = arith.constant 0 : index
    %c560_322 = arith.constant 560 : index
    %c0_323 = arith.constant 0 : index
    %589 = vector.load %arg4[%c0_321, %c560_322, %c0_323] : memref<1x1024x128xf32, #tpu.memory_space<vmem>>, vector<1x8x128xf32>
    %590 = vector.shape_cast %589 : vector<1x8x128xf32> to vector<8x128xf32>
    %591 = vector.shape_cast %588 : vector<8x128xf32> to vector<1x8x128xf32>
    tpu.vector_store %arg4[%c0_321, %c560_322, %c0_323], %591 {strides = array<i32>} : memref<1x1024x128xf32, #tpu.memory_space<vmem>>, vector<1x8x128xf32>,
    %592 = arith.subf %535, %571 : vector<8x128xf32>
    %c0_324 = arith.constant 0 : index
    %c688_325 = arith.constant 688 : index
    %c0_326 = arith.constant 0 : index
    %593 = vector.load %arg4[%c0_324, %c688_325, %c0_326] : memref<1x1024x128xf32, #tpu.memory_space<vmem>>, vector<1x8x128xf32>
    %594 = vector.shape_cast %593 : vector<1x8x128xf32> to vector<8x128xf32>
    %595 = vector.shape_cast %592 : vector<8x128xf32> to vector<1x8x128xf32>
    tpu.vector_store %arg4[%c0_324, %c688_325, %c0_326], %595 {strides = array<i32>} : memref<1x1024x128xf32, #tpu.memory_space<vmem>>, vector<1x8x128xf32>,
    %596 = arith.subf %537, %571 : vector<8x128xf32>
    %c0_327 = arith.constant 0 : index
    %c816_328 = arith.constant 816 : index
    %c0_329 = arith.constant 0 : index
    %597 = vector.load %arg4[%c0_327, %c816_328, %c0_329] : memref<1x1024x128xf32, #tpu.memory_space<vmem>>, vector<1x8x128xf32>
    %598 = vector.shape_cast %597 : vector<1x8x128xf32> to vector<8x128xf32>
    %599 = vector.shape_cast %596 : vector<8x128xf32> to vector<1x8x128xf32>
    tpu.vector_store %arg4[%c0_327, %c816_328, %c0_329], %599 {strides = array<i32>} : memref<1x1024x128xf32, #tpu.memory_space<vmem>>, vector<1x8x128xf32>,
    %600 = arith.subf %539, %571 : vector<8x128xf32>
    %c0_330 = arith.constant 0 : index
    %c944_331 = arith.constant 944 : index
    %c0_332 = arith.constant 0 : index
    %601 = vector.load %arg4[%c0_330, %c944_331, %c0_332] : memref<1x1024x128xf32, #tpu.memory_space<vmem>>, vector<1x8x128xf32>
    %602 = vector.shape_cast %601 : vector<1x8x128xf32> to vector<8x128xf32>
    %603 = vector.shape_cast %600 : vector<8x128xf32> to vector<1x8x128xf32>
    tpu.vector_store %arg4[%c0_330, %c944_331, %c0_332], %603 {strides = array<i32>} : memref<1x1024x128xf32, #tpu.memory_space<vmem>>, vector<1x8x128xf32>,
    %c0_333 = arith.constant 0 : index
    %c56 = arith.constant 56 : index
    %c0_334 = arith.constant 0 : index
    %604 = vector.load %arg4[%c0_333, %c56, %c0_334] : memref<1x1024x128xf32, #tpu.memory_space<vmem>>, vector<1x8x128xf32>
    %605 = vector.shape_cast %604 : vector<1x8x128xf32> to vector<8x128xf32>
    %c0_335 = arith.constant 0 : index
    %c184 = arith.constant 184 : index
    %c0_336 = arith.constant 0 : index
    %606 = vector.load %arg4[%c0_335, %c184, %c0_336] : memref<1x1024x128xf32, #tpu.memory_space<vmem>>, vector<1x8x128xf32>
    %607 = vector.shape_cast %606 : vector<1x8x128xf32> to vector<8x128xf32>
    %c0_337 = arith.constant 0 : index
    %c312 = arith.constant 312 : index
    %c0_338 = arith.constant 0 : index
    %608 = vector.load %arg4[%c0_337, %c312, %c0_338] : memref<1x1024x128xf32, #tpu.memory_space<vmem>>, vector<1x8x128xf32>
    %609 = vector.shape_cast %608 : vector<1x8x128xf32> to vector<8x128xf32>
    %c0_339 = arith.constant 0 : index
    %c440 = arith.constant 440 : index
    %c0_340 = arith.constant 0 : index
    %610 = vector.load %arg4[%c0_339, %c440, %c0_340] : memref<1x1024x128xf32, #tpu.memory_space<vmem>>, vector<1x8x128xf32>
    %611 = vector.shape_cast %610 : vector<1x8x128xf32> to vector<8x128xf32>
    %c0_341 = arith.constant 0 : index
    %c568 = arith.constant 568 : index
    %c0_342 = arith.constant 0 : index
    %612 = vector.load %arg4[%c0_341, %c568, %c0_342] : memref<1x1024x128xf32, #tpu.memory_space<vmem>>, vector<1x8x128xf32>
    %613 = vector.shape_cast %612 : vector<1x8x128xf32> to vector<8x128xf32>
    %c0_343 = arith.constant 0 : index
    %c696 = arith.constant 696 : index
    %c0_344 = arith.constant 0 : index
    %614 = vector.load %arg4[%c0_343, %c696, %c0_344] : memref<1x1024x128xf32, #tpu.memory_space<vmem>>, vector<1x8x128xf32>
    %615 = vector.shape_cast %614 : vector<1x8x128xf32> to vector<8x128xf32>
    %c0_345 = arith.constant 0 : index
    %c824 = arith.constant 824 : index
    %c0_346 = arith.constant 0 : index
    %616 = vector.load %arg4[%c0_345, %c824, %c0_346] : memref<1x1024x128xf32, #tpu.memory_space<vmem>>, vector<1x8x128xf32>
    %617 = vector.shape_cast %616 : vector<1x8x128xf32> to vector<8x128xf32>
    %c0_347 = arith.constant 0 : index
    %c952 = arith.constant 952 : index
    %c0_348 = arith.constant 0 : index
    %618 = vector.load %arg4[%c0_347, %c952, %c0_348] : memref<1x1024x128xf32, #tpu.memory_space<vmem>>, vector<1x8x128xf32>
    %619 = vector.shape_cast %618 : vector<1x8x128xf32> to vector<8x128xf32>
    %620 = arith.maximumf %605, %607 : vector<8x128xf32>
    %621 = arith.maximumf %620, %609 : vector<8x128xf32>
    %622 = arith.maximumf %621, %611 : vector<8x128xf32>
    %623 = arith.maximumf %622, %613 : vector<8x128xf32>
    %624 = arith.maximumf %623, %615 : vector<8x128xf32>
    %625 = arith.maximumf %624, %617 : vector<8x128xf32>
    %626 = arith.maximumf %625, %619 : vector<8x128xf32>
    %627 = arith.subf %605, %626 : vector<8x128xf32>
    %628 = math.exp %627 : vector<8x128xf32>
    %629 = arith.subf %607, %626 : vector<8x128xf32>
    %630 = math.exp %629 : vector<8x128xf32>
    %631 = arith.addf %628, %630 : vector<8x128xf32>
    %632 = arith.subf %609, %626 : vector<8x128xf32>
    %633 = math.exp %632 : vector<8x128xf32>
    %634 = arith.addf %631, %633 : vector<8x128xf32>
    %635 = arith.subf %611, %626 : vector<8x128xf32>
    %636 = math.exp %635 : vector<8x128xf32>
    %637 = arith.addf %634, %636 : vector<8x128xf32>
    %638 = arith.subf %613, %626 : vector<8x128xf32>
    %639 = math.exp %638 : vector<8x128xf32>
    %640 = arith.addf %637, %639 : vector<8x128xf32>
    %641 = arith.subf %615, %626 : vector<8x128xf32>
    %642 = math.exp %641 : vector<8x128xf32>
    %643 = arith.addf %640, %642 : vector<8x128xf32>
    %644 = arith.subf %617, %626 : vector<8x128xf32>
    %645 = math.exp %644 : vector<8x128xf32>
    %646 = arith.addf %643, %645 : vector<8x128xf32>
    %647 = arith.subf %619, %626 : vector<8x128xf32>
    %648 = math.exp %647 : vector<8x128xf32>
    %649 = arith.addf %646, %648 : vector<8x128xf32>
    %650 = math.log %649 : vector<8x128xf32>
    %651 = arith.addf %626, %650 : vector<8x128xf32>
    %652 = arith.subf %605, %651 : vector<8x128xf32>
    %c0_349 = arith.constant 0 : index
    %c56_350 = arith.constant 56 : index
    %c0_351 = arith.constant 0 : index
    %653 = vector.load %arg4[%c0_349, %c56_350, %c0_351] : memref<1x1024x128xf32, #tpu.memory_space<vmem>>, vector<1x8x128xf32>
    %654 = vector.shape_cast %653 : vector<1x8x128xf32> to vector<8x128xf32>
    %655 = vector.shape_cast %652 : vector<8x128xf32> to vector<1x8x128xf32>
    tpu.vector_store %arg4[%c0_349, %c56_350, %c0_351], %655 {strides = array<i32>} : memref<1x1024x128xf32, #tpu.memory_space<vmem>>, vector<1x8x128xf32>,
    %656 = arith.subf %607, %651 : vector<8x128xf32>
    %c0_352 = arith.constant 0 : index
    %c184_353 = arith.constant 184 : index
    %c0_354 = arith.constant 0 : index
    %657 = vector.load %arg4[%c0_352, %c184_353, %c0_354] : memref<1x1024x128xf32, #tpu.memory_space<vmem>>, vector<1x8x128xf32>
    %658 = vector.shape_cast %657 : vector<1x8x128xf32> to vector<8x128xf32>
    %659 = vector.shape_cast %656 : vector<8x128xf32> to vector<1x8x128xf32>
    tpu.vector_store %arg4[%c0_352, %c184_353, %c0_354], %659 {strides = array<i32>} : memref<1x1024x128xf32, #tpu.memory_space<vmem>>, vector<1x8x128xf32>,
    %660 = arith.subf %609, %651 : vector<8x128xf32>
    %c0_355 = arith.constant 0 : index
    %c312_356 = arith.constant 312 : index
    %c0_357 = arith.constant 0 : index
    %661 = vector.load %arg4[%c0_355, %c312_356, %c0_357] : memref<1x1024x128xf32, #tpu.memory_space<vmem>>, vector<1x8x128xf32>
    %662 = vector.shape_cast %661 : vector<1x8x128xf32> to vector<8x128xf32>
    %663 = vector.shape_cast %660 : vector<8x128xf32> to vector<1x8x128xf32>
    tpu.vector_store %arg4[%c0_355, %c312_356, %c0_357], %663 {strides = array<i32>} : memref<1x1024x128xf32, #tpu.memory_space<vmem>>, vector<1x8x128xf32>,
    %664 = arith.subf %611, %651 : vector<8x128xf32>
    %c0_358 = arith.constant 0 : index
    %c440_359 = arith.constant 440 : index
    %c0_360 = arith.constant 0 : index
    %665 = vector.load %arg4[%c0_358, %c440_359, %c0_360] : memref<1x1024x128xf32, #tpu.memory_space<vmem>>, vector<1x8x128xf32>
    %666 = vector.shape_cast %665 : vector<1x8x128xf32> to vector<8x128xf32>
    %667 = vector.shape_cast %664 : vector<8x128xf32> to vector<1x8x128xf32>
    tpu.vector_store %arg4[%c0_358, %c440_359, %c0_360], %667 {strides = array<i32>} : memref<1x1024x128xf32, #tpu.memory_space<vmem>>, vector<1x8x128xf32>,
    %668 = arith.subf %613, %651 : vector<8x128xf32>
    %c0_361 = arith.constant 0 : index
    %c568_362 = arith.constant 568 : index
    %c0_363 = arith.constant 0 : index
    %669 = vector.load %arg4[%c0_361, %c568_362, %c0_363] : memref<1x1024x128xf32, #tpu.memory_space<vmem>>, vector<1x8x128xf32>
    %670 = vector.shape_cast %669 : vector<1x8x128xf32> to vector<8x128xf32>
    %671 = vector.shape_cast %668 : vector<8x128xf32> to vector<1x8x128xf32>
    tpu.vector_store %arg4[%c0_361, %c568_362, %c0_363], %671 {strides = array<i32>} : memref<1x1024x128xf32, #tpu.memory_space<vmem>>, vector<1x8x128xf32>,
    %672 = arith.subf %615, %651 : vector<8x128xf32>
    %c0_364 = arith.constant 0 : index
    %c696_365 = arith.constant 696 : index
    %c0_366 = arith.constant 0 : index
    %673 = vector.load %arg4[%c0_364, %c696_365, %c0_366] : memref<1x1024x128xf32, #tpu.memory_space<vmem>>, vector<1x8x128xf32>
    %674 = vector.shape_cast %673 : vector<1x8x128xf32> to vector<8x128xf32>
    %675 = vector.shape_cast %672 : vector<8x128xf32> to vector<1x8x128xf32>
    tpu.vector_store %arg4[%c0_364, %c696_365, %c0_366], %675 {strides = array<i32>} : memref<1x1024x128xf32, #tpu.memory_space<vmem>>, vector<1x8x128xf32>,
    %676 = arith.subf %617, %651 : vector<8x128xf32>
    %c0_367 = arith.constant 0 : index
    %c824_368 = arith.constant 824 : index
    %c0_369 = arith.constant 0 : index
    %677 = vector.load %arg4[%c0_367, %c824_368, %c0_369] : memref<1x1024x128xf32, #tpu.memory_space<vmem>>, vector<1x8x128xf32>
    %678 = vector.shape_cast %677 : vector<1x8x128xf32> to vector<8x128xf32>
    %679 = vector.shape_cast %676 : vector<8x128xf32> to vector<1x8x128xf32>
    tpu.vector_store %arg4[%c0_367, %c824_368, %c0_369], %679 {strides = array<i32>} : memref<1x1024x128xf32, #tpu.memory_space<vmem>>, vector<1x8x128xf32>,
    %680 = arith.subf %619, %651 : vector<8x128xf32>
    %c0_370 = arith.constant 0 : index
    %c952_371 = arith.constant 952 : index
    %c0_372 = arith.constant 0 : index
    %681 = vector.load %arg4[%c0_370, %c952_371, %c0_372] : memref<1x1024x128xf32, #tpu.memory_space<vmem>>, vector<1x8x128xf32>
    %682 = vector.shape_cast %681 : vector<1x8x128xf32> to vector<8x128xf32>
    %683 = vector.shape_cast %680 : vector<8x128xf32> to vector<1x8x128xf32>
    tpu.vector_store %arg4[%c0_370, %c952_371, %c0_372], %683 {strides = array<i32>} : memref<1x1024x128xf32, #tpu.memory_space<vmem>>, vector<1x8x128xf32>,
    %c0_373 = arith.constant 0 : index
    %c64 = arith.constant 64 : index
    %c0_374 = arith.constant 0 : index
    %684 = vector.load %arg4[%c0_373, %c64, %c0_374] : memref<1x1024x128xf32, #tpu.memory_space<vmem>>, vector<1x8x128xf32>
    %685 = vector.shape_cast %684 : vector<1x8x128xf32> to vector<8x128xf32>
    %c0_375 = arith.constant 0 : index
    %c192 = arith.constant 192 : index
    %c0_376 = arith.constant 0 : index
    %686 = vector.load %arg4[%c0_375, %c192, %c0_376] : memref<1x1024x128xf32, #tpu.memory_space<vmem>>, vector<1x8x128xf32>
    %687 = vector.shape_cast %686 : vector<1x8x128xf32> to vector<8x128xf32>
    %c0_377 = arith.constant 0 : index
    %c320 = arith.constant 320 : index
    %c0_378 = arith.constant 0 : index
    %688 = vector.load %arg4[%c0_377, %c320, %c0_378] : memref<1x1024x128xf32, #tpu.memory_space<vmem>>, vector<1x8x128xf32>
    %689 = vector.shape_cast %688 : vector<1x8x128xf32> to vector<8x128xf32>
    %c0_379 = arith.constant 0 : index
    %c448 = arith.constant 448 : index
    %c0_380 = arith.constant 0 : index
    %690 = vector.load %arg4[%c0_379, %c448, %c0_380] : memref<1x1024x128xf32, #tpu.memory_space<vmem>>, vector<1x8x128xf32>
    %691 = vector.shape_cast %690 : vector<1x8x128xf32> to vector<8x128xf32>
    %c0_381 = arith.constant 0 : index
    %c576 = arith.constant 576 : index
    %c0_382 = arith.constant 0 : index
    %692 = vector.load %arg4[%c0_381, %c576, %c0_382] : memref<1x1024x128xf32, #tpu.memory_space<vmem>>, vector<1x8x128xf32>
    %693 = vector.shape_cast %692 : vector<1x8x128xf32> to vector<8x128xf32>
    %c0_383 = arith.constant 0 : index
    %c704 = arith.constant 704 : index
    %c0_384 = arith.constant 0 : index
    %694 = vector.load %arg4[%c0_383, %c704, %c0_384] : memref<1x1024x128xf32, #tpu.memory_space<vmem>>, vector<1x8x128xf32>
    %695 = vector.shape_cast %694 : vector<1x8x128xf32> to vector<8x128xf32>
    %c0_385 = arith.constant 0 : index
    %c832 = arith.constant 832 : index
    %c0_386 = arith.constant 0 : index
    %696 = vector.load %arg4[%c0_385, %c832, %c0_386] : memref<1x1024x128xf32, #tpu.memory_space<vmem>>, vector<1x8x128xf32>
    %697 = vector.shape_cast %696 : vector<1x8x128xf32> to vector<8x128xf32>
    %c0_387 = arith.constant 0 : index
    %c960 = arith.constant 960 : index
    %c0_388 = arith.constant 0 : index
    %698 = vector.load %arg4[%c0_387, %c960, %c0_388] : memref<1x1024x128xf32, #tpu.memory_space<vmem>>, vector<1x8x128xf32>
    %699 = vector.shape_cast %698 : vector<1x8x128xf32> to vector<8x128xf32>
    %700 = arith.maximumf %685, %687 : vector<8x128xf32>
    %701 = arith.maximumf %700, %689 : vector<8x128xf32>
    %702 = arith.maximumf %701, %691 : vector<8x128xf32>
    %703 = arith.maximumf %702, %693 : vector<8x128xf32>
    %704 = arith.maximumf %703, %695 : vector<8x128xf32>
    %705 = arith.maximumf %704, %697 : vector<8x128xf32>
    %706 = arith.maximumf %705, %699 : vector<8x128xf32>
    %707 = arith.subf %685, %706 : vector<8x128xf32>
    %708 = math.exp %707 : vector<8x128xf32>
    %709 = arith.subf %687, %706 : vector<8x128xf32>
    %710 = math.exp %709 : vector<8x128xf32>
    %711 = arith.addf %708, %710 : vector<8x128xf32>
    %712 = arith.subf %689, %706 : vector<8x128xf32>
    %713 = math.exp %712 : vector<8x128xf32>
    %714 = arith.addf %711, %713 : vector<8x128xf32>
    %715 = arith.subf %691, %706 : vector<8x128xf32>
    %716 = math.exp %715 : vector<8x128xf32>
    %717 = arith.addf %714, %716 : vector<8x128xf32>
    %718 = arith.subf %693, %706 : vector<8x128xf32>
    %719 = math.exp %718 : vector<8x128xf32>
    %720 = arith.addf %717, %719 : vector<8x128xf32>
    %721 = arith.subf %695, %706 : vector<8x128xf32>
    %722 = math.exp %721 : vector<8x128xf32>
    %723 = arith.addf %720, %722 : vector<8x128xf32>
    %724 = arith.subf %697, %706 : vector<8x128xf32>
    %725 = math.exp %724 : vector<8x128xf32>
    %726 = arith.addf %723, %725 : vector<8x128xf32>
    %727 = arith.subf %699, %706 : vector<8x128xf32>
    %728 = math.exp %727 : vector<8x128xf32>
    %729 = arith.addf %726, %728 : vector<8x128xf32>
    %730 = math.log %729 : vector<8x128xf32>
    %731 = arith.addf %706, %730 : vector<8x128xf32>
    %732 = arith.subf %685, %731 : vector<8x128xf32>
    %c0_389 = arith.constant 0 : index
    %c64_390 = arith.constant 64 : index
    %c0_391 = arith.constant 0 : index
    %733 = vector.load %arg4[%c0_389, %c64_390, %c0_391] : memref<1x1024x128xf32, #tpu.memory_space<vmem>>, vector<1x8x128xf32>
    %734 = vector.shape_cast %733 : vector<1x8x128xf32> to vector<8x128xf32>
    %735 = vector.shape_cast %732 : vector<8x128xf32> to vector<1x8x128xf32>
    tpu.vector_store %arg4[%c0_389, %c64_390, %c0_391], %735 {strides = array<i32>} : memref<1x1024x128xf32, #tpu.memory_space<vmem>>, vector<1x8x128xf32>,
    %736 = arith.subf %687, %731 : vector<8x128xf32>
    %c0_392 = arith.constant 0 : index
    %c192_393 = arith.constant 192 : index
    %c0_394 = arith.constant 0 : index
    %737 = vector.load %arg4[%c0_392, %c192_393, %c0_394] : memref<1x1024x128xf32, #tpu.memory_space<vmem>>, vector<1x8x128xf32>
    %738 = vector.shape_cast %737 : vector<1x8x128xf32> to vector<8x128xf32>
    %739 = vector.shape_cast %736 : vector<8x128xf32> to vector<1x8x128xf32>
    tpu.vector_store %arg4[%c0_392, %c192_393, %c0_394], %739 {strides = array<i32>} : memref<1x1024x128xf32, #tpu.memory_space<vmem>>, vector<1x8x128xf32>,
    %740 = arith.subf %689, %731 : vector<8x128xf32>
    %c0_395 = arith.constant 0 : index
    %c320_396 = arith.constant 320 : index
    %c0_397 = arith.constant 0 : index
    %741 = vector.load %arg4[%c0_395, %c320_396, %c0_397] : memref<1x1024x128xf32, #tpu.memory_space<vmem>>, vector<1x8x128xf32>
    %742 = vector.shape_cast %741 : vector<1x8x128xf32> to vector<8x128xf32>
    %743 = vector.shape_cast %740 : vector<8x128xf32> to vector<1x8x128xf32>
    tpu.vector_store %arg4[%c0_395, %c320_396, %c0_397], %743 {strides = array<i32>} : memref<1x1024x128xf32, #tpu.memory_space<vmem>>, vector<1x8x128xf32>,
    %744 = arith.subf %691, %731 : vector<8x128xf32>
    %c0_398 = arith.constant 0 : index
    %c448_399 = arith.constant 448 : index
    %c0_400 = arith.constant 0 : index
    %745 = vector.load %arg4[%c0_398, %c448_399, %c0_400] : memref<1x1024x128xf32, #tpu.memory_space<vmem>>, vector<1x8x128xf32>
    %746 = vector.shape_cast %745 : vector<1x8x128xf32> to vector<8x128xf32>
    %747 = vector.shape_cast %744 : vector<8x128xf32> to vector<1x8x128xf32>
    tpu.vector_store %arg4[%c0_398, %c448_399, %c0_400], %747 {strides = array<i32>} : memref<1x1024x128xf32, #tpu.memory_space<vmem>>, vector<1x8x128xf32>,
    %748 = arith.subf %693, %731 : vector<8x128xf32>
    %c0_401 = arith.constant 0 : index
    %c576_402 = arith.constant 576 : index
    %c0_403 = arith.constant 0 : index
    %749 = vector.load %arg4[%c0_401, %c576_402, %c0_403] : memref<1x1024x128xf32, #tpu.memory_space<vmem>>, vector<1x8x128xf32>
    %750 = vector.shape_cast %749 : vector<1x8x128xf32> to vector<8x128xf32>
    %751 = vector.shape_cast %748 : vector<8x128xf32> to vector<1x8x128xf32>
    tpu.vector_store %arg4[%c0_401, %c576_402, %c0_403], %751 {strides = array<i32>} : memref<1x1024x128xf32, #tpu.memory_space<vmem>>, vector<1x8x128xf32>,
    %752 = arith.subf %695, %731 : vector<8x128xf32>
    %c0_404 = arith.constant 0 : index
    %c704_405 = arith.constant 704 : index
    %c0_406 = arith.constant 0 : index
    %753 = vector.load %arg4[%c0_404, %c704_405, %c0_406] : memref<1x1024x128xf32, #tpu.memory_space<vmem>>, vector<1x8x128xf32>
    %754 = vector.shape_cast %753 : vector<1x8x128xf32> to vector<8x128xf32>
    %755 = vector.shape_cast %752 : vector<8x128xf32> to vector<1x8x128xf32>
    tpu.vector_store %arg4[%c0_404, %c704_405, %c0_406], %755 {strides = array<i32>} : memref<1x1024x128xf32, #tpu.memory_space<vmem>>, vector<1x8x128xf32>,
    %756 = arith.subf %697, %731 : vector<8x128xf32>
    %c0_407 = arith.constant 0 : index
    %c832_408 = arith.constant 832 : index
    %c0_409 = arith.constant 0 : index
    %757 = vector.load %arg4[%c0_407, %c832_408, %c0_409] : memref<1x1024x128xf32, #tpu.memory_space<vmem>>, vector<1x8x128xf32>
    %758 = vector.shape_cast %757 : vector<1x8x128xf32> to vector<8x128xf32>
    %759 = vector.shape_cast %756 : vector<8x128xf32> to vector<1x8x128xf32>
    tpu.vector_store %arg4[%c0_407, %c832_408, %c0_409], %759 {strides = array<i32>} : memref<1x1024x128xf32, #tpu.memory_space<vmem>>, vector<1x8x128xf32>,
    %760 = arith.subf %699, %731 : vector<8x128xf32>
    %c0_410 = arith.constant 0 : index
    %c960_411 = arith.constant 960 : index
    %c0_412 = arith.constant 0 : index
    %761 = vector.load %arg4[%c0_410, %c960_411, %c0_412] : memref<1x1024x128xf32, #tpu.memory_space<vmem>>, vector<1x8x128xf32>
    %762 = vector.shape_cast %761 : vector<1x8x128xf32> to vector<8x128xf32>
    %763 = vector.shape_cast %760 : vector<8x128xf32> to vector<1x8x128xf32>
    tpu.vector_store %arg4[%c0_410, %c960_411, %c0_412], %763 {strides = array<i32>} : memref<1x1024x128xf32, #tpu.memory_space<vmem>>, vector<1x8x128xf32>,
    %c0_413 = arith.constant 0 : index
    %c72 = arith.constant 72 : index
    %c0_414 = arith.constant 0 : index
    %764 = vector.load %arg4[%c0_413, %c72, %c0_414] : memref<1x1024x128xf32, #tpu.memory_space<vmem>>, vector<1x8x128xf32>
    %765 = vector.shape_cast %764 : vector<1x8x128xf32> to vector<8x128xf32>
    %c0_415 = arith.constant 0 : index
    %c200 = arith.constant 200 : index
    %c0_416 = arith.constant 0 : index
    %766 = vector.load %arg4[%c0_415, %c200, %c0_416] : memref<1x1024x128xf32, #tpu.memory_space<vmem>>, vector<1x8x128xf32>
    %767 = vector.shape_cast %766 : vector<1x8x128xf32> to vector<8x128xf32>
    %c0_417 = arith.constant 0 : index
    %c328 = arith.constant 328 : index
    %c0_418 = arith.constant 0 : index
    %768 = vector.load %arg4[%c0_417, %c328, %c0_418] : memref<1x1024x128xf32, #tpu.memory_space<vmem>>, vector<1x8x128xf32>
    %769 = vector.shape_cast %768 : vector<1x8x128xf32> to vector<8x128xf32>
    %c0_419 = arith.constant 0 : index
    %c456 = arith.constant 456 : index
    %c0_420 = arith.constant 0 : index
    %770 = vector.load %arg4[%c0_419, %c456, %c0_420] : memref<1x1024x128xf32, #tpu.memory_space<vmem>>, vector<1x8x128xf32>
    %771 = vector.shape_cast %770 : vector<1x8x128xf32> to vector<8x128xf32>
    %c0_421 = arith.constant 0 : index
    %c584 = arith.constant 584 : index
    %c0_422 = arith.constant 0 : index
    %772 = vector.load %arg4[%c0_421, %c584, %c0_422] : memref<1x1024x128xf32, #tpu.memory_space<vmem>>, vector<1x8x128xf32>
    %773 = vector.shape_cast %772 : vector<1x8x128xf32> to vector<8x128xf32>
    %c0_423 = arith.constant 0 : index
    %c712 = arith.constant 712 : index
    %c0_424 = arith.constant 0 : index
    %774 = vector.load %arg4[%c0_423, %c712, %c0_424] : memref<1x1024x128xf32, #tpu.memory_space<vmem>>, vector<1x8x128xf32>
    %775 = vector.shape_cast %774 : vector<1x8x128xf32> to vector<8x128xf32>
    %c0_425 = arith.constant 0 : index
    %c840 = arith.constant 840 : index
    %c0_426 = arith.constant 0 : index
    %776 = vector.load %arg4[%c0_425, %c840, %c0_426] : memref<1x1024x128xf32, #tpu.memory_space<vmem>>, vector<1x8x128xf32>
    %777 = vector.shape_cast %776 : vector<1x8x128xf32> to vector<8x128xf32>
    %c0_427 = arith.constant 0 : index
    %c968 = arith.constant 968 : index
    %c0_428 = arith.constant 0 : index
    %778 = vector.load %arg4[%c0_427, %c968, %c0_428] : memref<1x1024x128xf32, #tpu.memory_space<vmem>>, vector<1x8x128xf32>
    %779 = vector.shape_cast %778 : vector<1x8x128xf32> to vector<8x128xf32>
    %780 = arith.maximumf %765, %767 : vector<8x128xf32>
    %781 = arith.maximumf %780, %769 : vector<8x128xf32>
    %782 = arith.maximumf %781, %771 : vector<8x128xf32>
    %783 = arith.maximumf %782, %773 : vector<8x128xf32>
    %784 = arith.maximumf %783, %775 : vector<8x128xf32>
    %785 = arith.maximumf %784, %777 : vector<8x128xf32>
    %786 = arith.maximumf %785, %779 : vector<8x128xf32>
    %787 = arith.subf %765, %786 : vector<8x128xf32>
    %788 = math.exp %787 : vector<8x128xf32>
    %789 = arith.subf %767, %786 : vector<8x128xf32>
    %790 = math.exp %789 : vector<8x128xf32>
    %791 = arith.addf %788, %790 : vector<8x128xf32>
    %792 = arith.subf %769, %786 : vector<8x128xf32>
    %793 = math.exp %792 : vector<8x128xf32>
    %794 = arith.addf %791, %793 : vector<8x128xf32>
    %795 = arith.subf %771, %786 : vector<8x128xf32>
    %796 = math.exp %795 : vector<8x128xf32>
    %797 = arith.addf %794, %796 : vector<8x128xf32>
    %798 = arith.subf %773, %786 : vector<8x128xf32>
    %799 = math.exp %798 : vector<8x128xf32>
    %800 = arith.addf %797, %799 : vector<8x128xf32>
    %801 = arith.subf %775, %786 : vector<8x128xf32>
    %802 = math.exp %801 : vector<8x128xf32>
    %803 = arith.addf %800, %802 : vector<8x128xf32>
    %804 = arith.subf %777, %786 : vector<8x128xf32>
    %805 = math.exp %804 : vector<8x128xf32>
    %806 = arith.addf %803, %805 : vector<8x128xf32>
    %807 = arith.subf %779, %786 : vector<8x128xf32>
    %808 = math.exp %807 : vector<8x128xf32>
    %809 = arith.addf %806, %808 : vector<8x128xf32>
    %810 = math.log %809 : vector<8x128xf32>
    %811 = arith.addf %786, %810 : vector<8x128xf32>
    %812 = arith.subf %765, %811 : vector<8x128xf32>
    %c0_429 = arith.constant 0 : index
    %c72_430 = arith.constant 72 : index
    %c0_431 = arith.constant 0 : index
    %813 = vector.load %arg4[%c0_429, %c72_430, %c0_431] : memref<1x1024x128xf32, #tpu.memory_space<vmem>>, vector<1x8x128xf32>
    %814 = vector.shape_cast %813 : vector<1x8x128xf32> to vector<8x128xf32>
    %815 = vector.shape_cast %812 : vector<8x128xf32> to vector<1x8x128xf32>
    tpu.vector_store %arg4[%c0_429, %c72_430, %c0_431], %815 {strides = array<i32>} : memref<1x1024x128xf32, #tpu.memory_space<vmem>>, vector<1x8x128xf32>,
    %816 = arith.subf %767, %811 : vector<8x128xf32>
    %c0_432 = arith.constant 0 : index
    %c200_433 = arith.constant 200 : index
    %c0_434 = arith.constant 0 : index
    %817 = vector.load %arg4[%c0_432, %c200_433, %c0_434] : memref<1x1024x128xf32, #tpu.memory_space<vmem>>, vector<1x8x128xf32>
    %818 = vector.shape_cast %817 : vector<1x8x128xf32> to vector<8x128xf32>
    %819 = vector.shape_cast %816 : vector<8x128xf32> to vector<1x8x128xf32>
    tpu.vector_store %arg4[%c0_432, %c200_433, %c0_434], %819 {strides = array<i32>} : memref<1x1024x128xf32, #tpu.memory_space<vmem>>, vector<1x8x128xf32>,
    %820 = arith.subf %769, %811 : vector<8x128xf32>
    %c0_435 = arith.constant 0 : index
    %c328_436 = arith.constant 328 : index
    %c0_437 = arith.constant 0 : index
    %821 = vector.load %arg4[%c0_435, %c328_436, %c0_437] : memref<1x1024x128xf32, #tpu.memory_space<vmem>>, vector<1x8x128xf32>
    %822 = vector.shape_cast %821 : vector<1x8x128xf32> to vector<8x128xf32>
    %823 = vector.shape_cast %820 : vector<8x128xf32> to vector<1x8x128xf32>
    tpu.vector_store %arg4[%c0_435, %c328_436, %c0_437], %823 {strides = array<i32>} : memref<1x1024x128xf32, #tpu.memory_space<vmem>>, vector<1x8x128xf32>,
    %824 = arith.subf %771, %811 : vector<8x128xf32>
    %c0_438 = arith.constant 0 : index
    %c456_439 = arith.constant 456 : index
    %c0_440 = arith.constant 0 : index
    %825 = vector.load %arg4[%c0_438, %c456_439, %c0_440] : memref<1x1024x128xf32, #tpu.memory_space<vmem>>, vector<1x8x128xf32>
    %826 = vector.shape_cast %825 : vector<1x8x128xf32> to vector<8x128xf32>
    %827 = vector.shape_cast %824 : vector<8x128xf32> to vector<1x8x128xf32>
    tpu.vector_store %arg4[%c0_438, %c456_439, %c0_440], %827 {strides = array<i32>} : memref<1x1024x128xf32, #tpu.memory_space<vmem>>, vector<1x8x128xf32>,
    %828 = arith.subf %773, %811 : vector<8x128xf32>
    %c0_441 = arith.constant 0 : index
    %c584_442 = arith.constant 584 : index
    %c0_443 = arith.constant 0 : index
    %829 = vector.load %arg4[%c0_441, %c584_442, %c0_443] : memref<1x1024x128xf32, #tpu.memory_space<vmem>>, vector<1x8x128xf32>
    %830 = vector.shape_cast %829 : vector<1x8x128xf32> to vector<8x128xf32>
    %831 = vector.shape_cast %828 : vector<8x128xf32> to vector<1x8x128xf32>
    tpu.vector_store %arg4[%c0_441, %c584_442, %c0_443], %831 {strides = array<i32>} : memref<1x1024x128xf32, #tpu.memory_space<vmem>>, vector<1x8x128xf32>,
    %832 = arith.subf %775, %811 : vector<8x128xf32>
    %c0_444 = arith.constant 0 : index
    %c712_445 = arith.constant 712 : index
    %c0_446 = arith.constant 0 : index
    %833 = vector.load %arg4[%c0_444, %c712_445, %c0_446] : memref<1x1024x128xf32, #tpu.memory_space<vmem>>, vector<1x8x128xf32>
    %834 = vector.shape_cast %833 : vector<1x8x128xf32> to vector<8x128xf32>
    %835 = vector.shape_cast %832 : vector<8x128xf32> to vector<1x8x128xf32>
    tpu.vector_store %arg4[%c0_444, %c712_445, %c0_446], %835 {strides = array<i32>} : memref<1x1024x128xf32, #tpu.memory_space<vmem>>, vector<1x8x128xf32>,
    %836 = arith.subf %777, %811 : vector<8x128xf32>
    %c0_447 = arith.constant 0 : index
    %c840_448 = arith.constant 840 : index
    %c0_449 = arith.constant 0 : index
    %837 = vector.load %arg4[%c0_447, %c840_448, %c0_449] : memref<1x1024x128xf32, #tpu.memory_space<vmem>>, vector<1x8x128xf32>
    %838 = vector.shape_cast %837 : vector<1x8x128xf32> to vector<8x128xf32>
    %839 = vector.shape_cast %836 : vector<8x128xf32> to vector<1x8x128xf32>
    tpu.vector_store %arg4[%c0_447, %c840_448, %c0_449], %839 {strides = array<i32>} : memref<1x1024x128xf32, #tpu.memory_space<vmem>>, vector<1x8x128xf32>,
    %840 = arith.subf %779, %811 : vector<8x128xf32>
    %c0_450 = arith.constant 0 : index
    %c968_451 = arith.constant 968 : index
    %c0_452 = arith.constant 0 : index
    %841 = vector.load %arg4[%c0_450, %c968_451, %c0_452] : memref<1x1024x128xf32, #tpu.memory_space<vmem>>, vector<1x8x128xf32>
    %842 = vector.shape_cast %841 : vector<1x8x128xf32> to vector<8x128xf32>
    %843 = vector.shape_cast %840 : vector<8x128xf32> to vector<1x8x128xf32>
    tpu.vector_store %arg4[%c0_450, %c968_451, %c0_452], %843 {strides = array<i32>} : memref<1x1024x128xf32, #tpu.memory_space<vmem>>, vector<1x8x128xf32>,
    %c0_453 = arith.constant 0 : index
    %c80 = arith.constant 80 : index
    %c0_454 = arith.constant 0 : index
    %844 = vector.load %arg4[%c0_453, %c80, %c0_454] : memref<1x1024x128xf32, #tpu.memory_space<vmem>>, vector<1x8x128xf32>
    %845 = vector.shape_cast %844 : vector<1x8x128xf32> to vector<8x128xf32>
    %c0_455 = arith.constant 0 : index
    %c208 = arith.constant 208 : index
    %c0_456 = arith.constant 0 : index
    %846 = vector.load %arg4[%c0_455, %c208, %c0_456] : memref<1x1024x128xf32, #tpu.memory_space<vmem>>, vector<1x8x128xf32>
    %847 = vector.shape_cast %846 : vector<1x8x128xf32> to vector<8x128xf32>
    %c0_457 = arith.constant 0 : index
    %c336 = arith.constant 336 : index
    %c0_458 = arith.constant 0 : index
    %848 = vector.load %arg4[%c0_457, %c336, %c0_458] : memref<1x1024x128xf32, #tpu.memory_space<vmem>>, vector<1x8x128xf32>
    %849 = vector.shape_cast %848 : vector<1x8x128xf32> to vector<8x128xf32>
    %c0_459 = arith.constant 0 : index
    %c464 = arith.constant 464 : index
    %c0_460 = arith.constant 0 : index
    %850 = vector.load %arg4[%c0_459, %c464, %c0_460] : memref<1x1024x128xf32, #tpu.memory_space<vmem>>, vector<1x8x128xf32>
    %851 = vector.shape_cast %850 : vector<1x8x128xf32> to vector<8x128xf32>
    %c0_461 = arith.constant 0 : index
    %c592 = arith.constant 592 : index
    %c0_462 = arith.constant 0 : index
    %852 = vector.load %arg4[%c0_461, %c592, %c0_462] : memref<1x1024x128xf32, #tpu.memory_space<vmem>>, vector<1x8x128xf32>
    %853 = vector.shape_cast %852 : vector<1x8x128xf32> to vector<8x128xf32>
    %c0_463 = arith.constant 0 : index
    %c720 = arith.constant 720 : index
    %c0_464 = arith.constant 0 : index
    %854 = vector.load %arg4[%c0_463, %c720, %c0_464] : memref<1x1024x128xf32, #tpu.memory_space<vmem>>, vector<1x8x128xf32>
    %855 = vector.shape_cast %854 : vector<1x8x128xf32> to vector<8x128xf32>
    %c0_465 = arith.constant 0 : index
    %c848 = arith.constant 848 : index
    %c0_466 = arith.constant 0 : index
    %856 = vector.load %arg4[%c0_465, %c848, %c0_466] : memref<1x1024x128xf32, #tpu.memory_space<vmem>>, vector<1x8x128xf32>
    %857 = vector.shape_cast %856 : vector<1x8x128xf32> to vector<8x128xf32>
    %c0_467 = arith.constant 0 : index
    %c976 = arith.constant 976 : index
    %c0_468 = arith.constant 0 : index
    %858 = vector.load %arg4[%c0_467, %c976, %c0_468] : memref<1x1024x128xf32, #tpu.memory_space<vmem>>, vector<1x8x128xf32>
    %859 = vector.shape_cast %858 : vector<1x8x128xf32> to vector<8x128xf32>
    %860 = arith.maximumf %845, %847 : vector<8x128xf32>
    %861 = arith.maximumf %860, %849 : vector<8x128xf32>
    %862 = arith.maximumf %861, %851 : vector<8x128xf32>
    %863 = arith.maximumf %862, %853 : vector<8x128xf32>
    %864 = arith.maximumf %863, %855 : vector<8x128xf32>
    %865 = arith.maximumf %864, %857 : vector<8x128xf32>
    %866 = arith.maximumf %865, %859 : vector<8x128xf32>
    %867 = arith.subf %845, %866 : vector<8x128xf32>
    %868 = math.exp %867 : vector<8x128xf32>
    %869 = arith.subf %847, %866 : vector<8x128xf32>
    %870 = math.exp %869 : vector<8x128xf32>
    %871 = arith.addf %868, %870 : vector<8x128xf32>
    %872 = arith.subf %849, %866 : vector<8x128xf32>
    %873 = math.exp %872 : vector<8x128xf32>
    %874 = arith.addf %871, %873 : vector<8x128xf32>
    %875 = arith.subf %851, %866 : vector<8x128xf32>
    %876 = math.exp %875 : vector<8x128xf32>
    %877 = arith.addf %874, %876 : vector<8x128xf32>
    %878 = arith.subf %853, %866 : vector<8x128xf32>
    %879 = math.exp %878 : vector<8x128xf32>
    %880 = arith.addf %877, %879 : vector<8x128xf32>
    %881 = arith.subf %855, %866 : vector<8x128xf32>
    %882 = math.exp %881 : vector<8x128xf32>
    %883 = arith.addf %880, %882 : vector<8x128xf32>
    %884 = arith.subf %857, %866 : vector<8x128xf32>
    %885 = math.exp %884 : vector<8x128xf32>
    %886 = arith.addf %883, %885 : vector<8x128xf32>
    %887 = arith.subf %859, %866 : vector<8x128xf32>
    %888 = math.exp %887 : vector<8x128xf32>
    %889 = arith.addf %886, %888 : vector<8x128xf32>
    %890 = math.log %889 : vector<8x128xf32>
    %891 = arith.addf %866, %890 : vector<8x128xf32>
    %892 = arith.subf %845, %891 : vector<8x128xf32>
    %c0_469 = arith.constant 0 : index
    %c80_470 = arith.constant 80 : index
    %c0_471 = arith.constant 0 : index
    %893 = vector.load %arg4[%c0_469, %c80_470, %c0_471] : memref<1x1024x128xf32, #tpu.memory_space<vmem>>, vector<1x8x128xf32>
    %894 = vector.shape_cast %893 : vector<1x8x128xf32> to vector<8x128xf32>
    %895 = vector.shape_cast %892 : vector<8x128xf32> to vector<1x8x128xf32>
    tpu.vector_store %arg4[%c0_469, %c80_470, %c0_471], %895 {strides = array<i32>} : memref<1x1024x128xf32, #tpu.memory_space<vmem>>, vector<1x8x128xf32>,
    %896 = arith.subf %847, %891 : vector<8x128xf32>
    %c0_472 = arith.constant 0 : index
    %c208_473 = arith.constant 208 : index
    %c0_474 = arith.constant 0 : index
    %897 = vector.load %arg4[%c0_472, %c208_473, %c0_474] : memref<1x1024x128xf32, #tpu.memory_space<vmem>>, vector<1x8x128xf32>
    %898 = vector.shape_cast %897 : vector<1x8x128xf32> to vector<8x128xf32>
    %899 = vector.shape_cast %896 : vector<8x128xf32> to vector<1x8x128xf32>
    tpu.vector_store %arg4[%c0_472, %c208_473, %c0_474], %899 {strides = array<i32>} : memref<1x1024x128xf32, #tpu.memory_space<vmem>>, vector<1x8x128xf32>,
    %900 = arith.subf %849, %891 : vector<8x128xf32>
    %c0_475 = arith.constant 0 : index
    %c336_476 = arith.constant 336 : index
    %c0_477 = arith.constant 0 : index
    %901 = vector.load %arg4[%c0_475, %c336_476, %c0_477] : memref<1x1024x128xf32, #tpu.memory_space<vmem>>, vector<1x8x128xf32>
    %902 = vector.shape_cast %901 : vector<1x8x128xf32> to vector<8x128xf32>
    %903 = vector.shape_cast %900 : vector<8x128xf32> to vector<1x8x128xf32>
    tpu.vector_store %arg4[%c0_475, %c336_476, %c0_477], %903 {strides = array<i32>} : memref<1x1024x128xf32, #tpu.memory_space<vmem>>, vector<1x8x128xf32>,
    %904 = arith.subf %851, %891 : vector<8x128xf32>
    %c0_478 = arith.constant 0 : index
    %c464_479 = arith.constant 464 : index
    %c0_480 = arith.constant 0 : index
    %905 = vector.load %arg4[%c0_478, %c464_479, %c0_480] : memref<1x1024x128xf32, #tpu.memory_space<vmem>>, vector<1x8x128xf32>
    %906 = vector.shape_cast %905 : vector<1x8x128xf32> to vector<8x128xf32>
    %907 = vector.shape_cast %904 : vector<8x128xf32> to vector<1x8x128xf32>
    tpu.vector_store %arg4[%c0_478, %c464_479, %c0_480], %907 {strides = array<i32>} : memref<1x1024x128xf32, #tpu.memory_space<vmem>>, vector<1x8x128xf32>,
    %908 = arith.subf %853, %891 : vector<8x128xf32>
    %c0_481 = arith.constant 0 : index
    %c592_482 = arith.constant 592 : index
    %c0_483 = arith.constant 0 : index
    %909 = vector.load %arg4[%c0_481, %c592_482, %c0_483] : memref<1x1024x128xf32, #tpu.memory_space<vmem>>, vector<1x8x128xf32>
    %910 = vector.shape_cast %909 : vector<1x8x128xf32> to vector<8x128xf32>
    %911 = vector.shape_cast %908 : vector<8x128xf32> to vector<1x8x128xf32>
    tpu.vector_store %arg4[%c0_481, %c592_482, %c0_483], %911 {strides = array<i32>} : memref<1x1024x128xf32, #tpu.memory_space<vmem>>, vector<1x8x128xf32>,
    %912 = arith.subf %855, %891 : vector<8x128xf32>
    %c0_484 = arith.constant 0 : index
    %c720_485 = arith.constant 720 : index
    %c0_486 = arith.constant 0 : index
    %913 = vector.load %arg4[%c0_484, %c720_485, %c0_486] : memref<1x1024x128xf32, #tpu.memory_space<vmem>>, vector<1x8x128xf32>
    %914 = vector.shape_cast %913 : vector<1x8x128xf32> to vector<8x128xf32>
    %915 = vector.shape_cast %912 : vector<8x128xf32> to vector<1x8x128xf32>
    tpu.vector_store %arg4[%c0_484, %c720_485, %c0_486], %915 {strides = array<i32>} : memref<1x1024x128xf32, #tpu.memory_space<vmem>>, vector<1x8x128xf32>,
    %916 = arith.subf %857, %891 : vector<8x128xf32>
    %c0_487 = arith.constant 0 : index
    %c848_488 = arith.constant 848 : index
    %c0_489 = arith.constant 0 : index
    %917 = vector.load %arg4[%c0_487, %c848_488, %c0_489] : memref<1x1024x128xf32, #tpu.memory_space<vmem>>, vector<1x8x128xf32>
    %918 = vector.shape_cast %917 : vector<1x8x128xf32> to vector<8x128xf32>
    %919 = vector.shape_cast %916 : vector<8x128xf32> to vector<1x8x128xf32>
    tpu.vector_store %arg4[%c0_487, %c848_488, %c0_489], %919 {strides = array<i32>} : memref<1x1024x128xf32, #tpu.memory_space<vmem>>, vector<1x8x128xf32>,
    %920 = arith.subf %859, %891 : vector<8x128xf32>
    %c0_490 = arith.constant 0 : index
    %c976_491 = arith.constant 976 : index
    %c0_492 = arith.constant 0 : index
    %921 = vector.load %arg4[%c0_490, %c976_491, %c0_492] : memref<1x1024x128xf32, #tpu.memory_space<vmem>>, vector<1x8x128xf32>
    %922 = vector.shape_cast %921 : vector<1x8x128xf32> to vector<8x128xf32>
    %923 = vector.shape_cast %920 : vector<8x128xf32> to vector<1x8x128xf32>
    tpu.vector_store %arg4[%c0_490, %c976_491, %c0_492], %923 {strides = array<i32>} : memref<1x1024x128xf32, #tpu.memory_space<vmem>>, vector<1x8x128xf32>,
    %c0_493 = arith.constant 0 : index
    %c88 = arith.constant 88 : index
    %c0_494 = arith.constant 0 : index
    %924 = vector.load %arg4[%c0_493, %c88, %c0_494] : memref<1x1024x128xf32, #tpu.memory_space<vmem>>, vector<1x8x128xf32>
    %925 = vector.shape_cast %924 : vector<1x8x128xf32> to vector<8x128xf32>
    %c0_495 = arith.constant 0 : index
    %c216 = arith.constant 216 : index
    %c0_496 = arith.constant 0 : index
    %926 = vector.load %arg4[%c0_495, %c216, %c0_496] : memref<1x1024x128xf32, #tpu.memory_space<vmem>>, vector<1x8x128xf32>
    %927 = vector.shape_cast %926 : vector<1x8x128xf32> to vector<8x128xf32>
    %c0_497 = arith.constant 0 : index
    %c344 = arith.constant 344 : index
    %c0_498 = arith.constant 0 : index
    %928 = vector.load %arg4[%c0_497, %c344, %c0_498] : memref<1x1024x128xf32, #tpu.memory_space<vmem>>, vector<1x8x128xf32>
    %929 = vector.shape_cast %928 : vector<1x8x128xf32> to vector<8x128xf32>
    %c0_499 = arith.constant 0 : index
    %c472 = arith.constant 472 : index
    %c0_500 = arith.constant 0 : index
    %930 = vector.load %arg4[%c0_499, %c472, %c0_500] : memref<1x1024x128xf32, #tpu.memory_space<vmem>>, vector<1x8x128xf32>
    %931 = vector.shape_cast %930 : vector<1x8x128xf32> to vector<8x128xf32>
    %c0_501 = arith.constant 0 : index
    %c600 = arith.constant 600 : index
    %c0_502 = arith.constant 0 : index
    %932 = vector.load %arg4[%c0_501, %c600, %c0_502] : memref<1x1024x128xf32, #tpu.memory_space<vmem>>, vector<1x8x128xf32>
    %933 = vector.shape_cast %932 : vector<1x8x128xf32> to vector<8x128xf32>
    %c0_503 = arith.constant 0 : index
    %c728 = arith.constant 728 : index
    %c0_504 = arith.constant 0 : index
    %934 = vector.load %arg4[%c0_503, %c728, %c0_504] : memref<1x1024x128xf32, #tpu.memory_space<vmem>>, vector<1x8x128xf32>
    %935 = vector.shape_cast %934 : vector<1x8x128xf32> to vector<8x128xf32>
    %c0_505 = arith.constant 0 : index
    %c856 = arith.constant 856 : index
    %c0_506 = arith.constant 0 : index
    %936 = vector.load %arg4[%c0_505, %c856, %c0_506] : memref<1x1024x128xf32, #tpu.memory_space<vmem>>, vector<1x8x128xf32>
    %937 = vector.shape_cast %936 : vector<1x8x128xf32> to vector<8x128xf32>
    %c0_507 = arith.constant 0 : index
    %c984 = arith.constant 984 : index
    %c0_508 = arith.constant 0 : index
    %938 = vector.load %arg4[%c0_507, %c984, %c0_508] : memref<1x1024x128xf32, #tpu.memory_space<vmem>>, vector<1x8x128xf32>
    %939 = vector.shape_cast %938 : vector<1x8x128xf32> to vector<8x128xf32>
    %940 = arith.maximumf %925, %927 : vector<8x128xf32>
    %941 = arith.maximumf %940, %929 : vector<8x128xf32>
    %942 = arith.maximumf %941, %931 : vector<8x128xf32>
    %943 = arith.maximumf %942, %933 : vector<8x128xf32>
    %944 = arith.maximumf %943, %935 : vector<8x128xf32>
    %945 = arith.maximumf %944, %937 : vector<8x128xf32>
    %946 = arith.maximumf %945, %939 : vector<8x128xf32>
    %947 = arith.subf %925, %946 : vector<8x128xf32>
    %948 = math.exp %947 : vector<8x128xf32>
    %949 = arith.subf %927, %946 : vector<8x128xf32>
    %950 = math.exp %949 : vector<8x128xf32>
    %951 = arith.addf %948, %950 : vector<8x128xf32>
    %952 = arith.subf %929, %946 : vector<8x128xf32>
    %953 = math.exp %952 : vector<8x128xf32>
    %954 = arith.addf %951, %953 : vector<8x128xf32>
    %955 = arith.subf %931, %946 : vector<8x128xf32>
    %956 = math.exp %955 : vector<8x128xf32>
    %957 = arith.addf %954, %956 : vector<8x128xf32>
    %958 = arith.subf %933, %946 : vector<8x128xf32>
    %959 = math.exp %958 : vector<8x128xf32>
    %960 = arith.addf %957, %959 : vector<8x128xf32>
    %961 = arith.subf %935, %946 : vector<8x128xf32>
    %962 = math.exp %961 : vector<8x128xf32>
    %963 = arith.addf %960, %962 : vector<8x128xf32>
    %964 = arith.subf %937, %946 : vector<8x128xf32>
    %965 = math.exp %964 : vector<8x128xf32>
    %966 = arith.addf %963, %965 : vector<8x128xf32>
    %967 = arith.subf %939, %946 : vector<8x128xf32>
    %968 = math.exp %967 : vector<8x128xf32>
    %969 = arith.addf %966, %968 : vector<8x128xf32>
    %970 = math.log %969 : vector<8x128xf32>
    %971 = arith.addf %946, %970 : vector<8x128xf32>
    %972 = arith.subf %925, %971 : vector<8x128xf32>
    %c0_509 = arith.constant 0 : index
    %c88_510 = arith.constant 88 : index
    %c0_511 = arith.constant 0 : index
    %973 = vector.load %arg4[%c0_509, %c88_510, %c0_511] : memref<1x1024x128xf32, #tpu.memory_space<vmem>>, vector<1x8x128xf32>
    %974 = vector.shape_cast %973 : vector<1x8x128xf32> to vector<8x128xf32>
    %975 = vector.shape_cast %972 : vector<8x128xf32> to vector<1x8x128xf32>
    tpu.vector_store %arg4[%c0_509, %c88_510, %c0_511], %975 {strides = array<i32>} : memref<1x1024x128xf32, #tpu.memory_space<vmem>>, vector<1x8x128xf32>,
    %976 = arith.subf %927, %971 : vector<8x128xf32>
    %c0_512 = arith.constant 0 : index
    %c216_513 = arith.constant 216 : index
    %c0_514 = arith.constant 0 : index
    %977 = vector.load %arg4[%c0_512, %c216_513, %c0_514] : memref<1x1024x128xf32, #tpu.memory_space<vmem>>, vector<1x8x128xf32>
    %978 = vector.shape_cast %977 : vector<1x8x128xf32> to vector<8x128xf32>
    %979 = vector.shape_cast %976 : vector<8x128xf32> to vector<1x8x128xf32>
    tpu.vector_store %arg4[%c0_512, %c216_513, %c0_514], %979 {strides = array<i32>} : memref<1x1024x128xf32, #tpu.memory_space<vmem>>, vector<1x8x128xf32>,
    %980 = arith.subf %929, %971 : vector<8x128xf32>
    %c0_515 = arith.constant 0 : index
    %c344_516 = arith.constant 344 : index
    %c0_517 = arith.constant 0 : index
    %981 = vector.load %arg4[%c0_515, %c344_516, %c0_517] : memref<1x1024x128xf32, #tpu.memory_space<vmem>>, vector<1x8x128xf32>
    %982 = vector.shape_cast %981 : vector<1x8x128xf32> to vector<8x128xf32>
    %983 = vector.shape_cast %980 : vector<8x128xf32> to vector<1x8x128xf32>
    tpu.vector_store %arg4[%c0_515, %c344_516, %c0_517], %983 {strides = array<i32>} : memref<1x1024x128xf32, #tpu.memory_space<vmem>>, vector<1x8x128xf32>,
    %984 = arith.subf %931, %971 : vector<8x128xf32>
    %c0_518 = arith.constant 0 : index
    %c472_519 = arith.constant 472 : index
    %c0_520 = arith.constant 0 : index
    %985 = vector.load %arg4[%c0_518, %c472_519, %c0_520] : memref<1x1024x128xf32, #tpu.memory_space<vmem>>, vector<1x8x128xf32>
    %986 = vector.shape_cast %985 : vector<1x8x128xf32> to vector<8x128xf32>
    %987 = vector.shape_cast %984 : vector<8x128xf32> to vector<1x8x128xf32>
    tpu.vector_store %arg4[%c0_518, %c472_519, %c0_520], %987 {strides = array<i32>} : memref<1x1024x128xf32, #tpu.memory_space<vmem>>, vector<1x8x128xf32>,
    %988 = arith.subf %933, %971 : vector<8x128xf32>
    %c0_521 = arith.constant 0 : index
    %c600_522 = arith.constant 600 : index
    %c0_523 = arith.constant 0 : index
    %989 = vector.load %arg4[%c0_521, %c600_522, %c0_523] : memref<1x1024x128xf32, #tpu.memory_space<vmem>>, vector<1x8x128xf32>
    %990 = vector.shape_cast %989 : vector<1x8x128xf32> to vector<8x128xf32>
    %991 = vector.shape_cast %988 : vector<8x128xf32> to vector<1x8x128xf32>
    tpu.vector_store %arg4[%c0_521, %c600_522, %c0_523], %991 {strides = array<i32>} : memref<1x1024x128xf32, #tpu.memory_space<vmem>>, vector<1x8x128xf32>,
    %992 = arith.subf %935, %971 : vector<8x128xf32>
    %c0_524 = arith.constant 0 : index
    %c728_525 = arith.constant 728 : index
    %c0_526 = arith.constant 0 : index
    %993 = vector.load %arg4[%c0_524, %c728_525, %c0_526] : memref<1x1024x128xf32, #tpu.memory_space<vmem>>, vector<1x8x128xf32>
    %994 = vector.shape_cast %993 : vector<1x8x128xf32> to vector<8x128xf32>
    %995 = vector.shape_cast %992 : vector<8x128xf32> to vector<1x8x128xf32>
    tpu.vector_store %arg4[%c0_524, %c728_525, %c0_526], %995 {strides = array<i32>} : memref<1x1024x128xf32, #tpu.memory_space<vmem>>, vector<1x8x128xf32>,
    %996 = arith.subf %937, %971 : vector<8x128xf32>
    %c0_527 = arith.constant 0 : index
    %c856_528 = arith.constant 856 : index
    %c0_529 = arith.constant 0 : index
    %997 = vector.load %arg4[%c0_527, %c856_528, %c0_529] : memref<1x1024x128xf32, #tpu.memory_space<vmem>>, vector<1x8x128xf32>
    %998 = vector.shape_cast %997 : vector<1x8x128xf32> to vector<8x128xf32>
    %999 = vector.shape_cast %996 : vector<8x128xf32> to vector<1x8x128xf32>
    tpu.vector_store %arg4[%c0_527, %c856_528, %c0_529], %999 {strides = array<i32>} : memref<1x1024x128xf32, #tpu.memory_space<vmem>>, vector<1x8x128xf32>,
    %1000 = arith.subf %939, %971 : vector<8x128xf32>
    %c0_530 = arith.constant 0 : index
    %c984_531 = arith.constant 984 : index
    %c0_532 = arith.constant 0 : index
    %1001 = vector.load %arg4[%c0_530, %c984_531, %c0_532] : memref<1x1024x128xf32, #tpu.memory_space<vmem>>, vector<1x8x128xf32>
    %1002 = vector.shape_cast %1001 : vector<1x8x128xf32> to vector<8x128xf32>
    %1003 = vector.shape_cast %1000 : vector<8x128xf32> to vector<1x8x128xf32>
    tpu.vector_store %arg4[%c0_530, %c984_531, %c0_532], %1003 {strides = array<i32>} : memref<1x1024x128xf32, #tpu.memory_space<vmem>>, vector<1x8x128xf32>,
    %c0_533 = arith.constant 0 : index
    %c96 = arith.constant 96 : index
    %c0_534 = arith.constant 0 : index
    %1004 = vector.load %arg4[%c0_533, %c96, %c0_534] : memref<1x1024x128xf32, #tpu.memory_space<vmem>>, vector<1x8x128xf32>
    %1005 = vector.shape_cast %1004 : vector<1x8x128xf32> to vector<8x128xf32>
    %c0_535 = arith.constant 0 : index
    %c224 = arith.constant 224 : index
    %c0_536 = arith.constant 0 : index
    %1006 = vector.load %arg4[%c0_535, %c224, %c0_536] : memref<1x1024x128xf32, #tpu.memory_space<vmem>>, vector<1x8x128xf32>
    %1007 = vector.shape_cast %1006 : vector<1x8x128xf32> to vector<8x128xf32>
    %c0_537 = arith.constant 0 : index
    %c352 = arith.constant 352 : index
    %c0_538 = arith.constant 0 : index
    %1008 = vector.load %arg4[%c0_537, %c352, %c0_538] : memref<1x1024x128xf32, #tpu.memory_space<vmem>>, vector<1x8x128xf32>
    %1009 = vector.shape_cast %1008 : vector<1x8x128xf32> to vector<8x128xf32>
    %c0_539 = arith.constant 0 : index
    %c480 = arith.constant 480 : index
    %c0_540 = arith.constant 0 : index
    %1010 = vector.load %arg4[%c0_539, %c480, %c0_540] : memref<1x1024x128xf32, #tpu.memory_space<vmem>>, vector<1x8x128xf32>
    %1011 = vector.shape_cast %1010 : vector<1x8x128xf32> to vector<8x128xf32>
    %c0_541 = arith.constant 0 : index
    %c608 = arith.constant 608 : index
    %c0_542 = arith.constant 0 : index
    %1012 = vector.load %arg4[%c0_541, %c608, %c0_542] : memref<1x1024x128xf32, #tpu.memory_space<vmem>>, vector<1x8x128xf32>
    %1013 = vector.shape_cast %1012 : vector<1x8x128xf32> to vector<8x128xf32>
    %c0_543 = arith.constant 0 : index
    %c736 = arith.constant 736 : index
    %c0_544 = arith.constant 0 : index
    %1014 = vector.load %arg4[%c0_543, %c736, %c0_544] : memref<1x1024x128xf32, #tpu.memory_space<vmem>>, vector<1x8x128xf32>
    %1015 = vector.shape_cast %1014 : vector<1x8x128xf32> to vector<8x128xf32>
    %c0_545 = arith.constant 0 : index
    %c864 = arith.constant 864 : index
    %c0_546 = arith.constant 0 : index
    %1016 = vector.load %arg4[%c0_545, %c864, %c0_546] : memref<1x1024x128xf32, #tpu.memory_space<vmem>>, vector<1x8x128xf32>
    %1017 = vector.shape_cast %1016 : vector<1x8x128xf32> to vector<8x128xf32>
    %c0_547 = arith.constant 0 : index
    %c992 = arith.constant 992 : index
    %c0_548 = arith.constant 0 : index
    %1018 = vector.load %arg4[%c0_547, %c992, %c0_548] : memref<1x1024x128xf32, #tpu.memory_space<vmem>>, vector<1x8x128xf32>
    %1019 = vector.shape_cast %1018 : vector<1x8x128xf32> to vector<8x128xf32>
    %1020 = arith.maximumf %1005, %1007 : vector<8x128xf32>
    %1021 = arith.maximumf %1020, %1009 : vector<8x128xf32>
    %1022 = arith.maximumf %1021, %1011 : vector<8x128xf32>
    %1023 = arith.maximumf %1022, %1013 : vector<8x128xf32>
    %1024 = arith.maximumf %1023, %1015 : vector<8x128xf32>
    %1025 = arith.maximumf %1024, %1017 : vector<8x128xf32>
    %1026 = arith.maximumf %1025, %1019 : vector<8x128xf32>
    %1027 = arith.subf %1005, %1026 : vector<8x128xf32>
    %1028 = math.exp %1027 : vector<8x128xf32>
    %1029 = arith.subf %1007, %1026 : vector<8x128xf32>
    %1030 = math.exp %1029 : vector<8x128xf32>
    %1031 = arith.addf %1028, %1030 : vector<8x128xf32>
    %1032 = arith.subf %1009, %1026 : vector<8x128xf32>
    %1033 = math.exp %1032 : vector<8x128xf32>
    %1034 = arith.addf %1031, %1033 : vector<8x128xf32>
    %1035 = arith.subf %1011, %1026 : vector<8x128xf32>
    %1036 = math.exp %1035 : vector<8x128xf32>
    %1037 = arith.addf %1034, %1036 : vector<8x128xf32>
    %1038 = arith.subf %1013, %1026 : vector<8x128xf32>
    %1039 = math.exp %1038 : vector<8x128xf32>
    %1040 = arith.addf %1037, %1039 : vector<8x128xf32>
    %1041 = arith.subf %1015, %1026 : vector<8x128xf32>
    %1042 = math.exp %1041 : vector<8x128xf32>
    %1043 = arith.addf %1040, %1042 : vector<8x128xf32>
    %1044 = arith.subf %1017, %1026 : vector<8x128xf32>
    %1045 = math.exp %1044 : vector<8x128xf32>
    %1046 = arith.addf %1043, %1045 : vector<8x128xf32>
    %1047 = arith.subf %1019, %1026 : vector<8x128xf32>
    %1048 = math.exp %1047 : vector<8x128xf32>
    %1049 = arith.addf %1046, %1048 : vector<8x128xf32>
    %1050 = math.log %1049 : vector<8x128xf32>
    %1051 = arith.addf %1026, %1050 : vector<8x128xf32>
    %1052 = arith.subf %1005, %1051 : vector<8x128xf32>
    %c0_549 = arith.constant 0 : index
    %c96_550 = arith.constant 96 : index
    %c0_551 = arith.constant 0 : index
    %1053 = vector.load %arg4[%c0_549, %c96_550, %c0_551] : memref<1x1024x128xf32, #tpu.memory_space<vmem>>, vector<1x8x128xf32>
    %1054 = vector.shape_cast %1053 : vector<1x8x128xf32> to vector<8x128xf32>
    %1055 = vector.shape_cast %1052 : vector<8x128xf32> to vector<1x8x128xf32>
    tpu.vector_store %arg4[%c0_549, %c96_550, %c0_551], %1055 {strides = array<i32>} : memref<1x1024x128xf32, #tpu.memory_space<vmem>>, vector<1x8x128xf32>,
    %1056 = arith.subf %1007, %1051 : vector<8x128xf32>
    %c0_552 = arith.constant 0 : index
    %c224_553 = arith.constant 224 : index
    %c0_554 = arith.constant 0 : index
    %1057 = vector.load %arg4[%c0_552, %c224_553, %c0_554] : memref<1x1024x128xf32, #tpu.memory_space<vmem>>, vector<1x8x128xf32>
    %1058 = vector.shape_cast %1057 : vector<1x8x128xf32> to vector<8x128xf32>
    %1059 = vector.shape_cast %1056 : vector<8x128xf32> to vector<1x8x128xf32>
    tpu.vector_store %arg4[%c0_552, %c224_553, %c0_554], %1059 {strides = array<i32>} : memref<1x1024x128xf32, #tpu.memory_space<vmem>>, vector<1x8x128xf32>,
    %1060 = arith.subf %1009, %1051 : vector<8x128xf32>
    %c0_555 = arith.constant 0 : index
    %c352_556 = arith.constant 352 : index
    %c0_557 = arith.constant 0 : index
    %1061 = vector.load %arg4[%c0_555, %c352_556, %c0_557] : memref<1x1024x128xf32, #tpu.memory_space<vmem>>, vector<1x8x128xf32>
    %1062 = vector.shape_cast %1061 : vector<1x8x128xf32> to vector<8x128xf32>
    %1063 = vector.shape_cast %1060 : vector<8x128xf32> to vector<1x8x128xf32>
    tpu.vector_store %arg4[%c0_555, %c352_556, %c0_557], %1063 {strides = array<i32>} : memref<1x1024x128xf32, #tpu.memory_space<vmem>>, vector<1x8x128xf32>,
    %1064 = arith.subf %1011, %1051 : vector<8x128xf32>
    %c0_558 = arith.constant 0 : index
    %c480_559 = arith.constant 480 : index
    %c0_560 = arith.constant 0 : index
    %1065 = vector.load %arg4[%c0_558, %c480_559, %c0_560] : memref<1x1024x128xf32, #tpu.memory_space<vmem>>, vector<1x8x128xf32>
    %1066 = vector.shape_cast %1065 : vector<1x8x128xf32> to vector<8x128xf32>
    %1067 = vector.shape_cast %1064 : vector<8x128xf32> to vector<1x8x128xf32>
    tpu.vector_store %arg4[%c0_558, %c480_559, %c0_560], %1067 {strides = array<i32>} : memref<1x1024x128xf32, #tpu.memory_space<vmem>>, vector<1x8x128xf32>,
    %1068 = arith.subf %1013, %1051 : vector<8x128xf32>
    %c0_561 = arith.constant 0 : index
    %c608_562 = arith.constant 608 : index
    %c0_563 = arith.constant 0 : index
    %1069 = vector.load %arg4[%c0_561, %c608_562, %c0_563] : memref<1x1024x128xf32, #tpu.memory_space<vmem>>, vector<1x8x128xf32>
    %1070 = vector.shape_cast %1069 : vector<1x8x128xf32> to vector<8x128xf32>
    %1071 = vector.shape_cast %1068 : vector<8x128xf32> to vector<1x8x128xf32>
    tpu.vector_store %arg4[%c0_561, %c608_562, %c0_563], %1071 {strides = array<i32>} : memref<1x1024x128xf32, #tpu.memory_space<vmem>>, vector<1x8x128xf32>,
    %1072 = arith.subf %1015, %1051 : vector<8x128xf32>
    %c0_564 = arith.constant 0 : index
    %c736_565 = arith.constant 736 : index
    %c0_566 = arith.constant 0 : index
    %1073 = vector.load %arg4[%c0_564, %c736_565, %c0_566] : memref<1x1024x128xf32, #tpu.memory_space<vmem>>, vector<1x8x128xf32>
    %1074 = vector.shape_cast %1073 : vector<1x8x128xf32> to vector<8x128xf32>
    %1075 = vector.shape_cast %1072 : vector<8x128xf32> to vector<1x8x128xf32>
    tpu.vector_store %arg4[%c0_564, %c736_565, %c0_566], %1075 {strides = array<i32>} : memref<1x1024x128xf32, #tpu.memory_space<vmem>>, vector<1x8x128xf32>,
    %1076 = arith.subf %1017, %1051 : vector<8x128xf32>
    %c0_567 = arith.constant 0 : index
    %c864_568 = arith.constant 864 : index
    %c0_569 = arith.constant 0 : index
    %1077 = vector.load %arg4[%c0_567, %c864_568, %c0_569] : memref<1x1024x128xf32, #tpu.memory_space<vmem>>, vector<1x8x128xf32>
    %1078 = vector.shape_cast %1077 : vector<1x8x128xf32> to vector<8x128xf32>
    %1079 = vector.shape_cast %1076 : vector<8x128xf32> to vector<1x8x128xf32>
    tpu.vector_store %arg4[%c0_567, %c864_568, %c0_569], %1079 {strides = array<i32>} : memref<1x1024x128xf32, #tpu.memory_space<vmem>>, vector<1x8x128xf32>,
    %1080 = arith.subf %1019, %1051 : vector<8x128xf32>
    %c0_570 = arith.constant 0 : index
    %c992_571 = arith.constant 992 : index
    %c0_572 = arith.constant 0 : index
    %1081 = vector.load %arg4[%c0_570, %c992_571, %c0_572] : memref<1x1024x128xf32, #tpu.memory_space<vmem>>, vector<1x8x128xf32>
    %1082 = vector.shape_cast %1081 : vector<1x8x128xf32> to vector<8x128xf32>
    %1083 = vector.shape_cast %1080 : vector<8x128xf32> to vector<1x8x128xf32>
    tpu.vector_store %arg4[%c0_570, %c992_571, %c0_572], %1083 {strides = array<i32>} : memref<1x1024x128xf32, #tpu.memory_space<vmem>>, vector<1x8x128xf32>,
    %c0_573 = arith.constant 0 : index
    %c104 = arith.constant 104 : index
    %c0_574 = arith.constant 0 : index
    %1084 = vector.load %arg4[%c0_573, %c104, %c0_574] : memref<1x1024x128xf32, #tpu.memory_space<vmem>>, vector<1x8x128xf32>
    %1085 = vector.shape_cast %1084 : vector<1x8x128xf32> to vector<8x128xf32>
    %c0_575 = arith.constant 0 : index
    %c232 = arith.constant 232 : index
    %c0_576 = arith.constant 0 : index
    %1086 = vector.load %arg4[%c0_575, %c232, %c0_576] : memref<1x1024x128xf32, #tpu.memory_space<vmem>>, vector<1x8x128xf32>
    %1087 = vector.shape_cast %1086 : vector<1x8x128xf32> to vector<8x128xf32>
    %c0_577 = arith.constant 0 : index
    %c360 = arith.constant 360 : index
    %c0_578 = arith.constant 0 : index
    %1088 = vector.load %arg4[%c0_577, %c360, %c0_578] : memref<1x1024x128xf32, #tpu.memory_space<vmem>>, vector<1x8x128xf32>
    %1089 = vector.shape_cast %1088 : vector<1x8x128xf32> to vector<8x128xf32>
    %c0_579 = arith.constant 0 : index
    %c488 = arith.constant 488 : index
    %c0_580 = arith.constant 0 : index
    %1090 = vector.load %arg4[%c0_579, %c488, %c0_580] : memref<1x1024x128xf32, #tpu.memory_space<vmem>>, vector<1x8x128xf32>
    %1091 = vector.shape_cast %1090 : vector<1x8x128xf32> to vector<8x128xf32>
    %c0_581 = arith.constant 0 : index
    %c616 = arith.constant 616 : index
    %c0_582 = arith.constant 0 : index
    %1092 = vector.load %arg4[%c0_581, %c616, %c0_582] : memref<1x1024x128xf32, #tpu.memory_space<vmem>>, vector<1x8x128xf32>
    %1093 = vector.shape_cast %1092 : vector<1x8x128xf32> to vector<8x128xf32>
    %c0_583 = arith.constant 0 : index
    %c744 = arith.constant 744 : index
    %c0_584 = arith.constant 0 : index
    %1094 = vector.load %arg4[%c0_583, %c744, %c0_584] : memref<1x1024x128xf32, #tpu.memory_space<vmem>>, vector<1x8x128xf32>
    %1095 = vector.shape_cast %1094 : vector<1x8x128xf32> to vector<8x128xf32>
    %c0_585 = arith.constant 0 : index
    %c872 = arith.constant 872 : index
    %c0_586 = arith.constant 0 : index
    %1096 = vector.load %arg4[%c0_585, %c872, %c0_586] : memref<1x1024x128xf32, #tpu.memory_space<vmem>>, vector<1x8x128xf32>
    %1097 = vector.shape_cast %1096 : vector<1x8x128xf32> to vector<8x128xf32>
    %c0_587 = arith.constant 0 : index
    %c1000 = arith.constant 1000 : index
    %c0_588 = arith.constant 0 : index
    %1098 = vector.load %arg4[%c0_587, %c1000, %c0_588] : memref<1x1024x128xf32, #tpu.memory_space<vmem>>, vector<1x8x128xf32>
    %1099 = vector.shape_cast %1098 : vector<1x8x128xf32> to vector<8x128xf32>
    %1100 = arith.maximumf %1085, %1087 : vector<8x128xf32>
    %1101 = arith.maximumf %1100, %1089 : vector<8x128xf32>
    %1102 = arith.maximumf %1101, %1091 : vector<8x128xf32>
    %1103 = arith.maximumf %1102, %1093 : vector<8x128xf32>
    %1104 = arith.maximumf %1103, %1095 : vector<8x128xf32>
    %1105 = arith.maximumf %1104, %1097 : vector<8x128xf32>
    %1106 = arith.maximumf %1105, %1099 : vector<8x128xf32>
    %1107 = arith.subf %1085, %1106 : vector<8x128xf32>
    %1108 = math.exp %1107 : vector<8x128xf32>
    %1109 = arith.subf %1087, %1106 : vector<8x128xf32>
    %1110 = math.exp %1109 : vector<8x128xf32>
    %1111 = arith.addf %1108, %1110 : vector<8x128xf32>
    %1112 = arith.subf %1089, %1106 : vector<8x128xf32>
    %1113 = math.exp %1112 : vector<8x128xf32>
    %1114 = arith.addf %1111, %1113 : vector<8x128xf32>
    %1115 = arith.subf %1091, %1106 : vector<8x128xf32>
    %1116 = math.exp %1115 : vector<8x128xf32>
    %1117 = arith.addf %1114, %1116 : vector<8x128xf32>
    %1118 = arith.subf %1093, %1106 : vector<8x128xf32>
    %1119 = math.exp %1118 : vector<8x128xf32>
    %1120 = arith.addf %1117, %1119 : vector<8x128xf32>
    %1121 = arith.subf %1095, %1106 : vector<8x128xf32>
    %1122 = math.exp %1121 : vector<8x128xf32>
    %1123 = arith.addf %1120, %1122 : vector<8x128xf32>
    %1124 = arith.subf %1097, %1106 : vector<8x128xf32>
    %1125 = math.exp %1124 : vector<8x128xf32>
    %1126 = arith.addf %1123, %1125 : vector<8x128xf32>
    %1127 = arith.subf %1099, %1106 : vector<8x128xf32>
    %1128 = math.exp %1127 : vector<8x128xf32>
    %1129 = arith.addf %1126, %1128 : vector<8x128xf32>
    %1130 = math.log %1129 : vector<8x128xf32>
    %1131 = arith.addf %1106, %1130 : vector<8x128xf32>
    %1132 = arith.subf %1085, %1131 : vector<8x128xf32>
    %c0_589 = arith.constant 0 : index
    %c104_590 = arith.constant 104 : index
    %c0_591 = arith.constant 0 : index
    %1133 = vector.load %arg4[%c0_589, %c104_590, %c0_591] : memref<1x1024x128xf32, #tpu.memory_space<vmem>>, vector<1x8x128xf32>
    %1134 = vector.shape_cast %1133 : vector<1x8x128xf32> to vector<8x128xf32>
    %1135 = vector.shape_cast %1132 : vector<8x128xf32> to vector<1x8x128xf32>
    tpu.vector_store %arg4[%c0_589, %c104_590, %c0_591], %1135 {strides = array<i32>} : memref<1x1024x128xf32, #tpu.memory_space<vmem>>, vector<1x8x128xf32>,
    %1136 = arith.subf %1087, %1131 : vector<8x128xf32>
    %c0_592 = arith.constant 0 : index
    %c232_593 = arith.constant 232 : index
    %c0_594 = arith.constant 0 : index
    %1137 = vector.load %arg4[%c0_592, %c232_593, %c0_594] : memref<1x1024x128xf32, #tpu.memory_space<vmem>>, vector<1x8x128xf32>
    %1138 = vector.shape_cast %1137 : vector<1x8x128xf32> to vector<8x128xf32>
    %1139 = vector.shape_cast %1136 : vector<8x128xf32> to vector<1x8x128xf32>
    tpu.vector_store %arg4[%c0_592, %c232_593, %c0_594], %1139 {strides = array<i32>} : memref<1x1024x128xf32, #tpu.memory_space<vmem>>, vector<1x8x128xf32>,
    %1140 = arith.subf %1089, %1131 : vector<8x128xf32>
    %c0_595 = arith.constant 0 : index
    %c360_596 = arith.constant 360 : index
    %c0_597 = arith.constant 0 : index
    %1141 = vector.load %arg4[%c0_595, %c360_596, %c0_597] : memref<1x1024x128xf32, #tpu.memory_space<vmem>>, vector<1x8x128xf32>
    %1142 = vector.shape_cast %1141 : vector<1x8x128xf32> to vector<8x128xf32>
    %1143 = vector.shape_cast %1140 : vector<8x128xf32> to vector<1x8x128xf32>
    tpu.vector_store %arg4[%c0_595, %c360_596, %c0_597], %1143 {strides = array<i32>} : memref<1x1024x128xf32, #tpu.memory_space<vmem>>, vector<1x8x128xf32>,
    %1144 = arith.subf %1091, %1131 : vector<8x128xf32>
    %c0_598 = arith.constant 0 : index
    %c488_599 = arith.constant 488 : index
    %c0_600 = arith.constant 0 : index
    %1145 = vector.load %arg4[%c0_598, %c488_599, %c0_600] : memref<1x1024x128xf32, #tpu.memory_space<vmem>>, vector<1x8x128xf32>
    %1146 = vector.shape_cast %1145 : vector<1x8x128xf32> to vector<8x128xf32>
    %1147 = vector.shape_cast %1144 : vector<8x128xf32> to vector<1x8x128xf32>
    tpu.vector_store %arg4[%c0_598, %c488_599, %c0_600], %1147 {strides = array<i32>} : memref<1x1024x128xf32, #tpu.memory_space<vmem>>, vector<1x8x128xf32>,
    %1148 = arith.subf %1093, %1131 : vector<8x128xf32>
    %c0_601 = arith.constant 0 : index
    %c616_602 = arith.constant 616 : index
    %c0_603 = arith.constant 0 : index
    %1149 = vector.load %arg4[%c0_601, %c616_602, %c0_603] : memref<1x1024x128xf32, #tpu.memory_space<vmem>>, vector<1x8x128xf32>
    %1150 = vector.shape_cast %1149 : vector<1x8x128xf32> to vector<8x128xf32>
    %1151 = vector.shape_cast %1148 : vector<8x128xf32> to vector<1x8x128xf32>
    tpu.vector_store %arg4[%c0_601, %c616_602, %c0_603], %1151 {strides = array<i32>} : memref<1x1024x128xf32, #tpu.memory_space<vmem>>, vector<1x8x128xf32>,
    %1152 = arith.subf %1095, %1131 : vector<8x128xf32>
    %c0_604 = arith.constant 0 : index
    %c744_605 = arith.constant 744 : index
    %c0_606 = arith.constant 0 : index
    %1153 = vector.load %arg4[%c0_604, %c744_605, %c0_606] : memref<1x1024x128xf32, #tpu.memory_space<vmem>>, vector<1x8x128xf32>
    %1154 = vector.shape_cast %1153 : vector<1x8x128xf32> to vector<8x128xf32>
    %1155 = vector.shape_cast %1152 : vector<8x128xf32> to vector<1x8x128xf32>
    tpu.vector_store %arg4[%c0_604, %c744_605, %c0_606], %1155 {strides = array<i32>} : memref<1x1024x128xf32, #tpu.memory_space<vmem>>, vector<1x8x128xf32>,
    %1156 = arith.subf %1097, %1131 : vector<8x128xf32>
    %c0_607 = arith.constant 0 : index
    %c872_608 = arith.constant 872 : index
    %c0_609 = arith.constant 0 : index
    %1157 = vector.load %arg4[%c0_607, %c872_608, %c0_609] : memref<1x1024x128xf32, #tpu.memory_space<vmem>>, vector<1x8x128xf32>
    %1158 = vector.shape_cast %1157 : vector<1x8x128xf32> to vector<8x128xf32>
    %1159 = vector.shape_cast %1156 : vector<8x128xf32> to vector<1x8x128xf32>
    tpu.vector_store %arg4[%c0_607, %c872_608, %c0_609], %1159 {strides = array<i32>} : memref<1x1024x128xf32, #tpu.memory_space<vmem>>, vector<1x8x128xf32>,
    %1160 = arith.subf %1099, %1131 : vector<8x128xf32>
    %c0_610 = arith.constant 0 : index
    %c1000_611 = arith.constant 1000 : index
    %c0_612 = arith.constant 0 : index
    %1161 = vector.load %arg4[%c0_610, %c1000_611, %c0_612] : memref<1x1024x128xf32, #tpu.memory_space<vmem>>, vector<1x8x128xf32>
    %1162 = vector.shape_cast %1161 : vector<1x8x128xf32> to vector<8x128xf32>
    %1163 = vector.shape_cast %1160 : vector<8x128xf32> to vector<1x8x128xf32>
    tpu.vector_store %arg4[%c0_610, %c1000_611, %c0_612], %1163 {strides = array<i32>} : memref<1x1024x128xf32, #tpu.memory_space<vmem>>, vector<1x8x128xf32>,
    %c0_613 = arith.constant 0 : index
    %c112 = arith.constant 112 : index
    %c0_614 = arith.constant 0 : index
    %1164 = vector.load %arg4[%c0_613, %c112, %c0_614] : memref<1x1024x128xf32, #tpu.memory_space<vmem>>, vector<1x8x128xf32>
    %1165 = vector.shape_cast %1164 : vector<1x8x128xf32> to vector<8x128xf32>
    %c0_615 = arith.constant 0 : index
    %c240 = arith.constant 240 : index
    %c0_616 = arith.constant 0 : index
    %1166 = vector.load %arg4[%c0_615, %c240, %c0_616] : memref<1x1024x128xf32, #tpu.memory_space<vmem>>, vector<1x8x128xf32>
    %1167 = vector.shape_cast %1166 : vector<1x8x128xf32> to vector<8x128xf32>
    %c0_617 = arith.constant 0 : index
    %c368 = arith.constant 368 : index
    %c0_618 = arith.constant 0 : index
    %1168 = vector.load %arg4[%c0_617, %c368, %c0_618] : memref<1x1024x128xf32, #tpu.memory_space<vmem>>, vector<1x8x128xf32>
    %1169 = vector.shape_cast %1168 : vector<1x8x128xf32> to vector<8x128xf32>
    %c0_619 = arith.constant 0 : index
    %c496 = arith.constant 496 : index
    %c0_620 = arith.constant 0 : index
    %1170 = vector.load %arg4[%c0_619, %c496, %c0_620] : memref<1x1024x128xf32, #tpu.memory_space<vmem>>, vector<1x8x128xf32>
    %1171 = vector.shape_cast %1170 : vector<1x8x128xf32> to vector<8x128xf32>
    %c0_621 = arith.constant 0 : index
    %c624 = arith.constant 624 : index
    %c0_622 = arith.constant 0 : index
    %1172 = vector.load %arg4[%c0_621, %c624, %c0_622] : memref<1x1024x128xf32, #tpu.memory_space<vmem>>, vector<1x8x128xf32>
    %1173 = vector.shape_cast %1172 : vector<1x8x128xf32> to vector<8x128xf32>
    %c0_623 = arith.constant 0 : index
    %c752 = arith.constant 752 : index
    %c0_624 = arith.constant 0 : index
    %1174 = vector.load %arg4[%c0_623, %c752, %c0_624] : memref<1x1024x128xf32, #tpu.memory_space<vmem>>, vector<1x8x128xf32>
    %1175 = vector.shape_cast %1174 : vector<1x8x128xf32> to vector<8x128xf32>
    %c0_625 = arith.constant 0 : index
    %c880 = arith.constant 880 : index
    %c0_626 = arith.constant 0 : index
    %1176 = vector.load %arg4[%c0_625, %c880, %c0_626] : memref<1x1024x128xf32, #tpu.memory_space<vmem>>, vector<1x8x128xf32>
    %1177 = vector.shape_cast %1176 : vector<1x8x128xf32> to vector<8x128xf32>
    %c0_627 = arith.constant 0 : index
    %c1008 = arith.constant 1008 : index
    %c0_628 = arith.constant 0 : index
    %1178 = vector.load %arg4[%c0_627, %c1008, %c0_628] : memref<1x1024x128xf32, #tpu.memory_space<vmem>>, vector<1x8x128xf32>
    %1179 = vector.shape_cast %1178 : vector<1x8x128xf32> to vector<8x128xf32>
    %1180 = arith.maximumf %1165, %1167 : vector<8x128xf32>
    %1181 = arith.maximumf %1180, %1169 : vector<8x128xf32>
    %1182 = arith.maximumf %1181, %1171 : vector<8x128xf32>
    %1183 = arith.maximumf %1182, %1173 : vector<8x128xf32>
    %1184 = arith.maximumf %1183, %1175 : vector<8x128xf32>
    %1185 = arith.maximumf %1184, %1177 : vector<8x128xf32>
    %1186 = arith.maximumf %1185, %1179 : vector<8x128xf32>
    %1187 = arith.subf %1165, %1186 : vector<8x128xf32>
    %1188 = math.exp %1187 : vector<8x128xf32>
    %1189 = arith.subf %1167, %1186 : vector<8x128xf32>
    %1190 = math.exp %1189 : vector<8x128xf32>
    %1191 = arith.addf %1188, %1190 : vector<8x128xf32>
    %1192 = arith.subf %1169, %1186 : vector<8x128xf32>
    %1193 = math.exp %1192 : vector<8x128xf32>
    %1194 = arith.addf %1191, %1193 : vector<8x128xf32>
    %1195 = arith.subf %1171, %1186 : vector<8x128xf32>
    %1196 = math.exp %1195 : vector<8x128xf32>
    %1197 = arith.addf %1194, %1196 : vector<8x128xf32>
    %1198 = arith.subf %1173, %1186 : vector<8x128xf32>
    %1199 = math.exp %1198 : vector<8x128xf32>
    %1200 = arith.addf %1197, %1199 : vector<8x128xf32>
    %1201 = arith.subf %1175, %1186 : vector<8x128xf32>
    %1202 = math.exp %1201 : vector<8x128xf32>
    %1203 = arith.addf %1200, %1202 : vector<8x128xf32>
    %1204 = arith.subf %1177, %1186 : vector<8x128xf32>
    %1205 = math.exp %1204 : vector<8x128xf32>
    %1206 = arith.addf %1203, %1205 : vector<8x128xf32>
    %1207 = arith.subf %1179, %1186 : vector<8x128xf32>
    %1208 = math.exp %1207 : vector<8x128xf32>
    %1209 = arith.addf %1206, %1208 : vector<8x128xf32>
    %1210 = math.log %1209 : vector<8x128xf32>
    %1211 = arith.addf %1186, %1210 : vector<8x128xf32>
    %1212 = arith.subf %1165, %1211 : vector<8x128xf32>
    %c0_629 = arith.constant 0 : index
    %c112_630 = arith.constant 112 : index
    %c0_631 = arith.constant 0 : index
    %1213 = vector.load %arg4[%c0_629, %c112_630, %c0_631] : memref<1x1024x128xf32, #tpu.memory_space<vmem>>, vector<1x8x128xf32>
    %1214 = vector.shape_cast %1213 : vector<1x8x128xf32> to vector<8x128xf32>
    %1215 = vector.shape_cast %1212 : vector<8x128xf32> to vector<1x8x128xf32>
    tpu.vector_store %arg4[%c0_629, %c112_630, %c0_631], %1215 {strides = array<i32>} : memref<1x1024x128xf32, #tpu.memory_space<vmem>>, vector<1x8x128xf32>,
    %1216 = arith.subf %1167, %1211 : vector<8x128xf32>
    %c0_632 = arith.constant 0 : index
    %c240_633 = arith.constant 240 : index
    %c0_634 = arith.constant 0 : index
    %1217 = vector.load %arg4[%c0_632, %c240_633, %c0_634] : memref<1x1024x128xf32, #tpu.memory_space<vmem>>, vector<1x8x128xf32>
    %1218 = vector.shape_cast %1217 : vector<1x8x128xf32> to vector<8x128xf32>
    %1219 = vector.shape_cast %1216 : vector<8x128xf32> to vector<1x8x128xf32>
    tpu.vector_store %arg4[%c0_632, %c240_633, %c0_634], %1219 {strides = array<i32>} : memref<1x1024x128xf32, #tpu.memory_space<vmem>>, vector<1x8x128xf32>,
    %1220 = arith.subf %1169, %1211 : vector<8x128xf32>
    %c0_635 = arith.constant 0 : index
    %c368_636 = arith.constant 368 : index
    %c0_637 = arith.constant 0 : index
    %1221 = vector.load %arg4[%c0_635, %c368_636, %c0_637] : memref<1x1024x128xf32, #tpu.memory_space<vmem>>, vector<1x8x128xf32>
    %1222 = vector.shape_cast %1221 : vector<1x8x128xf32> to vector<8x128xf32>
    %1223 = vector.shape_cast %1220 : vector<8x128xf32> to vector<1x8x128xf32>
    tpu.vector_store %arg4[%c0_635, %c368_636, %c0_637], %1223 {strides = array<i32>} : memref<1x1024x128xf32, #tpu.memory_space<vmem>>, vector<1x8x128xf32>,
    %1224 = arith.subf %1171, %1211 : vector<8x128xf32>
    %c0_638 = arith.constant 0 : index
    %c496_639 = arith.constant 496 : index
    %c0_640 = arith.constant 0 : index
    %1225 = vector.load %arg4[%c0_638, %c496_639, %c0_640] : memref<1x1024x128xf32, #tpu.memory_space<vmem>>, vector<1x8x128xf32>
    %1226 = vector.shape_cast %1225 : vector<1x8x128xf32> to vector<8x128xf32>
    %1227 = vector.shape_cast %1224 : vector<8x128xf32> to vector<1x8x128xf32>
    tpu.vector_store %arg4[%c0_638, %c496_639, %c0_640], %1227 {strides = array<i32>} : memref<1x1024x128xf32, #tpu.memory_space<vmem>>, vector<1x8x128xf32>,
    %1228 = arith.subf %1173, %1211 : vector<8x128xf32>
    %c0_641 = arith.constant 0 : index
    %c624_642 = arith.constant 624 : index
    %c0_643 = arith.constant 0 : index
    %1229 = vector.load %arg4[%c0_641, %c624_642, %c0_643] : memref<1x1024x128xf32, #tpu.memory_space<vmem>>, vector<1x8x128xf32>
    %1230 = vector.shape_cast %1229 : vector<1x8x128xf32> to vector<8x128xf32>
    %1231 = vector.shape_cast %1228 : vector<8x128xf32> to vector<1x8x128xf32>
    tpu.vector_store %arg4[%c0_641, %c624_642, %c0_643], %1231 {strides = array<i32>} : memref<1x1024x128xf32, #tpu.memory_space<vmem>>, vector<1x8x128xf32>,
    %1232 = arith.subf %1175, %1211 : vector<8x128xf32>
    %c0_644 = arith.constant 0 : index
    %c752_645 = arith.constant 752 : index
    %c0_646 = arith.constant 0 : index
    %1233 = vector.load %arg4[%c0_644, %c752_645, %c0_646] : memref<1x1024x128xf32, #tpu.memory_space<vmem>>, vector<1x8x128xf32>
    %1234 = vector.shape_cast %1233 : vector<1x8x128xf32> to vector<8x128xf32>
    %1235 = vector.shape_cast %1232 : vector<8x128xf32> to vector<1x8x128xf32>
    tpu.vector_store %arg4[%c0_644, %c752_645, %c0_646], %1235 {strides = array<i32>} : memref<1x1024x128xf32, #tpu.memory_space<vmem>>, vector<1x8x128xf32>,
    %1236 = arith.subf %1177, %1211 : vector<8x128xf32>
    %c0_647 = arith.constant 0 : index
    %c880_648 = arith.constant 880 : index
    %c0_649 = arith.constant 0 : index
    %1237 = vector.load %arg4[%c0_647, %c880_648, %c0_649] : memref<1x1024x128xf32, #tpu.memory_space<vmem>>, vector<1x8x128xf32>
    %1238 = vector.shape_cast %1237 : vector<1x8x128xf32> to vector<8x128xf32>
    %1239 = vector.shape_cast %1236 : vector<8x128xf32> to vector<1x8x128xf32>
    tpu.vector_store %arg4[%c0_647, %c880_648, %c0_649], %1239 {strides = array<i32>} : memref<1x1024x128xf32, #tpu.memory_space<vmem>>, vector<1x8x128xf32>,
    %1240 = arith.subf %1179, %1211 : vector<8x128xf32>
    %c0_650 = arith.constant 0 : index
    %c1008_651 = arith.constant 1008 : index
    %c0_652 = arith.constant 0 : index
    %1241 = vector.load %arg4[%c0_650, %c1008_651, %c0_652] : memref<1x1024x128xf32, #tpu.memory_space<vmem>>, vector<1x8x128xf32>
    %1242 = vector.shape_cast %1241 : vector<1x8x128xf32> to vector<8x128xf32>
    %1243 = vector.shape_cast %1240 : vector<8x128xf32> to vector<1x8x128xf32>
    tpu.vector_store %arg4[%c0_650, %c1008_651, %c0_652], %1243 {strides = array<i32>} : memref<1x1024x128xf32, #tpu.memory_space<vmem>>, vector<1x8x128xf32>,
    %c0_653 = arith.constant 0 : index
    %c120 = arith.constant 120 : index
    %c0_654 = arith.constant 0 : index
    %1244 = vector.load %arg4[%c0_653, %c120, %c0_654] : memref<1x1024x128xf32, #tpu.memory_space<vmem>>, vector<1x8x128xf32>
    %1245 = vector.shape_cast %1244 : vector<1x8x128xf32> to vector<8x128xf32>
    %c0_655 = arith.constant 0 : index
    %c248 = arith.constant 248 : index
    %c0_656 = arith.constant 0 : index
    %1246 = vector.load %arg4[%c0_655, %c248, %c0_656] : memref<1x1024x128xf32, #tpu.memory_space<vmem>>, vector<1x8x128xf32>
    %1247 = vector.shape_cast %1246 : vector<1x8x128xf32> to vector<8x128xf32>
    %c0_657 = arith.constant 0 : index
    %c376 = arith.constant 376 : index
    %c0_658 = arith.constant 0 : index
    %1248 = vector.load %arg4[%c0_657, %c376, %c0_658] : memref<1x1024x128xf32, #tpu.memory_space<vmem>>, vector<1x8x128xf32>
    %1249 = vector.shape_cast %1248 : vector<1x8x128xf32> to vector<8x128xf32>
    %c0_659 = arith.constant 0 : index
    %c504 = arith.constant 504 : index
    %c0_660 = arith.constant 0 : index
    %1250 = vector.load %arg4[%c0_659, %c504, %c0_660] : memref<1x1024x128xf32, #tpu.memory_space<vmem>>, vector<1x8x128xf32>
    %1251 = vector.shape_cast %1250 : vector<1x8x128xf32> to vector<8x128xf32>
    %c0_661 = arith.constant 0 : index
    %c632 = arith.constant 632 : index
    %c0_662 = arith.constant 0 : index
    %1252 = vector.load %arg4[%c0_661, %c632, %c0_662] : memref<1x1024x128xf32, #tpu.memory_space<vmem>>, vector<1x8x128xf32>
    %1253 = vector.shape_cast %1252 : vector<1x8x128xf32> to vector<8x128xf32>
    %c0_663 = arith.constant 0 : index
    %c760 = arith.constant 760 : index
    %c0_664 = arith.constant 0 : index
    %1254 = vector.load %arg4[%c0_663, %c760, %c0_664] : memref<1x1024x128xf32, #tpu.memory_space<vmem>>, vector<1x8x128xf32>
    %1255 = vector.shape_cast %1254 : vector<1x8x128xf32> to vector<8x128xf32>
    %c0_665 = arith.constant 0 : index
    %c888 = arith.constant 888 : index
    %c0_666 = arith.constant 0 : index
    %1256 = vector.load %arg4[%c0_665, %c888, %c0_666] : memref<1x1024x128xf32, #tpu.memory_space<vmem>>, vector<1x8x128xf32>
    %1257 = vector.shape_cast %1256 : vector<1x8x128xf32> to vector<8x128xf32>
    %c0_667 = arith.constant 0 : index
    %c1016 = arith.constant 1016 : index
    %c0_668 = arith.constant 0 : index
    %1258 = vector.load %arg4[%c0_667, %c1016, %c0_668] : memref<1x1024x128xf32, #tpu.memory_space<vmem>>, vector<1x8x128xf32>
    %1259 = vector.shape_cast %1258 : vector<1x8x128xf32> to vector<8x128xf32>
    %1260 = arith.maximumf %1245, %1247 : vector<8x128xf32>
    %1261 = arith.maximumf %1260, %1249 : vector<8x128xf32>
    %1262 = arith.maximumf %1261, %1251 : vector<8x128xf32>
    %1263 = arith.maximumf %1262, %1253 : vector<8x128xf32>
    %1264 = arith.maximumf %1263, %1255 : vector<8x128xf32>
    %1265 = arith.maximumf %1264, %1257 : vector<8x128xf32>
    %1266 = arith.maximumf %1265, %1259 : vector<8x128xf32>
    %1267 = arith.subf %1245, %1266 : vector<8x128xf32>
    %1268 = math.exp %1267 : vector<8x128xf32>
    %1269 = arith.subf %1247, %1266 : vector<8x128xf32>
    %1270 = math.exp %1269 : vector<8x128xf32>
    %1271 = arith.addf %1268, %1270 : vector<8x128xf32>
    %1272 = arith.subf %1249, %1266 : vector<8x128xf32>
    %1273 = math.exp %1272 : vector<8x128xf32>
    %1274 = arith.addf %1271, %1273 : vector<8x128xf32>
    %1275 = arith.subf %1251, %1266 : vector<8x128xf32>
    %1276 = math.exp %1275 : vector<8x128xf32>
    %1277 = arith.addf %1274, %1276 : vector<8x128xf32>
    %1278 = arith.subf %1253, %1266 : vector<8x128xf32>
    %1279 = math.exp %1278 : vector<8x128xf32>
    %1280 = arith.addf %1277, %1279 : vector<8x128xf32>
    %1281 = arith.subf %1255, %1266 : vector<8x128xf32>
    %1282 = math.exp %1281 : vector<8x128xf32>
    %1283 = arith.addf %1280, %1282 : vector<8x128xf32>
    %1284 = arith.subf %1257, %1266 : vector<8x128xf32>
    %1285 = math.exp %1284 : vector<8x128xf32>
    %1286 = arith.addf %1283, %1285 : vector<8x128xf32>
    %1287 = arith.subf %1259, %1266 : vector<8x128xf32>
    %1288 = math.exp %1287 : vector<8x128xf32>
    %1289 = arith.addf %1286, %1288 : vector<8x128xf32>
    %1290 = math.log %1289 : vector<8x128xf32>
    %1291 = arith.addf %1266, %1290 : vector<8x128xf32>
    %1292 = arith.subf %1245, %1291 : vector<8x128xf32>
    %c0_669 = arith.constant 0 : index
    %c120_670 = arith.constant 120 : index
    %c0_671 = arith.constant 0 : index
    %1293 = vector.load %arg4[%c0_669, %c120_670, %c0_671] : memref<1x1024x128xf32, #tpu.memory_space<vmem>>, vector<1x8x128xf32>
    %1294 = vector.shape_cast %1293 : vector<1x8x128xf32> to vector<8x128xf32>
    %1295 = vector.shape_cast %1292 : vector<8x128xf32> to vector<1x8x128xf32>
    tpu.vector_store %arg4[%c0_669, %c120_670, %c0_671], %1295 {strides = array<i32>} : memref<1x1024x128xf32, #tpu.memory_space<vmem>>, vector<1x8x128xf32>,
    %1296 = arith.subf %1247, %1291 : vector<8x128xf32>
    %c0_672 = arith.constant 0 : index
    %c248_673 = arith.constant 248 : index
    %c0_674 = arith.constant 0 : index
    %1297 = vector.load %arg4[%c0_672, %c248_673, %c0_674] : memref<1x1024x128xf32, #tpu.memory_space<vmem>>, vector<1x8x128xf32>
    %1298 = vector.shape_cast %1297 : vector<1x8x128xf32> to vector<8x128xf32>
    %1299 = vector.shape_cast %1296 : vector<8x128xf32> to vector<1x8x128xf32>
    tpu.vector_store %arg4[%c0_672, %c248_673, %c0_674], %1299 {strides = array<i32>} : memref<1x1024x128xf32, #tpu.memory_space<vmem>>, vector<1x8x128xf32>,
    %1300 = arith.subf %1249, %1291 : vector<8x128xf32>
    %c0_675 = arith.constant 0 : index
    %c376_676 = arith.constant 376 : index
    %c0_677 = arith.constant 0 : index
    %1301 = vector.load %arg4[%c0_675, %c376_676, %c0_677] : memref<1x1024x128xf32, #tpu.memory_space<vmem>>, vector<1x8x128xf32>
    %1302 = vector.shape_cast %1301 : vector<1x8x128xf32> to vector<8x128xf32>
    %1303 = vector.shape_cast %1300 : vector<8x128xf32> to vector<1x8x128xf32>
    tpu.vector_store %arg4[%c0_675, %c376_676, %c0_677], %1303 {strides = array<i32>} : memref<1x1024x128xf32, #tpu.memory_space<vmem>>, vector<1x8x128xf32>,
    %1304 = arith.subf %1251, %1291 : vector<8x128xf32>
    %c0_678 = arith.constant 0 : index
    %c504_679 = arith.constant 504 : index
    %c0_680 = arith.constant 0 : index
    %1305 = vector.load %arg4[%c0_678, %c504_679, %c0_680] : memref<1x1024x128xf32, #tpu.memory_space<vmem>>, vector<1x8x128xf32>
    %1306 = vector.shape_cast %1305 : vector<1x8x128xf32> to vector<8x128xf32>
    %1307 = vector.shape_cast %1304 : vector<8x128xf32> to vector<1x8x128xf32>
    tpu.vector_store %arg4[%c0_678, %c504_679, %c0_680], %1307 {strides = array<i32>} : memref<1x1024x128xf32, #tpu.memory_space<vmem>>, vector<1x8x128xf32>,
    %1308 = arith.subf %1253, %1291 : vector<8x128xf32>
    %c0_681 = arith.constant 0 : index
    %c632_682 = arith.constant 632 : index
    %c0_683 = arith.constant 0 : index
    %1309 = vector.load %arg4[%c0_681, %c632_682, %c0_683] : memref<1x1024x128xf32, #tpu.memory_space<vmem>>, vector<1x8x128xf32>
    %1310 = vector.shape_cast %1309 : vector<1x8x128xf32> to vector<8x128xf32>
    %1311 = vector.shape_cast %1308 : vector<8x128xf32> to vector<1x8x128xf32>
    tpu.vector_store %arg4[%c0_681, %c632_682, %c0_683], %1311 {strides = array<i32>} : memref<1x1024x128xf32, #tpu.memory_space<vmem>>, vector<1x8x128xf32>,
    %1312 = arith.subf %1255, %1291 : vector<8x128xf32>
    %c0_684 = arith.constant 0 : index
    %c760_685 = arith.constant 760 : index
    %c0_686 = arith.constant 0 : index
    %1313 = vector.load %arg4[%c0_684, %c760_685, %c0_686] : memref<1x1024x128xf32, #tpu.memory_space<vmem>>, vector<1x8x128xf32>
    %1314 = vector.shape_cast %1313 : vector<1x8x128xf32> to vector<8x128xf32>
    %1315 = vector.shape_cast %1312 : vector<8x128xf32> to vector<1x8x128xf32>
    tpu.vector_store %arg4[%c0_684, %c760_685, %c0_686], %1315 {strides = array<i32>} : memref<1x1024x128xf32, #tpu.memory_space<vmem>>, vector<1x8x128xf32>,
    %1316 = arith.subf %1257, %1291 : vector<8x128xf32>
    %c0_687 = arith.constant 0 : index
    %c888_688 = arith.constant 888 : index
    %c0_689 = arith.constant 0 : index
    %1317 = vector.load %arg4[%c0_687, %c888_688, %c0_689] : memref<1x1024x128xf32, #tpu.memory_space<vmem>>, vector<1x8x128xf32>
    %1318 = vector.shape_cast %1317 : vector<1x8x128xf32> to vector<8x128xf32>
    %1319 = vector.shape_cast %1316 : vector<8x128xf32> to vector<1x8x128xf32>
    tpu.vector_store %arg4[%c0_687, %c888_688, %c0_689], %1319 {strides = array<i32>} : memref<1x1024x128xf32, #tpu.memory_space<vmem>>, vector<1x8x128xf32>,
    %1320 = arith.subf %1259, %1291 : vector<8x128xf32>
    %c0_690 = arith.constant 0 : index
    %c1016_691 = arith.constant 1016 : index
    %c0_692 = arith.constant 0 : index
    %1321 = vector.load %arg4[%c0_690, %c1016_691, %c0_692] : memref<1x1024x128xf32, #tpu.memory_space<vmem>>, vector<1x8x128xf32>
    %1322 = vector.shape_cast %1321 : vector<1x8x128xf32> to vector<8x128xf32>
    %1323 = vector.shape_cast %1320 : vector<8x128xf32> to vector<1x8x128xf32>
    tpu.vector_store %arg4[%c0_690, %c1016_691, %c0_692], %1323 {strides = array<i32>} : memref<1x1024x128xf32, #tpu.memory_space<vmem>>, vector<1x8x128xf32>,
    return
  }
  func.func @transform_0(%arg0: i32) -> (i32, i32, i32) {
    %c0_i32 = arith.constant 0 : i32
    %c0_i32_0 = arith.constant 0 : i32
    %c0_i32_1 = arith.constant 0 : i32
    return %arg0, %c0_i32, %c0_i32_0 : i32, i32, i32
  }
  func.func @transform_1(%arg0: i32) -> (i32, i32) {
    %c0_i32 = arith.constant 0 : i32
    %c0_i32_0 = arith.constant 0 : i32
    %c0_i32_1 = arith.constant 0 : i32
    return %c0_i32, %c0_i32_0 : i32, i32
  }
  func.func @transform_2(%arg0: i32) -> (i32, i32) {
    %c0_i32 = arith.constant 0 : i32
    %c0_i32_0 = arith.constant 0 : i32
    %c0_i32_1 = arith.constant 0 : i32
    return %c0_i32, %c0_i32_0 : i32, i32
  }
  func.func @transform_3(%arg0: i32) -> (i32, i32, i32) {
    %c0_i32 = arith.constant 0 : i32
    %c0_i32_0 = arith.constant 0 : i32
    %c0_i32_1 = arith.constant 0 : i32
    return %arg0, %c0_i32, %c0_i32_0 : i32, i32, i32
  }
}

</mosaic_0001>

<bundles_post_ra>
// kernel: drn_seg_forward.2
= control target key start
LH: loop header
LB: loop body
LE: loop exit
PB: predicated region body
PF: predicated region fallthrough
CT: control target
= control target key end

     0   :  { %s381_s12 = smov 0   ;;  %s404_s0 = inlined_call_operand.vmem [shape: f32[2,32,256], index: 0, kind: input, shape index: {}]   ;;  %s405_s1 = inlined_call_operand.vmem [shape: f32[8,32], index: 1, kind: input, shape index: {}]   ;;  %s406_s2 = inlined_call_operand.vmem [shape: f32[8,1], index: 2, kind: input, shape index: {}]   ;;  %s407_s3 = inlined_call_operand.vmem [shape: f32[2,8,256], index: 3, kind: output, shape index: {}]  }
   0x1 LB: > { %s318_s13 = sadd.s32 4294967295, %s357_s12   ;;  %p322_p0 = scmp.ge.s32.totalorder %s357_s12, 1  ;;  %s357_s12 = sphi %s381_s12, %s13_s12  }
   0x2   : > { %p137_p1 = scmp.lt.s32.totalorder %s357_s12, 3 }
   0x4   : > { %p138_p2 = pnand %p322_p0, %p137_p1 }
   0x5   : > { %p161_p3 = scmp.lt.s32.totalorder (!%p138_p2), %s318_s13, 1  ;;  %v180_v0 = vld [vmem:[%s406_s2] sm:$0xff] (!%p138_p2)  ;;  %v359_v1 = vmov (!%p138_p2), 0.0   ;;  %v360_v2 = vmov (!%p138_p2), 0   ;;  %vm186_vm0 = vcmask (!%p138_p2), 261120  }
   0x6   : > { %141 = sbr.rel (%p138_p2) target bundleno = 243 (0xf3), region = 32  ;;  %254 = vmatprep.mubr.f32.mxu0 (!%p138_p2), %v359_v1  ;;  %350 = vset.pattern.permute.xlu0 (!%p138_p2), %v360_v2  ;;  %v171_v15 = vld [vmem:[%s405_s1] sm:$0xff] (!%p138_p2) }
   0x7   : > { %183 = vperm.xlu0 (!%p138_p2), %350, %v180_v0  }
   0xd   : > { %s409_s13 = smov (!%p161_p3, %s318_s13), 1 }
   0xe   : > { %s330_s16 = sshll.u32 %s409_s13, 6  ;;  %s331_s22 = sshll.u32 %s409_s13, 4 }
   0xf   : > { %s165_s19 = scalar_lea.vmem %s404_s0, %s330_s16  ;;  %s170_s25 = scalar_lea.vmem %s407_s3, %s331_s22 }
  0x10   : > { %v173_v3 = vld [vmem:[%s165_s19 + $0x8] sm:$0xff]  ;;  %v175_v4 = vld [vmem:[%s165_s19 + $0x18] sm:$0xff]  ;;  %v172_v5 = vld [vmem:[%s165_s19] sm:$0xff] }
  0x11   : > { %v332_v6 = vpack.c.bf16 %v175_v4, %v173_v3  ;;  %v174_v7 = vld [vmem:[%s165_s19 + $0x10] sm:$0xff]  ;;  %v177_v8 = vld [vmem:[%s165_s19 + $0x28] sm:$0xff]  ;;  %v179_v9 = vld [vmem:[%s165_s19 + $0x38] sm:$0xff] }
  0x12   : > { %v334_v10 = vpack.c.bf16 %v174_v7, %v172_v5  ;;  %v336_v11 = vpack.c.bf16 %v179_v9, %v177_v8  ;;  %v176_v12 = vld [vmem:[%s165_s19 + $0x20] sm:$0xff]  ;;  %v178_v13 = vld [vmem:[%s165_s19 + $0x30] sm:$0xff] }
  0x13   : > { %333 = vmatprep.subr.bf16.mxu0 %v332_v6  ;;  %v338_v14 = vpack.c.bf16 %v178_v13, %v176_v12 }
  0x14   : > { %335 = vmatpush1.bf16.msra.mxu0 %v334_v10 }
  0x15   : > { %337 = vmatprep.subr.bf16.mxu0 %v336_v11 }
  0x18   : > { %339 = vmatpush1.bf16.msra.mxu0 %v338_v14 }
  0x1b   : > { %327 = vmatmul.mubr.msk.f32.vlgmr.msra.gmra.mrb[0].mxu0 %vm186_vm0, %v171_v15 }
  0x86   : > { %v184_v16 = vpop.permute.xlu0 %183 }
  0xee   : > { %v256_v17 = vpop.f32.mrb[0].mxu0 }
  0xef   : > { %v257_v18 = vadd.f32 %v256_v17, %v184_v16  ;;  %v258_v19 = vpop.f32.mrb[1].mxu0 }
  0xf0   : > { %v259_v20 = vadd.f32 %v258_v19, %v184_v16 }
  0xf1   : > { %261 = vst [vmem:[%s170_s25] sm:$0xff] %v257_v18 }
  0xf2   : > { %262 = vst [vmem:[%s170_s25 + $0x8] sm:$0xff] %v259_v20 }
  0xf3 PF: > { %s13_s12 = sadd.s32 1, %s357_s12  }
  0xf4   : > { %p10_p4 = scmp.ge.s32.totalorder %s13_s12, 4  }
  0xf6   :  { %12 = sbr.rel (!%p10_p4) target bundleno = 1 (0x1), region = 62 }

// kernel: drn_seg_forward.3
= control target key start
LH: loop header
LB: loop body
LE: loop exit
PB: predicated region body
PF: predicated region fallthrough
CT: control target
= control target key end

     0   :  { %8 = vsyncpa [#allocation3], 0  ;;  %s6440_s0 = inlined_call_operand.vmem [shape: f32[2,128,16], index: 0, kind: input, shape index: {}]   ;;  %s6441_s1 = inlined_call_operand.vmem [shape: f32[16,128], index: 1, kind: input, shape index: {}]   ;;  %s6442_s2 = inlined_call_operand.vmem [shape: f32[1024,128], index: 2, kind: input, shape index: {}]   ;;  %s6443_s3 = inlined_call_operand.hbm [shape: f32[2,1024,128], index: 3, kind: output, shape index: {}]  }
   0x1   :  { %10 = vsyncpa [#allocation3 + $0x1], 0  ;;  %s4425_s12 = smov 0   ;;  %s4427_s13 = smov 0  }
   0x2   :  { %s4429_s14 = smov 0   ;;  %s4431_s15 = smov 0  }
   0x3 LB: > { %s4446_s16 = sadd.s32 4294967295, %s4400_s15   ;;  %s2913_s17 = sadd.s32 4294967294, %s4400_s15   ;;  %s4400_s15 = sphi %s4431_s15, %s6763_s15   ;;  %s4396_s14 = sphi %s4429_s14, %s6762_s14   ;;  %s4392_s13 = sphi %s4427_s13, %s6761_s13   ;;  %s4388_s12 = sphi %s4425_s12, %s6760_s12  }
   0x4   : > { %s4450_s18 = sadd.s32 1, %s4400_s15   ;;  %s91_s19 = sadd.s32 1, %s4396_s14 }
   0x5   : > { %s88_s20 = ssub.s32 %s4400_s15, %s4450_s18  ;;  %p101_p0 = scmp.ne.s32.totalorder %s4396_s14, %s4392_s13 }
   0x6   : > { %p89_p1 = scmp.eq.s32.totalorder %s88_s20, 0  ;;  %p102_p2 = scmp.eq.s32.totalorder %s4446_s16, 1 }
   0x7   : > { %p107_p3 = scmp.ne.s32.totalorder %s4392_s13, %s4388_s12  ;;  %p108_p4 = scmp.eq.s32.totalorder %s2913_s17, 1 }
   0x8   : > { %s4461_s21 = scalar_select %p89_p1, %s4396_s14, %s91_s19  }
   0x9   : > { %p4463_p5 = por %p102_p2, %p101_p0  ;;  %p4467_p6 = por %p108_p4, %p107_p3 }
   0xa   : > { %p2916_p7 = scmp.ge.s32.totalorder %s4400_s15, 1  ;;  %p140_p8 = scmp.lt.s32.totalorder %s4400_s15, 3 }
   0xc   : > { %p141_p9 = pnand %p2916_p7, %p140_p8 }
   0xe   : > { %144 = sbr.rel (%p141_p9) target bundleno = 816 (0x330), region = 32 }
  0x15   : > { %v185_v0 = vld [vmem:[%s6441_s1] sm:$0xff]  ;;  %v186_v1 = vld [vmem:[%s6441_s1 + $0x8] sm:$0xff]  ;;  %p164_p10 = scmp.lt.s32.totalorder %s4446_s16, 1  ;;  %vm187_vm0 = vcmask 130048   ;;  %v383_v47 = vld [vmem:[%s6442_s2 + $0x10] sm:$0xff]  ;;  %s161_s10 = sand.u32 1, %s4392_s13  }
  0x16   : > { %v3693_v2 = vpack.c.bf16 %v186_v1, %v185_v0  ;;  %v381_v19 = vld [vmem:[%s6442_s2] sm:$0xff]  ;;  %v382_v45 = vld [vmem:[%s6442_s2 + $0x8] sm:$0xff]  ;;  %v560_v48 = vld [vmem:[%s6442_s2 + $0x90] sm:$0xff]  ;;  %s2917_s11 = sshll.u32 %s161_s10, 10  ;;  %s2942_s19 = sshll.u32 %s4446_s16, 14 }
  0x17   : > { %s165_s28 = scalar_select %p164_p10, %s4446_s16, 1  ;;  %v558_v20 = vld [vmem:[%s6442_s2 + $0x80] sm:$0xff]  ;;  %3277 = vmatprep.mubr.f32.mxu1 %v381_v19  ;;  %v559_v46 = vld [vmem:[%s6442_s2 + $0x88] sm:$0xff]  ;;  %v384_v49 = vld [vmem:[%s6442_s2 + $0x18] sm:$0xff] }
  0x18   : > { %3694 = vmatprep.subr.bf16.mxu0 %v3693_v2  ;;  %v561_v50 = vld [vmem:[%s6442_s2 + $0x98] sm:$0xff]  ;;  %v385_v51 = vld [vmem:[%s6442_s2 + $0x20] sm:$0xff]  ;;  %v386_v53 = vld [vmem:[%s6442_s2 + $0x28] sm:$0xff]  ;;  %s5079_s17 = scalar_lea.vmem [#allocation2], %s2917_s11  ;;  %s6381_s16 = scalar_lea.hbm %s6443_s3, %s2942_s19 }
  0x19   : > { %3696 = vmatpush3.bf16.msra.mxu0 %v3693_v2  ;;  %s2941_s29 = sshll.u32 %s165_s28, 7  ;;  %v562_v52 = vld [vmem:[%s6442_s2 + $0xa0] sm:$0xff]  ;;  %v563_v54 = vld [vmem:[%s6442_s2 + $0xa8] sm:$0xff]  ;;  %v387_v55 = vld [vmem:[%s6442_s2 + $0x30] sm:$0xff]  ;;  %s2851_s20 = sshll.u32 %s5079_s17, 4  ;;  %s6383_s20 = int_to_ptr.vmem [resolvable:$true] %s2851_s20 }
  0x1a   : > { %s4484_s5 = scalar_lea.vmem %s6440_s0, %s2941_s29  ;;  %v564_v56 = vld [vmem:[%s6442_s2 + $0xb0] sm:$0xff]  ;;  %v388_v57 = vld [vmem:[%s6442_s2 + $0x38] sm:$0xff]  ;;  %v389_v59 = vld [vmem:[%s6442_s2 + $0x40] sm:$0xff]  ;;  %s6399_s26 = scalar_lea.sflag [#allocation3], %s161_s10 }
  0x1b   : > { %v169_v3 = vld [vmem:[%s4484_s5] sm:$0xff]  ;;  %v170_v4 = vld [vmem:[%s4484_s5 + $0x8] sm:$0xff]  ;;  %v171_v5 = vld [vmem:[%s4484_s5 + $0x10] sm:$0xff]  ;;  %s4338_s27 = scalar_lea.vmem %s6383_s20, 16384  ;;  %s4402_s28 = smov [#allocation2]  }
  0x1c   : > { %3221 = vmatprep.mubr.msk.f32.mxu0 %vm187_vm0, %v169_v3  ;;  %v172_v6 = vld [vmem:[%s4484_s5 + $0x18] sm:$0xff]  ;;  %v173_v7 = vld [vmem:[%s4484_s5 + $0x20] sm:$0xff]  ;;  %v174_v8 = vld [vmem:[%s4484_s5 + $0x28] sm:$0xff]  ;;  %p4339_p11 = scmp.ne.s32.totalorder %s6383_s20, %s4338_s27  ;;  %s4342_s29 = sshll.u32 %s4402_s28, 4  ;;  %s4343_s29 = int_to_ptr.vmem [resolvable:$false] %s4342_s29 }
  0x1d   : > { %3222 = vmatmul.mubr.msk.f32.vlgmr.msra.gmra.mrb[0].mxu0 %vm187_vm0, %v170_v4  ;;  %v175_v9 = vld [vmem:[%s4484_s5 + $0x30] sm:$0xff]  ;;  %v176_v10 = vld [vmem:[%s4484_s5 + $0x38] sm:$0xff]  ;;  %v177_v11 = vld [vmem:[%s4484_s5 + $0x40] sm:$0xff]  ;;  %s4344_s30 = scalar_lea.vmem %s4343_s29, 32768  ;;  %p4345_p0 = scmp.lt.s32.totalorder %s6383_s20, %s4343_s29 }
  0x1e   : > { %3224 = vmatprep.mubr.msk.f32.mxu0 %vm187_vm0, %v171_v5  ;;  %v178_v12 = vld [vmem:[%s4484_s5 + $0x48] sm:$0xff]  ;;  %v179_v13 = vld [vmem:[%s4484_s5 + $0x50] sm:$0xff]  ;;  %v180_v14 = vld [vmem:[%s4484_s5 + $0x58] sm:$0xff]  ;;  %p4340_p12 = pnand %p4339_p11, %p4463_p5  ;;  %p4346_p1 = scmp.lt.s32.totalorder %s4344_s30, %s4338_s27 }
  0x1f   : > { %v181_v15 = vld [vmem:[%s4484_s5 + $0x60] sm:$0xff]  ;;  %v182_v16 = vld [vmem:[%s4484_s5 + $0x68] sm:$0xff]  ;;  %v183_v17 = vld [vmem:[%s4484_s5 + $0x70] sm:$0xff] }
  0x20   : > { %v184_v18 = vld [vmem:[%s4484_s5 + $0x78] sm:$0xff]  ;;  %v566_v60 = vld [vmem:[%s6442_s2 + $0xc0] sm:$0xff]  ;;  %v390_v61 = vld [vmem:[%s6442_s2 + $0x48] sm:$0xff]  ;;  %p4341_p13 = pneg %p4340_p12  ;;  %p4347_p2 = por %p4346_p1, %p4345_p0 }
  0x21   : > { %3225 = vmatmul.mubr.msk.f32.gmra.mrb[2].mxu0 %vm187_vm0, %v172_v6  ;;  %v565_v58 = vld [vmem:[%s6442_s2 + $0xb8] sm:$0xff]  ;;  %v567_v62 = vld [vmem:[%s6442_s2 + $0xc8] sm:$0xff]  ;;  %v391_v63 = vld [vmem:[%s6442_s2 + $0x50] sm:$0xff] }
  0x22   : > { %3227 = vmatprep.mubr.msk.f32.mxu0 %vm187_vm0, %v173_v7  ;;  %v568_v0 = vld [vmem:[%s6442_s2 + $0xd0] sm:$0xff]  ;;  %v392_v1 = vld [vmem:[%s6442_s2 + $0x58] sm:$0xff]  ;;  %v393_v3 = vld [vmem:[%s6442_s2 + $0x60] sm:$0xff]  ;;  %p4348_p3 = pnand %p4347_p2, %p4341_p13 }
  0x23   : > { %v569_v2 = vld [vmem:[%s6442_s2 + $0xd8] sm:$0xff]  ;;  %v570_v4 = vld [vmem:[%s6442_s2 + $0xe0] sm:$0xff]  ;;  %v394_v5 = vld [vmem:[%s6442_s2 + $0x68] sm:$0xff] }
  0x24   : > { %v571_v6 = vld [vmem:[%s6442_s2 + $0xe8] sm:$0xff]  ;;  %v395_v7 = vld [vmem:[%s6442_s2 + $0x70] sm:$0xff]  ;;  %v739_v19 = vld [vmem:[%s6442_s2 + $0x120] sm:$0xff] }
  0x25   : > { %3228 = vmatmul.mubr.msk.f32.gmra.mrb[4].mxu0 %vm187_vm0, %v174_v8  ;;  %v572_v8 = vld [vmem:[%s6442_s2 + $0xf0] sm:$0xff] }
  0x26   : > { %3230 = vmatprep.mubr.msk.f32.mxu0 %vm187_vm0, %v175_v9  ;;  %v396_v9 = vld [vmem:[%s6442_s2 + $0x78] sm:$0xff] }
  0x29   : > { %3231 = vmatmul.mubr.msk.f32.gmra.mrb[6].mxu0 %vm187_vm0, %v176_v10  ;;  %v573_v10 = vld [vmem:[%s6442_s2 + $0xf8] sm:$0xff] }
  0x2a   : > { %3233 = vmatprep.mubr.msk.f32.mxu0 %vm187_vm0, %v177_v11  ;;  %v735_v11 = vld [vmem:[%s6442_s2 + $0x100] sm:$0xff] }
  0x2d   : > { %3234 = vmatmul.mubr.msk.f32.gmra.mrb[8].mxu0 %vm187_vm0, %v178_v12  ;;  %v912_v12 = vld [vmem:[%s6442_s2 + $0x180] sm:$0xff] }
  0x2e   : > { %3236 = vmatprep.mubr.msk.f32.mxu0 %vm187_vm0, %v179_v13  ;;  %v736_v13 = vld [vmem:[%s6442_s2 + $0x108] sm:$0xff] }
  0x31   : > { %3237 = vmatmul.mubr.msk.f32.gmra.mrb[10].mxu0 %vm187_vm0, %v180_v14  ;;  %v913_v14 = vld [vmem:[%s6442_s2 + $0x188] sm:$0xff] }
  0x32   : > { %3239 = vmatprep.mubr.msk.f32.mxu0 %vm187_vm0, %v181_v15  ;;  %v737_v15 = vld [vmem:[%s6442_s2 + $0x110] sm:$0xff] }
  0x35   : > { %3240 = vmatmul.mubr.msk.f32.gmra.mrb[12].mxu0 %vm187_vm0, %v182_v16  ;;  %v914_v16 = vld [vmem:[%s6442_s2 + $0x190] sm:$0xff] }
  0x36   : > { %3242 = vmatprep.mubr.msk.f32.mxu0 %vm187_vm0, %v183_v17  ;;  %v738_v17 = vld [vmem:[%s6442_s2 + $0x118] sm:$0xff] }
  0x39   : > { %3243 = vmatmul.mubr.msk.f32.gmra.mrb[14].mxu0 %vm187_vm0, %v184_v18  ;;  %v915_v18 = vld [vmem:[%s6442_s2 + $0x198] sm:$0xff] }
  0x3a   : > { %3333 = vmatprep.mubr.f32.mxu0 %v558_v20  ;;  %v916_v20 = vld [vmem:[%s6442_s2 + $0x1a0] sm:$0xff] }
  0xf0   : > { %v3223_v21 = vpop.f32.mrb[0].mxu0 }
  0xf1   : > { %v302_v22 = vpop.f32.mrb[1].mxu0 }
  0xf2   : > { %v4524_v23 = vpack.c.bf16 %v3223_v21, %v302_v22  ;;  %v740_v21 = vld [vmem:[%s6442_s2 + $0x128] sm:$0xff] }
  0xf3   : > { %v917_v22 = vld [vmem:[%s6442_s2 + $0x1a8] sm:$0xff] }
  0xf4   : > { %v3226_v24 = vpop.f32.mrb[2].mxu0  ;;  %3698 = vmatprep.subr.bf16.mxu1 %v4524_v23  ;;  %3730 = vmatprep.subr.bf16.mxu0 %v4524_v23 }
  0xf5   : > { %v312_v25 = vpop.f32.mrb[3].mxu0  ;;  %3700 = vmatpush3.bf16.msra.mxu1 %v4524_v23  ;;  %3732 = vmatpush3.bf16.msra.mxu0 %v4524_v23 }
  0xf6   : > { %v4530_v26 = vpack.c.bf16 %v3226_v24, %v312_v25  ;;  %v741_v24 = vld [vmem:[%s6442_s2 + $0x130] sm:$0xff] }
  0xf7   : > { %v918_v25 = vld [vmem:[%s6442_s2 + $0x1b0] sm:$0xff] }
  0xf8   : > { %v3229_v27 = vpop.f32.mrb[4].mxu0  ;;  %3702 = vmatprep.subr.bf16.mxu1 %v4530_v26  ;;  %3734 = vmatprep.subr.bf16.mxu0 %v4530_v26 }
  0xf9   : > { %v322_v28 = vpop.f32.mrb[5].mxu0  ;;  %3704 = vmatpush3.bf16.msra.mxu1 %v4530_v26  ;;  %3736 = vmatpush3.bf16.msra.mxu0 %v4530_v26 }
  0xfa   : > { %v4536_v29 = vpack.c.bf16 %v3229_v27, %v322_v28  ;;  %v742_v27 = vld [vmem:[%s6442_s2 + $0x138] sm:$0xff] }
  0xfb   : > { %v919_v28 = vld [vmem:[%s6442_s2 + $0x1b8] sm:$0xff] }
  0xfc   : > { %v3232_v30 = vpop.f32.mrb[6].mxu0  ;;  %3706 = vmatprep.subr.bf16.mxu1 %v4536_v29  ;;  %3738 = vmatprep.subr.bf16.mxu0 %v4536_v29 }
  0xfd   : > { %v332_v31 = vpop.f32.mrb[7].mxu0  ;;  %3708 = vmatpush3.bf16.msra.mxu1 %v4536_v29  ;;  %3740 = vmatpush3.bf16.msra.mxu0 %v4536_v29 }
  0xfe   : > { %v4542_v32 = vpack.c.bf16 %v3232_v30, %v332_v31  ;;  %v743_v30 = vld [vmem:[%s6442_s2 + $0x140] sm:$0xff] }
  0xff   : > { %v920_v31 = vld [vmem:[%s6442_s2 + $0x1c0] sm:$0xff] }
 0x100   : > { %v3235_v33 = vpop.f32.mrb[8].mxu0  ;;  %3710 = vmatprep.subr.bf16.mxu1 %v4542_v32  ;;  %3742 = vmatprep.subr.bf16.mxu0 %v4542_v32 }
 0x101   : > { %v342_v34 = vpop.f32.mrb[9].mxu0  ;;  %3712 = vmatpush3.bf16.msra.mxu1 %v4542_v32  ;;  %3744 = vmatpush3.bf16.msra.mxu0 %v4542_v32 }
 0x102   : > { %v4548_v35 = vpack.c.bf16 %v3235_v33, %v342_v34  ;;  %v744_v33 = vld [vmem:[%s6442_s2 + $0x148] sm:$0xff] }
 0x103   : > { %v921_v34 = vld [vmem:[%s6442_s2 + $0x1c8] sm:$0xff] }
 0x104   : > { %v3238_v36 = vpop.f32.mrb[10].mxu0  ;;  %3714 = vmatprep.subr.bf16.mxu1 %v4548_v35  ;;  %3746 = vmatprep.subr.bf16.mxu0 %v4548_v35 }
 0x105   : > { %v352_v37 = vpop.f32.mrb[11].mxu0  ;;  %3716 = vmatpush3.bf16.msra.mxu1 %v4548_v35  ;;  %3748 = vmatpush3.bf16.msra.mxu0 %v4548_v35 }
 0x106   : > { %v4554_v38 = vpack.c.bf16 %v3238_v36, %v352_v37  ;;  %v745_v36 = vld [vmem:[%s6442_s2 + $0x150] sm:$0xff] }
 0x107   : > { %v922_v37 = vld [vmem:[%s6442_s2 + $0x1d0] sm:$0xff] }
 0x108   : > { %v3241_v39 = vpop.f32.mrb[12].mxu0  ;;  %3718 = vmatprep.subr.bf16.mxu1 %v4554_v38  ;;  %3750 = vmatprep.subr.bf16.mxu0 %v4554_v38 }
 0x109   : > { %v362_v40 = vpop.f32.mrb[13].mxu0  ;;  %3720 = vmatpush3.bf16.msra.mxu1 %v4554_v38  ;;  %3752 = vmatpush3.bf16.msra.mxu0 %v4554_v38 }
 0x10a   : > { %v4560_v41 = vpack.c.bf16 %v3241_v39, %v362_v40  ;;  %v746_v39 = vld [vmem:[%s6442_s2 + $0x158] sm:$0xff] }
 0x10b   : > { %v923_v40 = vld [vmem:[%s6442_s2 + $0x1d8] sm:$0xff] }
 0x10c   : > { %v3244_v42 = vpop.f32.mrb[14].mxu0  ;;  %3722 = vmatprep.subr.bf16.mxu1 %v4560_v41  ;;  %3754 = vmatprep.subr.bf16.mxu0 %v4560_v41 }
 0x10d   : > { %v372_v43 = vpop.f32.mrb[15].mxu0  ;;  %3724 = vmatpush3.bf16.msra.mxu1 %v4560_v41  ;;  %3756 = vmatpush3.bf16.msra.mxu0 %v4560_v41 }
 0x10e   : > { %v4566_v44 = vpack.c.bf16 %v3244_v42, %v372_v43  ;;  %v747_v42 = vld [vmem:[%s6442_s2 + $0x160] sm:$0xff] }
 0x10f   : > { %v924_v43 = vld [vmem:[%s6442_s2 + $0x1e0] sm:$0xff] }
 0x110   : > { %3726 = vmatprep.subr.bf16.mxu1 %v4566_v44  ;;  %3758 = vmatprep.subr.bf16.mxu0 %v4566_v44 }
 0x111   : > { %3728 = vmatpush3.bf16.msra.mxu1 %v4566_v44  ;;  %3760 = vmatpush3.bf16.msra.mxu0 %v4566_v44 }
 0x112   : > { %3762 = vmatprep.subr.bf16.mxu1 %v4524_v23  ;;  %3794 = vmatprep.subr.bf16.mxu0 %v4524_v23 }
 0x114   : > { %3278 = vmatmul.mubr.f32.vlgmr.msra.gmra.mrb[0].mxu1 %v382_v45  ;;  %3334 = vmatmul.mubr.f32.vlgmr.msra.gmra.mrb[16].mxu0 %v559_v46  ;;  %v748_v45 = vld [vmem:[%s6442_s2 + $0x168] sm:$0xff] }
 0x115   : > { %3764 = vmatpush3.bf16.msra.mxu1 %v4524_v23  ;;  %3796 = vmatpush3.bf16.msra.mxu0 %v4524_v23  ;;  %v925_v46 = vld [vmem:[%s6442_s2 + $0x1e8] sm:$0xff] }
 0x116   : > { %3766 = vmatprep.subr.bf16.mxu1 %v4530_v26  ;;  %3798 = vmatprep.subr.bf16.mxu0 %v4530_v26 }
 0x117   : > { %3280 = vmatprep.mubr.f32.mxu1 %v383_v47  ;;  %3336 = vmatprep.mubr.f32.mxu0 %v560_v48  ;;  %v749_v47 = vld [vmem:[%s6442_s2 + $0x170] sm:$0xff] }
 0x118   : > { %3281 = vmatmul.mubr.f32.gmra.mrb[2].mxu1 %v384_v49  ;;  %3337 = vmatmul.mubr.f32.gmra.mrb[18].mxu0 %v561_v50  ;;  %v926_v48 = vld [vmem:[%s6442_s2 + $0x1f0] sm:$0xff]  ;;  %v750_v49 = vld [vmem:[%s6442_s2 + $0x178] sm:$0xff] }
 0x119   : > { %3768 = vmatpush3.bf16.msra.mxu1 %v4530_v26  ;;  %3800 = vmatpush3.bf16.msra.mxu0 %v4530_v26  ;;  %v927_v50 = vld [vmem:[%s6442_s2 + $0x1f8] sm:$0xff] }
 0x11a   : > { %3770 = vmatprep.subr.bf16.mxu1 %v4536_v29  ;;  %3802 = vmatprep.subr.bf16.mxu0 %v4536_v29 }
 0x11b   : > { %3283 = vmatprep.mubr.f32.mxu1 %v385_v51  ;;  %3339 = vmatprep.mubr.f32.mxu0 %v562_v52  ;;  %v1089_v51 = vld [vmem:[%s6442_s2 + $0x200] sm:$0xff] }
 0x11c   : > { %3284 = vmatmul.mubr.f32.gmra.mrb[4].mxu1 %v386_v53  ;;  %3340 = vmatmul.mubr.f32.gmra.mrb[20].mxu0 %v563_v54  ;;  %v1266_v52 = vld [vmem:[%s6442_s2 + $0x280] sm:$0xff]  ;;  %v1090_v53 = vld [vmem:[%s6442_s2 + $0x208] sm:$0xff] }
 0x11d   : > { %3772 = vmatpush3.bf16.msra.mxu1 %v4536_v29  ;;  %3804 = vmatpush3.bf16.msra.mxu0 %v4536_v29  ;;  %v1267_v54 = vld [vmem:[%s6442_s2 + $0x288] sm:$0xff] }
 0x11e   : > { %3774 = vmatprep.subr.bf16.mxu1 %v4542_v32  ;;  %3806 = vmatprep.subr.bf16.mxu0 %v4542_v32 }
 0x11f   : > { %3286 = vmatprep.mubr.f32.mxu1 %v387_v55  ;;  %3342 = vmatprep.mubr.f32.mxu0 %v564_v56  ;;  %v1091_v55 = vld [vmem:[%s6442_s2 + $0x210] sm:$0xff] }
 0x120   : > { %3287 = vmatmul.mubr.f32.gmra.mrb[6].mxu1 %v388_v57  ;;  %3343 = vmatmul.mubr.f32.gmra.mrb[22].mxu0 %v565_v58  ;;  %v1268_v56 = vld [vmem:[%s6442_s2 + $0x290] sm:$0xff]  ;;  %v1092_v57 = vld [vmem:[%s6442_s2 + $0x218] sm:$0xff] }
 0x121   : > { %3776 = vmatpush3.bf16.msra.mxu1 %v4542_v32  ;;  %3808 = vmatpush3.bf16.msra.mxu0 %v4542_v32  ;;  %v1269_v58 = vld [vmem:[%s6442_s2 + $0x298] sm:$0xff] }
 0x122   : > { %3778 = vmatprep.subr.bf16.mxu1 %v4548_v35  ;;  %3810 = vmatprep.subr.bf16.mxu0 %v4548_v35 }
 0x123   : > { %3289 = vmatprep.mubr.f32.mxu1 %v389_v59  ;;  %3345 = vmatprep.mubr.f32.mxu0 %v566_v60  ;;  %v1270_v59 = vld [vmem:[%s6442_s2 + $0x2a0] sm:$0xff]  ;;  %v1094_v60 = vld [vmem:[%s6442_s2 + $0x228] sm:$0xff] }
 0x124   : > { %3290 = vmatmul.mubr.f32.gmra.mrb[8].mxu1 %v390_v61  ;;  %3346 = vmatmul.mubr.f32.gmra.mrb[24].mxu0 %v567_v62  ;;  %v1271_v61 = vld [vmem:[%s6442_s2 + $0x2a8] sm:$0xff]  ;;  %v1272_v62 = vld [vmem:[%s6442_s2 + $0x2b0] sm:$0xff] }
 0x125   : > { %3780 = vmatpush3.bf16.msra.mxu1 %v4548_v35  ;;  %3812 = vmatpush3.bf16.msra.mxu0 %v4548_v35 }
 0x126   : > { %3782 = vmatprep.subr.bf16.mxu1 %v4554_v38  ;;  %3814 = vmatprep.subr.bf16.mxu0 %v4554_v38 }
 0x127   : > { %3292 = vmatprep.mubr.f32.mxu1 %v391_v63  ;;  %3348 = vmatprep.mubr.f32.mxu0 %v568_v0  ;;  %v1096_v63 = vld [vmem:[%s6442_s2 + $0x238] sm:$0xff] }
 0x128   : > { %3293 = vmatmul.mubr.f32.gmra.mrb[10].mxu1 %v392_v1  ;;  %3349 = vmatmul.mubr.f32.gmra.mrb[26].mxu0 %v569_v2  ;;  %v1273_v0 = vld [vmem:[%s6442_s2 + $0x2b8] sm:$0xff]  ;;  %v1274_v1 = vld [vmem:[%s6442_s2 + $0x2c0] sm:$0xff]  ;;  %v1098_v2 = vld [vmem:[%s6442_s2 + $0x248] sm:$0xff] }
 0x129   : > { %3784 = vmatpush3.bf16.msra.mxu1 %v4554_v38  ;;  %3816 = vmatpush3.bf16.msra.mxu0 %v4554_v38 }
 0x12a   : > { %3786 = vmatprep.subr.bf16.mxu1 %v4560_v41  ;;  %3818 = vmatprep.subr.bf16.mxu0 %v4560_v41 }
 0x12b   : > { %3295 = vmatprep.mubr.f32.mxu1 %v393_v3  ;;  %3351 = vmatprep.mubr.f32.mxu0 %v570_v4  ;;  %v1275_v3 = vld [vmem:[%s6442_s2 + $0x2c8] sm:$0xff]  ;;  %v1276_v4 = vld [vmem:[%s6442_s2 + $0x2d0] sm:$0xff] }
 0x12c   : > { %3296 = vmatmul.mubr.f32.gmra.mrb[12].mxu1 %v394_v5  ;;  %3352 = vmatmul.mubr.f32.gmra.mrb[28].mxu0 %v571_v6  ;;  %v1100_v5 = vld [vmem:[%s6442_s2 + $0x258] sm:$0xff] }
 0x12d   : > { %3788 = vmatpush3.bf16.msra.mxu1 %v4560_v41  ;;  %3820 = vmatpush3.bf16.msra.mxu0 %v4560_v41  ;;  %v1277_v6 = vld [vmem:[%s6442_s2 + $0x2d8] sm:$0xff] }
 0x12e   : > { %3790 = vmatprep.subr.bf16.mxu1 %v4566_v44  ;;  %3822 = vmatprep.subr.bf16.mxu0 %v4566_v44 }
 0x12f   : > { %3298 = vmatprep.mubr.f32.mxu1 %v395_v7  ;;  %3354 = vmatprep.mubr.f32.mxu0 %v572_v8  ;;  %v1278_v7 = vld [vmem:[%s6442_s2 + $0x2e0] sm:$0xff]  ;;  %v1102_v8 = vld [vmem:[%s6442_s2 + $0x268] sm:$0xff] }
 0x130   : > { %3299 = vmatmul.mubr.f32.gmra.mrb[14].mxu1 %v396_v9  ;;  %3355 = vmatmul.mubr.f32.gmra.mrb[30].mxu0 %v573_v10  ;;  %v1279_v9 = vld [vmem:[%s6442_s2 + $0x2e8] sm:$0xff]  ;;  %v1280_v10 = vld [vmem:[%s6442_s2 + $0x2f0] sm:$0xff] }
 0x131   : > { %3792 = vmatpush3.bf16.msra.mxu1 %v4566_v44  ;;  %3824 = vmatpush3.bf16.msra.mxu0 %v4566_v44 }
 0x132   : > { %3826 = vmatprep.subr.bf16.mxu1 %v4524_v23  ;;  %3858 = vmatprep.subr.bf16.mxu0 %v4524_v23 }
 0x133   : > { %3389 = vmatprep.mubr.f32.mxu1 %v735_v11  ;;  %3445 = vmatprep.mubr.f32.mxu0 %v912_v12  ;;  %v1104_v11 = vld [vmem:[%s6442_s2 + $0x278] sm:$0xff] }
 0x134   : > { %3390 = vmatmul.mubr.f32.vlgmr.msra.gmra.mrb[16].mxu1 %v736_v13  ;;  %3446 = vmatmul.mubr.f32.vlgmr.msra.gmra.mrb[32].mxu0 %v913_v14  ;;  %v1281_v12 = vld [vmem:[%s6442_s2 + $0x2f8] sm:$0xff]  ;;  %v1443_v13 = vld [vmem:[%s6442_s2 + $0x300] sm:$0xff]  ;;  %v1444_v14 = vld [vmem:[%s6442_s2 + $0x308] sm:$0xff] }
 0x135   : > { %3828 = vmatpush3.bf16.msra.mxu1 %v4524_v23  ;;  %3860 = vmatpush3.bf16.msra.mxu0 %v4524_v23 }
 0x136   : > { %3830 = vmatprep.subr.bf16.mxu1 %v4530_v26  ;;  %3862 = vmatprep.subr.bf16.mxu0 %v4530_v26 }
 0x137   : > { %3392 = vmatprep.mubr.f32.mxu1 %v737_v15  ;;  %3448 = vmatprep.mubr.f32.mxu0 %v914_v16  ;;  %v1621_v15 = vld [vmem:[%s6442_s2 + $0x388] sm:$0xff]  ;;  %v1445_v16 = vld [vmem:[%s6442_s2 + $0x310] sm:$0xff] }
 0x138   : > { %3393 = vmatmul.mubr.f32.gmra.mrb[18].mxu1 %v738_v17  ;;  %3449 = vmatmul.mubr.f32.gmra.mrb[34].mxu0 %v915_v18  ;;  %v1622_v17 = vld [vmem:[%s6442_s2 + $0x390] sm:$0xff]  ;;  %v1623_v18 = vld [vmem:[%s6442_s2 + $0x398] sm:$0xff] }
 0x139   : > { %3832 = vmatpush3.bf16.msra.mxu1 %v4530_v26  ;;  %3864 = vmatpush3.bf16.msra.mxu0 %v4530_v26 }
 0x13a   : > { %3834 = vmatprep.subr.bf16.mxu1 %v4536_v29  ;;  %3866 = vmatprep.subr.bf16.mxu0 %v4536_v29 }
 0x13b   : > { %3395 = vmatprep.mubr.f32.mxu1 %v739_v19  ;;  %3451 = vmatprep.mubr.f32.mxu0 %v916_v20  ;;  %v1447_v19 = vld [vmem:[%s6442_s2 + $0x320] sm:$0xff] }
 0x13c   : > { %3396 = vmatmul.mubr.f32.gmra.mrb[20].mxu1 %v740_v21  ;;  %3452 = vmatmul.mubr.f32.gmra.mrb[36].mxu0 %v917_v22  ;;  %v1624_v20 = vld [vmem:[%s6442_s2 + $0x3a0] sm:$0xff]  ;;  %v1448_v21 = vld [vmem:[%s6442_s2 + $0x328] sm:$0xff] }
 0x13d   : > { %3836 = vmatpush3.bf16.msra.mxu1 %v4536_v29  ;;  %3868 = vmatpush3.bf16.msra.mxu0 %v4536_v29  ;;  %v1625_v22 = vld [vmem:[%s6442_s2 + $0x3a8] sm:$0xff] }
 0x13e   : > { %3838 = vmatprep.subr.bf16.mxu1 %v4542_v32  ;;  %3870 = vmatprep.subr.bf16.mxu0 %v4542_v32 }
 0x13f   : > { %3398 = vmatprep.mubr.f32.mxu1 %v741_v24  ;;  %3454 = vmatprep.mubr.f32.mxu0 %v918_v25  ;;  %v1449_v24 = vld [vmem:[%s6442_s2 + $0x330] sm:$0xff] }
 0x140   : > { %3399 = vmatmul.mubr.f32.gmra.mrb[22].mxu1 %v742_v27  ;;  %3455 = vmatmul.mubr.f32.gmra.mrb[38].mxu0 %v919_v28  ;;  %v1626_v25 = vld [vmem:[%s6442_s2 + $0x3b0] sm:$0xff]  ;;  %v1450_v27 = vld [vmem:[%s6442_s2 + $0x338] sm:$0xff] }
 0x141   : > { %3840 = vmatpush3.bf16.msra.mxu1 %v4542_v32  ;;  %3872 = vmatpush3.bf16.msra.mxu0 %v4542_v32  ;;  %v1627_v28 = vld [vmem:[%s6442_s2 + $0x3b8] sm:$0xff] }
 0x142   : > { %3842 = vmatprep.subr.bf16.mxu1 %v4548_v35  ;;  %3874 = vmatprep.subr.bf16.mxu0 %v4548_v35 }
 0x143   : > { %3401 = vmatprep.mubr.f32.mxu1 %v743_v30  ;;  %3457 = vmatprep.mubr.f32.mxu0 %v920_v31  ;;  %v1451_v30 = vld [vmem:[%s6442_s2 + $0x340] sm:$0xff] }
 0x144   : > { %3402 = vmatmul.mubr.f32.gmra.mrb[24].mxu1 %v744_v33  ;;  %3458 = vmatmul.mubr.f32.gmra.mrb[40].mxu0 %v921_v34  ;;  %v1628_v31 = vld [vmem:[%s6442_s2 + $0x3c0] sm:$0xff]  ;;  %v1452_v33 = vld [vmem:[%s6442_s2 + $0x348] sm:$0xff] }
 0x145   : > { %3844 = vmatpush3.bf16.msra.mxu1 %v4548_v35  ;;  %3876 = vmatpush3.bf16.msra.mxu0 %v4548_v35  ;;  %v1629_v34 = vld [vmem:[%s6442_s2 + $0x3c8] sm:$0xff] }
 0x146   : > { %3846 = vmatprep.subr.bf16.mxu1 %v4554_v38  ;;  %3878 = vmatprep.subr.bf16.mxu0 %v4554_v38 }
 0x147   : > { %3404 = vmatprep.mubr.f32.mxu1 %v745_v36  ;;  %3460 = vmatprep.mubr.f32.mxu0 %v922_v37  ;;  %v1453_v36 = vld [vmem:[%s6442_s2 + $0x350] sm:$0xff] }
 0x148   : > { %3405 = vmatmul.mubr.f32.gmra.mrb[26].mxu1 %v746_v39  ;;  %3461 = vmatmul.mubr.f32.gmra.mrb[42].mxu0 %v923_v40  ;;  %v1630_v37 = vld [vmem:[%s6442_s2 + $0x3d0] sm:$0xff]  ;;  %v1454_v39 = vld [vmem:[%s6442_s2 + $0x358] sm:$0xff] }
 0x149   : > { %3848 = vmatpush3.bf16.msra.mxu1 %v4554_v38  ;;  %3880 = vmatpush3.bf16.msra.mxu0 %v4554_v38  ;;  %v1631_v40 = vld [vmem:[%s6442_s2 + $0x3d8] sm:$0xff] }
 0x14a   : > { %3850 = vmatprep.subr.bf16.mxu1 %v4560_v41  ;;  %3882 = vmatprep.subr.bf16.mxu0 %v4560_v41 }
 0x14b   : > { %3407 = vmatprep.mubr.f32.mxu1 %v747_v42  ;;  %3463 = vmatprep.mubr.f32.mxu0 %v924_v43  ;;  %v1455_v42 = vld [vmem:[%s6442_s2 + $0x360] sm:$0xff] }
 0x14c   : > { %3408 = vmatmul.mubr.f32.gmra.mrb[28].mxu1 %v748_v45  ;;  %3464 = vmatmul.mubr.f32.gmra.mrb[44].mxu0 %v925_v46  ;;  %v1632_v43 = vld [vmem:[%s6442_s2 + $0x3e0] sm:$0xff]  ;;  %v1456_v45 = vld [vmem:[%s6442_s2 + $0x368] sm:$0xff] }
 0x14d   : > { %3852 = vmatpush3.bf16.msra.mxu1 %v4560_v41  ;;  %3884 = vmatpush3.bf16.msra.mxu0 %v4560_v41  ;;  %v1633_v46 = vld [vmem:[%s6442_s2 + $0x3e8] sm:$0xff] }
 0x14e   : > { %3854 = vmatprep.subr.bf16.mxu1 %v4566_v44  ;;  %3886 = vmatprep.subr.bf16.mxu0 %v4566_v44 }
 0x14f   : > { %3410 = vmatprep.mubr.f32.mxu1 %v749_v47  ;;  %3466 = vmatprep.mubr.f32.mxu0 %v926_v48  ;;  %v1457_v47 = vld [vmem:[%s6442_s2 + $0x370] sm:$0xff] }
 0x150   : > { %3411 = vmatmul.mubr.f32.gmra.mrb[30].mxu1 %v750_v49  ;;  %3467 = vmatmul.mubr.f32.gmra.mrb[46].mxu0 %v927_v50  ;;  %v1634_v48 = vld [vmem:[%s6442_s2 + $0x3f0] sm:$0xff]  ;;  %v1458_v49 = vld [vmem:[%s6442_s2 + $0x378] sm:$0xff] }
 0x151   : > { %3856 = vmatpush3.bf16.msra.mxu1 %v4566_v44  ;;  %3888 = vmatpush3.bf16.msra.mxu0 %v4566_v44  ;;  %v1635_v50 = vld [vmem:[%s6442_s2 + $0x3f8] sm:$0xff] }
 0x152   : > { %3890 = vmatprep.subr.bf16.mxu1 %v4524_v23  ;;  %3922 = vmatprep.subr.bf16.mxu0 %v4524_v23 }
 0x153   : > { %3501 = vmatprep.mubr.f32.mxu1 %v1089_v51  ;;  %3557 = vmatprep.mubr.f32.mxu0 %v1266_v52 }
 0x154   : > { %3502 = vmatmul.mubr.f32.vlgmr.msra.gmra.mrb[32].mxu1 %v1090_v53  ;;  %3558 = vmatmul.mubr.f32.vlgmr.msra.gmra.mrb[48].mxu0 %v1267_v54 }
 0x155   : > { %3892 = vmatpush3.bf16.msra.mxu1 %v4524_v23  ;;  %3924 = vmatpush3.bf16.msra.mxu0 %v4524_v23  ;;  %v1093_v23 = vld [vmem:[%s6442_s2 + $0x220] sm:$0xff] }
 0x156   : > { %3894 = vmatprep.subr.bf16.mxu1 %v4530_v26  ;;  %3926 = vmatprep.subr.bf16.mxu0 %v4530_v26 }
 0x157   : > { %3504 = vmatprep.mubr.f32.mxu1 %v1091_v55  ;;  %3560 = vmatprep.mubr.f32.mxu0 %v1268_v56 }
 0x158   : > { %3505 = vmatmul.mubr.f32.gmra.mrb[34].mxu1 %v1092_v57  ;;  %3561 = vmatmul.mubr.f32.gmra.mrb[50].mxu0 %v1269_v58 }
 0x159   : > { %3896 = vmatpush3.bf16.msra.mxu1 %v4530_v26  ;;  %3928 = vmatpush3.bf16.msra.mxu0 %v4530_v26  ;;  %v1095_v26 = vld [vmem:[%s6442_s2 + $0x230] sm:$0xff] }
 0x15a   : > { %3898 = vmatprep.subr.bf16.mxu1 %v4536_v29  ;;  %3930 = vmatprep.subr.bf16.mxu0 %v4536_v29 }
 0x15b   : > { %3507 = vmatprep.mubr.f32.mxu1 %v1093_v23  ;;  %3563 = vmatprep.mubr.f32.mxu0 %v1270_v59 }
 0x15c   : > { %3508 = vmatmul.mubr.f32.gmra.mrb[36].mxu1 %v1094_v60  ;;  %3564 = vmatmul.mubr.f32.gmra.mrb[52].mxu0 %v1271_v61 }
 0x15d   : > { %3900 = vmatpush3.bf16.msra.mxu1 %v4536_v29  ;;  %3932 = vmatpush3.bf16.msra.mxu0 %v4536_v29  ;;  %v1097_v29 = vld [vmem:[%s6442_s2 + $0x240] sm:$0xff] }
 0x15e   : > { %3902 = vmatprep.subr.bf16.mxu1 %v4542_v32  ;;  %3934 = vmatprep.subr.bf16.mxu0 %v4542_v32 }
 0x15f   : > { %3510 = vmatprep.mubr.f32.mxu1 %v1095_v26  ;;  %3566 = vmatprep.mubr.f32.mxu0 %v1272_v62 }
 0x160   : > { %3511 = vmatmul.mubr.f32.gmra.mrb[38].mxu1 %v1096_v63  ;;  %3567 = vmatmul.mubr.f32.gmra.mrb[54].mxu0 %v1273_v0 }
 0x161   : > { %3904 = vmatpush3.bf16.msra.mxu1 %v4542_v32  ;;  %3936 = vmatpush3.bf16.msra.mxu0 %v4542_v32  ;;  %v1099_v32 = vld [vmem:[%s6442_s2 + $0x250] sm:$0xff] }
 0x162   : > { %3906 = vmatprep.subr.bf16.mxu1 %v4548_v35  ;;  %3938 = vmatprep.subr.bf16.mxu0 %v4548_v35 }
 0x163   : > { %3513 = vmatprep.mubr.f32.mxu1 %v1097_v29  ;;  %3569 = vmatprep.mubr.f32.mxu0 %v1274_v1 }
 0x164   : > { %3514 = vmatmul.mubr.f32.gmra.mrb[40].mxu1 %v1098_v2  ;;  %3570 = vmatmul.mubr.f32.gmra.mrb[56].mxu0 %v1275_v3 }
 0x165   : > { %3908 = vmatpush3.bf16.msra.mxu1 %v4548_v35  ;;  %3940 = vmatpush3.bf16.msra.mxu0 %v4548_v35  ;;  %v1101_v35 = vld [vmem:[%s6442_s2 + $0x260] sm:$0xff] }
 0x166   : > { %3910 = vmatprep.subr.bf16.mxu1 %v4554_v38  ;;  %3942 = vmatprep.subr.bf16.mxu0 %v4554_v38 }
 0x167   : > { %3516 = vmatprep.mubr.f32.mxu1 %v1099_v32  ;;  %3572 = vmatprep.mubr.f32.mxu0 %v1276_v4 }
 0x168   : > { %3517 = vmatmul.mubr.f32.gmra.mrb[42].mxu1 %v1100_v5  ;;  %3573 = vmatmul.mubr.f32.gmra.mrb[58].mxu0 %v1277_v6 }
 0x169   : > { %3912 = vmatpush3.bf16.msra.mxu1 %v4554_v38  ;;  %3944 = vmatpush3.bf16.msra.mxu0 %v4554_v38  ;;  %v1103_v38 = vld [vmem:[%s6442_s2 + $0x270] sm:$0xff] }
 0x16a   : > { %3914 = vmatprep.subr.bf16.mxu1 %v4560_v41  ;;  %3946 = vmatprep.subr.bf16.mxu0 %v4560_v41 }
 0x16b   : > { %3519 = vmatprep.mubr.f32.mxu1 %v1101_v35  ;;  %3575 = vmatprep.mubr.f32.mxu0 %v1278_v7 }
 0x16c   : > { %3520 = vmatmul.mubr.f32.gmra.mrb[44].mxu1 %v1102_v8  ;;  %3576 = vmatmul.mubr.f32.gmra.mrb[60].mxu0 %v1279_v9 }
 0x16d   : > { %3916 = vmatpush3.bf16.msra.mxu1 %v4560_v41  ;;  %3948 = vmatpush3.bf16.msra.mxu0 %v4560_v41  ;;  %v1620_v41 = vld [vmem:[%s6442_s2 + $0x380] sm:$0xff] }
 0x16e   : > { %3918 = vmatprep.subr.bf16.mxu1 %v4566_v44  ;;  %3950 = vmatprep.subr.bf16.mxu0 %v4566_v44 }
 0x16f   : > { %3522 = vmatprep.mubr.f32.mxu1 %v1103_v38  ;;  %3578 = vmatprep.mubr.f32.mxu0 %v1280_v10 }
 0x170   : > { %3523 = vmatmul.mubr.f32.gmra.mrb[46].mxu1 %v1104_v11  ;;  %3579 = vmatmul.mubr.f32.gmra.mrb[62].mxu0 %v1281_v12 }
 0x171   : > { %3920 = vmatpush3.bf16.msra.mxu1 %v4566_v44  ;;  %3952 = vmatpush3.bf16.msra.mxu0 %v4566_v44  ;;  %v1446_v44 = vld [vmem:[%s6442_s2 + $0x318] sm:$0xff] }
 0x172   : > { %3613 = vmatprep.mubr.f32.mxu1 %v1443_v13  ;;  %3669 = vmatprep.mubr.f32.mxu0 %v1620_v41 }
 0x174   : > { %3614 = vmatmul.mubr.f32.vlgmr.msra.gmra.mrb[48].mxu1 %v1444_v14  ;;  %3670 = vmatmul.mubr.f32.vlgmr.msra.gmra.mrb[64].mxu0 %v1621_v15 }
 0x175   : > { %3616 = vmatprep.mubr.f32.mxu1 %v1445_v16  ;;  %3672 = vmatprep.mubr.f32.mxu0 %v1622_v17 }
 0x178   : > { %3617 = vmatmul.mubr.f32.gmra.mrb[50].mxu1 %v1446_v44  ;;  %3673 = vmatmul.mubr.f32.gmra.mrb[66].mxu0 %v1623_v18 }
 0x179   : > { %3619 = vmatprep.mubr.f32.mxu1 %v1447_v19  ;;  %3675 = vmatprep.mubr.f32.mxu0 %v1624_v20 }
 0x17c   : > { %3620 = vmatmul.mubr.f32.gmra.mrb[52].mxu1 %v1448_v21  ;;  %3676 = vmatmul.mubr.f32.gmra.mrb[68].mxu0 %v1625_v22 }
 0x17d   : > { %3622 = vmatprep.mubr.f32.mxu1 %v1449_v24  ;;  %3678 = vmatprep.mubr.f32.mxu0 %v1626_v25 }
 0x180   : > { %3623 = vmatmul.mubr.f32.gmra.mrb[54].mxu1 %v1450_v27  ;;  %3679 = vmatmul.mubr.f32.gmra.mrb[70].mxu0 %v1627_v28 }
 0x181   : > { %3625 = vmatprep.mubr.f32.mxu1 %v1451_v30  ;;  %3681 = vmatprep.mubr.f32.mxu0 %v1628_v31 }
 0x184   : > { %3626 = vmatmul.mubr.f32.gmra.mrb[56].mxu1 %v1452_v33  ;;  %3682 = vmatmul.mubr.f32.gmra.mrb[72].mxu0 %v1629_v34 }
 0x185   : > { %3628 = vmatprep.mubr.f32.mxu1 %v1453_v36  ;;  %3684 = vmatprep.mubr.f32.mxu0 %v1630_v37 }
 0x188   : > { %3629 = vmatmul.mubr.f32.gmra.mrb[58].mxu1 %v1454_v39  ;;  %3685 = vmatmul.mubr.f32.gmra.mrb[74].mxu0 %v1631_v40 }
 0x189   : > { %3631 = vmatprep.mubr.f32.mxu1 %v1455_v42  ;;  %3687 = vmatprep.mubr.f32.mxu0 %v1632_v43 }
 0x18c   : > { %3632 = vmatmul.mubr.f32.gmra.mrb[60].mxu1 %v1456_v45  ;;  %3688 = vmatmul.mubr.f32.gmra.mrb[76].mxu0 %v1633_v46 }
 0x18d   : > { %3634 = vmatprep.mubr.f32.mxu1 %v1457_v47  ;;  %3690 = vmatprep.mubr.f32.mxu0 %v1634_v48 }
 0x190   : > { %3635 = vmatmul.mubr.f32.gmra.mrb[62].mxu1 %v1458_v49  ;;  %3691 = vmatmul.mubr.f32.gmra.mrb[78].mxu0 %v1635_v50 }
 0x1e7   : > { %v5046_v51 = vpop.f32.mrb[0].mxu1  ;;  %v5048_v52 = vpop.f32.mrb[16].mxu0 }
 0x1e8   : > { %6549 = vst [vmem:[#allocation5_spill] sm:$0xff] %v5048_v52  ;;  %v5051_v53 = vpop.f32.mrb[1].mxu1  ;;  %v5053_v54 = vpop.f32.mrb[17].mxu0  ;;  %v1870_v55 = vmax.f32 %v5046_v51, %v5048_v52 }
 0x1e9   : > { %6550 = vst [vmem:[#allocation6_spill] sm:$0xff] %v5051_v53  ;;  %v1805_v56 = vmax.f32 %v5051_v53, %v5053_v54 }
 0x1eb   : > { %v5061_v57 = vpop.f32.mrb[2].mxu1  ;;  %v5063_v58 = vpop.f32.mrb[18].mxu0 }
 0x1ec   : > { %6551 = vst [vmem:[#allocation7_spill] sm:$0xff] %v5061_v57  ;;  %6552 = vst [vmem:[#allocation8_spill] sm:$0xff] %v5063_v58  ;;  %v5065_v23 = vpop.f32.mrb[3].mxu1  ;;  %v5067_v59 = vpop.f32.mrb[19].mxu0  ;;  %v2000_v60 = vmax.f32 %v5061_v57, %v5063_v58 }
 0x1ed   : > { %6553 = vst [vmem:[#allocation9_spill] sm:$0xff] %v5065_v23  ;;  %6554 = vst [vmem:[#allocation10_spill] sm:$0xff] %v5067_v59  ;;  %v1935_v61 = vmax.f32 %v5065_v23, %v5067_v59 }
 0x1ef   : > { %v5073_v26 = vpop.f32.mrb[4].mxu1  ;;  %v5075_v62 = vpop.f32.mrb[20].mxu0 }
 0x1f0   : > { %6555 = vst [vmem:[#allocation11_spill] sm:$0xff] %v5073_v26  ;;  %6556 = vst [vmem:[#allocation12_spill] sm:$0xff] %v5075_v62  ;;  %v483_v63 = vpop.f32.mrb[5].mxu1  ;;  %v660_v0 = vpop.f32.mrb[21].mxu0  ;;  %v2130_v29 = vmax.f32 %v5073_v26, %v5075_v62 }
 0x1f1   : > { %546 = vst [vmem:[%s5079_s17 + $0x20] sm:$0xff] %v483_v63  ;;  %723 = vst [vmem:[%s5079_s17 + $0xa0] sm:$0xff] %v660_v0 }
 0x1f3   : > { %v3288_v1 = vpop.f32.mrb[6].mxu1  ;;  %v3344_v2 = vpop.f32.mrb[22].mxu0 }
 0x1f4   : > { %549 = vst [vmem:[%s5079_s17 + $0x38] sm:$0xff] %v3288_v1  ;;  %726 = vst [vmem:[%s5079_s17 + $0xb8] sm:$0xff] %v3344_v2  ;;  %v493_v3 = vpop.f32.mrb[7].mxu1  ;;  %v670_v32 = vpop.f32.mrb[23].mxu0 }
 0x1f5   : > { %548 = vst [vmem:[%s5079_s17 + $0x30] sm:$0xff] %v493_v3  ;;  %725 = vst [vmem:[%s5079_s17 + $0xb0] sm:$0xff] %v670_v32 }
 0x1f7   : > { %v3291_v4 = vpop.f32.mrb[8].mxu1  ;;  %v3347_v5 = vpop.f32.mrb[24].mxu0 }
 0x1f8   : > { %551 = vst [vmem:[%s5079_s17 + $0x48] sm:$0xff] %v3291_v4  ;;  %728 = vst [vmem:[%s5079_s17 + $0xc8] sm:$0xff] %v3347_v5  ;;  %v503_v6 = vpop.f32.mrb[9].mxu1  ;;  %v680_v35 = vpop.f32.mrb[25].mxu0  ;;  %v5133_v33 = vld [vmem:[%s5079_s17 + $0x20] sm:$0xff] }
 0x1f9   : > { %550 = vst [vmem:[%s5079_s17 + $0x40] sm:$0xff] %v503_v6  ;;  %727 = vst [vmem:[%s5079_s17 + $0xc0] sm:$0xff] %v680_v35  ;;  %v5136_v34 = vld [vmem:[%s5079_s17 + $0xa0] sm:$0xff] }
 0x1fa   : > { %6563 = vst [vmem:[#allocation19_spill] sm:$0xff] %v5133_v33  ;;  %6564 = vst [vmem:[#allocation20_spill] sm:$0xff] %v5136_v34  ;;  %v2065_v43 = vmax.f32 %v5133_v33, %v5136_v34 }
 0x1fb   : > { %v3294_v7 = vpop.f32.mrb[10].mxu1  ;;  %v3350_v8 = vpop.f32.mrb[26].mxu0 }
 0x1fc   : > { %553 = vst [vmem:[%s5079_s17 + $0x58] sm:$0xff] %v3294_v7  ;;  %730 = vst [vmem:[%s5079_s17 + $0xd8] sm:$0xff] %v3350_v8  ;;  %v513_v9 = vpop.f32.mrb[11].mxu1  ;;  %v690_v38 = vpop.f32.mrb[27].mxu0 }
 0x1fd   : > { %552 = vst [vmem:[%s5079_s17 + $0x50] sm:$0xff] %v513_v9  ;;  %729 = vst [vmem:[%s5079_s17 + $0xd0] sm:$0xff] %v690_v38 }
 0x1ff   : > { %v3297_v10 = vpop.f32.mrb[12].mxu1  ;;  %v3353_v11 = vpop.f32.mrb[28].mxu0 }
 0x200   : > { %555 = vst [vmem:[%s5079_s17 + $0x68] sm:$0xff] %v3297_v10  ;;  %732 = vst [vmem:[%s5079_s17 + $0xe8] sm:$0xff] %v3353_v11  ;;  %v523_v12 = vpop.f32.mrb[13].mxu1  ;;  %v700_v13 = vpop.f32.mrb[29].mxu0 }
 0x201   : > { %554 = vst [vmem:[%s5079_s17 + $0x60] sm:$0xff] %v523_v12  ;;  %731 = vst [vmem:[%s5079_s17 + $0xe0] sm:$0xff] %v700_v13 }
 0x203   : > { %v3300_v41 = vpop.f32.mrb[14].mxu1  ;;  %v3356_v14 = vpop.f32.mrb[30].mxu0 }
 0x204   : > { %557 = vst [vmem:[%s5079_s17 + $0x78] sm:$0xff] %v3300_v41  ;;  %734 = vst [vmem:[%s5079_s17 + $0xf8] sm:$0xff] %v3356_v14  ;;  %v533_v15 = vpop.f32.mrb[15].mxu1  ;;  %v710_v16 = vpop.f32.mrb[31].mxu0 }
 0x205   : > { %556 = vst [vmem:[%s5079_s17 + $0x70] sm:$0xff] %v533_v15  ;;  %733 = vst [vmem:[%s5079_s17 + $0xf0] sm:$0xff] %v710_v16  ;;  %v5212_v16 = vld [vmem:[%s5079_s17 + $0x38] sm:$0xff] }
 0x206   : > { %6573 = vst [vmem:[#allocation29_spill] sm:$0xff] %v5212_v16 }
 0x207   : > { %v5103_v17 = vpop.f32.mrb[16].mxu1  ;;  %v5105_v44 = vpop.f32.mrb[32].mxu0 }
 0x208   : > { %6557 = vst [vmem:[#allocation13_spill] sm:$0xff] %v5103_v17  ;;  %6558 = vst [vmem:[#allocation14_spill] sm:$0xff] %v5105_v44  ;;  %v5107_v18 = vpop.f32.mrb[17].mxu1  ;;  %v5109_v19 = vpop.f32.mrb[33].mxu0  ;;  %v5112_v20 = vmax.f32 %v1870_v55, %v5103_v17 }
 0x209   : > { %v5115_v21 = vmax.f32 %v1805_v56, %v5107_v18 }
 0x20a   : > { %v1872_v22 = vmax.f32 %v5112_v20, %v5105_v44 }
 0x20b   : > { %v5119_v24 = vpop.f32.mrb[18].mxu1  ;;  %v5121_v25 = vpop.f32.mrb[34].mxu0  ;;  %v1807_v27 = vmax.f32 %v5115_v21, %v5109_v19  ;;  %v2773_v33 = vld [vmem:[%s5079_s17 + $0xf8] sm:$0xff] }
 0x20c   : > { %6559 = vst [vmem:[#allocation15_spill] sm:$0xff] %v5119_v24  ;;  %6560 = vst [vmem:[#allocation16_spill] sm:$0xff] %v5121_v25  ;;  %v5125_v28 = vpop.f32.mrb[19].mxu1  ;;  %v5127_v30 = vpop.f32.mrb[35].mxu0  ;;  %v5130_v31 = vmax.f32 %v2000_v60, %v5119_v24 }
 0x20d   : > { %6561 = vst [vmem:[#allocation17_spill] sm:$0xff] %v5125_v28  ;;  %6562 = vst [vmem:[#allocation18_spill] sm:$0xff] %v5127_v30  ;;  %v5142_v36 = vmax.f32 %v1935_v61, %v5125_v28 }
 0x20e   : > { %v2002_v37 = vmax.f32 %v5130_v31, %v5121_v25 }
 0x20f   : > { %v5146_v39 = vpop.f32.mrb[20].mxu1  ;;  %v5148_v40 = vpop.f32.mrb[36].mxu0  ;;  %v1937_v42 = vmax.f32 %v5142_v36, %v5127_v30 }
 0x210   : > { %6565 = vst [vmem:[#allocation21_spill] sm:$0xff] %v5146_v39  ;;  %6566 = vst [vmem:[#allocation22_spill] sm:$0xff] %v5148_v40  ;;  %v5154_v45 = vpop.f32.mrb[21].mxu1  ;;  %v5156_v46 = vpop.f32.mrb[37].mxu0  ;;  %v5162_v47 = vmax.f32 %v2130_v29, %v5146_v39 }
 0x211   : > { %6567 = vst [vmem:[#allocation23_spill] sm:$0xff] %v5154_v45  ;;  %6568 = vst [vmem:[#allocation24_spill] sm:$0xff] %v5156_v46  ;;  %v5165_v48 = vmax.f32 %v2065_v43, %v5154_v45  ;;  %v5215_v43 = vld [vmem:[%s5079_s17 + $0xb8] sm:$0xff] }
 0x212   : > { %v2132_v49 = vmax.f32 %v5162_v47, %v5148_v40  ;;  %6574 = vst [vmem:[#allocation30_spill] sm:$0xff] %v5215_v43 }
 0x213   : > { %v3400_v50 = vpop.f32.mrb[22].mxu1  ;;  %v3456_v55 = vpop.f32.mrb[38].mxu0  ;;  %v2067_v56 = vmax.f32 %v5165_v48, %v5156_v46  ;;  %v2708_v46 = vld [vmem:[%s5079_s17 + $0xf0] sm:$0xff] }
 0x214   : > { %903 = vst [vmem:[%s5079_s17 + $0x138] sm:$0xff] %v3400_v50  ;;  %v847_v60 = vpop.f32.mrb[23].mxu1  ;;  %1080 = vst [vmem:[%s5079_s17 + $0x1b8] sm:$0xff] %v3456_v55  ;;  %v1024_v61 = vpop.f32.mrb[39].mxu0 }
 0x215   : > { %902 = vst [vmem:[%s5079_s17 + $0x130] sm:$0xff] %v847_v60  ;;  %1079 = vst [vmem:[%s5079_s17 + $0x1b0] sm:$0xff] %v1024_v61 }
 0x217   : > { %v3403_v63 = vpop.f32.mrb[24].mxu1  ;;  %v3459_v0 = vpop.f32.mrb[40].mxu0 }
 0x218   : > { %905 = vst [vmem:[%s5079_s17 + $0x148] sm:$0xff] %v3403_v63  ;;  %v857_v29 = vpop.f32.mrb[25].mxu1  ;;  %1082 = vst [vmem:[%s5079_s17 + $0x1c8] sm:$0xff] %v3459_v0  ;;  %v1034_v1 = vpop.f32.mrb[41].mxu0  ;;  %v2260_v63 = vmax.f32 %v5212_v16, %v5215_v43  ;;  %v2772_v43 = vld [vmem:[%s5079_s17 + $0x78] sm:$0xff] }
 0x219   : > { %904 = vst [vmem:[%s5079_s17 + $0x140] sm:$0xff] %v857_v29  ;;  %1081 = vst [vmem:[%s5079_s17 + $0x1c0] sm:$0xff] %v1034_v1  ;;  %v2448_v29 = vld [vmem:[%s5079_s17 + $0xd0] sm:$0xff] }
 0x21b   : > { %v3406_v2 = vpop.f32.mrb[26].mxu1  ;;  %v3462_v3 = vpop.f32.mrb[42].mxu0 }
 0x21c   : > { %907 = vst [vmem:[%s5079_s17 + $0x158] sm:$0xff] %v3406_v2  ;;  %v867_v32 = vpop.f32.mrb[27].mxu1  ;;  %1084 = vst [vmem:[%s5079_s17 + $0x1d8] sm:$0xff] %v3462_v3  ;;  %v1044_v4 = vpop.f32.mrb[43].mxu0  ;;  %v5256_v3 = vld [vmem:[%s5079_s17 + $0x1b8] sm:$0xff]  ;;  %v5330_v45 = vld [vmem:[%s5079_s17 + $0x1b0] sm:$0xff] }
 0x21d   : > { %906 = vst [vmem:[%s5079_s17 + $0x150] sm:$0xff] %v867_v32  ;;  %1083 = vst [vmem:[%s5079_s17 + $0x1d0] sm:$0xff] %v1044_v4 }
 0x21e   : > { %6582 = vst [vmem:[#allocation38_spill] sm:$0xff] %v5256_v3  ;;  %6588 = vst [vmem:[#allocation44_spill] sm:$0xff] %v5330_v45 }
 0x21f   : > { %v3409_v5 = vpop.f32.mrb[28].mxu1  ;;  %v3465_v6 = vpop.f32.mrb[44].mxu0 }
 0x220   : > { %909 = vst [vmem:[%s5079_s17 + $0x168] sm:$0xff] %v3409_v5  ;;  %v877_v35 = vpop.f32.mrb[29].mxu1  ;;  %1086 = vst [vmem:[%s5079_s17 + $0x1e8] sm:$0xff] %v3465_v6  ;;  %v1054_v7 = vpop.f32.mrb[45].mxu0  ;;  %v2513_v5 = vld [vmem:[%s5079_s17 + $0xd8] sm:$0xff] }
 0x221   : > { %908 = vst [vmem:[%s5079_s17 + $0x160] sm:$0xff] %v877_v35  ;;  %1085 = vst [vmem:[%s5079_s17 + $0x1e0] sm:$0xff] %v1054_v7 }
 0x223   : > { %v3412_v8 = vpop.f32.mrb[30].mxu1  ;;  %v3468_v9 = vpop.f32.mrb[46].mxu0 }
 0x224   : > { %911 = vst [vmem:[%s5079_s17 + $0x178] sm:$0xff] %v3412_v8  ;;  %v887_v38 = vpop.f32.mrb[31].mxu1  ;;  %1088 = vst [vmem:[%s5079_s17 + $0x1f8] sm:$0xff] %v3468_v9  ;;  %v1064_v10 = vpop.f32.mrb[47].mxu0  ;;  %v2317_v8 = vld [vmem:[%s5079_s17 + $0x40] sm:$0xff]  ;;  %v2449_v39 = vld [vmem:[%s5079_s17 + $0x150] sm:$0xff] }
 0x225   : > { %910 = vst [vmem:[%s5079_s17 + $0x170] sm:$0xff] %v887_v38  ;;  %1087 = vst [vmem:[%s5079_s17 + $0x1f0] sm:$0xff] %v1064_v10 }
 0x227   : > { %v5191_v11 = vpop.f32.mrb[32].mxu1  ;;  %v5193_v12 = vpop.f32.mrb[48].mxu0  ;;  %v2644_v62 = vld [vmem:[%s5079_s17 + $0x168] sm:$0xff] }
 0x228   : > { %6569 = vst [vmem:[#allocation25_spill] sm:$0xff] %v5191_v11  ;;  %6570 = vst [vmem:[#allocation26_spill] sm:$0xff] %v5193_v12  ;;  %v5195_v13 = vpop.f32.mrb[33].mxu1  ;;  %v5197_v41 = vpop.f32.mrb[49].mxu0  ;;  %v5203_v14 = vmax.f32 %v1872_v22, %v5191_v11  ;;  %v5226_v22 = vld [vmem:[%s5079_s17 + $0x138] sm:$0xff] }
 0x229   : > { %6571 = vst [vmem:[#allocation27_spill] sm:$0xff] %v5195_v13  ;;  %6572 = vst [vmem:[#allocation28_spill] sm:$0xff] %v5197_v41  ;;  %v5209_v15 = vmax.f32 %v1807_v27, %v5195_v13  ;;  %v2261_v1 = vmax.f32 %v2260_v63, %v5226_v22 }
 0x22a   : > { %6577 = vst [vmem:[#allocation33_spill] sm:$0xff] %v5226_v22  ;;  %v2577_v22 = vld [vmem:[%s5079_s17 + $0x60] sm:$0xff] }
 0x22b   : > { %v5219_v55 = vpop.f32.mrb[34].mxu1  ;;  %v5221_v60 = vpop.f32.mrb[50].mxu0  ;;  %v2262_v6 = vmax.f32 %v2261_v1, %v5256_v3  ;;  %v2774_v28 = vld [vmem:[%s5079_s17 + $0x178] sm:$0xff] }
 0x22c   : > { %6575 = vst [vmem:[#allocation31_spill] sm:$0xff] %v5219_v55  ;;  %6576 = vst [vmem:[#allocation32_spill] sm:$0xff] %v5221_v60  ;;  %v5228_v21 = vpop.f32.mrb[35].mxu1  ;;  %v5230_v27 = vpop.f32.mrb[51].mxu0  ;;  %v5236_v61 = vmax.f32 %v2002_v37, %v5219_v55  ;;  %v2447_v37 = vld [vmem:[%s5079_s17 + $0x50] sm:$0xff] }
 0x22d   : > { %6578 = vst [vmem:[#allocation34_spill] sm:$0xff] %v5228_v21  ;;  %6579 = vst [vmem:[#allocation35_spill] sm:$0xff] %v5230_v27  ;;  %v5244_v0 = vmax.f32 %v1937_v42, %v5228_v21  ;;  %v2455_v21 = vmax.f32 %v2447_v37, %v2448_v29  ;;  %v2780_v29 = vmax.f32 %v2772_v43, %v2773_v33  ;;  %v2709_v37 = vld [vmem:[%s5079_s17 + $0x170] sm:$0xff]  ;;  %v5361_v33 = vld [vmem:[%s5079_s17 + $0x1e8] sm:$0xff] }
 0x22f   : > { %v5249_v2 = vpop.f32.mrb[36].mxu1  ;;  %v5251_v31 = vpop.f32.mrb[52].mxu0  ;;  %v5365_v43 = vmax.f32 %v2780_v29, %v2774_v28  ;;  %v6599_v28 = vmax.f32 %v5203_v14, %v5193_v12 }
 0x230   : > { %6580 = vst [vmem:[#allocation36_spill] sm:$0xff] %v5249_v2  ;;  %6581 = vst [vmem:[#allocation37_spill] sm:$0xff] %v5251_v31  ;;  %v5258_v32 = vpop.f32.mrb[37].mxu1  ;;  %v5260_v36 = vpop.f32.mrb[53].mxu0  ;;  %v5266_v42 = vmax.f32 %v2132_v49, %v5249_v2  ;;  %v5309_v49 = vld [vmem:[%s5079_s17 + $0x130] sm:$0xff] }
 0x231   : > { %6583 = vst [vmem:[#allocation39_spill] sm:$0xff] %v5258_v32  ;;  %v5272_v4 = vmax.f32 %v2067_v56, %v5258_v32  ;;  %6587 = vst [vmem:[#allocation43_spill] sm:$0xff] %v5309_v49  ;;  %v2707_v32 = vld [vmem:[%s5079_s17 + $0x70] sm:$0xff] }
 0x232   : > { %6592 = vst [vmem:[#allocation48_spill] sm:$0xff] %v5365_v43 }
 0x233   : > { %v5277_v35 = vpop.f32.mrb[38].mxu1  ;;  %v5279_v47 = vpop.f32.mrb[54].mxu0 }
 0x234   : > { %6584 = vst [vmem:[#allocation40_spill] sm:$0xff] %v5277_v35  ;;  %v1201_v7 = vpop.f32.mrb[39].mxu1  ;;  %v1378_v48 = vpop.f32.mrb[55].mxu0  ;;  %v5284_v56 = vmax.f32 %v2262_v6, %v5277_v35  ;;  %v2578_v35 = vld [vmem:[%s5079_s17 + $0xe0] sm:$0xff] }
 0x235   : > { %1256 = vst [vmem:[%s5079_s17 + $0x230] sm:$0xff] %v1201_v7  ;;  %1433 = vst [vmem:[%s5079_s17 + $0x2b0] sm:$0xff] %v1378_v48 }
 0x237   : > { %v3515_v9 = vpop.f32.mrb[40].mxu1  ;;  %v3571_v38 = vpop.f32.mrb[56].mxu0 }
 0x238   : > { %1259 = vst [vmem:[%s5079_s17 + $0x248] sm:$0xff] %v3515_v9  ;;  %v1211_v10 = vpop.f32.mrb[41].mxu1  ;;  %1436 = vst [vmem:[%s5079_s17 + $0x2c8] sm:$0xff] %v3571_v38  ;;  %v1388_v63 = vpop.f32.mrb[57].mxu0  ;;  %v5297_v9 = vld [vmem:[%s5079_s17 + $0x30] sm:$0xff] }
 0x239   : > { %1258 = vst [vmem:[%s5079_s17 + $0x240] sm:$0xff] %v1211_v10  ;;  %1435 = vst [vmem:[%s5079_s17 + $0x2c0] sm:$0xff] %v1388_v63  ;;  %v5300_v38 = vld [vmem:[%s5079_s17 + $0xb0] sm:$0xff]  ;;  %v2382_v10 = vld [vmem:[%s5079_s17 + $0x48] sm:$0xff] }
 0x23a   : > { %6585 = vst [vmem:[#allocation41_spill] sm:$0xff] %v5297_v9  ;;  %6586 = vst [vmem:[#allocation42_spill] sm:$0xff] %v5300_v38  ;;  %v2383_v63 = vld [vmem:[%s5079_s17 + $0xc8] sm:$0xff]  ;;  %v2195_v3 = vmax.f32 %v5297_v9, %v5300_v38 }
 0x23b   : > { %v3518_v1 = vpop.f32.mrb[42].mxu1  ;;  %v3574_v6 = vpop.f32.mrb[58].mxu0  ;;  %v5334_v9 = vld [vmem:[%s5079_s17 + $0x148] sm:$0xff]  ;;  %v2390_v2 = vmax.f32 %v2382_v10, %v2383_v63 }
 0x23c   : > { %1261 = vst [vmem:[%s5079_s17 + $0x258] sm:$0xff] %v3518_v1  ;;  %v1221_v7 = vpop.f32.mrb[43].mxu1  ;;  %1438 = vst [vmem:[%s5079_s17 + $0x2d8] sm:$0xff] %v3574_v6  ;;  %v1398_v48 = vpop.f32.mrb[59].mxu0  ;;  %v2318_v1 = vld [vmem:[%s5079_s17 + $0xc0] sm:$0xff]  ;;  %v2512_v6 = vld [vmem:[%s5079_s17 + $0x58] sm:$0xff]  ;;  %v2196_v38 = vmax.f32 %v2195_v3, %v5309_v49  ;;  %v2585_v49 = vmax.f32 %v2577_v22, %v2578_v35 }
 0x23d   : > { %1260 = vst [vmem:[%s5079_s17 + $0x250] sm:$0xff] %v1221_v7  ;;  %1437 = vst [vmem:[%s5079_s17 + $0x2d0] sm:$0xff] %v1398_v48  ;;  %v2642_v7 = vld [vmem:[%s5079_s17 + $0x68] sm:$0xff]  ;;  %v2325_v40 = vmax.f32 %v2317_v8, %v2318_v1  ;;  %v2579_v3 = vld [vmem:[%s5079_s17 + $0x160] sm:$0xff] }
 0x23e   : > { %v2643_v48 = vld [vmem:[%s5079_s17 + $0xe8] sm:$0xff]  ;;  %6589 = vst [vmem:[#allocation45_spill] sm:$0xff] %v5334_v9  ;;  %v5345_v63 = vld [vmem:[%s5079_s17 + $0x230] sm:$0xff]  ;;  %v2320_v35 = vld [vmem:[%s5079_s17 + $0x1c0] sm:$0xff] }
 0x23f   : > { %v3521_v20 = vpop.f32.mrb[44].mxu1  ;;  %v3577_v50 = vpop.f32.mrb[60].mxu0  ;;  %v2650_v30 = vmax.f32 %v2642_v7, %v2643_v48  ;;  %6590 = vst [vmem:[#allocation46_spill] sm:$0xff] %v5345_v63  ;;  %v5353_v22 = vld [vmem:[%s5079_s17 + $0x1c8] sm:$0xff]  ;;  %v2456_v48 = vmax.f32 %v2455_v21, %v2449_v39  ;;  %v5381_v39 = vld [vmem:[%s5079_s17 + $0x1f8] sm:$0xff] }
 0x240   : > { %1263 = vst [vmem:[%s5079_s17 + $0x268] sm:$0xff] %v3521_v20  ;;  %v1231_v16 = vpop.f32.mrb[45].mxu1  ;;  %1440 = vst [vmem:[%s5079_s17 + $0x2e8] sm:$0xff] %v3577_v50  ;;  %v1408_v34 = vpop.f32.mrb[61].mxu0  ;;  %v2319_v20 = vld [vmem:[%s5079_s17 + $0x140] sm:$0xff]  ;;  %v2514_v50 = vld [vmem:[%s5079_s17 + $0x158] sm:$0xff] }
 0x241   : > { %1262 = vst [vmem:[%s5079_s17 + $0x260] sm:$0xff] %v1231_v16  ;;  %1439 = vst [vmem:[%s5079_s17 + $0x2e0] sm:$0xff] %v1408_v34  ;;  %v2520_v34 = vmax.f32 %v2512_v6, %v2513_v5  ;;  %v2391_v5 = vmax.f32 %v2390_v2, %v5334_v9  ;;  %v2326_v1 = vmax.f32 %v2325_v40, %v2319_v20  ;;  %v2515_v2 = vld [vmem:[%s5079_s17 + $0x1d8] sm:$0xff]  ;;  %v2450_v40 = vld [vmem:[%s5079_s17 + $0x1d0] sm:$0xff] }
 0x242   : > { %v2715_v6 = vmax.f32 %v2707_v32, %v2708_v46  ;;  %6591 = vst [vmem:[#allocation47_spill] sm:$0xff] %v5353_v22  ;;  %v5363_v46 = vmax.f32 %v2585_v49, %v2579_v3  ;;  %6596 = vst [vmem:[#allocation52_spill] sm:$0xff] %v5381_v39  ;;  %v5394_v3 = vld [vmem:[%s5079_s17 + $0x2b0] sm:$0xff] }
 0x243   : > { %v3524_v26 = vpop.f32.mrb[46].mxu1  ;;  %v3580_v16 = vpop.f32.mrb[62].mxu0  ;;  %v2521_v7 = vmax.f32 %v2520_v34, %v2514_v50  ;;  %v2327_v29 = vmax.f32 %v2326_v1, %v2320_v35 }
 0x244   : > { %1265 = vst [vmem:[%s5079_s17 + $0x278] sm:$0xff] %v3524_v26  ;;  %v1241_v10 = vpop.f32.mrb[47].mxu1  ;;  %1442 = vst [vmem:[%s5079_s17 + $0x2f8] sm:$0xff] %v3580_v16  ;;  %v1418_v8 = vpop.f32.mrb[63].mxu0  ;;  %v2197_v26 = vmax.f32 %v2196_v38, %v5330_v45  ;;  %v5356_v16 = vmax.f32 %v2650_v30, %v2644_v62  ;;  %v5375_v62 = vld [vmem:[%s5079_s17 + $0x248] sm:$0xff]  ;;  %v5378_v30 = vld [vmem:[%s5079_s17 + $0x1e0] sm:$0xff]  ;;  %v5383_v21 = vmax.f32 %v2715_v6, %v2709_v37 }
 0x245   : > { %1264 = vst [vmem:[%s5079_s17 + $0x270] sm:$0xff] %v1241_v10  ;;  %1441 = vst [vmem:[%s5079_s17 + $0x2f0] sm:$0xff] %v1418_v8  ;;  %v2392_v10 = vmax.f32 %v2391_v5, %v5353_v22  ;;  %v2321_v8 = vld [vmem:[%s5079_s17 + $0x240] sm:$0xff]  ;;  %v6602_v37 = vmax.f32 %v5209_v15, %v5197_v41  ;;  %v2522_v9 = vmax.f32 %v2521_v7, %v2515_v2  ;;  %v2451_v43 = vld [vmem:[%s5079_s17 + $0x250] sm:$0xff] }
 0x246   : > { %v5372_v20 = vmax.f32 %v2197_v26, %v5345_v63  ;;  %6595 = vst [vmem:[#allocation51_spill] sm:$0xff] %v5375_v62  ;;  %6597 = vst [vmem:[#allocation53_spill] sm:$0xff] %v5383_v21  ;;  %v5399_v26 = vld [vmem:[%s5079_s17 + $0x1f0] sm:$0xff]  ;;  %v2457_v63 = vmax.f32 %v2456_v48, %v2450_v40  ;;  %v5427_v40 = vld [vmem:[%s5079_s17 + $0x2c8] sm:$0xff] }
 0x247   : > { %v5367_v32 = vpop.f32.mrb[48].mxu1  ;;  %v5369_v38 = vpop.f32.mrb[64].mxu0  ;;  %6601 = vst [vmem:[#allocation56_spill] sm:$0xff] %v5399_v26  ;;  %v5411_v5 = vmax.f32 %v2392_v10, %v5375_v62  ;;  %6604 = vst [vmem:[#allocation58_spill] sm:$0xff] %v5427_v40 }
 0x248   : > { %6593 = vst [vmem:[#allocation49_spill] sm:$0xff] %v5367_v32  ;;  %6594 = vst [vmem:[#allocation50_spill] sm:$0xff] %v5369_v38  ;;  %v5385_v49 = vpop.f32.mrb[49].mxu1  ;;  %v1875_v50 = vmax.f32 %v6599_v28, %v5367_v32  ;;  %v5391_v34 = vpop.f32.mrb[65].mxu0 }
 0x249   : > { %6598 = vst [vmem:[#allocation54_spill] sm:$0xff] %v5385_v49  ;;  %6600 = vst [vmem:[#allocation55_spill] sm:$0xff] %v5391_v34  ;;  %v1810_v6 = vmax.f32 %v6602_v37, %v5385_v49 }
 0x24a   : > { %v5408_v28 = vmax.f32 %v1875_v50, %v5369_v38  ;;  %6603 = vst [vmem:[#allocation57_spill] sm:$0xff] %v5411_v5  ;;  %v5429_v50 = vmax.f32 %v2327_v29, %v2321_v8  ;;  %v5446_v8 = vld [vmem:[%s5079_s17 + $0x2c0] sm:$0xff]  ;;  %v2516_v29 = vld [vmem:[%s5079_s17 + $0x258] sm:$0xff] }
 0x24b   : > { %v5418_v35 = vmax.f32 %v1810_v6, %v5391_v34  ;;  %v5420_v7 = vpop.f32.mrb[50].mxu1  ;;  %v5422_v48 = vpop.f32.mrb[66].mxu0  ;;  %6608 = vst [vmem:[#allocation62_spill] sm:$0xff] %v5446_v8 }
 0x24c   : > { %6605 = vst [vmem:[#allocation59_spill] sm:$0xff] %v5429_v50  ;;  %v1877_v37 = vsub.f32 %v5046_v51, %v5408_v28  ;;  %v1880_v6 = vsub.f32 %v5048_v52, %v5408_v28  ;;  %v1884_v15 = vsub.f32 %v5103_v17, %v5408_v28  ;;  %v1888_v2 = vsub.f32 %v5105_v44, %v5408_v28  ;;  %v5441_v1 = vpop.f32.mrb[51].mxu1  ;;  %v5443_v14 = vpop.f32.mrb[67].mxu0 }
 0x24d   : > { %6606 = vst [vmem:[#allocation60_spill] sm:$0xff] %v5441_v1  ;;  %6607 = vst [vmem:[#allocation61_spill] sm:$0xff] %v5443_v14  ;;  %v1892_v10 = vsub.f32 %v5191_v11, %v5408_v28  ;;  %v1896_v26 = vsub.f32 %v5193_v12, %v5408_v28  ;;  %v1900_v21 = vsub.f32 %v5367_v32, %v5408_v28 }
 0x24e   : > { %v1904_v39 = vsub.f32 %v5369_v38, %v5408_v28  ;;  %v1878_v62 = vmul.f32 1.442695, %v1877_v37  ;;  %v1881_v22 = vmul.f32 1.442695, %v1880_v6  ;;  %v1812_v45 = vsub.f32 %v5051_v53, %v5418_v35 }
 0x24f   : > { %v1885_v17 = vmul.f32 1.442695, %v1884_v15  ;;  %v1815_v11 = vsub.f32 %v5053_v54, %v5418_v35  ;;  %v5466_v32 = vmax.f32 %v2522_v9, %v2516_v29  ;;  %v1889_v38 = vmul.f32 1.442695, %v1888_v2  ;;  %v5474_v44 = vpop.f32.mrb[52].mxu1  ;;  %v5476_v40 = vpop.f32.mrb[68].mxu0 }
 0x250   : > { %3994 = vpow2.f32 %v1878_v62  ;;  %v1893_v52 = vmul.f32 1.442695, %v1892_v10  ;;  %v5468_v37 = vmax.f32 %v2457_v63, %v2451_v43  ;;  %v1897_v6 = vmul.f32 1.442695, %v1896_v26  ;;  %6610 = vst [vmem:[#allocation64_spill] sm:$0xff] %v5474_v44  ;;  %6611 = vst [vmem:[#allocation65_spill] sm:$0xff] %v5476_v40 }
 0x251   : > { %3996 = vpow2.f32 %v1881_v22  ;;  %v1819_v53 = vsub.f32 %v5107_v18, %v5418_v35  ;;  %v1823_v15 = vsub.f32 %v5109_v19, %v5418_v35  ;;  %v1901_v12 = vmul.f32 1.442695, %v1900_v21  ;;  %v5484_v43 = vpop.f32.mrb[53].mxu1  ;;  %v5486_v62 = vpop.f32.mrb[69].mxu0 }
 0x252   : > { %6609 = vst [vmem:[#allocation63_spill] sm:$0xff] %v5468_v37  ;;  %v1827_v9 = vsub.f32 %v5195_v13, %v5418_v35  ;;  %v1831_v63 = vsub.f32 %v5197_v41, %v5418_v35  ;;  %v1835_v22 = vsub.f32 %v5385_v49, %v5418_v35  ;;  %3998 = vpow2.f32 %v1885_v17 }
 0x253   : > { %v1905_v26 = vmul.f32 1.442695, %v1904_v39  ;;  %v1813_v2 = vmul.f32 1.442695, %v1812_v45  ;;  %v1839_v10 = vsub.f32 %v5391_v34, %v5418_v35  ;;  %v5490_v21 = vpop.f32.mrb[54].mxu1  ;;  %v5492_v29 = vpop.f32.mrb[70].mxu0  ;;  %4000 = vpow2.f32 %v1889_v38 }
 0x254   : > { %v1816_v8 = vmul.f32 1.442695, %v1815_v11  ;;  %v1820_v50 = vmul.f32 1.442695, %v1819_v53  ;;  %v1824_v5 = vmul.f32 1.442695, %v1823_v15  ;;  %4002 = vpow2.f32 %v1893_v52 }
 0x255   : > { %v1828_v49 = vmul.f32 1.442695, %v1827_v9  ;;  %v6612_v41 = vmax.f32 %v5236_v61, %v5221_v60  ;;  %v6613_v45 = vmax.f32 %v5244_v0, %v5230_v27  ;;  %v5502_v34 = vpop.f32.mrb[55].mxu1  ;;  %v5504_v13 = vpop.f32.mrb[71].mxu0  ;;  %4004 = vpow2.f32 %v1897_v6 }
 0x256   : > { %v6614_v52 = vmax.f32 %v5266_v42, %v5251_v31  ;;  %v6615_v11 = vmax.f32 %v5272_v4, %v5260_v36  ;;  %v6616_v61 = vmax.f32 %v5284_v56, %v5279_v47  ;;  %4006 = vpow2.f32 %v1901_v12 }
 0x257   : > { %v2005_v17 = vmax.f32 %v6612_v41, %v5420_v7  ;;  %v1940_v39 = vmax.f32 %v6613_v45, %v5441_v1  ;;  %v1832_v38 = vmul.f32 1.442695, %v1831_v63  ;;  %v5524_v15 = vpop.f32.mrb[56].mxu1  ;;  %v5526_v9 = vpop.f32.mrb[72].mxu0  ;;  %4008 = vpow2.f32 %v1813_v2 }
 0x258   : > { %v2135_v53 = vmax.f32 %v6614_v52, %v5474_v44  ;;  %v2070_v41 = vmax.f32 %v6615_v11, %v5484_v43  ;;  %v2265_v0 = vmax.f32 %v6616_v61, %v5490_v21  ;;  %6617 = vst [vmem:[#allocation66_spill] sm:$0xff] %v5524_v15  ;;  %6618 = vst [vmem:[#allocation67_spill] sm:$0xff] %v5526_v9  ;;  %v5537_v56 = vpop.f32.mrb[57].mxu1  ;;  %v5539_v63 = vpop.f32.mrb[73].mxu0  ;;  %4010 = vpow2.f32 %v1816_v8  ;;  %v2646_v15 = vld [vmem:[%s5079_s17 + $0x268] sm:$0xff]  ;;  %v6625_v9 = vld [vmem:[#allocation17_spill] sm:$0xff] }
 0x259   : > { %v5519_v6 = vmax.f32 %v2005_v17, %v5422_v48  ;;  %v5522_v42 = vmax.f32 %v1940_v39, %v5443_v14  ;;  %6619 = vst [vmem:[#allocation68_spill] sm:$0xff] %v5537_v56  ;;  %6620 = vst [vmem:[#allocation69_spill] sm:$0xff] %v5539_v63  ;;  %v5542_v17 = vld [vmem:[%s5079_s17 + $0x2d8] sm:$0xff]  ;;  %v5545_v39 = vld [vmem:[%s5079_s17 + $0x2d0] sm:$0xff]  ;;  %4012 = vpow2.f32 %v1905_v26  ;;  %v1836_v63 = vmul.f32 1.442695, %v1835_v22 }
 0x25a   : > { %v5529_v4 = vmax.f32 %v2135_v53, %v5476_v40  ;;  %v5532_v45 = vmax.f32 %v2070_v41, %v5486_v62  ;;  %v5535_v12 = vmax.f32 %v2265_v0, %v5492_v29  ;;  %6621 = vst [vmem:[#allocation70_spill] sm:$0xff] %v5545_v39  ;;  %v3995_v11 = vpop.eup %3994  ;;  %4014 = vpow2.f32 %v1820_v50 }
 0x25b   : > { %v2007_v2 = vsub.f32 %v5061_v57, %v5519_v6  ;;  %v2010_v52 = vsub.f32 %v5063_v58, %v5519_v6  ;;  %v2014_v53 = vsub.f32 %v5119_v24, %v5519_v6  ;;  %v2018_v41 = vsub.f32 %v5121_v25, %v5519_v6  ;;  %v3997_v0 = vpop.eup %3996  ;;  %v5564_v58 = vpop.f32.mrb[58].mxu1 }
 0x25c   : > { %v2022_v61 = vsub.f32 %v5219_v55, %v5519_v6  ;;  %v2026_v8 = vsub.f32 %v5221_v60, %v5519_v6  ;;  %v1883_v26 = vadd.f32 %v3997_v0, %v3995_v11  ;;  %4016 = vpow2.f32 %v1824_v5  ;;  %v5566_v55 = vpop.f32.mrb[74].mxu0  ;;  %v3999_v57 = vpop.eup %3998 }
 0x25d   : > { %v1840_v24 = vmul.f32 1.442695, %v1839_v10  ;;  %v2008_v25 = vmul.f32 1.442695, %v2007_v2  ;;  %6622 = vst [vmem:[#allocation71_spill] sm:$0xff] %v5566_v55  ;;  %4018 = vpow2.f32 %v1828_v49  ;;  %v2030_v50 = vsub.f32 %v5420_v7, %v5519_v6  ;;  %v5572_v56 = vpop.f32.mrb[59].mxu1  ;;  %v4001_v5 = vpop.eup %4000 }
 0x25e   : > { %v2011_v60 = vmul.f32 1.442695, %v2010_v52  ;;  %6623 = vst [vmem:[#allocation72_spill] sm:$0xff] %v5572_v56  ;;  %v5574_v11 = vpop.f32.mrb[75].mxu0  ;;  %v1887_v10 = vadd.f32 %v3999_v57, %v1883_v26  ;;  %4020 = vpow2.f32 %v1832_v38  ;;  %v1942_v2 = vsub.f32 %v5065_v23, %v5522_v42  ;;  %v4003_v52 = vpop.eup %4002  ;;  %v2581_v26 = vld [vmem:[%s5079_s17 + $0x260] sm:$0xff] }
 0x25f   : > { %6624 = vst [vmem:[#allocation73_spill] sm:$0xff] %v5574_v11  ;;  %v1945_v49 = vsub.f32 %v5067_v59, %v5522_v42  ;;  %4022 = vpow2.f32 %v1836_v63  ;;  %v2015_v0 = vmul.f32 1.442695, %v2014_v53  ;;  %v1949_v55 = vsub.f32 %v6625_v9, %v5522_v42  ;;  %v5582_v22 = vpop.f32.mrb[60].mxu1  ;;  %v5584_v39 = vpop.f32.mrb[76].mxu0 }
 0x260   : > { %6626 = vst [vmem:[#allocation74_spill] sm:$0xff] %v5582_v22  ;;  %6627 = vst [vmem:[#allocation75_spill] sm:$0xff] %v5584_v39  ;;  %v6628_v57 = vmax.f32 %v5356_v16, %v5361_v33  ;;  %v4005_v11 = vpop.eup %4004  ;;  %v1891_v37 = vadd.f32 %v4001_v5, %v1887_v10  ;;  %4024 = vpow2.f32 %v2008_v25  ;;  %v2019_v56 = vmul.f32 1.442695, %v2018_v41  ;;  %v5592_v53 = vpop.f32.mrb[61].mxu1  ;;  %v6631_v39 = vld [vmem:[#allocation18_spill] sm:$0xff] }
 0x261   : > { %v2023_v63 = vmul.f32 1.442695, %v2022_v61  ;;  %6629 = vst [vmem:[#allocation76_spill] sm:$0xff] %v5592_v53  ;;  %v5594_v59 = vpop.f32.mrb[77].mxu0  ;;  %v4007_v9 = vpop.eup %4006  ;;  %4026 = vpow2.f32 %v2011_v60  ;;  %v2027_v22 = vmul.f32 1.442695, %v2026_v8  ;;  %v1953_v23 = vsub.f32 %v6631_v39, %v5522_v42 }
 0x262   : > { %v5589_v38 = vmax.f32 %v6628_v57, %v2646_v15  ;;  %6630 = vst [vmem:[#allocation77_spill] sm:$0xff] %v5594_v59  ;;  %v6632_v16 = vld [vmem:[#allocation34_spill] sm:$0xff]  ;;  %v4009_v15 = vpop.eup %4008  ;;  %v1895_v57 = vadd.f32 %v4003_v52, %v1891_v37  ;;  %4028 = vpow2.f32 %v1840_v24  ;;  %v1961_v25 = vsub.f32 %v5230_v27, %v5522_v42 }
 0x263   : > { %v1957_v33 = vsub.f32 %v6632_v16, %v5522_v42  ;;  %v1965_v41 = vsub.f32 %v5441_v1, %v5522_v42  ;;  %v5605_v61 = vld [vmem:[%s5079_s17 + $0x2e8] sm:$0xff]  ;;  %v4011_v5 = vpop.eup %4010  ;;  %4030 = vpow2.f32 %v2015_v0  ;;  %v2031_v60 = vmul.f32 1.442695, %v2030_v50  ;;  %v5614_v24 = vpop.f32.mrb[62].mxu1 }
 0x264   : > { %v1969_v8 = vsub.f32 %v5443_v14, %v5522_v42  ;;  %v6633_v10 = vmax.f32 %v5363_v46, %v5378_v30  ;;  %6635 = vst [vmem:[#allocation78_spill] sm:$0xff] %v5614_v24  ;;  %v5616_v37 = vpop.f32.mrb[78].mxu0  ;;  %v4013_v52 = vpop.eup %4012  ;;  %v1899_v53 = vadd.f32 %v4005_v11, %v1895_v57  ;;  %v1818_v1 = vadd.f32 %v4011_v5, %v4009_v15  ;;  %v6639_v46 = vld [vmem:[#allocation11_spill] sm:$0xff]  ;;  %v6642_v5 = vld [vmem:[#allocation22_spill] sm:$0xff] }
 0x265   : > { %6636 = vst [vmem:[#allocation79_spill] sm:$0xff] %v5616_v37  ;;  %4032 = vpow2.f32 %v2019_v56  ;;  %v1943_v27 = vmul.f32 1.442695, %v1942_v2  ;;  %v5618_v16 = vpop.f32.mrb[63].mxu1  ;;  %v5620_v50 = vpop.f32.mrb[79].mxu0  ;;  %v2137_v30 = vsub.f32 %v6639_v46, %v5529_v4  ;;  %v6640_v56 = vld [vmem:[#allocation12_spill] sm:$0xff] }
 0x266   : > { %v5612_v59 = vmax.f32 %v6633_v10, %v2581_v26  ;;  %6637 = vst [vmem:[#allocation80_spill] sm:$0xff] %v5618_v16  ;;  %6638 = vst [vmem:[#allocation81_spill] sm:$0xff] %v5620_v50  ;;  %v4015_v0 = vpop.eup %4014  ;;  %4034 = vpow2.f32 %v2023_v63  ;;  %v1946_v14 = vmul.f32 1.442695, %v1945_v49  ;;  %v1903_v37 = vadd.f32 %v4007_v9, %v1899_v53  ;;  %v6641_v63 = vld [vmem:[#allocation21_spill] sm:$0xff] }
 0x267   : > { %v4017_v10 = vpop.eup %4016  ;;  %v1822_v11 = vadd.f32 %v4015_v0, %v1818_v1  ;;  %4036 = vpow2.f32 %v2027_v22  ;;  %v2140_v2 = vsub.f32 %v6640_v56, %v5529_v4  ;;  %v1950_v57 = vmul.f32 1.442695, %v1949_v55  ;;  %v5636_v22 = vld [vmem:[%s5079_s17 + $0x2e0] sm:$0xff]  ;;  %v6645_v0 = vld [vmem:[#allocation36_spill] sm:$0xff] }
 0x268   : > { %6634 = vst [vmem:[#allocation18_spill] sm:$0xff] %v5612_v59  ;;  %v4019_v15 = vpop.eup %4018  ;;  %4038 = vpow2.f32 %v2031_v60  ;;  %v2144_v49 = vsub.f32 %v6641_v63, %v5529_v4  ;;  %v2148_v50 = vsub.f32 %v6642_v5, %v5529_v4  ;;  %v1907_v24 = vadd.f32 %v4013_v52, %v1903_v37  ;;  %6644 = vst [vmem:[#allocation11_spill] sm:$0xff] %v5636_v22 }
 0x269   : > { %v4021_v16 = vpop.eup %4020  ;;  %v1826_v26 = vadd.f32 %v4017_v10, %v1822_v11  ;;  %v6643_v9 = vsub.f32 %v5422_v48, %v5519_v6  ;;  %4040 = vpow2.f32 %v1943_v27  ;;  %v1954_v60 = vmul.f32 1.442695, %v1953_v23 }
 0x26a   : > { %v4023_v53 = vpop.eup %4022  ;;  %4042 = vpow2.f32 %v1946_v14  ;;  %v1958_v55 = vmul.f32 1.442695, %v1957_v33  ;;  %v2152_v63 = vsub.f32 %v6645_v0, %v5529_v4  ;;  %v2156_v37 = vsub.f32 %v5251_v31, %v5529_v4 }
 0x26b   : > { %v2035_v1 = vmul.f32 1.442695, %v6643_v9  ;;  %v4025_v56 = vpop.eup %4024  ;;  %4044 = vlog2.f32 %v1907_v24  ;;  %v1830_v5 = vadd.f32 %v4019_v15, %v1826_v26  ;;  %v2160_v52 = vsub.f32 %v5474_v44, %v5529_v4 }
 0x26c   : > { %v4027_v10 = vpop.eup %4026  ;;  %4046 = vpow2.f32 %v1950_v57  ;;  %v1962_v27 = vmul.f32 1.442695, %v1961_v25  ;;  %v2164_v14 = vsub.f32 %v5476_v40, %v5529_v4  ;;  %v1966_v24 = vmul.f32 1.442695, %v1965_v41 }
 0x26d   : > { %v4029_v33 = vpop.eup %4028  ;;  %v1834_v11 = vadd.f32 %v4021_v16, %v1830_v5  ;;  %v2013_v9 = vadd.f32 %v4027_v10, %v4025_v56  ;;  %4048 = vpow2.f32 %v2035_v1  ;;  %v1970_v15 = vmul.f32 1.442695, %v1969_v8  ;;  %v6647_v16 = vld [vmem:[#allocation23_spill] sm:$0xff]  ;;  %v6648_v56 = vld [vmem:[#allocation24_spill] sm:$0xff] }
 0x26e   : > { %v4031_v26 = vpop.eup %4030  ;;  %4050 = vpow2.f32 %v1954_v60  ;;  %v2138_v31 = vmul.f32 1.442695, %v2137_v30  ;;  %v6646_v57 = vmax.f32 %v5372_v20, %v5394_v3  ;;  %v2141_v23 = vmul.f32 1.442695, %v2140_v2  ;;  %v6649_v30 = vld [vmem:[#allocation39_spill] sm:$0xff] }
 0x26f   : > { %v4033_v44 = vpop.eup %4032  ;;  %v1838_v40 = vadd.f32 %v4023_v53, %v1834_v11  ;;  %v2017_v0 = vadd.f32 %v4031_v26, %v2013_v9  ;;  %4052 = vpow2.f32 %v1958_v55  ;;  %v2079_v41 = vsub.f32 %v6647_v16, %v5532_v45  ;;  %v6650_v2 = vld [vmem:[#allocation19_spill] sm:$0xff]  ;;  %v6651_v11 = vld [vmem:[#allocation20_spill] sm:$0xff] }
 0x270   : > { %v5652_v25 = vmax.f32 %v6646_v57, %v5502_v34  ;;  %v4035_v22 = vpop.eup %4034  ;;  %4054 = vpow2.f32 %v1962_v27  ;;  %v2083_v8 = vsub.f32 %v6648_v56, %v5532_v45  ;;  %v2087_v5 = vsub.f32 %v6649_v30, %v5532_v45 }
 0x271   : > { %v4037_v1 = vpop.eup %4036  ;;  %v1842_v20 = vadd.f32 %v4029_v33, %v1838_v40  ;;  %v2021_v60 = vadd.f32 %v4033_v44, %v2017_v0  ;;  %4056 = vpow2.f32 %v1966_v24  ;;  %v2145_v10 = vmul.f32 1.442695, %v2144_v49 }
 0x272   : > { %v4039_v53 = vpop.eup %4038  ;;  %4058 = vpow2.f32 %v2138_v31  ;;  %v2149_v55 = vmul.f32 1.442695, %v2148_v50  ;;  %v2072_v27 = vsub.f32 %v6650_v2, %v5532_v45  ;;  %v2075_v9 = vsub.f32 %v6651_v11, %v5532_v45 }
 0x273   : > { %v4041_v26 = vpop.eup %4040  ;;  %4060 = vlog2.f32 %v1842_v20  ;;  %v2025_v57 = vadd.f32 %v4035_v22, %v2021_v60  ;;  %v2153_v49 = vmul.f32 1.442695, %v2152_v63  ;;  %v2157_v31 = vmul.f32 1.442695, %v2156_v37 }
 0x274   : > { %v4043_v40 = vpop.eup %4042  ;;  %4062 = vpow2.f32 %v2141_v23  ;;  %v2161_v2 = vmul.f32 1.442695, %v2160_v52  ;;  %v2165_v60 = vmul.f32 1.442695, %v2164_v14  ;;  %v2073_v11 = vmul.f32 1.442695, %v2072_v27 }
 0x275   : > { %v4045_v0 = vpop.eup %4044  ;;  %v2029_v33 = vadd.f32 %v4037_v1, %v2025_v57  ;;  %v1948_v24 = vadd.f32 %v4043_v40, %v4041_v26  ;;  %4064 = vpow2.f32 %v1970_v15  ;;  %v2076_v23 = vmul.f32 1.442695, %v2075_v9  ;;  %v6655_v57 = vld [vmem:[#allocation25_spill] sm:$0xff] }
 0x276   : > { %v4047_v20 = vpop.eup %4046  ;;  %v1909_v22 = vmul.f32 0.6931472, %v4045_v0  ;;  %4066 = vpow2.f32 %v2145_v10  ;;  %v2080_v50 = vmul.f32 1.442695, %v2079_v41  ;;  %v5671_v56 = vmul.f32 1.442695, %v2083_v8 }
 0x277   : > { %v4049_v59 = vpop.eup %4048  ;;  %v2033_v30 = vadd.f32 %v4039_v53, %v2029_v33  ;;  %v1952_v44 = vadd.f32 %v4047_v20, %v1948_v24  ;;  %4068 = vpow2.f32 %v2149_v55  ;;  %v5673_v14 = vmul.f32 1.442695, %v2087_v5  ;;  %v6652_v55 = vld [vmem:[#allocation5_spill] sm:$0xff]  ;;  %v6654_v41 = vld [vmem:[#allocation14_spill] sm:$0xff] }
 0x278   : > { %v4051_v63 = vpop.eup %4050  ;;  %v1910_v37 = vadd.f32 %v1909_v22, %v5408_v28  ;;  %4070 = vpow2.f32 %v2153_v49  ;;  %v6653_v28 = vld [vmem:[#allocation13_spill] sm:$0xff]  ;;  %v6658_v49 = vld [vmem:[#allocation50_spill] sm:$0xff] }
 0x279   : > { %v4053_v1 = vpop.eup %4052  ;;  %v2037_v52 = vadd.f32 %v4049_v59, %v2033_v30  ;;  %v1956_v15 = vadd.f32 %v4051_v63, %v1952_v44  ;;  %4072 = vpow2.f32 %v2157_v31  ;;  %v6656_v30 = vld [vmem:[#allocation26_spill] sm:$0xff]  ;;  %v6657_v40 = vld [vmem:[#allocation49_spill] sm:$0xff] }
 0x27a   : > { %v4055_v10 = vpop.eup %4054  ;;  %v1911_v53 = vsub.f32 %v5046_v51, %v1910_v37  ;;  %v1913_v27 = vsub.f32 %v6652_v55, %v1910_v37  ;;  %v1915_v9 = vsub.f32 %v6653_v28, %v1910_v37  ;;  %v1917_v8 = vsub.f32 %v6654_v41, %v1910_v37  ;;  %v6659_v33 = vld [vmem:[#allocation29_spill] sm:$0xff]  ;;  %v6660_v20 = vld [vmem:[#allocation30_spill] sm:$0xff] }
 0x27b   : > { %v4057_v26 = vpop.eup %4056  ;;  %v1919_v59 = vsub.f32 %v6655_v57, %v1910_v37  ;;  %v1921_v44 = vsub.f32 %v6656_v30, %v1910_v37  ;;  %v1923_v5 = vsub.f32 %v6657_v40, %v1910_v37  ;;  %v1925_v31 = vsub.f32 %v6658_v49, %v1910_v37  ;;  %v6661_v37 = vld [vmem:[#allocation40_spill] sm:$0xff]  ;;  %v6665_v49 = vld [vmem:[#allocation38_spill] sm:$0xff] }
 0x27c   : > { %v4059_v51 = vpop.eup %4058  ;;  %1912 = vst [vmem:[%s5079_s17 + $0x8] sm:$0xff] %v1911_v53  ;;  %1914 = vst [vmem:[%s5079_s17 + $0x88] sm:$0xff] %v1913_v27  ;;  %4074 = vlog2.f32 %v2037_v52  ;;  %v1960_v0 = vadd.f32 %v4053_v1, %v1956_v15  ;;  %v2267_v24 = vsub.f32 %v6659_v33, %v5535_v12  ;;  %v2270_v22 = vsub.f32 %v6660_v20, %v5535_v12 }
 0x27d   : > { %1916 = vst [vmem:[%s5079_s17 + $0x108] sm:$0xff] %v1915_v9  ;;  %1918 = vst [vmem:[%s5079_s17 + $0x188] sm:$0xff] %v1917_v8  ;;  %v4061_v63 = vpop.eup %4060  ;;  %4076 = vpow2.f32 %v2161_v2  ;;  %v2282_v53 = vsub.f32 %v6661_v37, %v5535_v12  ;;  %v2286_v55 = vsub.f32 %v5279_v47, %v5535_v12  ;;  %v2290_v1 = vsub.f32 %v5490_v21, %v5535_v12 }
 0x27e   : > { %1920 = vst [vmem:[%s5079_s17 + $0x208] sm:$0xff] %v1919_v59  ;;  %1922 = vst [vmem:[%s5079_s17 + $0x288] sm:$0xff] %v1921_v44  ;;  %v4063_v52 = vpop.eup %4062  ;;  %v1844_v15 = vmul.f32 0.6931472, %v4061_v63  ;;  %v1964_v27 = vadd.f32 %v4055_v10, %v1960_v0  ;;  %4078 = vpow2.f32 %v2073_v11  ;;  %v2294_v28 = vsub.f32 %v5492_v29, %v5535_v12  ;;  %v6664_v11 = vld [vmem:[#allocation33_spill] sm:$0xff]  ;;  %v6667_v63 = vld [vmem:[#allocation27_spill] sm:$0xff] }
 0x27f   : > { %1924 = vst [vmem:[%s5079_s17 + $0x308] sm:$0xff] %v1923_v5  ;;  %1926 = vst [vmem:[%s5079_s17 + $0x388] sm:$0xff] %v1925_v31  ;;  %v4065_v9 = vpop.eup %4064  ;;  %v2143_v41 = vadd.f32 %v4063_v52, %v4059_v51  ;;  %4080 = vpow2.f32 %v2076_v23  ;;  %v6662_v2 = vsub.f32 %v5260_v36, %v5532_v45  ;;  %v6663_v57 = vsub.f32 %v5484_v43, %v5532_v45 }
 0x280   : > { %v4067_v30 = vpop.eup %4066  ;;  %v1845_v44 = vadd.f32 %v1844_v15, %v5418_v35  ;;  %v1968_v40 = vadd.f32 %v4057_v26, %v1964_v27  ;;  %4082 = vpow2.f32 %v2165_v60  ;;  %v2274_v10 = vsub.f32 %v6664_v11, %v5535_v12  ;;  %v6666_v26 = vld [vmem:[#allocation6_spill] sm:$0xff]  ;;  %v6668_v15 = vld [vmem:[#allocation28_spill] sm:$0xff] }
 0x281   : > { %v2092_v8 = vmul.f32 1.442695, %v6662_v2  ;;  %v2096_v59 = vmul.f32 1.442695, %v6663_v57  ;;  %v4069_v5 = vpop.eup %4068  ;;  %v2147_v23 = vadd.f32 %v4067_v30, %v2143_v41  ;;  %4084 = vpow2.f32 %v2080_v50  ;;  %v6670_v2 = vld [vmem:[#allocation55_spill] sm:$0xff] }
 0x282   : > { %v2278_v31 = vsub.f32 %v6665_v49, %v5535_v12  ;;  %v5716_v51 = vmax.f32 %v5652_v25, %v5504_v13  ;;  %v4071_v35 = vpop.eup %4070  ;;  %v1846_v60 = vsub.f32 %v6666_v26, %v1845_v44  ;;  %v1848_v0 = vsub.f32 %v5053_v54, %v1845_v44  ;;  %v6669_v25 = vld [vmem:[#allocation54_spill] sm:$0xff] }
 0x283   : > { %v1850_v33 = vsub.f32 %v5107_v18, %v1845_v44  ;;  %v1852_v20 = vsub.f32 %v5109_v19, %v1845_v44  ;;  %v4073_v50 = vpop.eup %4072  ;;  %v1854_v52 = vsub.f32 %v6667_v63, %v1845_v44  ;;  %v1856_v27 = vsub.f32 %v6668_v15, %v1845_v44 }
 0x284   : > { %v1858_v41 = vsub.f32 %v6669_v25, %v1845_v44  ;;  %v1860_v57 = vsub.f32 %v6670_v2, %v1845_v44  ;;  %1847 = vst [vmem:[%s5079_s17] sm:$0xff] %v1846_v60  ;;  %1849 = vst [vmem:[%s5079_s17 + $0x80] sm:$0xff] %v1848_v0  ;;  %v1972_v54 = vadd.f32 %v4065_v9, %v1968_v40  ;;  %4086 = vpow2.f32 %v5671_v56 }
 0x285   : > { %1851 = vst [vmem:[%s5079_s17 + $0x100] sm:$0xff] %v1850_v33  ;;  %1853 = vst [vmem:[%s5079_s17 + $0x180] sm:$0xff] %v1852_v20  ;;  %v2151_v18 = vadd.f32 %v4069_v5, %v2147_v23  ;;  %v6671_v19 = vsub.f32 %v5486_v62, %v5532_v45  ;;  %4088 = vpow2.f32 %v5673_v14  ;;  %v2268_v11 = vmul.f32 1.442695, %v2267_v24  ;;  %v6672_v14 = vld [vmem:[#allocation41_spill] sm:$0xff] }
 0x286   : > { %1855 = vst [vmem:[%s5079_s17 + $0x200] sm:$0xff] %v1854_v52  ;;  %1857 = vst [vmem:[%s5079_s17 + $0x280] sm:$0xff] %v1856_v27  ;;  %v2271_v44 = vmul.f32 1.442695, %v2270_v22  ;;  %v2275_v49 = vmul.f32 1.442695, %v2274_v10  ;;  %v4075_v26 = vpop.eup %4074  ;;  %4090 = vlog2.f32 %v1972_v54  ;;  %v2202_v24 = vsub.f32 %v6672_v14, %v5716_v51 }
 0x287   : > { %v2100_v30 = vmul.f32 1.442695, %v6671_v19  ;;  %1859 = vst [vmem:[%s5079_s17 + $0x300] sm:$0xff] %v1858_v41  ;;  %1861 = vst [vmem:[%s5079_s17 + $0x380] sm:$0xff] %v1860_v57  ;;  %v2155_v60 = vadd.f32 %v4071_v35, %v2151_v18  ;;  %v2279_v9 = vmul.f32 1.442695, %v2278_v31  ;;  %v4077_v5 = vpop.eup %4076  ;;  %4092 = vpow2.f32 %v2092_v8 }
 0x288   : > { %v2283_v40 = vmul.f32 1.442695, %v2282_v53  ;;  %v2039_v56 = vmul.f32 0.6931472, %v4075_v26  ;;  %v2287_v23 = vmul.f32 1.442695, %v2286_v55  ;;  %v4079_v33 = vpop.eup %4078  ;;  %4094 = vpow2.f32 %v2096_v59 }
 0x289   : > { %v5739_v0 = vmul.f32 1.442695, %v2290_v1  ;;  %v2159_v20 = vadd.f32 %v4073_v50, %v2155_v60  ;;  %v5741_v63 = vmul.f32 1.442695, %v2294_v28  ;;  %v4081_v22 = vpop.eup %4080  ;;  %4096 = vpow2.f32 %v2268_v11  ;;  %v6673_v53 = vld [vmem:[#allocation42_spill] sm:$0xff]  ;;  %v6675_v52 = vld [vmem:[#allocation8_spill] sm:$0xff] }
 0x28a   : > { %v2040_v10 = vadd.f32 %v2039_v56, %v5519_v6  ;;  %v2205_v31 = vsub.f32 %v6673_v53, %v5716_v51  ;;  %v2225_v55 = vsub.f32 %v5502_v34, %v5716_v51  ;;  %v4083_v1 = vpop.eup %4082  ;;  %v2078_v28 = vadd.f32 %v4081_v22, %v4079_v33  ;;  %v6674_v6 = vld [vmem:[#allocation7_spill] sm:$0xff]  ;;  %v6677_v41 = vld [vmem:[#allocation16_spill] sm:$0xff]  ;;  %v6683_v22 = vld [vmem:[#allocation66_spill] sm:$0xff] }
 0x28b   : > { %v2163_v8 = vadd.f32 %v4077_v5, %v2159_v20  ;;  %4098 = vpow2.f32 %v2271_v44  ;;  %v2229_v59 = vsub.f32 %v5504_v13, %v5716_v51  ;;  %v4085_v35 = vpop.eup %4084  ;;  %v6676_v27 = vld [vmem:[#allocation15_spill] sm:$0xff]  ;;  %v6679_v18 = vld [vmem:[#allocation32_spill] sm:$0xff]  ;;  %v6685_v53 = vld [vmem:[#allocation58_spill] sm:$0xff] }
 0x28c   : > { %v2041_v50 = vsub.f32 %v6674_v6, %v2040_v10  ;;  %v2043_v15 = vsub.f32 %v6675_v52, %v2040_v10  ;;  %v2045_v25 = vsub.f32 %v6676_v27, %v2040_v10  ;;  %v2047_v2 = vsub.f32 %v6677_v41, %v2040_v10  ;;  %v6678_v57 = vld [vmem:[#allocation31_spill] sm:$0xff]  ;;  %v6687_v6 = vld [vmem:[#allocation68_spill] sm:$0xff] }
 0x28d   : > { %v2049_v54 = vsub.f32 %v6678_v57, %v2040_v10  ;;  %v2051_v19 = vsub.f32 %v6679_v18, %v2040_v10  ;;  %v2053_v11 = vsub.f32 %v5420_v7, %v2040_v10  ;;  %v2055_v44 = vsub.f32 %v5422_v48, %v2040_v10  ;;  %v6680_v5 = vld [vmem:[#allocation43_spill] sm:$0xff]  ;;  %v6681_v7 = vld [vmem:[#allocation44_spill] sm:$0xff]  ;;  %v6682_v48 = vld [vmem:[#allocation46_spill] sm:$0xff] }
 0x28e   : > { %2042 = vst [vmem:[%s5079_s17 + $0x18] sm:$0xff] %v2041_v50  ;;  %2044 = vst [vmem:[%s5079_s17 + $0x98] sm:$0xff] %v2043_v15  ;;  %v2167_v26 = vadd.f32 %v4083_v1, %v2163_v8  ;;  %v2082_v60 = vadd.f32 %v4085_v35, %v2078_v28  ;;  %4100 = vpow2.f32 %v2100_v30  ;;  %v2209_v56 = vsub.f32 %v6680_v5, %v5716_v51  ;;  %v4087_v33 = vpop.eup %4086  ;;  %v6684_v10 = vld [vmem:[#allocation57_spill] sm:$0xff]  ;;  %v6688_v50 = vld [vmem:[#allocation59_spill] sm:$0xff] }
 0x28f   : > { %2046 = vst [vmem:[%s5079_s17 + $0x118] sm:$0xff] %v2045_v25  ;;  %2048 = vst [vmem:[%s5079_s17 + $0x198] sm:$0xff] %v2047_v2  ;;  %4102 = vpow2.f32 %v2275_v49  ;;  %v2213_v20 = vsub.f32 %v6681_v7, %v5716_v51  ;;  %v2217_v14 = vsub.f32 %v6682_v48, %v5716_v51  ;;  %v6686_v1 = vmax.f32 %v6684_v10, %v6685_v53  ;;  %v4089_v8 = vpop.eup %4088  ;;  %v6689_v49 = vld [vmem:[#allocation62_spill] sm:$0xff]  ;;  %v6691_v2 = vld [vmem:[#allocation67_spill] sm:$0xff] }
 0x290   : > { %2050 = vst [vmem:[%s5079_s17 + $0x218] sm:$0xff] %v2049_v54  ;;  %2052 = vst [vmem:[%s5079_s17 + $0x298] sm:$0xff] %v2051_v19  ;;  %4104 = vlog2.f32 %v2167_v26  ;;  %v2086_v28 = vadd.f32 %v4087_v33, %v2082_v60  ;;  %v2221_v35 = vsub.f32 %v5394_v3, %v5716_v51  ;;  %v6690_v52 = vmax.f32 %v6688_v50, %v6689_v49  ;;  %v4091_v27 = vpop.eup %4090  ;;  %v6696_v10 = vld [vmem:[#allocation17_spill] sm:$0xff] }
 0x291   : > { %2054 = vst [vmem:[%s5079_s17 + $0x318] sm:$0xff] %v2053_v11  ;;  %2056 = vst [vmem:[%s5079_s17 + $0x398] sm:$0xff] %v2055_v44  ;;  %v2395_v30 = vmax.f32 %v6686_v1, %v6683_v22  ;;  %4106 = vpow2.f32 %v2279_v9  ;;  %v2203_v25 = vmul.f32 1.442695, %v2202_v24  ;;  %v2206_v41 = vmul.f32 1.442695, %v2205_v31  ;;  %v4093_v54 = vpop.eup %4092 }
 0x292   : > { %v2330_v15 = vmax.f32 %v6690_v52, %v6687_v6  ;;  %v1974_v18 = vmul.f32 0.6931472, %v4091_v27  ;;  %v2090_v19 = vadd.f32 %v4089_v8, %v2086_v28  ;;  %4108 = vpow2.f32 %v2283_v40  ;;  %v6692_v11 = vld [vmem:[#allocation69_spill] sm:$0xff]  ;;  %v4095_v3 = vpop.eup %4094  ;;  %v6697_v8 = vld [vmem:[#allocation34_spill] sm:$0xff] }
 0x293   : > { %v5785_v57 = vmax.f32 %v2395_v30, %v6691_v2  ;;  %4110 = vpow2.f32 %v2287_v23  ;;  %v2210_v26 = vmul.f32 1.442695, %v2209_v56  ;;  %v2214_v60 = vmul.f32 1.442695, %v2213_v20  ;;  %v4097_v33 = vpop.eup %4096  ;;  %v6700_v50 = vld [vmem:[#allocation61_spill] sm:$0xff] }
 0x294   : > { %v5788_v44 = vmax.f32 %v2330_v15, %v6692_v11  ;;  %v2218_v5 = vmul.f32 1.442695, %v2217_v14  ;;  %v1975_v9 = vadd.f32 %v1974_v18, %v5522_v42  ;;  %v2094_v24 = vadd.f32 %v4093_v54, %v2090_v19  ;;  %v6694_v42 = vld [vmem:[#allocation9_spill] sm:$0xff]  ;;  %v5825_v19 = vld [vmem:[%s5079_s17 + $0xc8] sm:$0xff] }
 0x295   : > { %4112 = vpow2.f32 %v5739_v0  ;;  %v2222_v31 = vmul.f32 1.442695, %v2221_v35  ;;  %v4099_v7 = vpop.eup %4098  ;;  %v5792_v40 = vmul.f32 1.442695, %v2225_v55  ;;  %v5794_v48 = vmul.f32 1.442695, %v2229_v59 }
 0x296   : > { %4114 = vpow2.f32 %v2203_v25  ;;  %v6693_v23 = vmax.f32 %v5466_v32, %v5542_v17  ;;  %v1976_v20 = vsub.f32 %v6694_v42, %v1975_v9  ;;  %v6695_v0 = vld [vmem:[#allocation10_spill] sm:$0xff]  ;;  %v1980_v1 = vsub.f32 %v6696_v10, %v1975_v9  ;;  %v6698_v59 = vld [vmem:[#allocation35_spill] sm:$0xff]  ;;  %v6699_v35 = vld [vmem:[#allocation60_spill] sm:$0xff] }
 0x297   : > { %v1978_v14 = vsub.f32 %v6695_v0, %v1975_v9  ;;  %v1982_v30 = vsub.f32 %v6631_v39, %v1975_v9  ;;  %v1984_v55 = vsub.f32 %v6697_v8, %v1975_v9  ;;  %v1986_v28 = vsub.f32 %v6698_v59, %v1975_v9  ;;  %v5815_v25 = vld [vmem:[%s5079_s17 + $0x48] sm:$0xff]  ;;  %v6702_v0 = vld [vmem:[#allocation72_spill] sm:$0xff] }
 0x298   : > { %v5800_v56 = vmax.f32 %v6693_v23, %v5564_v58  ;;  %v1988_v32 = vsub.f32 %v6699_v35, %v1975_v9  ;;  %v1990_v52 = vsub.f32 %v6700_v50, %v1975_v9  ;;  %v4101_v15 = vpop.eup %4100  ;;  %1977 = vst [vmem:[%s5079_s17 + $0x10] sm:$0xff] %v1976_v20  ;;  %1981 = vst [vmem:[%s5079_s17 + $0x110] sm:$0xff] %v1980_v1  ;;  %4116 = vpow2.f32 %v2206_v41  ;;  %v6704_v10 = vld [vmem:[#allocation70_spill] sm:$0xff] }
 0x299   : > { %1979 = vst [vmem:[%s5079_s17 + $0x90] sm:$0xff] %v1978_v14  ;;  %1983 = vst [vmem:[%s5079_s17 + $0x190] sm:$0xff] %v1982_v30  ;;  %v2098_v27 = vadd.f32 %v4095_v3, %v2094_v24  ;;  %v2273_v39 = vadd.f32 %v4099_v7, %v4097_v33  ;;  %v2397_v54 = vsub.f32 %v5815_v25, %v5785_v57  ;;  %v4103_v18 = vpop.eup %4102  ;;  %4118 = vpow2.f32 %v5741_v63  ;;  %v6701_v3 = vld [vmem:[#allocation45_spill] sm:$0xff]  ;;  %v6703_v14 = vld [vmem:[#allocation63_spill] sm:$0xff] }
 0x29a   : > { %1985 = vst [vmem:[%s5079_s17 + $0x210] sm:$0xff] %v1984_v55  ;;  %1987 = vst [vmem:[%s5079_s17 + $0x290] sm:$0xff] %v1986_v28  ;;  %v2400_v9 = vsub.f32 %v5825_v19, %v5785_v57  ;;  %v2404_v41 = vsub.f32 %v6701_v3, %v5785_v57  ;;  %v2420_v33 = vsub.f32 %v6683_v22, %v5785_v57  ;;  %v4105_v24 = vpop.eup %4104  ;;  %4120 = vpow2.f32 %v2210_v26  ;;  %v6706_v8 = vld [vmem:[#allocation74_spill] sm:$0xff] }
 0x29b   : > { %1989 = vst [vmem:[%s5079_s17 + $0x310] sm:$0xff] %v1988_v32  ;;  %1991 = vst [vmem:[%s5079_s17 + $0x390] sm:$0xff] %v1990_v52  ;;  %v2102_v7 = vadd.f32 %v4101_v15, %v2098_v27  ;;  %v2277_v23 = vadd.f32 %v4103_v18, %v2273_v39  ;;  %v2424_v42 = vsub.f32 %v6691_v2, %v5785_v57  ;;  %v4107_v20 = vpop.eup %4106  ;;  %v2169_v63 = vmul.f32 0.6931472, %v4105_v24  ;;  %v6708_v32 = vld [vmem:[#allocation47_spill] sm:$0xff] }
 0x29c   : > { %4122 = vpow2.f32 %v2214_v60  ;;  %v6705_v1 = vmax.f32 %v6703_v14, %v6704_v10  ;;  %v6707_v55 = vmax.f32 %v5589_v38, %v5605_v61  ;;  %v4109_v28 = vpop.eup %4108  ;;  %v2398_v35 = vmul.f32 1.442695, %v2397_v54  ;;  %v6709_v27 = vld [vmem:[#allocation51_spill] sm:$0xff]  ;;  %v6714_v10 = vld [vmem:[#allocation37_spill] sm:$0xff] }
 0x29d   : > { %4124 = vlog2.f32 %v2102_v7  ;;  %v2281_v26 = vadd.f32 %v4107_v20, %v2277_v23  ;;  %v2408_v50 = vsub.f32 %v6708_v32, %v5785_v57  ;;  %v4111_v60 = vpop.eup %4110  ;;  %v2170_v52 = vadd.f32 %v2169_v63, %v5529_v4  ;;  %v6710_v4 = vld [vmem:[#allocation12_spill] sm:$0xff]  ;;  %v6712_v23 = vld [vmem:[#allocation22_spill] sm:$0xff] }
 0x29e   : > { %v5839_v30 = vmax.f32 %v6705_v1, %v6702_v0  ;;  %v5845_v59 = vmax.f32 %v6707_v55, %v6706_v8  ;;  %4126 = vpow2.f32 %v2218_v5  ;;  %v2401_v15 = vmul.f32 1.442695, %v2400_v9  ;;  %v6711_v9 = vld [vmem:[#allocation21_spill] sm:$0xff]  ;;  %v6713_v63 = vld [vmem:[#allocation36_spill] sm:$0xff] }
 0x29f   : > { %v2412_v39 = vsub.f32 %v6709_v27, %v5785_v57  ;;  %v4113_v38 = vpop.eup %4112  ;;  %v2285_v61 = vadd.f32 %v4109_v28, %v2281_v26  ;;  %4128 = vpow2.f32 %v2222_v31  ;;  %v2405_v18 = vmul.f32 1.442695, %v2404_v41  ;;  %v6715_v41 = vld [vmem:[#allocation64_spill] sm:$0xff] }
 0x2a0   : > { %v2416_v54 = vsub.f32 %v6685_v53, %v5785_v57  ;;  %v4115_v3 = vpop.eup %4114  ;;  %v2171_v24 = vsub.f32 %v6639_v46, %v2170_v52  ;;  %v2173_v5 = vsub.f32 %v6710_v4, %v2170_v52  ;;  %v2175_v7 = vsub.f32 %v6711_v9, %v2170_v52  ;;  %v6716_v53 = vld [vmem:[#allocation65_spill] sm:$0xff] }
 0x2a1   : > { %v2177_v20 = vsub.f32 %v6712_v23, %v2170_v52  ;;  %v2179_v14 = vsub.f32 %v6713_v63, %v2170_v52  ;;  %v2181_v31 = vsub.f32 %v6714_v10, %v2170_v52  ;;  %v2183_v1 = vsub.f32 %v6715_v41, %v2170_v52  ;;  %v6717_v10 = vld [vmem:[#allocation71_spill] sm:$0xff] }
 0x2a2   : > { %v2185_v55 = vsub.f32 %v6716_v53, %v2170_v52  ;;  %2172 = vst [vmem:[%s5079_s17 + $0x28] sm:$0xff] %v2171_v24  ;;  %2174 = vst [vmem:[%s5079_s17 + $0xa8] sm:$0xff] %v2173_v5  ;;  %v2289_v46 = vadd.f32 %v4111_v60, %v2285_v61  ;;  %4130 = vpow2.f32 %v5792_v40  ;;  %v2409_v28 = vmul.f32 1.442695, %v2408_v50  ;;  %v4117_v32 = vpop.eup %4116  ;;  %v5872_v24 = vld [vmem:[%s5079_s17 + $0x40] sm:$0xff] }
 0x2a3   : > { %2176 = vst [vmem:[%s5079_s17 + $0x128] sm:$0xff] %v2175_v7  ;;  %2178 = vst [vmem:[%s5079_s17 + $0x1a8] sm:$0xff] %v2177_v20  ;;  %v2413_v26 = vmul.f32 1.442695, %v2412_v39  ;;  %4132 = vpow2.f32 %v2398_v35  ;;  %v2417_v27 = vmul.f32 1.442695, %v2416_v54  ;;  %v2332_v4 = vsub.f32 %v5872_v24, %v5788_v44  ;;  %v4119_v60 = vpop.eup %4118 }
 0x2a4   : > { %2180 = vst [vmem:[%s5079_s17 + $0x228] sm:$0xff] %v2179_v14  ;;  %2182 = vst [vmem:[%s5079_s17 + $0x2a8] sm:$0xff] %v2181_v31  ;;  %v2421_v52 = vmul.f32 1.442695, %v2420_v33  ;;  %v2293_v40 = vadd.f32 %v4113_v38, %v2289_v46  ;;  %v2208_v50 = vadd.f32 %v4117_v32, %v4115_v3  ;;  %4134 = vpow2.f32 %v2401_v15  ;;  %v5877_v39 = vld [vmem:[%s5079_s17 + $0xc0] sm:$0xff]  ;;  %v4121_v5 = vpop.eup %4120 }
 0x2a5   : > { %2184 = vst [vmem:[%s5079_s17 + $0x328] sm:$0xff] %v2183_v1  ;;  %2186 = vst [vmem:[%s5079_s17 + $0x3a8] sm:$0xff] %v2185_v55  ;;  %v2335_v61 = vsub.f32 %v5877_v39, %v5788_v44  ;;  %4136 = vpow2.f32 %v5794_v48  ;;  %v5883_v33 = vld [vmem:[%s5079_s17 + $0x140] sm:$0xff]  ;;  %v2355_v54 = vsub.f32 %v6687_v6, %v5788_v44  ;;  %v2359_v15 = vsub.f32 %v6692_v11, %v5788_v44 }
 0x2a6   : > { %v2339_v35 = vsub.f32 %v5883_v33, %v5788_v44  ;;  %v4123_v38 = vpop.eup %4122  ;;  %v2297_v3 = vadd.f32 %v4119_v60, %v2293_v40  ;;  %v2212_v9 = vadd.f32 %v4121_v5, %v2208_v50  ;;  %4138 = vpow2.f32 %v2405_v18  ;;  %v5892_v7 = vld [vmem:[%s5079_s17 + $0x1c0] sm:$0xff] }
 0x2a7   : > { %v2343_v48 = vsub.f32 %v5892_v7, %v5788_v44  ;;  %v4125_v23 = vpop.eup %4124  ;;  %4140 = vpow2.f32 %v2409_v28  ;;  %v5897_v20 = vld [vmem:[%s5079_s17 + $0x240] sm:$0xff]  ;;  %v2351_v14 = vsub.f32 %v6689_v49, %v5788_v44  ;;  %v5905_v31 = vmax.f32 %v5800_v56, %v6717_v10 }
 0x2a8   : > { %v2347_v63 = vsub.f32 %v5897_v20, %v5788_v44  ;;  %v4127_v18 = vpop.eup %4126  ;;  %v2104_v41 = vmul.f32 0.6931472, %v4125_v23  ;;  %4142 = vlog2.f32 %v2297_v3  ;;  %v2216_v1 = vadd.f32 %v4123_v38, %v2212_v9  ;;  %v6718_v53 = vld [vmem:[#allocation73_spill] sm:$0xff] }
 0x2a9   : > { %v5909_v55 = vmax.f32 %v5839_v30, %v6718_v53  ;;  %v4129_v46 = vpop.eup %4128  ;;  %4144 = vpow2.f32 %v2413_v26  ;;  %v2425_v49 = vmul.f32 1.442695, %v2424_v42  ;;  %v2333_v28 = vmul.f32 1.442695, %v2332_v4  ;;  %v4289_v38 = vld [vmem:[%s5079_s17 + $0x20] sm:$0xff] }
 0x2aa   : > { %v2336_v32 = vmul.f32 1.442695, %v2335_v61  ;;  %v2105_v56 = vadd.f32 %v2104_v41, %v5532_v45  ;;  %v2220_v60 = vadd.f32 %v4127_v18, %v2216_v1  ;;  %4146 = vpow2.f32 %v2417_v27  ;;  %v4290_v42 = vld [vmem:[%s5079_s17 + $0xa0] sm:$0xff]  ;;  %v6719_v61 = vld [vmem:[#allocation24_spill] sm:$0xff] }
 0x2ab   : > { %v2340_v40 = vmul.f32 1.442695, %v2339_v35  ;;  %4148 = vpow2.f32 %v2421_v52  ;;  %v2344_v50 = vmul.f32 1.442695, %v2343_v48  ;;  %v2348_v5 = vmul.f32 1.442695, %v2347_v63 }
 0x2ac   : > { %v5915_v30 = vmul.f32 1.442695, %v2351_v14  ;;  %v4131_v26 = vpop.eup %4130  ;;  %v2106_v3 = vsub.f32 %v4289_v38, %v2105_v56  ;;  %v2108_v4 = vsub.f32 %v4290_v42, %v2105_v56  ;;  %v2110_v45 = vsub.f32 %v6647_v16, %v2105_v56  ;;  %v6720_v35 = vld [vmem:[#allocation39_spill] sm:$0xff]  ;;  %v5930_v18 = vld [vmem:[%s5079_s17 + $0x58] sm:$0xff] }
 0x2ad   : > { %v2112_v27 = vsub.f32 %v6719_v61, %v2105_v56  ;;  %v4133_v52 = vpop.eup %4132  ;;  %v2114_v9 = vsub.f32 %v6720_v35, %v2105_v56  ;;  %v2116_v48 = vsub.f32 %v5260_v36, %v2105_v56  ;;  %v2118_v23 = vsub.f32 %v5484_v43, %v2105_v56  ;;  %v5935_v41 = vld [vmem:[%s5079_s17 + $0xd8] sm:$0xff] }
 0x2ae   : > { %v2120_v63 = vsub.f32 %v5486_v62, %v2105_v56  ;;  %v4135_v14 = vpop.eup %4134  ;;  %2107 = vst [vmem:[%s5079_s17 + $0x20] sm:$0xff] %v2106_v3  ;;  %2109 = vst [vmem:[%s5079_s17 + $0xa0] sm:$0xff] %v2108_v4  ;;  %v2224_v16 = vadd.f32 %v4129_v46, %v2220_v60  ;;  %4150 = vpow2.f32 %v2333_v28  ;;  %v2527_v36 = vsub.f32 %v5930_v18, %v5905_v31  ;;  %v5944_v46 = vld [vmem:[%s5079_s17 + $0x158] sm:$0xff] }
 0x2af   : > { %2111 = vst [vmem:[%s5079_s17 + $0x120] sm:$0xff] %v2110_v45  ;;  %2113 = vst [vmem:[%s5079_s17 + $0x1a0] sm:$0xff] %v2112_v27  ;;  %v2530_v43 = vsub.f32 %v5935_v41, %v5905_v31  ;;  %v4137_v62 = vpop.eup %4136  ;;  %v2403_v1 = vadd.f32 %v4135_v14, %v4133_v52  ;;  %4152 = vpow2.f32 %v2336_v32  ;;  %v2534_v28 = vsub.f32 %v5944_v46, %v5905_v31  ;;  %v5951_v3 = vld [vmem:[%s5079_s17 + $0x1d8] sm:$0xff] }
 0x2b0   : > { %2115 = vst [vmem:[%s5079_s17 + $0x220] sm:$0xff] %v2114_v9  ;;  %2117 = vst [vmem:[%s5079_s17 + $0x2a0] sm:$0xff] %v2116_v48  ;;  %v2550_v56 = vsub.f32 %v5564_v58, %v5905_v31  ;;  %v4139_v60 = vpop.eup %4138  ;;  %v2228_v38 = vadd.f32 %v4131_v26, %v2224_v16  ;;  %4154 = vpow2.f32 %v2425_v49  ;;  %v2538_v42 = vsub.f32 %v5951_v3, %v5905_v31  ;;  %v5961_v27 = vld [vmem:[%s5079_s17 + $0x258] sm:$0xff] }
 0x2b1   : > { %2119 = vst [vmem:[%s5079_s17 + $0x320] sm:$0xff] %v2118_v23  ;;  %2121 = vst [vmem:[%s5079_s17 + $0x3a0] sm:$0xff] %v2120_v63  ;;  %v2554_v4 = vsub.f32 %v6717_v10, %v5905_v31  ;;  %v4141_v32 = vpop.eup %4140  ;;  %v2407_v45 = vadd.f32 %v4139_v60, %v2403_v1  ;;  %4156 = vpow2.f32 %v2340_v40  ;;  %v2356_v61 = vmul.f32 1.442695, %v2355_v54  ;;  %v5980_v60 = vld [vmem:[%s5079_s17 + $0xd0] sm:$0xff] }
 0x2b2   : > { %v2542_v49 = vsub.f32 %v5961_v27, %v5905_v31  ;;  %v4143_v26 = vpop.eup %4142  ;;  %v2232_v52 = vadd.f32 %v4137_v62, %v2228_v38  ;;  %4158 = vpow2.f32 %v2344_v50  ;;  %v2360_v35 = vmul.f32 1.442695, %v2359_v15 }
 0x2b3   : > { %v2546_v9 = vsub.f32 %v5542_v17, %v5905_v31  ;;  %v4145_v40 = vpop.eup %4144  ;;  %v2299_v48 = vmul.f32 0.6931472, %v4143_v26  ;;  %v2411_v23 = vadd.f32 %v4141_v32, %v2407_v45  ;;  %4160 = vpow2.f32 %v2348_v5  ;;  %v4300_v32 = vld [vmem:[%s5079_s17 + $0x138] sm:$0xff] }
 0x2b4   : > { %v2528_v54 = vmul.f32 1.442695, %v2527_v36  ;;  %v4147_v63 = vpop.eup %4146  ;;  %4162 = vlog2.f32 %v2232_v52  ;;  %v2531_v14 = vmul.f32 1.442695, %v2530_v43  ;;  %v2535_v50 = vmul.f32 1.442695, %v2534_v28 }
 0x2b5   : > { %v2539_v16 = vmul.f32 1.442695, %v2538_v42  ;;  %v4149_v62 = vpop.eup %4148  ;;  %v2300_v15 = vadd.f32 %v2299_v48, %v5535_v12  ;;  %v2415_v17 = vadd.f32 %v4145_v40, %v2411_v23  ;;  %4164 = vpow2.f32 %v5915_v30  ;;  %v5975_v36 = vld [vmem:[%s5079_s17 + $0x50] sm:$0xff]  ;;  %v4298_v12 = vld [vmem:[%s5079_s17 + $0x38] sm:$0xff] }
 0x2b6   : > { %v2543_v1 = vmul.f32 1.442695, %v2542_v49  ;;  %4166 = vpow2.f32 %v2356_v61  ;;  %v5972_v5 = vmul.f32 1.442695, %v2546_v9  ;;  %v2462_v43 = vsub.f32 %v5975_v36, %v5909_v55  ;;  %v4299_v30 = vld [vmem:[%s5079_s17 + $0xb8] sm:$0xff] }
 0x2b7   : > { %v2465_v28 = vsub.f32 %v5980_v60, %v5909_v55  ;;  %v2301_v38 = vsub.f32 %v4298_v12, %v2300_v15  ;;  %v2303_v42 = vsub.f32 %v4299_v30, %v2300_v15  ;;  %v2305_v45 = vsub.f32 %v4300_v32, %v2300_v15  ;;  %v4301_v61 = vld [vmem:[%s5079_s17 + $0x1b8] sm:$0xff]  ;;  %v5997_v30 = vld [vmem:[%s5079_s17 + $0x150] sm:$0xff] }
 0x2b8   : > { %v2307_v49 = vsub.f32 %v4301_v61, %v2300_v15  ;;  %v4151_v26 = vpop.eup %4150  ;;  %v2309_v52 = vsub.f32 %v6661_v37, %v2300_v15  ;;  %v2311_v9 = vsub.f32 %v5279_v47, %v2300_v15  ;;  %v2313_v40 = vsub.f32 %v5490_v21, %v2300_v15  ;;  %v6002_v37 = vld [vmem:[%s5079_s17 + $0x1d0] sm:$0xff] }
 0x2b9   : > { %v2315_v48 = vsub.f32 %v5492_v29, %v2300_v15  ;;  %v4153_v23 = vpop.eup %4152  ;;  %2302 = vst [vmem:[%s5079_s17 + $0x38] sm:$0xff] %v2301_v38  ;;  %2304 = vst [vmem:[%s5079_s17 + $0xb8] sm:$0xff] %v2303_v42  ;;  %v2419_v12 = vadd.f32 %v4147_v63, %v2415_v17  ;;  %4168 = vpow2.f32 %v2528_v54  ;;  %v2469_v47 = vsub.f32 %v5997_v30, %v5909_v55  ;;  %v6015_v42 = vld [vmem:[%s5079_s17 + $0x250] sm:$0xff] }
 0x2ba   : > { %2306 = vst [vmem:[%s5079_s17 + $0x138] sm:$0xff] %v2305_v45  ;;  %2308 = vst [vmem:[%s5079_s17 + $0x1b8] sm:$0xff] %v2307_v49  ;;  %v2473_v21 = vsub.f32 %v6002_v37, %v5909_v55  ;;  %v4155_v29 = vpop.eup %4154  ;;  %v2338_v15 = vadd.f32 %v4153_v23, %v4151_v26  ;;  %4170 = vpow2.f32 %v2531_v14  ;;  %v2485_v54 = vsub.f32 %v6702_v0, %v5909_v55  ;;  %v6721_v45 = vld [vmem:[#allocation75_spill] sm:$0xff] }
 0x2bb   : > { %2310 = vst [vmem:[%s5079_s17 + $0x238] sm:$0xff] %v2309_v52  ;;  %2312 = vst [vmem:[%s5079_s17 + $0x2b8] sm:$0xff] %v2311_v9  ;;  %v4157_v17 = vpop.eup %4156  ;;  %v2423_v38 = vadd.f32 %v4149_v62, %v2419_v12  ;;  %4172 = vpow2.f32 %v2360_v35  ;;  %v2477_v32 = vsub.f32 %v6015_v42, %v5909_v55  ;;  %v6021_v61 = vmax.f32 %v5845_v59, %v6721_v45  ;;  %v6027_v52 = vld [vmem:[%s5079_s17 + $0x2d0] sm:$0xff] }
 0x2bc   : > { %2314 = vst [vmem:[%s5079_s17 + $0x338] sm:$0xff] %v2313_v40  ;;  %2316 = vst [vmem:[%s5079_s17 + $0x3b8] sm:$0xff] %v2315_v48  ;;  %v4159_v49 = vpop.eup %4158  ;;  %v2342_v14 = vadd.f32 %v4157_v17, %v2338_v15  ;;  %4174 = vpow2.f32 %v2535_v50  ;;  %v2551_v26 = vmul.f32 1.442695, %v2550_v56  ;;  %v2481_v35 = vsub.f32 %v6027_v52, %v5909_v55 }
 0x2bd   : > { %6722 = vst [vmem:[#allocation23_spill] sm:$0xff] %v6021_v61  ;;  %v4161_v62 = vpop.eup %4160  ;;  %v2427_v9 = vadd.f32 %v4155_v29, %v2423_v38  ;;  %4176 = vpow2.f32 %v2539_v16  ;;  %v2555_v59 = vmul.f32 1.442695, %v2554_v4  ;;  %v2463_v40 = vmul.f32 1.442695, %v2462_v43 }
 0x2be   : > { %v4163_v48 = vpop.eup %4162  ;;  %v2346_v23 = vadd.f32 %v4159_v49, %v2342_v14  ;;  %4178 = vpow2.f32 %v2543_v1  ;;  %v2466_v50 = vmul.f32 1.442695, %v2465_v28  ;;  %v2470_v56 = vmul.f32 1.442695, %v2469_v47  ;;  %v6043_v28 = vld [vmem:[%s5079_s17 + $0x68] sm:$0xff]  ;;  %v4308_v49 = vld [vmem:[%s5079_s17 + $0x30] sm:$0xff] }
 0x2bf   : > { %v4165_v12 = vpop.eup %4164  ;;  %v2234_v15 = vmul.f32 0.6931472, %v4163_v48  ;;  %4180 = vlog2.f32 %v2427_v9  ;;  %v2474_v17 = vmul.f32 1.442695, %v2473_v21  ;;  %v6034_v63 = vmul.f32 1.442695, %v2477_v32 }
 0x2c0   : > { %v4167_v29 = vpop.eup %4166  ;;  %v2350_v16 = vadd.f32 %v4161_v62, %v2346_v23  ;;  %4182 = vpow2.f32 %v5972_v5  ;;  %v6037_v4 = vmul.f32 1.442695, %v2481_v35  ;;  %v6039_v43 = vmul.f32 1.442695, %v2485_v54  ;;  %6723 = vst [vmem:[#allocation19_spill] sm:$0xff] %v6043_v28  ;;  %v6048_v21 = vld [vmem:[%s5079_s17 + $0xe8] sm:$0xff] }
 0x2c1   : > { %v2235_v1 = vadd.f32 %v2234_v15, %v5716_v51  ;;  %4184 = vpow2.f32 %v2551_v26  ;;  %v2657_v47 = vsub.f32 %v6043_v28, %v6021_v61  ;;  %6724 = vst [vmem:[#allocation20_spill] sm:$0xff] %v6048_v21  ;;  %v2660_v5 = vsub.f32 %v6048_v21, %v6021_v61  ;;  %v4309_v26 = vld [vmem:[%s5079_s17 + $0xb0] sm:$0xff] }
 0x2c2   : > { %v2354_v38 = vadd.f32 %v4165_v12, %v2350_v16  ;;  %4186 = vpow2.f32 %v2463_v40  ;;  %v4310_v62 = vld [vmem:[%s5079_s17 + $0x130] sm:$0xff] }
 0x2c3   : > { %v4169_v32 = vpop.eup %4168  ;;  %v2236_v14 = vsub.f32 %v4308_v49, %v2235_v1  ;;  %v2238_v35 = vsub.f32 %v4309_v26, %v2235_v1  ;;  %v2240_v9 = vsub.f32 %v4310_v62, %v2235_v1  ;;  %v4311_v48 = vld [vmem:[%s5079_s17 + $0x1b0] sm:$0xff]  ;;  %v2248_v49 = vsub.f32 %v5502_v34, %v2235_v1 }
 0x2c4   : > { %v2242_v23 = vsub.f32 %v4311_v48, %v2235_v1  ;;  %v4171_v40 = vpop.eup %4170  ;;  %v4312_v12 = vld [vmem:[%s5079_s17 + $0x230] sm:$0xff]  ;;  %v2250_v54 = vsub.f32 %v5504_v13, %v2235_v1  ;;  %v2358_v62 = vadd.f32 %v4167_v29, %v2354_v38  ;;  %4188 = vpow2.f32 %v2466_v50  ;;  %v6078_v13 = vld [vmem:[%s5079_s17 + $0x1e8] sm:$0xff] }
 0x2c5   : > { %v2244_v15 = vsub.f32 %v4312_v12, %v2235_v1  ;;  %v4313_v16 = vld [vmem:[%s5079_s17 + $0x2b0] sm:$0xff]  ;;  %v4173_v26 = vpop.eup %4172  ;;  %2237 = vst [vmem:[%s5079_s17 + $0x30] sm:$0xff] %v2236_v14  ;;  %2239 = vst [vmem:[%s5079_s17 + $0xb0] sm:$0xff] %v2238_v35  ;;  %v2533_v48 = vadd.f32 %v4171_v40, %v4169_v32  ;;  %v6069_v12 = vld [vmem:[%s5079_s17 + $0x168] sm:$0xff]  ;;  %4190 = vpow2.f32 %v2555_v59 }
 0x2c6   : > { %v2246_v51 = vsub.f32 %v4313_v16, %v2235_v1  ;;  %2241 = vst [vmem:[%s5079_s17 + $0x130] sm:$0xff] %v2240_v9  ;;  %2243 = vst [vmem:[%s5079_s17 + $0x1b0] sm:$0xff] %v2242_v23  ;;  %v2664_v16 = vsub.f32 %v6069_v12, %v6021_v61  ;;  %v4175_v34 = vpop.eup %4174  ;;  %v2668_v1 = vsub.f32 %v6078_v13, %v6021_v61  ;;  %v6083_v14 = vld [vmem:[%s5079_s17 + $0x268] sm:$0xff]  ;;  %4192 = vpow2.f32 %v2470_v56  ;;  %v6729_v32 = vld [vmem:[#allocation76_spill] sm:$0xff] }
 0x2c7   : > { %6725 = vst [vmem:[#allocation5_spill] sm:$0xff] %v6069_v12  ;;  %2245 = vst [vmem:[%s5079_s17 + $0x230] sm:$0xff] %v2244_v15  ;;  %v2672_v50 = vsub.f32 %v6083_v14, %v6021_v61  ;;  %v6088_v29 = vld [vmem:[%s5079_s17 + $0x2e8] sm:$0xff]  ;;  %v2537_v59 = vadd.f32 %v4175_v34, %v2533_v48  ;;  %v6731_v9 = vld [vmem:[#allocation11_spill] sm:$0xff]  ;;  %4194 = vpow2.f32 %v2474_v17  ;;  %v2661_v12 = vmul.f32 1.442695, %v2660_v5 }
 0x2c8   : > { %2247 = vst [vmem:[%s5079_s17 + $0x2b0] sm:$0xff] %v2246_v51  ;;  %2249 = vst [vmem:[%s5079_s17 + $0x330] sm:$0xff] %v2248_v49  ;;  %v2676_v38 = vsub.f32 %v6088_v29, %v6021_v61  ;;  %v4177_v51 = vpop.eup %4176  ;;  %v6730_v35 = vld [vmem:[#allocation18_spill] sm:$0xff]  ;;  %v6733_v49 = vsub.f32 %v6718_v53, %v5909_v55  ;;  %v2665_v28 = vmul.f32 1.442695, %v2664_v16  ;;  %v6103_v56 = vld [vmem:[%s5079_s17 + $0x278] sm:$0xff] }
 0x2c9   : > { %2251 = vst [vmem:[%s5079_s17 + $0x3b0] sm:$0xff] %v2250_v54  ;;  %6726 = vst [vmem:[#allocation13_spill] sm:$0xff] %v6078_v13  ;;  %v2362_v54 = vadd.f32 %v4173_v26, %v2358_v62  ;;  %v6732_v23 = vmax.f32 %v6730_v35, %v6731_v9  ;;  %v4179_v15 = vpop.eup %4178  ;;  %v2658_v13 = vmul.f32 1.442695, %v2657_v47  ;;  %v2541_v21 = vadd.f32 %v4177_v51, %v2537_v59  ;;  %v6734_v26 = vld [vmem:[#allocation77_spill] sm:$0xff]  ;;  %v6106_v48 = vld [vmem:[%s5079_s17 + $0x270] sm:$0xff] }
 0x2ca   : > { %6727 = vst [vmem:[#allocation14_spill] sm:$0xff] %v6083_v14  ;;  %6728 = vst [vmem:[#allocation25_spill] sm:$0xff] %v6088_v29  ;;  %v2490_v14 = vmul.f32 1.442695, %v6733_v49  ;;  %v4181_v29 = vpop.eup %4180  ;;  %v2669_v17 = vmul.f32 1.442695, %v2668_v1  ;;  %v6735_v51 = vsub.f32 %v6706_v8, %v6021_v61 }
 0x2cb   : > { %v2590_v40 = vmax.f32 %v6732_v23, %v6729_v32  ;;  %4196 = vlog2.f32 %v2362_v54  ;;  %v4183_v34 = vpop.eup %4182  ;;  %v2429_v35 = vmul.f32 0.6931472, %v4181_v29  ;;  %v6109_v9 = vmul.f32 1.442695, %v2672_v50  ;;  %v6738_v50 = vld [vmem:[#allocation52_spill] sm:$0xff] }
 0x2cc   : > { %4198 = vpow2.f32 %v6034_v63  ;;  %v4185_v47 = vpop.eup %4184  ;;  %v2545_v5 = vadd.f32 %v4179_v15, %v2541_v21  ;;  %v6112_v16 = vmul.f32 1.442695, %v2676_v38  ;;  %v6117_v54 = vmul.f32 1.442695, %v6735_v51  ;;  %v6742_v15 = vld [vmem:[#allocation56_spill] sm:$0xff] }
 0x2cd   : > { %v6100_v62 = vmax.f32 %v2590_v40, %v6734_v26  ;;  %4200 = vpow2.f32 %v6037_v4  ;;  %v4187_v29 = vpop.eup %4186  ;;  %v2430_v63 = vadd.f32 %v2429_v35, %v5785_v57  ;;  %v6736_v21 = vsub.f32 %v6721_v45, %v6021_v61  ;;  %v6737_v4 = vld [vmem:[#allocation48_spill] sm:$0xff]  ;;  %v6131_v40 = vld [vmem:[%s5079_s17 + $0x60] sm:$0xff] }
 0x2ce   : > { %4202 = vpow2.f32 %v6039_v43  ;;  %v6739_v38 = vmax.f32 %v6737_v4, %v6738_v50  ;;  %v2549_v23 = vadd.f32 %v4183_v34, %v2545_v5  ;;  %6740 = vst [vmem:[#allocation26_spill] sm:$0xff] %v6131_v40  ;;  %v6741_v43 = vld [vmem:[#allocation53_spill] sm:$0xff]  ;;  %v4319_v4 = vld [vmem:[%s5079_s17 + $0x148] sm:$0xff]  ;;  %v6144_v50 = vld [vmem:[%s5079_s17 + $0x2f8] sm:$0xff] }
 0x2cf   : > { %v6124_v1 = vmul.f32 1.442695, %v6736_v21  ;;  %4204 = vpow2.f32 %v2658_v13  ;;  %v2592_v57 = vsub.f32 %v6131_v40, %v6100_v62  ;;  %v6743_v49 = vmax.f32 %v6741_v43, %v6742_v15  ;;  %v4320_v13 = vld [vmem:[%s5079_s17 + $0x1c8] sm:$0xff]  ;;  %v4189_v40 = vpop.eup %4188 }
 0x2d0   : > { %v2783_v59 = vmax.f32 %v6739_v38, %v6103_v56  ;;  %v2431_v51 = vsub.f32 %v5815_v25, %v2430_v63  ;;  %v2433_v21 = vsub.f32 %v5825_v19, %v2430_v63  ;;  %v2435_v34 = vsub.f32 %v4319_v4, %v2430_v63  ;;  %v6147_v38 = vld [vmem:[%s5079_s17 + $0x2f0] sm:$0xff]  ;;  %v4321_v43 = vld [vmem:[%s5079_s17 + $0x248] sm:$0xff]  ;;  %v4191_v45 = vpop.eup %4190 }
 0x2d1   : > { %v2718_v35 = vmax.f32 %v6743_v49, %v6106_v48  ;;  %v2437_v5 = vsub.f32 %v4320_v13, %v2430_v63  ;;  %v2439_v15 = vsub.f32 %v4321_v43, %v2430_v63  ;;  %v4322_v25 = vld [vmem:[%s5079_s17 + $0x2c8] sm:$0xff]  ;;  %v2443_v19 = vsub.f32 %v6683_v22, %v2430_v63  ;;  %v6158_v43 = vld [vmem:[%s5079_s17 + $0xe0] sm:$0xff]  ;;  %v4193_v61 = vpop.eup %4192 }
 0x2d2   : > { %v2441_v49 = vsub.f32 %v4322_v25, %v2430_v63  ;;  %v2445_v4 = vsub.f32 %v6691_v2, %v2430_v63  ;;  %2432 = vst [vmem:[%s5079_s17 + $0x48] sm:$0xff] %v2431_v51  ;;  %2434 = vst [vmem:[%s5079_s17 + $0xc8] sm:$0xff] %v2433_v21  ;;  %v2553_v13 = vadd.f32 %v4185_v47, %v2549_v23  ;;  %4206 = vpow2.f32 %v2661_v12  ;;  %v6167_v22 = vld [vmem:[%s5079_s17 + $0x160] sm:$0xff] }
 0x2d3   : > { %2436 = vst [vmem:[%s5079_s17 + $0x148] sm:$0xff] %v2435_v34  ;;  %2438 = vst [vmem:[%s5079_s17 + $0x1c8] sm:$0xff] %v2437_v5  ;;  %v2468_v8 = vadd.f32 %v4189_v40, %v4187_v29  ;;  %v2595_v25 = vsub.f32 %v6158_v43, %v6100_v62  ;;  %4208 = vpow2.f32 %v2490_v14  ;;  %v2599_v2 = vsub.f32 %v6167_v22, %v6100_v62  ;;  %v4195_v29 = vpop.eup %4194  ;;  %v6176_v14 = vld [vmem:[%s5079_s17 + $0x1e0] sm:$0xff] }
 0x2d4   : > { %2440 = vst [vmem:[%s5079_s17 + $0x248] sm:$0xff] %v2439_v15  ;;  %2442 = vst [vmem:[%s5079_s17 + $0x2c8] sm:$0xff] %v2441_v49  ;;  %v2784_v47 = vmax.f32 %v2783_v59, %v6144_v50  ;;  %v2719_v12 = vmax.f32 %v2718_v35, %v6147_v38  ;;  %v2557_v63 = vadd.f32 %v4191_v45, %v2553_v13  ;;  %4210 = vpow2.f32 %v2665_v28  ;;  %v6745_v15 = vld [vmem:[#allocation80_spill] sm:$0xff] }
 0x2d5   : > { %2444 = vst [vmem:[%s5079_s17 + $0x348] sm:$0xff] %v2443_v19  ;;  %2446 = vst [vmem:[%s5079_s17 + $0x3c8] sm:$0xff] %v2445_v4  ;;  %v2472_v23 = vadd.f32 %v4193_v61, %v2468_v8  ;;  %v4197_v51 = vpop.eup %4196  ;;  %4212 = vpow2.f32 %v2669_v17  ;;  %v2593_v21 = vmul.f32 1.442695, %v2592_v57  ;;  %v2603_v34 = vsub.f32 %v6176_v14, %v6100_v62  ;;  %v6744_v17 = vld [vmem:[#allocation78_spill] sm:$0xff] }
 0x2d6   : > { %v4199_v35 = vpop.eup %4198  ;;  %v2364_v5 = vmul.f32 0.6931472, %v4197_v51  ;;  %4214 = vlog2.f32 %v2557_v63  ;;  %v2596_v45 = vmul.f32 1.442695, %v2595_v25  ;;  %v2600_v28 = vmul.f32 1.442695, %v2599_v2 }
 0x2d7   : > { %v2476_v8 = vadd.f32 %v4195_v29, %v2472_v23  ;;  %v4201_v61 = vpop.eup %4200  ;;  %4216 = vpow2.f32 %v6109_v9  ;;  %v2785_v57 = vmax.f32 %v2784_v47, %v6744_v17  ;;  %v2720_v49 = vmax.f32 %v2719_v12, %v6745_v15  ;;  %v6188_v51 = vld [vmem:[%s5079_s17 + $0x260] sm:$0xff]  ;;  %v6746_v2 = vld [vmem:[#allocation79_spill] sm:$0xff] }
 0x2d8   : > { %v4203_v19 = vpop.eup %4202  ;;  %v2365_v4 = vadd.f32 %v2364_v5, %v5788_v44  ;;  %4218 = vpow2.f32 %v6112_v16  ;;  %v2607_v25 = vsub.f32 %v6188_v51, %v6100_v62  ;;  %v6194_v9 = vld [vmem:[%s5079_s17 + $0x2e0] sm:$0xff] }
 0x2d9   : > { %v2480_v13 = vadd.f32 %v4199_v35, %v2476_v8  ;;  %v4205_v29 = vpop.eup %4204  ;;  %4220 = vpow2.f32 %v6117_v54  ;;  %v2611_v44 = vsub.f32 %v6194_v9, %v6100_v62  ;;  %v6199_v47 = vmax.f32 %v2785_v57, %v6746_v2  ;;  %v6747_v16 = vld [vmem:[#allocation81_spill] sm:$0xff] }
 0x2da   : > { %v6202_v12 = vmax.f32 %v2720_v49, %v6747_v16  ;;  %v2366_v63 = vsub.f32 %v5872_v24, %v2365_v4  ;;  %v2368_v23 = vsub.f32 %v5877_v39, %v2365_v4  ;;  %v2370_v54 = vsub.f32 %v5883_v33, %v2365_v4  ;;  %v4328_v8 = vld [vmem:[%s5079_s17 + $0x2c0] sm:$0xff] }
 0x2db   : > { %v2372_v35 = vsub.f32 %v5892_v7, %v2365_v4  ;;  %v2374_v5 = vsub.f32 %v5897_v20, %v2365_v4  ;;  %v2376_v57 = vsub.f32 %v4328_v8, %v2365_v4  ;;  %v2378_v59 = vsub.f32 %v6687_v6, %v2365_v4 }
 0x2dc   : > { %v2380_v49 = vsub.f32 %v6692_v11, %v2365_v4  ;;  %v4207_v40 = vpop.eup %4206  ;;  %2367 = vst [vmem:[%s5079_s17 + $0x40] sm:$0xff] %v2366_v63  ;;  %2369 = vst [vmem:[%s5079_s17 + $0xc0] sm:$0xff] %v2368_v23  ;;  %v2484_v24 = vadd.f32 %v4201_v61, %v2480_v13  ;;  %4222 = vpow2.f32 %v2593_v21  ;;  %v2604_v39 = vmul.f32 1.442695, %v2603_v34  ;;  %v6222_v63 = vld [vmem:[%s5079_s17 + $0x78] sm:$0xff] }
 0x2dd   : > { %2371 = vst [vmem:[%s5079_s17 + $0x140] sm:$0xff] %v2370_v54  ;;  %2373 = vst [vmem:[%s5079_s17 + $0x1c0] sm:$0xff] %v2372_v35  ;;  %v4209_v33 = vpop.eup %4208  ;;  %v2663_v7 = vadd.f32 %v4207_v40, %v4205_v29  ;;  %4224 = vpow2.f32 %v2596_v45  ;;  %v2608_v6 = vmul.f32 1.442695, %v2607_v25  ;;  %v2612_v11 = vmul.f32 1.442695, %v2611_v44 }
 0x2de   : > { %2375 = vst [vmem:[%s5079_s17 + $0x240] sm:$0xff] %v2374_v5  ;;  %2377 = vst [vmem:[%s5079_s17 + $0x2c0] sm:$0xff] %v2376_v57  ;;  %v4211_v20 = vpop.eup %4210  ;;  %v2488_v4 = vadd.f32 %v4203_v19, %v2484_v24  ;;  %4226 = vpow2.f32 %v6124_v1  ;;  %v2787_v21 = vsub.f32 %v6222_v63, %v6199_v47  ;;  %v6227_v34 = vld [vmem:[%s5079_s17 + $0xf8] sm:$0xff]  ;;  %v6748_v45 = vsub.f32 %v6729_v32, %v6100_v62 }
 0x2df   : > { %2379 = vst [vmem:[%s5079_s17 + $0x340] sm:$0xff] %v2378_v59  ;;  %2381 = vst [vmem:[%s5079_s17 + $0x3c0] sm:$0xff] %v2380_v49  ;;  %v2790_v59 = vsub.f32 %v6227_v34, %v6199_v47  ;;  %v4213_v61 = vpop.eup %4212  ;;  %v2667_v40 = vadd.f32 %v4211_v20, %v2663_v7  ;;  %4228 = vpow2.f32 %v2600_v28  ;;  %v6235_v13 = vld [vmem:[%s5079_s17 + $0x178] sm:$0xff]  ;;  %v6749_v44 = vsub.f32 %v6734_v26, %v6100_v62 }
 0x2e0   : > { %v2616_v19 = vmul.f32 1.442695, %v6748_v45  ;;  %v2794_v1 = vsub.f32 %v6235_v13, %v6199_v47  ;;  %v4215_v25 = vpop.eup %4214  ;;  %v2492_v29 = vadd.f32 %v4209_v33, %v2488_v4  ;;  %4230 = vpow2.f32 %v2604_v39  ;;  %v6243_v54 = vld [vmem:[%s5079_s17 + $0x1f8] sm:$0xff] }
 0x2e1   : > { %v2620_v23 = vmul.f32 1.442695, %v6749_v44  ;;  %v2798_v28 = vsub.f32 %v6243_v54, %v6199_v47  ;;  %v4217_v35 = vpop.eup %4216  ;;  %v2559_v5 = vmul.f32 0.6931472, %v4215_v25  ;;  %v2671_v8 = vadd.f32 %v4213_v61, %v2667_v40 }
 0x2e2   : > { %4232 = vpow2.f32 %v2608_v6  ;;  %v2810_v57 = vsub.f32 %v6744_v17, %v6199_v47  ;;  %v4219_v49 = vpop.eup %4218  ;;  %v2788_v24 = vmul.f32 1.442695, %v2787_v21  ;;  %v2791_v39 = vmul.f32 1.442695, %v2790_v59  ;;  %v6257_v59 = vld [vmem:[%s5079_s17 + $0x70] sm:$0xff] }
 0x2e3   : > { %4234 = vlog2.f32 %v2492_v29  ;;  %v2814_v33 = vsub.f32 %v6746_v2, %v6199_v47  ;;  %v4221_v7 = vpop.eup %4220  ;;  %v2560_v20 = vadd.f32 %v2559_v5, %v5905_v31  ;;  %v2675_v4 = vadd.f32 %v4217_v35, %v2671_v8  ;;  %v4334_v29 = vld [vmem:[%s5079_s17 + $0x2d8] sm:$0xff] }
 0x2e4   : > { %4236 = vpow2.f32 %v2612_v11  ;;  %v2795_v45 = vmul.f32 1.442695, %v2794_v1  ;;  %v2802_v6 = vsub.f32 %v6103_v56, %v6199_v47  ;;  %v2806_v21 = vsub.f32 %v6144_v50, %v6199_v47 }
 0x2e5   : > { %4238 = vpow2.f32 %v2616_v19  ;;  %v2722_v61 = vsub.f32 %v6257_v59, %v6202_v12  ;;  %v2561_v31 = vsub.f32 %v5930_v18, %v2560_v20  ;;  %v2563_v11 = vsub.f32 %v5935_v41, %v2560_v20 }
 0x2e6   : > { %v2565_v40 = vsub.f32 %v5944_v46, %v2560_v20  ;;  %v2567_v19 = vsub.f32 %v5951_v3, %v2560_v20  ;;  %v4223_v1 = vpop.eup %4222  ;;  %v2569_v25 = vsub.f32 %v5961_v27, %v2560_v20  ;;  %v2571_v44 = vsub.f32 %v4334_v29, %v2560_v20 }
 0x2e7   : > { %v2573_v35 = vsub.f32 %v5564_v58, %v2560_v20  ;;  %v2575_v5 = vsub.f32 %v6717_v10, %v2560_v20  ;;  %v4225_v18 = vpop.eup %4224  ;;  %2562 = vst [vmem:[%s5079_s17 + $0x58] sm:$0xff] %v2561_v31  ;;  %2564 = vst [vmem:[%s5079_s17 + $0xd8] sm:$0xff] %v2563_v11  ;;  %v2679_v41 = vadd.f32 %v4219_v49, %v2675_v4  ;;  %4240 = vpow2.f32 %v2788_v24  ;;  %v6278_v24 = vld [vmem:[%s5079_s17 + $0xf0] sm:$0xff] }
 0x2e8   : > { %2566 = vst [vmem:[%s5079_s17 + $0x158] sm:$0xff] %v2565_v40  ;;  %2568 = vst [vmem:[%s5079_s17 + $0x1d8] sm:$0xff] %v2567_v19  ;;  %v2799_v46 = vmul.f32 1.442695, %v2798_v28  ;;  %v4227_v3 = vpop.eup %4226  ;;  %v2598_v27 = vadd.f32 %v4225_v18, %v4223_v1  ;;  %4242 = vpow2.f32 %v2791_v39  ;;  %v2803_v58 = vmul.f32 1.442695, %v2802_v6 }
 0x2e9   : > { %2570 = vst [vmem:[%s5079_s17 + $0x258] sm:$0xff] %v2569_v25  ;;  %2572 = vst [vmem:[%s5079_s17 + $0x2d8] sm:$0xff] %v2571_v44  ;;  %v4229_v8 = vpop.eup %4228  ;;  %v2683_v10 = vadd.f32 %v4221_v7, %v2679_v41  ;;  %4244 = vpow2.f32 %v2620_v23  ;;  %v2807_v20 = vmul.f32 1.442695, %v2806_v21  ;;  %v2811_v31 = vmul.f32 1.442695, %v2810_v57 }
 0x2ea   : > { %2574 = vst [vmem:[%s5079_s17 + $0x358] sm:$0xff] %v2573_v35  ;;  %2576 = vst [vmem:[%s5079_s17 + $0x3d8] sm:$0xff] %v2575_v5  ;;  %v4231_v11 = vpop.eup %4230  ;;  %v2602_v49 = vadd.f32 %v4229_v8, %v2598_v27  ;;  %4246 = vpow2.f32 %v2795_v45  ;;  %v2723_v28 = vmul.f32 1.442695, %v2722_v61  ;;  %v2725_v4 = vsub.f32 %v6278_v24, %v6202_v12  ;;  %v6283_v39 = vld [vmem:[%s5079_s17 + $0x170] sm:$0xff] }
 0x2eb   : > { %v2687_v19 = vadd.f32 %v4227_v3, %v2683_v10  ;;  %4248 = vpow2.f32 %v2799_v46  ;;  %v2729_v7 = vsub.f32 %v6283_v39, %v6202_v12  ;;  %v6288_v23 = vld [vmem:[%s5079_s17 + $0x1f0] sm:$0xff]  ;;  %v2745_v21 = vsub.f32 %v6745_v15, %v6202_v12 }
 0x2ec   : > { %v4233_v40 = vpop.eup %4232  ;;  %v2733_v57 = vsub.f32 %v6288_v23, %v6202_v12  ;;  %v2606_v6 = vadd.f32 %v4231_v11, %v2602_v49  ;;  %4250 = vpow2.f32 %v2803_v58  ;;  %v2749_v61 = vsub.f32 %v6747_v16, %v6202_v12 }
 0x2ed   : > { %v4235_v45 = vpop.eup %4234  ;;  %4252 = vlog2.f32 %v2687_v19  ;;  %v2815_v35 = vmul.f32 1.442695, %v2814_v33  ;;  %v2726_v18 = vmul.f32 1.442695, %v2725_v4  ;;  %v2737_v41 = vsub.f32 %v6106_v48, %v6202_v12 }
 0x2ee   : > { %v4237_v1 = vpop.eup %4236  ;;  %v2494_v25 = vmul.f32 0.6931472, %v4235_v45  ;;  %v2610_v44 = vadd.f32 %v4233_v40, %v2606_v6  ;;  %4254 = vpow2.f32 %v2807_v20  ;;  %v2730_v3 = vmul.f32 1.442695, %v2729_v7 }
 0x2ef   : > { %v4239_v29 = vpop.eup %4238  ;;  %4256 = vpow2.f32 %v2811_v31  ;;  %v2734_v27 = vmul.f32 1.442695, %v2733_v57  ;;  %v2738_v4 = vmul.f32 1.442695, %v2737_v41  ;;  %v2750_v41 = vmul.f32 1.442695, %v2749_v61 }
 0x2f0   : > { %v2495_v5 = vadd.f32 %v2494_v25, %v5909_v55  ;;  %v2614_v46 = vadd.f32 %v4237_v1, %v2610_v44  ;;  %4258 = vpow2.f32 %v2723_v28  ;;  %v6750_v44 = vld [vmem:[#allocation23_spill] sm:$0xff] }
 0x2f1   : > { %v4241_v58 = vpop.eup %4240  ;;  %4260 = vpow2.f32 %v2726_v18  ;;  %v2746_v18 = vmul.f32 1.442695, %v2745_v21  ;;  %v6758_v61 = vld [vmem:[#allocation75_spill] sm:$0xff] }
 0x2f2   : > { %v2496_v8 = vsub.f32 %v5975_v36, %v2495_v5  ;;  %v2498_v33 = vsub.f32 %v5980_v60, %v2495_v5  ;;  %v2500_v55 = vsub.f32 %v5997_v30, %v2495_v5  ;;  %v2502_v10 = vsub.f32 %v6002_v37, %v2495_v5  ;;  %v4243_v20 = vpop.eup %4242 }
 0x2f3   : > { %v2504_v31 = vsub.f32 %v6015_v42, %v2495_v5  ;;  %v2506_v11 = vsub.f32 %v6027_v52, %v2495_v5  ;;  %v2508_v49 = vsub.f32 %v6702_v0, %v2495_v5  ;;  %v2510_v28 = vsub.f32 %v6718_v53, %v2495_v5  ;;  %v4245_v36 = vpop.eup %4244 }
 0x2f4   : > { %2497 = vst [vmem:[%s5079_s17 + $0x50] sm:$0xff] %v2496_v8  ;;  %2499 = vst [vmem:[%s5079_s17 + $0xd0] sm:$0xff] %v2498_v33  ;;  %v2618_v60 = vadd.f32 %v4239_v29, %v2614_v46  ;;  %v2793_v30 = vadd.f32 %v4243_v20, %v4241_v58  ;;  %v2741_v37 = vsub.f32 %v6147_v38, %v6202_v12  ;;  %v4247_v42 = vpop.eup %4246  ;;  %4262 = vpow2.f32 %v2815_v35  ;;  %v6751_v46 = vld [vmem:[#allocation19_spill] sm:$0xff]  ;;  %v6753_v8 = vld [vmem:[#allocation5_spill] sm:$0xff] }
 0x2f5   : > { %2501 = vst [vmem:[%s5079_s17 + $0x150] sm:$0xff] %v2500_v55  ;;  %2503 = vst [vmem:[%s5079_s17 + $0x1d0] sm:$0xff] %v2502_v10  ;;  %v4249_v0 = vpop.eup %4248  ;;  %4264 = vpow2.f32 %v2730_v3  ;;  %v6754_v55 = vld [vmem:[#allocation13_spill] sm:$0xff] }
 0x2f6   : > { %2505 = vst [vmem:[%s5079_s17 + $0x250] sm:$0xff] %v2504_v31  ;;  %2507 = vst [vmem:[%s5079_s17 + $0x2d0] sm:$0xff] %v2506_v11  ;;  %v2622_v52 = vadd.f32 %v4245_v36, %v2618_v60  ;;  %v2797_v53 = vadd.f32 %v4247_v42, %v2793_v30  ;;  %v4251_v40 = vpop.eup %4250  ;;  %4266 = vpow2.f32 %v2734_v27  ;;  %v2742_v57 = vmul.f32 1.442695, %v2741_v37  ;;  %v6752_v27 = vld [vmem:[#allocation20_spill] sm:$0xff]  ;;  %v6755_v31 = vld [vmem:[#allocation14_spill] sm:$0xff] }
 0x2f7   : > { %2509 = vst [vmem:[%s5079_s17 + $0x350] sm:$0xff] %v2508_v49  ;;  %2511 = vst [vmem:[%s5079_s17 + $0x3d0] sm:$0xff] %v2510_v28  ;;  %v4253_v19 = vpop.eup %4252  ;;  %v6756_v49 = vld [vmem:[#allocation25_spill] sm:$0xff]  ;;  %v6757_v36 = vld [vmem:[#allocation74_spill] sm:$0xff] }
 0x2f8   : > { %4268 = vlog2.f32 %v2622_v52  ;;  %v2801_v7 = vadd.f32 %v4249_v0, %v2797_v53  ;;  %v4255_v45 = vpop.eup %4254  ;;  %v2689_v6 = vmul.f32 0.6931472, %v4253_v19 }
 0x2f9   : > { %v4257_v1 = vpop.eup %4256  ;;  %4270 = vpow2.f32 %v2738_v4 }
 0x2fa   : > { %v2805_v25 = vadd.f32 %v4251_v40, %v2801_v7  ;;  %v4259_v29 = vpop.eup %4258  ;;  %v2690_v35 = vadd.f32 %v2689_v6, %v6750_v44  ;;  %4272 = vpow2.f32 %v2742_v57 }
 0x2fb   : > { %v4261_v20 = vpop.eup %4260  ;;  %4274 = vpow2.f32 %v2746_v18 }
 0x2fc   : > { %v2809_v5 = vadd.f32 %v4255_v45, %v2805_v25  ;;  %v2691_v3 = vsub.f32 %v6751_v46, %v2690_v35  ;;  %v2693_v58 = vsub.f32 %v6752_v27, %v2690_v35  ;;  %v2695_v33 = vsub.f32 %v6753_v8, %v2690_v35  ;;  %v6759_v25 = vld [vmem:[#allocation26_spill] sm:$0xff] }
 0x2fd   : > { %v2697_v10 = vsub.f32 %v6754_v55, %v2690_v35  ;;  %v2699_v11 = vsub.f32 %v6755_v31, %v2690_v35  ;;  %v2701_v28 = vsub.f32 %v6756_v49, %v2690_v35  ;;  %v2703_v21 = vsub.f32 %v6757_v36, %v2690_v35 }
 0x2fe   : > { %v2705_v60 = vsub.f32 %v6758_v61, %v2690_v35  ;;  %v4263_v30 = vpop.eup %4262  ;;  %2692 = vst [vmem:[%s5079_s17 + $0x68] sm:$0xff] %v2691_v3  ;;  %2694 = vst [vmem:[%s5079_s17 + $0xe8] sm:$0xff] %v2693_v58  ;;  %v2813_v37 = vadd.f32 %v4257_v1, %v2809_v5  ;;  %v2728_v42 = vadd.f32 %v4261_v20, %v4259_v29  ;;  %4276 = vpow2.f32 %v2750_v41 }
 0x2ff   : > { %2696 = vst [vmem:[%s5079_s17 + $0x168] sm:$0xff] %v2695_v33  ;;  %2698 = vst [vmem:[%s5079_s17 + $0x1e8] sm:$0xff] %v2697_v10  ;;  %v4265_v0 = vpop.eup %4264 }
 0x300   : > { %2700 = vst [vmem:[%s5079_s17 + $0x268] sm:$0xff] %v2699_v11  ;;  %2702 = vst [vmem:[%s5079_s17 + $0x2e8] sm:$0xff] %v2701_v28  ;;  %v4267_v52 = vpop.eup %4266  ;;  %v2817_v53 = vadd.f32 %v4263_v30, %v2813_v37  ;;  %v2732_v4 = vadd.f32 %v4265_v0, %v2728_v42 }
 0x301   : > { %2704 = vst [vmem:[%s5079_s17 + $0x368] sm:$0xff] %v2703_v21  ;;  %2706 = vst [vmem:[%s5079_s17 + $0x3e8] sm:$0xff] %v2705_v60 }
 0x302   : > { %v4269_v40 = vpop.eup %4268  ;;  %4278 = vlog2.f32 %v2817_v53  ;;  %v2736_v7 = vadd.f32 %v4267_v52, %v2732_v4 }
 0x303   : > { %v2624_v19 = vmul.f32 0.6931472, %v4269_v40  ;;  %v4271_v57 = vpop.eup %4270 }
 0x304   : > { %v2740_v6 = vadd.f32 %v4271_v57, %v2736_v7  ;;  %v4273_v1 = vpop.eup %4272 }
 0x305   : > { %v2625_v45 = vadd.f32 %v2624_v19, %v6100_v62  ;;  %v4275_v27 = vpop.eup %4274 }
 0x306   : > { %v2744_v3 = vadd.f32 %v4273_v1, %v2740_v6 }
 0x307   : > { %v2626_v29 = vsub.f32 %v6759_v25, %v2625_v45  ;;  %v2628_v44 = vsub.f32 %v6158_v43, %v2625_v45  ;;  %v2630_v35 = vsub.f32 %v6167_v22, %v2625_v45  ;;  %v2632_v5 = vsub.f32 %v6176_v14, %v2625_v45 }
 0x308   : > { %v2634_v18 = vsub.f32 %v6188_v51, %v2625_v45  ;;  %v2636_v41 = vsub.f32 %v6194_v9, %v2625_v45  ;;  %v2638_v62 = vsub.f32 %v6729_v32, %v2625_v45  ;;  %v2640_v46 = vsub.f32 %v6734_v26, %v2625_v45  ;;  %v4277_v22 = vpop.eup %4276 }
 0x309   : > { %2627 = vst [vmem:[%s5079_s17 + $0x60] sm:$0xff] %v2626_v29  ;;  %2629 = vst [vmem:[%s5079_s17 + $0xe0] sm:$0xff] %v2628_v44  ;;  %v2748_v43 = vadd.f32 %v4275_v27, %v2744_v3 }
 0x30a   : > { %2631 = vst [vmem:[%s5079_s17 + $0x160] sm:$0xff] %v2630_v35  ;;  %2633 = vst [vmem:[%s5079_s17 + $0x1e0] sm:$0xff] %v2632_v5 }
 0x30b   : > { %2635 = vst [vmem:[%s5079_s17 + $0x260] sm:$0xff] %v2634_v18  ;;  %2637 = vst [vmem:[%s5079_s17 + $0x2e0] sm:$0xff] %v2636_v41  ;;  %v2752_v32 = vadd.f32 %v4277_v22, %v2748_v43 }
 0x30c   : > { %2639 = vst [vmem:[%s5079_s17 + $0x360] sm:$0xff] %v2638_v62  ;;  %2641 = vst [vmem:[%s5079_s17 + $0x3e0] sm:$0xff] %v2640_v46  ;;  %v4279_v14 = vpop.eup %4278 }
 0x30d   : > { %v2819_v26 = vmul.f32 0.6931472, %v4279_v14  ;;  %4280 = vlog2.f32 %v2752_v32 }
 0x30f   : > { %v2820_v51 = vadd.f32 %v2819_v26, %v6199_v47 }
 0x311   : > { %v2821_v9 = vsub.f32 %v6222_v63, %v2820_v51  ;;  %v2823_v58 = vsub.f32 %v6227_v34, %v2820_v51  ;;  %v2825_v8 = vsub.f32 %v6235_v13, %v2820_v51  ;;  %v2827_v33 = vsub.f32 %v6243_v54, %v2820_v51 }
 0x312   : > { %v2829_v55 = vsub.f32 %v6103_v56, %v2820_v51  ;;  %v2831_v10 = vsub.f32 %v6144_v50, %v2820_v51  ;;  %v2833_v20 = vsub.f32 %v6744_v17, %v2820_v51  ;;  %v2835_v31 = vsub.f32 %v6746_v2, %v2820_v51 }
 0x313   : > { %2822 = vst [vmem:[%s5079_s17 + $0x78] sm:$0xff] %v2821_v9  ;;  %2824 = vst [vmem:[%s5079_s17 + $0xf8] sm:$0xff] %v2823_v58 }
 0x314   : > { %2826 = vst [vmem:[%s5079_s17 + $0x178] sm:$0xff] %v2825_v8  ;;  %2828 = vst [vmem:[%s5079_s17 + $0x1f8] sm:$0xff] %v2827_v33 }
 0x315   : > { %2830 = vst [vmem:[%s5079_s17 + $0x278] sm:$0xff] %v2829_v55  ;;  %2832 = vst [vmem:[%s5079_s17 + $0x2f8] sm:$0xff] %v2831_v10 }
 0x316   : > { %2834 = vst [vmem:[%s5079_s17 + $0x378] sm:$0xff] %v2833_v20  ;;  %2836 = vst [vmem:[%s5079_s17 + $0x3f8] sm:$0xff] %v2835_v31 }
 0x317   : > { %v4281_v47 = vpop.eup %4280 }
 0x318   : > { %v2754_v63 = vmul.f32 0.6931472, %v4281_v47 }
 0x31a   : > { %v2755_v56 = vadd.f32 %v2754_v63, %v6202_v12 }
 0x31c   : > { %v2756_v50 = vsub.f32 %v6257_v59, %v2755_v56  ;;  %v2758_v17 = vsub.f32 %v6278_v24, %v2755_v56  ;;  %v2760_v2 = vsub.f32 %v6283_v39, %v2755_v56  ;;  %v2762_v34 = vsub.f32 %v6288_v23, %v2755_v56 }
 0x31d   : > { %v2764_v12 = vsub.f32 %v6106_v48, %v2755_v56  ;;  %v2766_v13 = vsub.f32 %v6147_v38, %v2755_v56  ;;  %v2768_v54 = vsub.f32 %v6745_v15, %v2755_v56  ;;  %v2770_v59 = vsub.f32 %v6747_v16, %v2755_v56 }
 0x31e   : > { %2757 = vst [vmem:[%s5079_s17 + $0x70] sm:$0xff] %v2756_v50  ;;  %2759 = vst [vmem:[%s5079_s17 + $0xf0] sm:$0xff] %v2758_v17 }
 0x31f   : > { %2761 = vst [vmem:[%s5079_s17 + $0x170] sm:$0xff] %v2760_v2  ;;  %2763 = vst [vmem:[%s5079_s17 + $0x1f0] sm:$0xff] %v2762_v34 }
 0x320   : > { %2765 = vst [vmem:[%s5079_s17 + $0x270] sm:$0xff] %v2764_v12  ;;  %2767 = vst [vmem:[%s5079_s17 + $0x2f0] sm:$0xff] %v2766_v13 }
 0x321   : > { %2769 = vst [vmem:[%s5079_s17 + $0x370] sm:$0xff] %v2768_v54  ;;  %2771 = vst [vmem:[%s5079_s17 + $0x3f0] sm:$0xff] %v2770_v59 }
 0x322   : > { %4351 = shalt.err (!%p4348_p3)
}
 0x323   : > { %s4352_s4 = scalar_lea.hbm %s6381_s16, 16384  ;;  %s4356_s7 = scalar_lea.hbm %s6443_s3, 32768 }
 0x324   : > { %p4353_p4 = scmp.ne.s32.totalorder %s6381_s16, %s4352_s4  ;;  %p4357_p9 = scmp.lt.u32.totalorder %s6381_s16, %s6443_s3 }
 0x325   : > { %p4358_p10 = scmp.lt.u32.totalorder %s4356_s7, %s4352_s4  ;;  %p4360_p12 = scmp.lt.u32.totalorder %s4352_s4, %s6381_s16 }
 0x326   : > { %p4354_p7 = pnand %p4353_p4, %p4463_p5 }
 0x327   : > { %p4359_p11 = por %p4358_p10, %p4357_p9 }
 0x328   : > { %p4355_p8 = pneg %p4354_p7 }
 0x329   : > { %p4361_p13 = por %p4360_p12, %p4359_p11 }
 0x32b   : > { %p4362_p0 = pnand %p4361_p13, %p4355_p8 }
 0x32d   : > { %4365 = shalt.err (!%p4362_p0)
}
 0x32e   : > { %s4403_s10 = smov 128   ;;  %s4404_s11 = smov 8  }
 0x32f   : > { %3953 = dma.vmem_to_hbm [thread:$0]  (%p4463_p5), %s6383_s20, 16384, %s6381_s16, %s6399_s26, %s4403_s10, %s4403_s10, %s4404_s11  }
 0x330 PF: > { %p3959_p1 = scmp.ge.s32.totalorder %s4400_s15, 2  ;;  %s2866_s17 = sand.u32 1, %s4388_s12  }
 0x331   : > { %s2867_s19 = scalar_lea.sflag [#allocation3], %s2866_s17 }
 0x332   : > { %p3956_p2 = pnand %p3959_p1, %p4467_p6 }
 0x334   : > { %4383 = dma.done.wait (!%p3956_p2), %s2867_s19, 16384  }
 0x335   : > { %4385 = vsyncadd (!%p3956_p2), %s2867_s19, 4294950912  ;;  %p13_p3 = scmp.ge.s32.totalorder %s4450_s18, 4   ;;  %s6760_s12 = smov %s4392_s13 }
 0x336   : > { %s6761_s13 = smov %s4396_s14  ;;  %s6762_s14 = smov %s4461_s21 }
 0x337   : > { %s6763_s15 = smov %s4450_s18  ;;  %15 = sbr.rel (!%p13_p3) target bundleno = 3 (0x3), region = 67 }
 0x33e   :  { %2872 = vsyncpa [#allocation3], 1 }
 0x33f   :  { %2874 = vsyncpa [#allocation3 + $0x1], 1 }

</bundles_post_ra>
